<compile_context>
chip_gen: v7x
topology: tpu7x:2x2x1
jax: 0.10.0
libtpu: 0.0.40
codegen_flags: <defaults>
</compile_context>

<pallas_src>
import functools

import jax
import jax.numpy as jnp
from jax import lax
from jax.experimental import pallas as pl
from jax.experimental.pallas import tpu as pltpu

# ---- hyperparameters (mirror LorentzClassifier.__init__) --------------------
FEATURE_DIM = 8      # per-particle feature dim
COORDS_DIM = 4       # Lorentz 4-vector
NUM_CLASSES = 5
N_HIDDEN = 32        # n_hidden
DEPTH = 8            # transformer depth
HEADS = 4
DIM_HEAD = N_HIDDEN // HEADS
HDH = HEADS * DIM_HEAD            # 32 (head-concat q/k/v width)
FF_DIM = 2 * N_HIDDEN
CLS_HIDDEN = 64      # classifier hidden (nn.Linear(n_hidden, 64))
CLS_PAD = 128        # lane-dense padded classifier output width
QKV_PAD = 128        # packed q|k|v|gate lanes (3*HDH + 1 gate + padding)

BATCH = 2
SEQ = 8              # number of particles


def _layernorm(x, g, b, eps=1e-5):
    mu = jnp.mean(x, axis=-1, keepdims=True)
    var = jnp.mean((x - mu) ** 2, axis=-1, keepdims=True)
    return (x - mu) * lax.rsqrt(var + eps) * g + b


def _dot_nt(a, b):
    """a (M,K) @ b (N,K)^T -> (M,N): contract the last dim of both (no transpose)."""
    return lax.dot_general(a, b, (((1,), (1,)), ((), ())),
                           preferred_element_type=jnp.float32)


# -----------------------------------------------------------------------------
# Fused kernel: embedding -> depth x (LorentzAttention + FF) -> masked sum-pool
# -> 2-layer classifier.  One grid step per batch element (v7x: 2 TCs busy).
# -----------------------------------------------------------------------------
def _lorentz_kernel(
    feat_ref, coor_ref, mask2_ref, maskf_ref, bmask_ref,
    rrep_ref, msum_ref, pavg_ref, hmask_ref, metric_ref,
    we_ref, be_ref,
    ln1g_ref, ln1b_ref, wqkvg_ref, distw_ref, wo_ref,
    ln2g_ref, ln2b_ref, w1_ref, b1_ref, w2_ref, b2_ref,
    wc1_ref, bc1_ref, wc2_ref, bc2_ref,
    out_ref,
):
    mask2 = mask2_ref[...]        # (N, 1)    1 valid / 0 padded particle
    maskf = maskf_ref[...]        # (HN, 1)   head-replicated particle mask
    bmask = bmask_ref[...]        # (HN, HN)  0 same-head & valid key, else -1e9
    rrep = rrep_ref[...]          # (HN, N)   0/1 head-replication matrix
    msum = msum_ref[...]          # (N, HN)   0/1 head-collection matrix
    pavg = pavg_ref[...]          # (HN, HN)  mean over head replicas
    hmask = hmask_ref[...]        # (HN, 128) per-row own-head lane mask (gate lanes = 1)
    metric = metric_ref[...]      # (1, 4)    diag(+,-,-,-)
    ones14 = jnp.ones((1, COORDS_DIM), jnp.float32)   # hoisted out of the layer loop

    # embedding: nn.Linear(feature_dim, n_hidden); masked so padded rows stay 0
    feats = (jnp.dot(feat_ref[...], we_ref[...],
                     preferred_element_type=jnp.float32) + be_ref[...]) * mask2  # (N, D)

    # head-replicated coordinates, row order (head, particle)
    cflat = jnp.dot(rrep, coor_ref[...], preferred_element_type=jnp.float32)     # (HN, 4)

    for l in range(DEPTH):
        # ---------------- attention block ----------------
        xn = _layernorm(feats, ln1g_ref[l], ln1b_ref[l])                  # (N, D)

        # fused q|k|v|gate projection: one lane-dense (D, 128) matmul
        # (1/sqrt(Dh) is folded into the packed q weights by the wrapper)
        qkvg = jnp.dot(xn, wqkvg_ref[l], preferred_element_type=jnp.float32)   # (N, 128)
        # replicate rows per head, zero out the other heads' lanes
        rep = jnp.dot(rrep, qkvg, preferred_element_type=jnp.float32) * hmask  # (HN, 128)
        q = rep[:, 0:HDH]
        k = rep[:, HDH:2 * HDH]
        v = rep[:, 2 * HDH:3 * HDH]
        gate = rep[:, 3 * HDH:3 * HDH + 1]                                # (HN, 1)

        # pairwise Minkowski intervals in head-replicated space
        cm = cflat * metric                                               # (HN, 4)
        cc = cflat * cm                                                   # eta_d * c_d^2
        sq_col = jnp.sum(cc, axis=-1, keepdims=True)                      # (HN, 1)
        sq_row = _dot_nt(ones14, cc)                                      # (1, HN)
        gram = _dot_nt(cflat, cm)                                         # (HN, HN)
        rel = sq_col + sq_row - 2.0 * gram                                # (HN, HN)

        # one flattened attention matmul over all (head, particle) rows;
        # cross-head / padded-key entries are killed by the additive bmask.
        logits = _dot_nt(q, k) + distw_ref[l] * rel + bmask               # (HN, HN)
        logits = logits - jnp.max(logits, axis=-1, keepdims=True)
        e = jnp.exp(logits)
        attn = e * pl.reciprocal(jnp.sum(e, axis=-1, keepdims=True), approx=True)

        out_f = jnp.dot(attn, v, preferred_element_type=jnp.float32)      # (HN, HDH)
        # collect heads onto the lane axis (disjoint lane blocks), then project
        merged = jnp.dot(msum, out_f, preferred_element_type=jnp.float32) # (N, HDH)
        attn_out = jnp.dot(merged, wo_ref[l], preferred_element_type=jnp.float32)
        feats = feats + attn_out * mask2                                  # residual

        # coordinate update (norm_rel_coors=False):
        #   sum_j a_ij (c_i - c_j) = c_i - (A @ C)_i, head-averaged
        agg = jnp.dot(attn, cflat, preferred_element_type=jnp.float32)    # (HN, 4)
        agg = jnp.dot(pavg, agg, preferred_element_type=jnp.float32)      # head mean
        cflat = cflat + (cflat - agg) * gate * maskf

        # ---------------- feed-forward block ----------------
        xn2 = _layernorm(feats, ln2g_ref[l], ln2b_ref[l])
        hdn = jnp.maximum(
            jnp.dot(xn2, w1_ref[l], preferred_element_type=jnp.float32) + b1_ref[l],
            0.0)
        ff = jnp.dot(hdn, w2_ref[l], preferred_element_type=jnp.float32) + b2_ref[l]
        feats = feats + ff * mask2

    # x = x.sum(1)  (sum over particles; padded rows are exactly zero)
    pooled = jnp.sum(feats, axis=0, keepdims=True)                        # (1, D)

    # classifier: Linear(D,64) -> ReLU -> Linear(64, num_classes [padded to 128])
    hcls = jnp.maximum(
        jnp.dot(pooled, wc1_ref[...], preferred_element_type=jnp.float32)
        + bc1_ref[...], 0.0)
    out_ref[...] = (jnp.dot(hcls, wc2_ref[...], preferred_element_type=jnp.float32)
                    + bc2_ref[...])                                       # (1, CLS_PAD)


def lorentz_classifier_forward(params, points, features, lorentz_vectors, mask):
    """Mirrors LorentzClassifier.forward.  `points` is unused (as in torch)."""
    del points
    B = features.shape[0]
    N = features.shape[2]
    H, Dh, D, L = HEADS, DIM_HEAD, N_HIDDEN, DEPTH
    HN = H * N

    feats_bnf = jnp.transpose(features, (0, 2, 1)).astype(jnp.float32)         # (B,N,F)
    coors_bn4 = jnp.transpose(lorentz_vectors, (0, 2, 1)).astype(jnp.float32)  # (B,N,4)
    mask_bn = mask[:, 0, :].astype(jnp.float32)                                # (B,N)
    mask2 = mask_bn[..., None]                                                 # (B,N,1)
    key_ok = jnp.tile(mask_bn, (1, H))                                         # (B,HN)
    mask_flat = key_ok[..., None]                                              # (B,HN,1)

    # ---- loop-invariant structure matrices (hoisted out of the kernel) -----
    n_idx = jnp.arange(N)
    hn_part = jnp.tile(n_idx, H)                      # particle index of flat row
    hn_head = jnp.repeat(jnp.arange(H), N)            # head index of flat row
    rrep = (hn_part[:, None] == n_idx[None, :]).astype(jnp.float32)            # (HN,N)
    msum = rrep.T                                                              # (N,HN)
    pavg = (rrep @ rrep.T) / H                                                 # (HN,HN)
    same_head = hn_head[:, None] == hn_head[None, :]
    block_mask = jnp.where(same_head[None, :, :] & (key_ok[:, None, :] > 0.5),
                           0.0, -1e9).astype(jnp.float32)                      # (B,HN,HN)
    lane_head = jnp.repeat(jnp.arange(H), Dh)                                  # (HDH,)
    hm = (hn_head[:, None] == lane_head[None, :]).astype(jnp.float32)          # (HN,HDH)
    hmask = jnp.concatenate(
        [hm, hm, hm, jnp.ones((HN, QKV_PAD - 3 * HDH), jnp.float32)], axis=1)  # (HN,128)

    # ---- weight packing: fused lane-dense q|k|v|gate, head-concat wo -------
    scale = 1.0 / (Dh ** 0.5)
    wq = jnp.transpose(params["wq"], (0, 2, 1, 3)).reshape(L, D, HDH) * scale
    wk = jnp.transpose(params["wk"], (0, 2, 1, 3)).reshape(L, D, HDH)
    wv = jnp.transpose(params["wv"], (0, 2, 1, 3)).reshape(L, D, HDH)
    wqkvg = jnp.concatenate(
        [wq, wk, wv, params["wg"],
         jnp.zeros((L, D, QKV_PAD - 3 * HDH - 1), jnp.float32)], axis=-1)      # (L,D,128)
    wo = params["wo"].reshape(L, HDH, D)
    distw_rows = jnp.repeat(params["dist_w"], N, axis=1)[..., None]            # (L,HN,1)

    # lane-dense classifier head: pad to 128 output lanes, slice after the call
    wc2 = jnp.pad(params["wc2"], ((0, 0), (0, CLS_PAD - NUM_CLASSES)))
    bc2 = jnp.pad(params["bc2"], ((0, 0), (0, CLS_PAD - NUM_CLASSES)))

    def batch_spec(*dims):
        return pl.BlockSpec((None,) + dims,
                            lambda b, _n=len(dims): (b,) + (0,) * _n)

    def full_spec(shape):
        return pl.BlockSpec(shape, lambda b, _n=len(shape): (0,) * _n)

    in_specs = [
        batch_spec(N, FEATURE_DIM),            # features
        batch_spec(N, COORDS_DIM),             # coords
        batch_spec(N, 1),                      # particle mask
        batch_spec(HN, 1),                     # head-replicated mask
        batch_spec(HN, HN),                    # additive attention mask
        full_spec((HN, N)),                    # rrep
        full_spec((N, HN)),                    # msum
        full_spec((HN, HN)),                   # pavg
        full_spec((HN, QKV_PAD)),              # head lane mask
        full_spec((1, COORDS_DIM)),            # metric
        full_spec((FEATURE_DIM, D)), full_spec((1, D)),
        full_spec((L, 1, D)), full_spec((L, 1, D)),
        full_spec((L, D, QKV_PAD)),            # fused q|k|v|gate weights
        full_spec((L, HN, 1)),                 # per-row Lorentz scales
        full_spec((L, HDH, D)),                # head-concat output projection
        full_spec((L, 1, D)), full_spec((L, 1, D)),
        full_spec((L, D, FF_DIM)), full_spec((L, 1, FF_DIM)),
        full_spec((L, FF_DIM, D)), full_spec((L, 1, D)),
        full_spec((D, CLS_HIDDEN)), full_spec((1, CLS_HIDDEN)),
        full_spec((CLS_HIDDEN, CLS_PAD)), full_spec((1, CLS_PAD)),
    ]

    out = pl.pallas_call(
        _lorentz_kernel,
        out_shape=jax.ShapeDtypeStruct((B, 1, CLS_PAD), jnp.float32),
        grid=(B,),                             # one batch element per grid block
        in_specs=in_specs,
        out_specs=pl.BlockSpec((None, 1, CLS_PAD), lambda b: (b, 0, 0)),
        compiler_params=pltpu.CompilerParams(
            # batch blocks are independent -> both v7x TensorCores get work;
            # on v5e/v6e (1 TC) this is just a 2-step sequential loop.
            dimension_semantics=("parallel",)),
    )(
        feats_bnf, coors_bn4, mask2, mask_flat, block_mask,
        rrep, msum, pavg, hmask, params["metric"],
        params["we"], params["be"],
        params["ln1_g"], params["ln1_b"], wqkvg, distw_rows, wo,
        params["ln2_g"], params["ln2_b"],
        params["w1"], params["b1"], params["w2"], params["b2"],
        params["wc1"], params["bc1"], wc2, bc2,
    )
    return out[:, 0, :NUM_CLASSES]                                        # (B, num_classes)


def init_params(key):
    ks = iter(jax.random.split(key, 32))

    def lin(k, fan_in, shape):
        bound = 1.0 / (fan_in ** 0.5)
        return jax.random.uniform(k, shape, jnp.float32, -bound, bound)

    D, F, L, H, Dh = N_HIDDEN, FEATURE_DIM, DEPTH, HEADS, DIM_HEAD
    params = {
        "metric": jnp.array([[1.0, -1.0, -1.0, -1.0]], dtype=jnp.float32),
        "we": lin(next(ks), F, (F, D)),
        "be": lin(next(ks), F, (1, D)),
        "ln1_g": jnp.ones((L, 1, D), jnp.float32),
        "ln1_b": jnp.zeros((L, 1, D), jnp.float32),
        "wq": lin(next(ks), D, (L, H, D, Dh)),
        "wk": lin(next(ks), D, (L, H, D, Dh)),
        "wv": lin(next(ks), D, (L, H, D, Dh)),
        "wo": lin(next(ks), D, (L, H, Dh, D)),
        "dist_w": 0.01 * jax.random.normal(next(ks), (L, H), jnp.float32),
        "wg": 0.1 * lin(next(ks), D, (L, D, 1)),
        "ln2_g": jnp.ones((L, 1, D), jnp.float32),
        "ln2_b": jnp.zeros((L, 1, D), jnp.float32),
        "w1": lin(next(ks), D, (L, D, FF_DIM)),
        "b1": lin(next(ks), D, (L, 1, FF_DIM)),
        "w2": lin(next(ks), FF_DIM, (L, FF_DIM, D)),
        "b2": lin(next(ks), FF_DIM, (L, 1, D)),
        "wc1": lin(next(ks), D, (D, CLS_HIDDEN)),
        "bc1": lin(next(ks), D, (1, CLS_HIDDEN)),
        "wc2": lin(next(ks), CLS_HIDDEN, (CLS_HIDDEN, NUM_CLASSES)),
        "bc2": lin(next(ks), CLS_HIDDEN, (1, NUM_CLASSES)),
    }
    return params


if __name__ == "__main__":
    key = jax.random.PRNGKey(0)
    kp, k1, k2, k3 = jax.random.split(key, 4)

    params = init_params(kp)

    # PyTorch-layout inputs: (B, C, N) channels-first, mask (B, 1, N)
    points = jax.random.normal(k1, (BATCH, 2, SEQ), jnp.float32)           # unused
    features = jax.random.normal(k2, (BATCH, FEATURE_DIM, SEQ), jnp.float32)
    lorentz_vectors = jax.random.normal(k3, (BATCH, COORDS_DIM, SEQ), jnp.float32)
    lengths = jnp.array([SEQ, SEQ - 3])
    mask = (jnp.arange(SEQ)[None, :] < lengths[:, None]).astype(jnp.float32)[:, None, :]

    fwd = jax.jit(functools.partial(lorentz_classifier_forward, params))
    logits = fwd(points, features, lorentz_vectors, mask)
    jax.block_until_ready(logits)

    assert logits.shape == (BATCH, NUM_CLASSES)
    assert bool(jnp.all(jnp.isfinite(logits)))
    print("KERNEL_OK")
</pallas_src>

<mosaic_0001>
module attributes {stable_mosaic.version = 11 : i64} {
  func.func @_lorentz_kernel(%arg0: i32, %arg1: memref<1x8x8xf32, #tpu.memory_space<vmem>>, %arg2: memref<1x8x4xf32, #tpu.memory_space<vmem>>, %arg3: memref<1x8x1xf32, #tpu.memory_space<vmem>>, %arg4: memref<1x32x1xf32, #tpu.memory_space<vmem>>, %arg5: memref<1x32x32xf32, #tpu.memory_space<vmem>>, %arg6: memref<32x8xf32, #tpu.memory_space<vmem>>, %arg7: memref<8x32xf32, #tpu.memory_space<vmem>>, %arg8: memref<32x32xf32, #tpu.memory_space<vmem>>, %arg9: memref<32x128xf32, #tpu.memory_space<vmem>>, %arg10: memref<1x4xf32, #tpu.memory_space<vmem>>, %arg11: memref<8x32xf32, #tpu.memory_space<vmem>>, %arg12: memref<1x32xf32, #tpu.memory_space<vmem>>, %arg13: memref<8x1x32xf32, #tpu.memory_space<vmem>>, %arg14: memref<8x1x32xf32, #tpu.memory_space<vmem>>, %arg15: memref<8x32x128xf32, #tpu.memory_space<vmem>>, %arg16: memref<8x32x1xf32, #tpu.memory_space<vmem>>, %arg17: memref<8x32x32xf32, #tpu.memory_space<vmem>>, %arg18: memref<8x1x32xf32, #tpu.memory_space<vmem>>, %arg19: memref<8x1x32xf32, #tpu.memory_space<vmem>>, %arg20: memref<8x32x64xf32, #tpu.memory_space<vmem>>, %arg21: memref<8x1x64xf32, #tpu.memory_space<vmem>>, %arg22: memref<8x64x32xf32, #tpu.memory_space<vmem>>, %arg23: memref<8x1x32xf32, #tpu.memory_space<vmem>>, %arg24: memref<32x64xf32, #tpu.memory_space<vmem>>, %arg25: memref<1x64xf32, #tpu.memory_space<vmem>>, %arg26: memref<64x128xf32, #tpu.memory_space<vmem>>, %arg27: memref<1x128xf32, #tpu.memory_space<vmem>>, %arg28: memref<1x1x128xf32, #tpu.memory_space<vmem>>) attributes {dimension_semantics = [#tpu.dimension_semantics<parallel>], iteration_bounds = array<i64: 2>, scalar_prefetch = 0 : i64, scratch_operands = 0 : i64, tpu.core_type = #tpu.core_type<tc>, window_params = [{transform_indices = @transform_0, window_bounds = array<i64: 1, 8, 8>}, {transform_indices = @transform_1, window_bounds = array<i64: 1, 8, 4>}, {transform_indices = @transform_2, window_bounds = array<i64: 1, 8, 1>}, {transform_indices = @transform_3, window_bounds = array<i64: 1, 32, 1>}, {transform_indices = @transform_4, window_bounds = array<i64: 1, 32, 32>}, {pipeline_mode = #tpu.pipeline_mode<synchronous>, transform_indices = @transform_5, window_bounds = array<i64: 32, 8>}, {pipeline_mode = #tpu.pipeline_mode<synchronous>, transform_indices = @transform_6, window_bounds = array<i64: 8, 32>}, {pipeline_mode = #tpu.pipeline_mode<synchronous>, transform_indices = @transform_7, window_bounds = array<i64: 32, 32>}, {pipeline_mode = #tpu.pipeline_mode<synchronous>, transform_indices = @transform_8, window_bounds = array<i64: 32, 128>}, {pipeline_mode = #tpu.pipeline_mode<synchronous>, transform_indices = @transform_9, window_bounds = array<i64: 1, 4>}, {pipeline_mode = #tpu.pipeline_mode<synchronous>, transform_indices = @transform_10, window_bounds = array<i64: 8, 32>}, {pipeline_mode = #tpu.pipeline_mode<synchronous>, transform_indices = @transform_11, window_bounds = array<i64: 1, 32>}, {pipeline_mode = #tpu.pipeline_mode<synchronous>, transform_indices = @transform_12, window_bounds = array<i64: 8, 1, 32>}, {pipeline_mode = #tpu.pipeline_mode<synchronous>, transform_indices = @transform_13, window_bounds = array<i64: 8, 1, 32>}, {pipeline_mode = #tpu.pipeline_mode<synchronous>, transform_indices = @transform_14, window_bounds = array<i64: 8, 32, 128>}, {pipeline_mode = #tpu.pipeline_mode<synchronous>, transform_indices = @transform_15, window_bounds = array<i64: 8, 32, 1>}, {pipeline_mode = #tpu.pipeline_mode<synchronous>, transform_indices = @transform_16, window_bounds = array<i64: 8, 32, 32>}, {pipeline_mode = #tpu.pipeline_mode<synchronous>, transform_indices = @transform_17, window_bounds = array<i64: 8, 1, 32>}, {pipeline_mode = #tpu.pipeline_mode<synchronous>, transform_indices = @transform_18, window_bounds = array<i64: 8, 1, 32>}, {pipeline_mode = #tpu.pipeline_mode<synchronous>, transform_indices = @transform_19, window_bounds = array<i64: 8, 32, 64>}, {pipeline_mode = #tpu.pipeline_mode<synchronous>, transform_indices = @transform_20, window_bounds = array<i64: 8, 1, 64>}, {pipeline_mode = #tpu.pipeline_mode<synchronous>, transform_indices = @transform_21, window_bounds = array<i64: 8, 64, 32>}, {pipeline_mode = #tpu.pipeline_mode<synchronous>, transform_indices = @transform_22, window_bounds = array<i64: 8, 1, 32>}, {pipeline_mode = #tpu.pipeline_mode<synchronous>, transform_indices = @transform_23, window_bounds = array<i64: 32, 64>}, {pipeline_mode = #tpu.pipeline_mode<synchronous>, transform_indices = @transform_24, window_bounds = array<i64: 1, 64>}, {pipeline_mode = #tpu.pipeline_mode<synchronous>, transform_indices = @transform_25, window_bounds = array<i64: 64, 128>}, {pipeline_mode = #tpu.pipeline_mode<synchronous>, transform_indices = @transform_26, window_bounds = array<i64: 1, 128>}, {transform_indices = @transform_27, window_bounds = array<i64: 1, 1, 128>}]} {
    %c0 = arith.constant 0 : index
    %c0_0 = arith.constant 0 : index
    %c0_1 = arith.constant 0 : index
    %0 = vector.load %arg3[%c0, %c0_0, %c0_1] : memref<1x8x1xf32, #tpu.memory_space<vmem>>, vector<1x8x1xf32>
    %1 = vector.shape_cast %0 : vector<1x8x1xf32> to vector<8x1xf32>
    %c0_2 = arith.constant 0 : index
    %c0_3 = arith.constant 0 : index
    %c0_4 = arith.constant 0 : index
    %2 = vector.load %arg4[%c0_2, %c0_3, %c0_4] : memref<1x32x1xf32, #tpu.memory_space<vmem>>, vector<1x32x1xf32>
    %3 = vector.shape_cast %2 : vector<1x32x1xf32> to vector<32x1xf32>
    %c0_5 = arith.constant 0 : index
    %c0_6 = arith.constant 0 : index
    %c0_7 = arith.constant 0 : index
    %4 = vector.load %arg5[%c0_5, %c0_6, %c0_7] : memref<1x32x32xf32, #tpu.memory_space<vmem>>, vector<1x32x32xf32>
    %5 = vector.shape_cast %4 : vector<1x32x32xf32> to vector<32x32xf32>
    %c0_8 = arith.constant 0 : index
    %c0_9 = arith.constant 0 : index
    %6 = vector.load %arg6[%c0_8, %c0_9] : memref<32x8xf32, #tpu.memory_space<vmem>>, vector<32x8xf32>
    %c0_10 = arith.constant 0 : index
    %c0_11 = arith.constant 0 : index
    %7 = vector.load %arg7[%c0_10, %c0_11] : memref<8x32xf32, #tpu.memory_space<vmem>>, vector<8x32xf32>
    %c0_12 = arith.constant 0 : index
    %c0_13 = arith.constant 0 : index
    %8 = vector.load %arg8[%c0_12, %c0_13] : memref<32x32xf32, #tpu.memory_space<vmem>>, vector<32x32xf32>
    %c0_14 = arith.constant 0 : index
    %c0_15 = arith.constant 0 : index
    %9 = vector.load %arg9[%c0_14, %c0_15] : memref<32x128xf32, #tpu.memory_space<vmem>>, vector<32x128xf32>
    %c0_16 = arith.constant 0 : index
    %c0_17 = arith.constant 0 : index
    %10 = vector.load %arg10[%c0_16, %c0_17] : memref<1x4xf32, #tpu.memory_space<vmem>>, vector<1x4xf32>
    %cst = arith.constant 1.000000e+00 : f32
    %11 = vector.broadcast %cst : f32 to vector<1x4xf32>
    %c0_18 = arith.constant 0 : index
    %c0_19 = arith.constant 0 : index
    %c0_20 = arith.constant 0 : index
    %12 = vector.load %arg1[%c0_18, %c0_19, %c0_20] : memref<1x8x8xf32, #tpu.memory_space<vmem>>, vector<1x8x8xf32>
    %13 = vector.shape_cast %12 : vector<1x8x8xf32> to vector<8x8xf32>
    %c0_21 = arith.constant 0 : index
    %c0_22 = arith.constant 0 : index
    %14 = vector.load %arg11[%c0_21, %c0_22] : memref<8x32xf32, #tpu.memory_space<vmem>>, vector<8x32xf32>
    %cst_23 = arith.constant dense<0.000000e+00> : vector<8x32xf32>
    %15 = tpu.matmul %13, %14, %cst_23 {dimension_numbers = #tpu.dot_dimension_numbers<[1], [0], [0], [1], [0, 0, 1, 1], [], []>} : vector<8x8xf32>, vector<8x32xf32>, vector<8x32xf32> -> vector<8x32xf32>
    %c0_24 = arith.constant 0 : index
    %c0_25 = arith.constant 0 : index
    %16 = vector.load %arg12[%c0_24, %c0_25] : memref<1x32xf32, #tpu.memory_space<vmem>>, vector<1x32xf32>
    %17 = vector.broadcast %16 : vector<1x32xf32> to vector<8x32xf32>
    %18 = arith.addf %15, %17 : vector<8x32xf32>
    %19 = vector.broadcast %1 : vector<8x1xf32> to vector<8x32xf32>
    %20 = arith.mulf %18, %19 : vector<8x32xf32>
    %c0_26 = arith.constant 0 : index
    %c0_27 = arith.constant 0 : index
    %c0_28 = arith.constant 0 : index
    %21 = vector.load %arg2[%c0_26, %c0_27, %c0_28] : memref<1x8x4xf32, #tpu.memory_space<vmem>>, vector<1x8x4xf32>
    %22 = vector.shape_cast %21 : vector<1x8x4xf32> to vector<8x4xf32>
    %cst_29 = arith.constant dense<0.000000e+00> : vector<32x4xf32>
    %23 = tpu.matmul %6, %22, %cst_29 {dimension_numbers = #tpu.dot_dimension_numbers<[1], [0], [0], [1], [0, 0, 1, 1], [], []>} : vector<32x8xf32>, vector<8x4xf32>, vector<32x4xf32> -> vector<32x4xf32>
    %c0_30 = arith.constant 0 : index
    %c0_31 = arith.constant 0 : index
    %c0_32 = arith.constant 0 : index
    %24 = vector.load %arg13[%c0_30, %c0_31, %c0_32] : memref<8x1x32xf32, #tpu.memory_space<vmem>>, vector<1x1x32xf32>
    %25 = vector.shape_cast %24 : vector<1x1x32xf32> to vector<1x32xf32>
    %c0_33 = arith.constant 0 : index
    %c0_34 = arith.constant 0 : index
    %c0_35 = arith.constant 0 : index
    %26 = vector.load %arg14[%c0_33, %c0_34, %c0_35] : memref<8x1x32xf32, #tpu.memory_space<vmem>>, vector<1x1x32xf32>
    %27 = vector.shape_cast %26 : vector<1x1x32xf32> to vector<1x32xf32>
    %cst_36 = arith.constant dense<0.000000e+00> : vector<8xf32>
    %28 = vector.multi_reduction <add>, %20, %cst_36 [1] : vector<8x32xf32> to vector<8xf32>
    %29 = vector.shape_cast %28 : vector<8xf32> to vector<8x1xf32>
    %cst_37 = arith.constant 3.200000e+01 : f32
    %30 = vector.broadcast %cst_37 : f32 to vector<8x1xf32>
    %31 = arith.divf %29, %30 : vector<8x1xf32>
    %32 = vector.broadcast %31 : vector<8x1xf32> to vector<8x32xf32>
    %33 = arith.subf %20, %32 : vector<8x32xf32>
    %34 = arith.mulf %33, %33 : vector<8x32xf32>
    %cst_38 = arith.constant dense<0.000000e+00> : vector<8xf32>
    %35 = vector.multi_reduction <add>, %34, %cst_38 [1] : vector<8x32xf32> to vector<8xf32>
    %36 = vector.shape_cast %35 : vector<8xf32> to vector<8x1xf32>
    %cst_39 = arith.constant 3.200000e+01 : f32
    %37 = vector.broadcast %cst_39 : f32 to vector<8x1xf32>
    %38 = arith.divf %36, %37 : vector<8x1xf32>
    %39 = vector.broadcast %31 : vector<8x1xf32> to vector<8x32xf32>
    %40 = arith.subf %20, %39 : vector<8x32xf32>
    %cst_40 = arith.constant 9.99999974E-6 : f32
    %41 = vector.broadcast %cst_40 : f32 to vector<8x1xf32>
    %42 = arith.addf %38, %41 : vector<8x1xf32>
    %43 = math.rsqrt %42 : vector<8x1xf32>
    %44 = vector.broadcast %43 : vector<8x1xf32> to vector<8x32xf32>
    %45 = arith.mulf %40, %44 : vector<8x32xf32>
    %46 = vector.broadcast %25 : vector<1x32xf32> to vector<8x32xf32>
    %47 = arith.mulf %45, %46 : vector<8x32xf32>
    %48 = vector.broadcast %27 : vector<1x32xf32> to vector<8x32xf32>
    %49 = arith.addf %47, %48 : vector<8x32xf32>
    %c0_41 = arith.constant 0 : index
    %c0_42 = arith.constant 0 : index
    %c0_43 = arith.constant 0 : index
    %50 = vector.load %arg15[%c0_41, %c0_42, %c0_43] : memref<8x32x128xf32, #tpu.memory_space<vmem>>, vector<1x32x128xf32>
    %51 = vector.shape_cast %50 : vector<1x32x128xf32> to vector<32x128xf32>
    %cst_44 = arith.constant dense<0.000000e+00> : vector<8x128xf32>
    %52 = tpu.matmul %49, %51, %cst_44 {dimension_numbers = #tpu.dot_dimension_numbers<[1], [0], [0], [1], [0, 0, 1, 1], [], []>} : vector<8x32xf32>, vector<32x128xf32>, vector<8x128xf32> -> vector<8x128xf32>
    %cst_45 = arith.constant dense<0.000000e+00> : vector<32x128xf32>
    %53 = tpu.matmul %6, %52, %cst_45 {dimension_numbers = #tpu.dot_dimension_numbers<[1], [0], [0], [1], [0, 0, 1, 1], [], []>} : vector<32x8xf32>, vector<8x128xf32>, vector<32x128xf32> -> vector<32x128xf32>
    %54 = arith.mulf %53, %9 : vector<32x128xf32>
    %55 = vector.extract_strided_slice %54 {offsets = [0, 0], sizes = [32, 32], strides = [1, 1]} : vector<32x128xf32> to vector<32x32xf32>
    %56 = vector.extract_strided_slice %54 {offsets = [0, 32], sizes = [32, 32], strides = [1, 1]} : vector<32x128xf32> to vector<32x32xf32>
    %57 = vector.extract_strided_slice %54 {offsets = [0, 64], sizes = [32, 32], strides = [1, 1]} : vector<32x128xf32> to vector<32x32xf32>
    %58 = vector.extract_strided_slice %54 {offsets = [0, 96], sizes = [32, 1], strides = [1, 1]} : vector<32x128xf32> to vector<32x1xf32>
    %59 = vector.broadcast %10 : vector<1x4xf32> to vector<32x4xf32>
    %60 = arith.mulf %23, %59 : vector<32x4xf32>
    %61 = arith.mulf %23, %60 : vector<32x4xf32>
    %cst_46 = arith.constant dense<0.000000e+00> : vector<32xf32>
    %62 = vector.multi_reduction <add>, %61, %cst_46 [1] : vector<32x4xf32> to vector<32xf32>
    %63 = vector.shape_cast %62 : vector<32xf32> to vector<32x1xf32>
    %cst_47 = arith.constant dense<0.000000e+00> : vector<1x32xf32>
    %64 = tpu.matmul %11, %61, %cst_47 {dimension_numbers = #tpu.dot_dimension_numbers<[1], [1], [0], [0], [0, 0, 1, 0], [], []>} : vector<1x4xf32>, vector<32x4xf32>, vector<1x32xf32> -> vector<1x32xf32>
    %cst_48 = arith.constant dense<0.000000e+00> : vector<32x32xf32>
    %65 = tpu.matmul %23, %60, %cst_48 {dimension_numbers = #tpu.dot_dimension_numbers<[1], [1], [0], [0], [0, 0, 1, 0], [], []>} : vector<32x4xf32>, vector<32x4xf32>, vector<32x32xf32> -> vector<32x32xf32>
    %66 = vector.broadcast %63 : vector<32x1xf32> to vector<32x32xf32>
    %67 = vector.broadcast %64 : vector<1x32xf32> to vector<32x32xf32>
    %68 = arith.addf %66, %67 : vector<32x32xf32>
    %cst_49 = arith.constant 2.000000e+00 : f32
    %69 = vector.broadcast %cst_49 : f32 to vector<32x32xf32>
    %70 = arith.mulf %69, %65 : vector<32x32xf32>
    %71 = arith.subf %68, %70 : vector<32x32xf32>
    %cst_50 = arith.constant dense<0.000000e+00> : vector<32x32xf32>
    %72 = tpu.matmul %55, %56, %cst_50 {dimension_numbers = #tpu.dot_dimension_numbers<[1], [1], [0], [0], [0, 0, 1, 0], [], []>} : vector<32x32xf32>, vector<32x32xf32>, vector<32x32xf32> -> vector<32x32xf32>
    %c0_51 = arith.constant 0 : index
    %c0_52 = arith.constant 0 : index
    %c0_53 = arith.constant 0 : index
    %73 = vector.load %arg16[%c0_51, %c0_52, %c0_53] : memref<8x32x1xf32, #tpu.memory_space<vmem>>, vector<1x32x1xf32>
    %74 = vector.shape_cast %73 : vector<1x32x1xf32> to vector<32x1xf32>
    %75 = vector.broadcast %74 : vector<32x1xf32> to vector<32x32xf32>
    %76 = arith.mulf %75, %71 : vector<32x32xf32>
    %77 = arith.addf %72, %76 : vector<32x32xf32>
    %78 = arith.addf %77, %5 : vector<32x32xf32>
    %cst_54 = arith.constant dense<0xFF800000> : vector<32xf32>
    %79 = vector.multi_reduction <maximumf>, %78, %cst_54 [1] : vector<32x32xf32> to vector<32xf32>
    %80 = vector.shape_cast %79 : vector<32xf32> to vector<32x1xf32>
    %81 = vector.broadcast %80 : vector<32x1xf32> to vector<32x32xf32>
    %82 = arith.subf %78, %81 : vector<32x32xf32>
    %83 = math.exp %82 : vector<32x32xf32>
    %cst_55 = arith.constant dense<0.000000e+00> : vector<32xf32>
    %84 = vector.multi_reduction <add>, %83, %cst_55 [1] : vector<32x32xf32> to vector<32xf32>
    %85 = vector.shape_cast %84 : vector<32xf32> to vector<32x1xf32>
    %86 = tpu.reciprocal %85 {approx = true} : vector<32x1xf32> -> vector<32x1xf32>
    %87 = vector.broadcast %86 : vector<32x1xf32> to vector<32x32xf32>
    %88 = arith.mulf %83, %87 : vector<32x32xf32>
    %cst_56 = arith.constant dense<0.000000e+00> : vector<32x32xf32>
    %89 = tpu.matmul %88, %57, %cst_56 {dimension_numbers = #tpu.dot_dimension_numbers<[1], [0], [0], [1], [0, 0, 1, 1], [], []>} : vector<32x32xf32>, vector<32x32xf32>, vector<32x32xf32> -> vector<32x32xf32>
    %cst_57 = arith.constant dense<0.000000e+00> : vector<8x32xf32>
    %90 = tpu.matmul %7, %89, %cst_57 {dimension_numbers = #tpu.dot_dimension_numbers<[1], [0], [0], [1], [0, 0, 1, 1], [], []>} : vector<8x32xf32>, vector<32x32xf32>, vector<8x32xf32> -> vector<8x32xf32>
    %c0_58 = arith.constant 0 : index
    %c0_59 = arith.constant 0 : index
    %c0_60 = arith.constant 0 : index
    %91 = vector.load %arg17[%c0_58, %c0_59, %c0_60] : memref<8x32x32xf32, #tpu.memory_space<vmem>>, vector<1x32x32xf32>
    %92 = vector.shape_cast %91 : vector<1x32x32xf32> to vector<32x32xf32>
    %cst_61 = arith.constant dense<0.000000e+00> : vector<8x32xf32>
    %93 = tpu.matmul %90, %92, %cst_61 {dimension_numbers = #tpu.dot_dimension_numbers<[1], [0], [0], [1], [0, 0, 1, 1], [], []>} : vector<8x32xf32>, vector<32x32xf32>, vector<8x32xf32> -> vector<8x32xf32>
    %94 = vector.broadcast %1 : vector<8x1xf32> to vector<8x32xf32>
    %95 = arith.mulf %93, %94 : vector<8x32xf32>
    %96 = arith.addf %20, %95 : vector<8x32xf32>
    %cst_62 = arith.constant dense<0.000000e+00> : vector<32x4xf32>
    %97 = tpu.matmul %88, %23, %cst_62 {dimension_numbers = #tpu.dot_dimension_numbers<[1], [0], [0], [1], [0, 0, 1, 1], [], []>} : vector<32x32xf32>, vector<32x4xf32>, vector<32x4xf32> -> vector<32x4xf32>
    %cst_63 = arith.constant dense<0.000000e+00> : vector<32x4xf32>
    %98 = tpu.matmul %8, %97, %cst_63 {dimension_numbers = #tpu.dot_dimension_numbers<[1], [0], [0], [1], [0, 0, 1, 1], [], []>} : vector<32x32xf32>, vector<32x4xf32>, vector<32x4xf32> -> vector<32x4xf32>
    %99 = arith.subf %23, %98 : vector<32x4xf32>
    %100 = vector.broadcast %58 : vector<32x1xf32> to vector<32x4xf32>
    %101 = arith.mulf %99, %100 : vector<32x4xf32>
    %102 = vector.broadcast %3 : vector<32x1xf32> to vector<32x4xf32>
    %103 = arith.mulf %101, %102 : vector<32x4xf32>
    %104 = arith.addf %23, %103 : vector<32x4xf32>
    %c0_64 = arith.constant 0 : index
    %c0_65 = arith.constant 0 : index
    %c0_66 = arith.constant 0 : index
    %105 = vector.load %arg18[%c0_64, %c0_65, %c0_66] : memref<8x1x32xf32, #tpu.memory_space<vmem>>, vector<1x1x32xf32>
    %106 = vector.shape_cast %105 : vector<1x1x32xf32> to vector<1x32xf32>
    %c0_67 = arith.constant 0 : index
    %c0_68 = arith.constant 0 : index
    %c0_69 = arith.constant 0 : index
    %107 = vector.load %arg19[%c0_67, %c0_68, %c0_69] : memref<8x1x32xf32, #tpu.memory_space<vmem>>, vector<1x1x32xf32>
    %108 = vector.shape_cast %107 : vector<1x1x32xf32> to vector<1x32xf32>
    %cst_70 = arith.constant dense<0.000000e+00> : vector<8xf32>
    %109 = vector.multi_reduction <add>, %96, %cst_70 [1] : vector<8x32xf32> to vector<8xf32>
    %110 = vector.shape_cast %109 : vector<8xf32> to vector<8x1xf32>
    %cst_71 = arith.constant 3.200000e+01 : f32
    %111 = vector.broadcast %cst_71 : f32 to vector<8x1xf32>
    %112 = arith.divf %110, %111 : vector<8x1xf32>
    %113 = vector.broadcast %112 : vector<8x1xf32> to vector<8x32xf32>
    %114 = arith.subf %96, %113 : vector<8x32xf32>
    %115 = arith.mulf %114, %114 : vector<8x32xf32>
    %cst_72 = arith.constant dense<0.000000e+00> : vector<8xf32>
    %116 = vector.multi_reduction <add>, %115, %cst_72 [1] : vector<8x32xf32> to vector<8xf32>
    %117 = vector.shape_cast %116 : vector<8xf32> to vector<8x1xf32>
    %cst_73 = arith.constant 3.200000e+01 : f32
    %118 = vector.broadcast %cst_73 : f32 to vector<8x1xf32>
    %119 = arith.divf %117, %118 : vector<8x1xf32>
    %120 = vector.broadcast %112 : vector<8x1xf32> to vector<8x32xf32>
    %121 = arith.subf %96, %120 : vector<8x32xf32>
    %cst_74 = arith.constant 9.99999974E-6 : f32
    %122 = vector.broadcast %cst_74 : f32 to vector<8x1xf32>
    %123 = arith.addf %119, %122 : vector<8x1xf32>
    %124 = math.rsqrt %123 : vector<8x1xf32>
    %125 = vector.broadcast %124 : vector<8x1xf32> to vector<8x32xf32>
    %126 = arith.mulf %121, %125 : vector<8x32xf32>
    %127 = vector.broadcast %106 : vector<1x32xf32> to vector<8x32xf32>
    %128 = arith.mulf %126, %127 : vector<8x32xf32>
    %129 = vector.broadcast %108 : vector<1x32xf32> to vector<8x32xf32>
    %130 = arith.addf %128, %129 : vector<8x32xf32>
    %c0_75 = arith.constant 0 : index
    %c0_76 = arith.constant 0 : index
    %c0_77 = arith.constant 0 : index
    %131 = vector.load %arg20[%c0_75, %c0_76, %c0_77] : memref<8x32x64xf32, #tpu.memory_space<vmem>>, vector<1x32x64xf32>
    %132 = vector.shape_cast %131 : vector<1x32x64xf32> to vector<32x64xf32>
    %cst_78 = arith.constant dense<0.000000e+00> : vector<8x64xf32>
    %133 = tpu.matmul %130, %132, %cst_78 {dimension_numbers = #tpu.dot_dimension_numbers<[1], [0], [0], [1], [0, 0, 1, 1], [], []>} : vector<8x32xf32>, vector<32x64xf32>, vector<8x64xf32> -> vector<8x64xf32>
    %c0_79 = arith.constant 0 : index
    %c0_80 = arith.constant 0 : index
    %c0_81 = arith.constant 0 : index
    %134 = vector.load %arg21[%c0_79, %c0_80, %c0_81] : memref<8x1x64xf32, #tpu.memory_space<vmem>>, vector<1x1x64xf32>
    %135 = vector.shape_cast %134 : vector<1x1x64xf32> to vector<1x64xf32>
    %136 = vector.broadcast %135 : vector<1x64xf32> to vector<8x64xf32>
    %137 = arith.addf %133, %136 : vector<8x64xf32>
    %cst_82 = arith.constant 0.000000e+00 : f32
    %138 = vector.broadcast %cst_82 : f32 to vector<8x64xf32>
    %139 = arith.maximumf %137, %138 : vector<8x64xf32>
    %c0_83 = arith.constant 0 : index
    %c0_84 = arith.constant 0 : index
    %c0_85 = arith.constant 0 : index
    %140 = vector.load %arg22[%c0_83, %c0_84, %c0_85] : memref<8x64x32xf32, #tpu.memory_space<vmem>>, vector<1x64x32xf32>
    %141 = vector.shape_cast %140 : vector<1x64x32xf32> to vector<64x32xf32>
    %cst_86 = arith.constant dense<0.000000e+00> : vector<8x32xf32>
    %142 = tpu.matmul %139, %141, %cst_86 {dimension_numbers = #tpu.dot_dimension_numbers<[1], [0], [0], [1], [0, 0, 1, 1], [], []>} : vector<8x64xf32>, vector<64x32xf32>, vector<8x32xf32> -> vector<8x32xf32>
    %c0_87 = arith.constant 0 : index
    %c0_88 = arith.constant 0 : index
    %c0_89 = arith.constant 0 : index
    %143 = vector.load %arg23[%c0_87, %c0_88, %c0_89] : memref<8x1x32xf32, #tpu.memory_space<vmem>>, vector<1x1x32xf32>
    %144 = vector.shape_cast %143 : vector<1x1x32xf32> to vector<1x32xf32>
    %145 = vector.broadcast %144 : vector<1x32xf32> to vector<8x32xf32>
    %146 = arith.addf %142, %145 : vector<8x32xf32>
    %147 = vector.broadcast %1 : vector<8x1xf32> to vector<8x32xf32>
    %148 = arith.mulf %146, %147 : vector<8x32xf32>
    %149 = arith.addf %96, %148 : vector<8x32xf32>
    %c1 = arith.constant 1 : index
    %c0_90 = arith.constant 0 : index
    %c0_91 = arith.constant 0 : index
    %150 = vector.load %arg13[%c1, %c0_90, %c0_91] : memref<8x1x32xf32, #tpu.memory_space<vmem>>, vector<1x1x32xf32>
    %151 = vector.shape_cast %150 : vector<1x1x32xf32> to vector<1x32xf32>
    %c1_92 = arith.constant 1 : index
    %c0_93 = arith.constant 0 : index
    %c0_94 = arith.constant 0 : index
    %152 = vector.load %arg14[%c1_92, %c0_93, %c0_94] : memref<8x1x32xf32, #tpu.memory_space<vmem>>, vector<1x1x32xf32>
    %153 = vector.shape_cast %152 : vector<1x1x32xf32> to vector<1x32xf32>
    %cst_95 = arith.constant dense<0.000000e+00> : vector<8xf32>
    %154 = vector.multi_reduction <add>, %149, %cst_95 [1] : vector<8x32xf32> to vector<8xf32>
    %155 = vector.shape_cast %154 : vector<8xf32> to vector<8x1xf32>
    %cst_96 = arith.constant 3.200000e+01 : f32
    %156 = vector.broadcast %cst_96 : f32 to vector<8x1xf32>
    %157 = arith.divf %155, %156 : vector<8x1xf32>
    %158 = vector.broadcast %157 : vector<8x1xf32> to vector<8x32xf32>
    %159 = arith.subf %149, %158 : vector<8x32xf32>
    %160 = arith.mulf %159, %159 : vector<8x32xf32>
    %cst_97 = arith.constant dense<0.000000e+00> : vector<8xf32>
    %161 = vector.multi_reduction <add>, %160, %cst_97 [1] : vector<8x32xf32> to vector<8xf32>
    %162 = vector.shape_cast %161 : vector<8xf32> to vector<8x1xf32>
    %cst_98 = arith.constant 3.200000e+01 : f32
    %163 = vector.broadcast %cst_98 : f32 to vector<8x1xf32>
    %164 = arith.divf %162, %163 : vector<8x1xf32>
    %165 = vector.broadcast %157 : vector<8x1xf32> to vector<8x32xf32>
    %166 = arith.subf %149, %165 : vector<8x32xf32>
    %cst_99 = arith.constant 9.99999974E-6 : f32
    %167 = vector.broadcast %cst_99 : f32 to vector<8x1xf32>
    %168 = arith.addf %164, %167 : vector<8x1xf32>
    %169 = math.rsqrt %168 : vector<8x1xf32>
    %170 = vector.broadcast %169 : vector<8x1xf32> to vector<8x32xf32>
    %171 = arith.mulf %166, %170 : vector<8x32xf32>
    %172 = vector.broadcast %151 : vector<1x32xf32> to vector<8x32xf32>
    %173 = arith.mulf %171, %172 : vector<8x32xf32>
    %174 = vector.broadcast %153 : vector<1x32xf32> to vector<8x32xf32>
    %175 = arith.addf %173, %174 : vector<8x32xf32>
    %c1_100 = arith.constant 1 : index
    %c0_101 = arith.constant 0 : index
    %c0_102 = arith.constant 0 : index
    %176 = vector.load %arg15[%c1_100, %c0_101, %c0_102] : memref<8x32x128xf32, #tpu.memory_space<vmem>>, vector<1x32x128xf32>
    %177 = vector.shape_cast %176 : vector<1x32x128xf32> to vector<32x128xf32>
    %cst_103 = arith.constant dense<0.000000e+00> : vector<8x128xf32>
    %178 = tpu.matmul %175, %177, %cst_103 {dimension_numbers = #tpu.dot_dimension_numbers<[1], [0], [0], [1], [0, 0, 1, 1], [], []>} : vector<8x32xf32>, vector<32x128xf32>, vector<8x128xf32> -> vector<8x128xf32>
    %cst_104 = arith.constant dense<0.000000e+00> : vector<32x128xf32>
    %179 = tpu.matmul %6, %178, %cst_104 {dimension_numbers = #tpu.dot_dimension_numbers<[1], [0], [0], [1], [0, 0, 1, 1], [], []>} : vector<32x8xf32>, vector<8x128xf32>, vector<32x128xf32> -> vector<32x128xf32>
    %180 = arith.mulf %179, %9 : vector<32x128xf32>
    %181 = vector.extract_strided_slice %180 {offsets = [0, 0], sizes = [32, 32], strides = [1, 1]} : vector<32x128xf32> to vector<32x32xf32>
    %182 = vector.extract_strided_slice %180 {offsets = [0, 32], sizes = [32, 32], strides = [1, 1]} : vector<32x128xf32> to vector<32x32xf32>
    %183 = vector.extract_strided_slice %180 {offsets = [0, 64], sizes = [32, 32], strides = [1, 1]} : vector<32x128xf32> to vector<32x32xf32>
    %184 = vector.extract_strided_slice %180 {offsets = [0, 96], sizes = [32, 1], strides = [1, 1]} : vector<32x128xf32> to vector<32x1xf32>
    %185 = vector.broadcast %10 : vector<1x4xf32> to vector<32x4xf32>
    %186 = arith.mulf %104, %185 : vector<32x4xf32>
    %187 = arith.mulf %104, %186 : vector<32x4xf32>
    %cst_105 = arith.constant dense<0.000000e+00> : vector<32xf32>
    %188 = vector.multi_reduction <add>, %187, %cst_105 [1] : vector<32x4xf32> to vector<32xf32>
    %189 = vector.shape_cast %188 : vector<32xf32> to vector<32x1xf32>
    %cst_106 = arith.constant dense<0.000000e+00> : vector<1x32xf32>
    %190 = tpu.matmul %11, %187, %cst_106 {dimension_numbers = #tpu.dot_dimension_numbers<[1], [1], [0], [0], [0, 0, 1, 0], [], []>} : vector<1x4xf32>, vector<32x4xf32>, vector<1x32xf32> -> vector<1x32xf32>
    %cst_107 = arith.constant dense<0.000000e+00> : vector<32x32xf32>
    %191 = tpu.matmul %104, %186, %cst_107 {dimension_numbers = #tpu.dot_dimension_numbers<[1], [1], [0], [0], [0, 0, 1, 0], [], []>} : vector<32x4xf32>, vector<32x4xf32>, vector<32x32xf32> -> vector<32x32xf32>
    %192 = vector.broadcast %189 : vector<32x1xf32> to vector<32x32xf32>
    %193 = vector.broadcast %190 : vector<1x32xf32> to vector<32x32xf32>
    %194 = arith.addf %192, %193 : vector<32x32xf32>
    %cst_108 = arith.constant 2.000000e+00 : f32
    %195 = vector.broadcast %cst_108 : f32 to vector<32x32xf32>
    %196 = arith.mulf %195, %191 : vector<32x32xf32>
    %197 = arith.subf %194, %196 : vector<32x32xf32>
    %cst_109 = arith.constant dense<0.000000e+00> : vector<32x32xf32>
    %198 = tpu.matmul %181, %182, %cst_109 {dimension_numbers = #tpu.dot_dimension_numbers<[1], [1], [0], [0], [0, 0, 1, 0], [], []>} : vector<32x32xf32>, vector<32x32xf32>, vector<32x32xf32> -> vector<32x32xf32>
    %c1_110 = arith.constant 1 : index
    %c0_111 = arith.constant 0 : index
    %c0_112 = arith.constant 0 : index
    %199 = vector.load %arg16[%c1_110, %c0_111, %c0_112] : memref<8x32x1xf32, #tpu.memory_space<vmem>>, vector<1x32x1xf32>
    %200 = vector.shape_cast %199 : vector<1x32x1xf32> to vector<32x1xf32>
    %201 = vector.broadcast %200 : vector<32x1xf32> to vector<32x32xf32>
    %202 = arith.mulf %201, %197 : vector<32x32xf32>
    %203 = arith.addf %198, %202 : vector<32x32xf32>
    %204 = arith.addf %203, %5 : vector<32x32xf32>
    %cst_113 = arith.constant dense<0xFF800000> : vector<32xf32>
    %205 = vector.multi_reduction <maximumf>, %204, %cst_113 [1] : vector<32x32xf32> to vector<32xf32>
    %206 = vector.shape_cast %205 : vector<32xf32> to vector<32x1xf32>
    %207 = vector.broadcast %206 : vector<32x1xf32> to vector<32x32xf32>
    %208 = arith.subf %204, %207 : vector<32x32xf32>
    %209 = math.exp %208 : vector<32x32xf32>
    %cst_114 = arith.constant dense<0.000000e+00> : vector<32xf32>
    %210 = vector.multi_reduction <add>, %209, %cst_114 [1] : vector<32x32xf32> to vector<32xf32>
    %211 = vector.shape_cast %210 : vector<32xf32> to vector<32x1xf32>
    %212 = tpu.reciprocal %211 {approx = true} : vector<32x1xf32> -> vector<32x1xf32>
    %213 = vector.broadcast %212 : vector<32x1xf32> to vector<32x32xf32>
    %214 = arith.mulf %209, %213 : vector<32x32xf32>
    %cst_115 = arith.constant dense<0.000000e+00> : vector<32x32xf32>
    %215 = tpu.matmul %214, %183, %cst_115 {dimension_numbers = #tpu.dot_dimension_numbers<[1], [0], [0], [1], [0, 0, 1, 1], [], []>} : vector<32x32xf32>, vector<32x32xf32>, vector<32x32xf32> -> vector<32x32xf32>
    %cst_116 = arith.constant dense<0.000000e+00> : vector<8x32xf32>
    %216 = tpu.matmul %7, %215, %cst_116 {dimension_numbers = #tpu.dot_dimension_numbers<[1], [0], [0], [1], [0, 0, 1, 1], [], []>} : vector<8x32xf32>, vector<32x32xf32>, vector<8x32xf32> -> vector<8x32xf32>
    %c1_117 = arith.constant 1 : index
    %c0_118 = arith.constant 0 : index
    %c0_119 = arith.constant 0 : index
    %217 = vector.load %arg17[%c1_117, %c0_118, %c0_119] : memref<8x32x32xf32, #tpu.memory_space<vmem>>, vector<1x32x32xf32>
    %218 = vector.shape_cast %217 : vector<1x32x32xf32> to vector<32x32xf32>
    %cst_120 = arith.constant dense<0.000000e+00> : vector<8x32xf32>
    %219 = tpu.matmul %216, %218, %cst_120 {dimension_numbers = #tpu.dot_dimension_numbers<[1], [0], [0], [1], [0, 0, 1, 1], [], []>} : vector<8x32xf32>, vector<32x32xf32>, vector<8x32xf32> -> vector<8x32xf32>
    %220 = vector.broadcast %1 : vector<8x1xf32> to vector<8x32xf32>
    %221 = arith.mulf %219, %220 : vector<8x32xf32>
    %222 = arith.addf %149, %221 : vector<8x32xf32>
    %cst_121 = arith.constant dense<0.000000e+00> : vector<32x4xf32>
    %223 = tpu.matmul %214, %104, %cst_121 {dimension_numbers = #tpu.dot_dimension_numbers<[1], [0], [0], [1], [0, 0, 1, 1], [], []>} : vector<32x32xf32>, vector<32x4xf32>, vector<32x4xf32> -> vector<32x4xf32>
    %cst_122 = arith.constant dense<0.000000e+00> : vector<32x4xf32>
    %224 = tpu.matmul %8, %223, %cst_122 {dimension_numbers = #tpu.dot_dimension_numbers<[1], [0], [0], [1], [0, 0, 1, 1], [], []>} : vector<32x32xf32>, vector<32x4xf32>, vector<32x4xf32> -> vector<32x4xf32>
    %225 = arith.subf %104, %224 : vector<32x4xf32>
    %226 = vector.broadcast %184 : vector<32x1xf32> to vector<32x4xf32>
    %227 = arith.mulf %225, %226 : vector<32x4xf32>
    %228 = vector.broadcast %3 : vector<32x1xf32> to vector<32x4xf32>
    %229 = arith.mulf %227, %228 : vector<32x4xf32>
    %230 = arith.addf %104, %229 : vector<32x4xf32>
    %c1_123 = arith.constant 1 : index
    %c0_124 = arith.constant 0 : index
    %c0_125 = arith.constant 0 : index
    %231 = vector.load %arg18[%c1_123, %c0_124, %c0_125] : memref<8x1x32xf32, #tpu.memory_space<vmem>>, vector<1x1x32xf32>
    %232 = vector.shape_cast %231 : vector<1x1x32xf32> to vector<1x32xf32>
    %c1_126 = arith.constant 1 : index
    %c0_127 = arith.constant 0 : index
    %c0_128 = arith.constant 0 : index
    %233 = vector.load %arg19[%c1_126, %c0_127, %c0_128] : memref<8x1x32xf32, #tpu.memory_space<vmem>>, vector<1x1x32xf32>
    %234 = vector.shape_cast %233 : vector<1x1x32xf32> to vector<1x32xf32>
    %cst_129 = arith.constant dense<0.000000e+00> : vector<8xf32>
    %235 = vector.multi_reduction <add>, %222, %cst_129 [1] : vector<8x32xf32> to vector<8xf32>
    %236 = vector.shape_cast %235 : vector<8xf32> to vector<8x1xf32>
    %cst_130 = arith.constant 3.200000e+01 : f32
    %237 = vector.broadcast %cst_130 : f32 to vector<8x1xf32>
    %238 = arith.divf %236, %237 : vector<8x1xf32>
    %239 = vector.broadcast %238 : vector<8x1xf32> to vector<8x32xf32>
    %240 = arith.subf %222, %239 : vector<8x32xf32>
    %241 = arith.mulf %240, %240 : vector<8x32xf32>
    %cst_131 = arith.constant dense<0.000000e+00> : vector<8xf32>
    %242 = vector.multi_reduction <add>, %241, %cst_131 [1] : vector<8x32xf32> to vector<8xf32>
    %243 = vector.shape_cast %242 : vector<8xf32> to vector<8x1xf32>
    %cst_132 = arith.constant 3.200000e+01 : f32
    %244 = vector.broadcast %cst_132 : f32 to vector<8x1xf32>
    %245 = arith.divf %243, %244 : vector<8x1xf32>
    %246 = vector.broadcast %238 : vector<8x1xf32> to vector<8x32xf32>
    %247 = arith.subf %222, %246 : vector<8x32xf32>
    %cst_133 = arith.constant 9.99999974E-6 : f32
    %248 = vector.broadcast %cst_133 : f32 to vector<8x1xf32>
    %249 = arith.addf %245, %248 : vector<8x1xf32>
    %250 = math.rsqrt %249 : vector<8x1xf32>
    %251 = vector.broadcast %250 : vector<8x1xf32> to vector<8x32xf32>
    %252 = arith.mulf %247, %251 : vector<8x32xf32>
    %253 = vector.broadcast %232 : vector<1x32xf32> to vector<8x32xf32>
    %254 = arith.mulf %252, %253 : vector<8x32xf32>
    %255 = vector.broadcast %234 : vector<1x32xf32> to vector<8x32xf32>
    %256 = arith.addf %254, %255 : vector<8x32xf32>
    %c1_134 = arith.constant 1 : index
    %c0_135 = arith.constant 0 : index
    %c0_136 = arith.constant 0 : index
    %257 = vector.load %arg20[%c1_134, %c0_135, %c0_136] : memref<8x32x64xf32, #tpu.memory_space<vmem>>, vector<1x32x64xf32>
    %258 = vector.shape_cast %257 : vector<1x32x64xf32> to vector<32x64xf32>
    %cst_137 = arith.constant dense<0.000000e+00> : vector<8x64xf32>
    %259 = tpu.matmul %256, %258, %cst_137 {dimension_numbers = #tpu.dot_dimension_numbers<[1], [0], [0], [1], [0, 0, 1, 1], [], []>} : vector<8x32xf32>, vector<32x64xf32>, vector<8x64xf32> -> vector<8x64xf32>
    %c1_138 = arith.constant 1 : index
    %c0_139 = arith.constant 0 : index
    %c0_140 = arith.constant 0 : index
    %260 = vector.load %arg21[%c1_138, %c0_139, %c0_140] : memref<8x1x64xf32, #tpu.memory_space<vmem>>, vector<1x1x64xf32>
    %261 = vector.shape_cast %260 : vector<1x1x64xf32> to vector<1x64xf32>
    %262 = vector.broadcast %261 : vector<1x64xf32> to vector<8x64xf32>
    %263 = arith.addf %259, %262 : vector<8x64xf32>
    %cst_141 = arith.constant 0.000000e+00 : f32
    %264 = vector.broadcast %cst_141 : f32 to vector<8x64xf32>
    %265 = arith.maximumf %263, %264 : vector<8x64xf32>
    %c1_142 = arith.constant 1 : index
    %c0_143 = arith.constant 0 : index
    %c0_144 = arith.constant 0 : index
    %266 = vector.load %arg22[%c1_142, %c0_143, %c0_144] : memref<8x64x32xf32, #tpu.memory_space<vmem>>, vector<1x64x32xf32>
    %267 = vector.shape_cast %266 : vector<1x64x32xf32> to vector<64x32xf32>
    %cst_145 = arith.constant dense<0.000000e+00> : vector<8x32xf32>
    %268 = tpu.matmul %265, %267, %cst_145 {dimension_numbers = #tpu.dot_dimension_numbers<[1], [0], [0], [1], [0, 0, 1, 1], [], []>} : vector<8x64xf32>, vector<64x32xf32>, vector<8x32xf32> -> vector<8x32xf32>
    %c1_146 = arith.constant 1 : index
    %c0_147 = arith.constant 0 : index
    %c0_148 = arith.constant 0 : index
    %269 = vector.load %arg23[%c1_146, %c0_147, %c0_148] : memref<8x1x32xf32, #tpu.memory_space<vmem>>, vector<1x1x32xf32>
    %270 = vector.shape_cast %269 : vector<1x1x32xf32> to vector<1x32xf32>
    %271 = vector.broadcast %270 : vector<1x32xf32> to vector<8x32xf32>
    %272 = arith.addf %268, %271 : vector<8x32xf32>
    %273 = vector.broadcast %1 : vector<8x1xf32> to vector<8x32xf32>
    %274 = arith.mulf %272, %273 : vector<8x32xf32>
    %275 = arith.addf %222, %274 : vector<8x32xf32>
    %c2 = arith.constant 2 : index
    %c0_149 = arith.constant 0 : index
    %c0_150 = arith.constant 0 : index
    %276 = vector.load %arg13[%c2, %c0_149, %c0_150] : memref<8x1x32xf32, #tpu.memory_space<vmem>>, vector<1x1x32xf32>
    %277 = vector.shape_cast %276 : vector<1x1x32xf32> to vector<1x32xf32>
    %c2_151 = arith.constant 2 : index
    %c0_152 = arith.constant 0 : index
    %c0_153 = arith.constant 0 : index
    %278 = vector.load %arg14[%c2_151, %c0_152, %c0_153] : memref<8x1x32xf32, #tpu.memory_space<vmem>>, vector<1x1x32xf32>
    %279 = vector.shape_cast %278 : vector<1x1x32xf32> to vector<1x32xf32>
    %cst_154 = arith.constant dense<0.000000e+00> : vector<8xf32>
    %280 = vector.multi_reduction <add>, %275, %cst_154 [1] : vector<8x32xf32> to vector<8xf32>
    %281 = vector.shape_cast %280 : vector<8xf32> to vector<8x1xf32>
    %cst_155 = arith.constant 3.200000e+01 : f32
    %282 = vector.broadcast %cst_155 : f32 to vector<8x1xf32>
    %283 = arith.divf %281, %282 : vector<8x1xf32>
    %284 = vector.broadcast %283 : vector<8x1xf32> to vector<8x32xf32>
    %285 = arith.subf %275, %284 : vector<8x32xf32>
    %286 = arith.mulf %285, %285 : vector<8x32xf32>
    %cst_156 = arith.constant dense<0.000000e+00> : vector<8xf32>
    %287 = vector.multi_reduction <add>, %286, %cst_156 [1] : vector<8x32xf32> to vector<8xf32>
    %288 = vector.shape_cast %287 : vector<8xf32> to vector<8x1xf32>
    %cst_157 = arith.constant 3.200000e+01 : f32
    %289 = vector.broadcast %cst_157 : f32 to vector<8x1xf32>
    %290 = arith.divf %288, %289 : vector<8x1xf32>
    %291 = vector.broadcast %283 : vector<8x1xf32> to vector<8x32xf32>
    %292 = arith.subf %275, %291 : vector<8x32xf32>
    %cst_158 = arith.constant 9.99999974E-6 : f32
    %293 = vector.broadcast %cst_158 : f32 to vector<8x1xf32>
    %294 = arith.addf %290, %293 : vector<8x1xf32>
    %295 = math.rsqrt %294 : vector<8x1xf32>
    %296 = vector.broadcast %295 : vector<8x1xf32> to vector<8x32xf32>
    %297 = arith.mulf %292, %296 : vector<8x32xf32>
    %298 = vector.broadcast %277 : vector<1x32xf32> to vector<8x32xf32>
    %299 = arith.mulf %297, %298 : vector<8x32xf32>
    %300 = vector.broadcast %279 : vector<1x32xf32> to vector<8x32xf32>
    %301 = arith.addf %299, %300 : vector<8x32xf32>
    %c2_159 = arith.constant 2 : index
    %c0_160 = arith.constant 0 : index
    %c0_161 = arith.constant 0 : index
    %302 = vector.load %arg15[%c2_159, %c0_160, %c0_161] : memref<8x32x128xf32, #tpu.memory_space<vmem>>, vector<1x32x128xf32>
    %303 = vector.shape_cast %302 : vector<1x32x128xf32> to vector<32x128xf32>
    %cst_162 = arith.constant dense<0.000000e+00> : vector<8x128xf32>
    %304 = tpu.matmul %301, %303, %cst_162 {dimension_numbers = #tpu.dot_dimension_numbers<[1], [0], [0], [1], [0, 0, 1, 1], [], []>} : vector<8x32xf32>, vector<32x128xf32>, vector<8x128xf32> -> vector<8x128xf32>
    %cst_163 = arith.constant dense<0.000000e+00> : vector<32x128xf32>
    %305 = tpu.matmul %6, %304, %cst_163 {dimension_numbers = #tpu.dot_dimension_numbers<[1], [0], [0], [1], [0, 0, 1, 1], [], []>} : vector<32x8xf32>, vector<8x128xf32>, vector<32x128xf32> -> vector<32x128xf32>
    %306 = arith.mulf %305, %9 : vector<32x128xf32>
    %307 = vector.extract_strided_slice %306 {offsets = [0, 0], sizes = [32, 32], strides = [1, 1]} : vector<32x128xf32> to vector<32x32xf32>
    %308 = vector.extract_strided_slice %306 {offsets = [0, 32], sizes = [32, 32], strides = [1, 1]} : vector<32x128xf32> to vector<32x32xf32>
    %309 = vector.extract_strided_slice %306 {offsets = [0, 64], sizes = [32, 32], strides = [1, 1]} : vector<32x128xf32> to vector<32x32xf32>
    %310 = vector.extract_strided_slice %306 {offsets = [0, 96], sizes = [32, 1], strides = [1, 1]} : vector<32x128xf32> to vector<32x1xf32>
    %311 = vector.broadcast %10 : vector<1x4xf32> to vector<32x4xf32>
    %312 = arith.mulf %230, %311 : vector<32x4xf32>
    %313 = arith.mulf %230, %312 : vector<32x4xf32>
    %cst_164 = arith.constant dense<0.000000e+00> : vector<32xf32>
    %314 = vector.multi_reduction <add>, %313, %cst_164 [1] : vector<32x4xf32> to vector<32xf32>
    %315 = vector.shape_cast %314 : vector<32xf32> to vector<32x1xf32>
    %cst_165 = arith.constant dense<0.000000e+00> : vector<1x32xf32>
    %316 = tpu.matmul %11, %313, %cst_165 {dimension_numbers = #tpu.dot_dimension_numbers<[1], [1], [0], [0], [0, 0, 1, 0], [], []>} : vector<1x4xf32>, vector<32x4xf32>, vector<1x32xf32> -> vector<1x32xf32>
    %cst_166 = arith.constant dense<0.000000e+00> : vector<32x32xf32>
    %317 = tpu.matmul %230, %312, %cst_166 {dimension_numbers = #tpu.dot_dimension_numbers<[1], [1], [0], [0], [0, 0, 1, 0], [], []>} : vector<32x4xf32>, vector<32x4xf32>, vector<32x32xf32> -> vector<32x32xf32>
    %318 = vector.broadcast %315 : vector<32x1xf32> to vector<32x32xf32>
    %319 = vector.broadcast %316 : vector<1x32xf32> to vector<32x32xf32>
    %320 = arith.addf %318, %319 : vector<32x32xf32>
    %cst_167 = arith.constant 2.000000e+00 : f32
    %321 = vector.broadcast %cst_167 : f32 to vector<32x32xf32>
    %322 = arith.mulf %321, %317 : vector<32x32xf32>
    %323 = arith.subf %320, %322 : vector<32x32xf32>
    %cst_168 = arith.constant dense<0.000000e+00> : vector<32x32xf32>
    %324 = tpu.matmul %307, %308, %cst_168 {dimension_numbers = #tpu.dot_dimension_numbers<[1], [1], [0], [0], [0, 0, 1, 0], [], []>} : vector<32x32xf32>, vector<32x32xf32>, vector<32x32xf32> -> vector<32x32xf32>
    %c2_169 = arith.constant 2 : index
    %c0_170 = arith.constant 0 : index
    %c0_171 = arith.constant 0 : index
    %325 = vector.load %arg16[%c2_169, %c0_170, %c0_171] : memref<8x32x1xf32, #tpu.memory_space<vmem>>, vector<1x32x1xf32>
    %326 = vector.shape_cast %325 : vector<1x32x1xf32> to vector<32x1xf32>
    %327 = vector.broadcast %326 : vector<32x1xf32> to vector<32x32xf32>
    %328 = arith.mulf %327, %323 : vector<32x32xf32>
    %329 = arith.addf %324, %328 : vector<32x32xf32>
    %330 = arith.addf %329, %5 : vector<32x32xf32>
    %cst_172 = arith.constant dense<0xFF800000> : vector<32xf32>
    %331 = vector.multi_reduction <maximumf>, %330, %cst_172 [1] : vector<32x32xf32> to vector<32xf32>
    %332 = vector.shape_cast %331 : vector<32xf32> to vector<32x1xf32>
    %333 = vector.broadcast %332 : vector<32x1xf32> to vector<32x32xf32>
    %334 = arith.subf %330, %333 : vector<32x32xf32>
    %335 = math.exp %334 : vector<32x32xf32>
    %cst_173 = arith.constant dense<0.000000e+00> : vector<32xf32>
    %336 = vector.multi_reduction <add>, %335, %cst_173 [1] : vector<32x32xf32> to vector<32xf32>
    %337 = vector.shape_cast %336 : vector<32xf32> to vector<32x1xf32>
    %338 = tpu.reciprocal %337 {approx = true} : vector<32x1xf32> -> vector<32x1xf32>
    %339 = vector.broadcast %338 : vector<32x1xf32> to vector<32x32xf32>
    %340 = arith.mulf %335, %339 : vector<32x32xf32>
    %cst_174 = arith.constant dense<0.000000e+00> : vector<32x32xf32>
    %341 = tpu.matmul %340, %309, %cst_174 {dimension_numbers = #tpu.dot_dimension_numbers<[1], [0], [0], [1], [0, 0, 1, 1], [], []>} : vector<32x32xf32>, vector<32x32xf32>, vector<32x32xf32> -> vector<32x32xf32>
    %cst_175 = arith.constant dense<0.000000e+00> : vector<8x32xf32>
    %342 = tpu.matmul %7, %341, %cst_175 {dimension_numbers = #tpu.dot_dimension_numbers<[1], [0], [0], [1], [0, 0, 1, 1], [], []>} : vector<8x32xf32>, vector<32x32xf32>, vector<8x32xf32> -> vector<8x32xf32>
    %c2_176 = arith.constant 2 : index
    %c0_177 = arith.constant 0 : index
    %c0_178 = arith.constant 0 : index
    %343 = vector.load %arg17[%c2_176, %c0_177, %c0_178] : memref<8x32x32xf32, #tpu.memory_space<vmem>>, vector<1x32x32xf32>
    %344 = vector.shape_cast %343 : vector<1x32x32xf32> to vector<32x32xf32>
    %cst_179 = arith.constant dense<0.000000e+00> : vector<8x32xf32>
    %345 = tpu.matmul %342, %344, %cst_179 {dimension_numbers = #tpu.dot_dimension_numbers<[1], [0], [0], [1], [0, 0, 1, 1], [], []>} : vector<8x32xf32>, vector<32x32xf32>, vector<8x32xf32> -> vector<8x32xf32>
    %346 = vector.broadcast %1 : vector<8x1xf32> to vector<8x32xf32>
    %347 = arith.mulf %345, %346 : vector<8x32xf32>
    %348 = arith.addf %275, %347 : vector<8x32xf32>
    %cst_180 = arith.constant dense<0.000000e+00> : vector<32x4xf32>
    %349 = tpu.matmul %340, %230, %cst_180 {dimension_numbers = #tpu.dot_dimension_numbers<[1], [0], [0], [1], [0, 0, 1, 1], [], []>} : vector<32x32xf32>, vector<32x4xf32>, vector<32x4xf32> -> vector<32x4xf32>
    %cst_181 = arith.constant dense<0.000000e+00> : vector<32x4xf32>
    %350 = tpu.matmul %8, %349, %cst_181 {dimension_numbers = #tpu.dot_dimension_numbers<[1], [0], [0], [1], [0, 0, 1, 1], [], []>} : vector<32x32xf32>, vector<32x4xf32>, vector<32x4xf32> -> vector<32x4xf32>
    %351 = arith.subf %230, %350 : vector<32x4xf32>
    %352 = vector.broadcast %310 : vector<32x1xf32> to vector<32x4xf32>
    %353 = arith.mulf %351, %352 : vector<32x4xf32>
    %354 = vector.broadcast %3 : vector<32x1xf32> to vector<32x4xf32>
    %355 = arith.mulf %353, %354 : vector<32x4xf32>
    %356 = arith.addf %230, %355 : vector<32x4xf32>
    %c2_182 = arith.constant 2 : index
    %c0_183 = arith.constant 0 : index
    %c0_184 = arith.constant 0 : index
    %357 = vector.load %arg18[%c2_182, %c0_183, %c0_184] : memref<8x1x32xf32, #tpu.memory_space<vmem>>, vector<1x1x32xf32>
    %358 = vector.shape_cast %357 : vector<1x1x32xf32> to vector<1x32xf32>
    %c2_185 = arith.constant 2 : index
    %c0_186 = arith.constant 0 : index
    %c0_187 = arith.constant 0 : index
    %359 = vector.load %arg19[%c2_185, %c0_186, %c0_187] : memref<8x1x32xf32, #tpu.memory_space<vmem>>, vector<1x1x32xf32>
    %360 = vector.shape_cast %359 : vector<1x1x32xf32> to vector<1x32xf32>
    %cst_188 = arith.constant dense<0.000000e+00> : vector<8xf32>
    %361 = vector.multi_reduction <add>, %348, %cst_188 [1] : vector<8x32xf32> to vector<8xf32>
    %362 = vector.shape_cast %361 : vector<8xf32> to vector<8x1xf32>
    %cst_189 = arith.constant 3.200000e+01 : f32
    %363 = vector.broadcast %cst_189 : f32 to vector<8x1xf32>
    %364 = arith.divf %362, %363 : vector<8x1xf32>
    %365 = vector.broadcast %364 : vector<8x1xf32> to vector<8x32xf32>
    %366 = arith.subf %348, %365 : vector<8x32xf32>
    %367 = arith.mulf %366, %366 : vector<8x32xf32>
    %cst_190 = arith.constant dense<0.000000e+00> : vector<8xf32>
    %368 = vector.multi_reduction <add>, %367, %cst_190 [1] : vector<8x32xf32> to vector<8xf32>
    %369 = vector.shape_cast %368 : vector<8xf32> to vector<8x1xf32>
    %cst_191 = arith.constant 3.200000e+01 : f32
    %370 = vector.broadcast %cst_191 : f32 to vector<8x1xf32>
    %371 = arith.divf %369, %370 : vector<8x1xf32>
    %372 = vector.broadcast %364 : vector<8x1xf32> to vector<8x32xf32>
    %373 = arith.subf %348, %372 : vector<8x32xf32>
    %cst_192 = arith.constant 9.99999974E-6 : f32
    %374 = vector.broadcast %cst_192 : f32 to vector<8x1xf32>
    %375 = arith.addf %371, %374 : vector<8x1xf32>
    %376 = math.rsqrt %375 : vector<8x1xf32>
    %377 = vector.broadcast %376 : vector<8x1xf32> to vector<8x32xf32>
    %378 = arith.mulf %373, %377 : vector<8x32xf32>
    %379 = vector.broadcast %358 : vector<1x32xf32> to vector<8x32xf32>
    %380 = arith.mulf %378, %379 : vector<8x32xf32>
    %381 = vector.broadcast %360 : vector<1x32xf32> to vector<8x32xf32>
    %382 = arith.addf %380, %381 : vector<8x32xf32>
    %c2_193 = arith.constant 2 : index
    %c0_194 = arith.constant 0 : index
    %c0_195 = arith.constant 0 : index
    %383 = vector.load %arg20[%c2_193, %c0_194, %c0_195] : memref<8x32x64xf32, #tpu.memory_space<vmem>>, vector<1x32x64xf32>
    %384 = vector.shape_cast %383 : vector<1x32x64xf32> to vector<32x64xf32>
    %cst_196 = arith.constant dense<0.000000e+00> : vector<8x64xf32>
    %385 = tpu.matmul %382, %384, %cst_196 {dimension_numbers = #tpu.dot_dimension_numbers<[1], [0], [0], [1], [0, 0, 1, 1], [], []>} : vector<8x32xf32>, vector<32x64xf32>, vector<8x64xf32> -> vector<8x64xf32>
    %c2_197 = arith.constant 2 : index
    %c0_198 = arith.constant 0 : index
    %c0_199 = arith.constant 0 : index
    %386 = vector.load %arg21[%c2_197, %c0_198, %c0_199] : memref<8x1x64xf32, #tpu.memory_space<vmem>>, vector<1x1x64xf32>
    %387 = vector.shape_cast %386 : vector<1x1x64xf32> to vector<1x64xf32>
    %388 = vector.broadcast %387 : vector<1x64xf32> to vector<8x64xf32>
    %389 = arith.addf %385, %388 : vector<8x64xf32>
    %cst_200 = arith.constant 0.000000e+00 : f32
    %390 = vector.broadcast %cst_200 : f32 to vector<8x64xf32>
    %391 = arith.maximumf %389, %390 : vector<8x64xf32>
    %c2_201 = arith.constant 2 : index
    %c0_202 = arith.constant 0 : index
    %c0_203 = arith.constant 0 : index
    %392 = vector.load %arg22[%c2_201, %c0_202, %c0_203] : memref<8x64x32xf32, #tpu.memory_space<vmem>>, vector<1x64x32xf32>
    %393 = vector.shape_cast %392 : vector<1x64x32xf32> to vector<64x32xf32>
    %cst_204 = arith.constant dense<0.000000e+00> : vector<8x32xf32>
    %394 = tpu.matmul %391, %393, %cst_204 {dimension_numbers = #tpu.dot_dimension_numbers<[1], [0], [0], [1], [0, 0, 1, 1], [], []>} : vector<8x64xf32>, vector<64x32xf32>, vector<8x32xf32> -> vector<8x32xf32>
    %c2_205 = arith.constant 2 : index
    %c0_206 = arith.constant 0 : index
    %c0_207 = arith.constant 0 : index
    %395 = vector.load %arg23[%c2_205, %c0_206, %c0_207] : memref<8x1x32xf32, #tpu.memory_space<vmem>>, vector<1x1x32xf32>
    %396 = vector.shape_cast %395 : vector<1x1x32xf32> to vector<1x32xf32>
    %397 = vector.broadcast %396 : vector<1x32xf32> to vector<8x32xf32>
    %398 = arith.addf %394, %397 : vector<8x32xf32>
    %399 = vector.broadcast %1 : vector<8x1xf32> to vector<8x32xf32>
    %400 = arith.mulf %398, %399 : vector<8x32xf32>
    %401 = arith.addf %348, %400 : vector<8x32xf32>
    %c3 = arith.constant 3 : index
    %c0_208 = arith.constant 0 : index
    %c0_209 = arith.constant 0 : index
    %402 = vector.load %arg13[%c3, %c0_208, %c0_209] : memref<8x1x32xf32, #tpu.memory_space<vmem>>, vector<1x1x32xf32>
    %403 = vector.shape_cast %402 : vector<1x1x32xf32> to vector<1x32xf32>
    %c3_210 = arith.constant 3 : index
    %c0_211 = arith.constant 0 : index
    %c0_212 = arith.constant 0 : index
    %404 = vector.load %arg14[%c3_210, %c0_211, %c0_212] : memref<8x1x32xf32, #tpu.memory_space<vmem>>, vector<1x1x32xf32>
    %405 = vector.shape_cast %404 : vector<1x1x32xf32> to vector<1x32xf32>
    %cst_213 = arith.constant dense<0.000000e+00> : vector<8xf32>
    %406 = vector.multi_reduction <add>, %401, %cst_213 [1] : vector<8x32xf32> to vector<8xf32>
    %407 = vector.shape_cast %406 : vector<8xf32> to vector<8x1xf32>
    %cst_214 = arith.constant 3.200000e+01 : f32
    %408 = vector.broadcast %cst_214 : f32 to vector<8x1xf32>
    %409 = arith.divf %407, %408 : vector<8x1xf32>
    %410 = vector.broadcast %409 : vector<8x1xf32> to vector<8x32xf32>
    %411 = arith.subf %401, %410 : vector<8x32xf32>
    %412 = arith.mulf %411, %411 : vector<8x32xf32>
    %cst_215 = arith.constant dense<0.000000e+00> : vector<8xf32>
    %413 = vector.multi_reduction <add>, %412, %cst_215 [1] : vector<8x32xf32> to vector<8xf32>
    %414 = vector.shape_cast %413 : vector<8xf32> to vector<8x1xf32>
    %cst_216 = arith.constant 3.200000e+01 : f32
    %415 = vector.broadcast %cst_216 : f32 to vector<8x1xf32>
    %416 = arith.divf %414, %415 : vector<8x1xf32>
    %417 = vector.broadcast %409 : vector<8x1xf32> to vector<8x32xf32>
    %418 = arith.subf %401, %417 : vector<8x32xf32>
    %cst_217 = arith.constant 9.99999974E-6 : f32
    %419 = vector.broadcast %cst_217 : f32 to vector<8x1xf32>
    %420 = arith.addf %416, %419 : vector<8x1xf32>
    %421 = math.rsqrt %420 : vector<8x1xf32>
    %422 = vector.broadcast %421 : vector<8x1xf32> to vector<8x32xf32>
    %423 = arith.mulf %418, %422 : vector<8x32xf32>
    %424 = vector.broadcast %403 : vector<1x32xf32> to vector<8x32xf32>
    %425 = arith.mulf %423, %424 : vector<8x32xf32>
    %426 = vector.broadcast %405 : vector<1x32xf32> to vector<8x32xf32>
    %427 = arith.addf %425, %426 : vector<8x32xf32>
    %c3_218 = arith.constant 3 : index
    %c0_219 = arith.constant 0 : index
    %c0_220 = arith.constant 0 : index
    %428 = vector.load %arg15[%c3_218, %c0_219, %c0_220] : memref<8x32x128xf32, #tpu.memory_space<vmem>>, vector<1x32x128xf32>
    %429 = vector.shape_cast %428 : vector<1x32x128xf32> to vector<32x128xf32>
    %cst_221 = arith.constant dense<0.000000e+00> : vector<8x128xf32>
    %430 = tpu.matmul %427, %429, %cst_221 {dimension_numbers = #tpu.dot_dimension_numbers<[1], [0], [0], [1], [0, 0, 1, 1], [], []>} : vector<8x32xf32>, vector<32x128xf32>, vector<8x128xf32> -> vector<8x128xf32>
    %cst_222 = arith.constant dense<0.000000e+00> : vector<32x128xf32>
    %431 = tpu.matmul %6, %430, %cst_222 {dimension_numbers = #tpu.dot_dimension_numbers<[1], [0], [0], [1], [0, 0, 1, 1], [], []>} : vector<32x8xf32>, vector<8x128xf32>, vector<32x128xf32> -> vector<32x128xf32>
    %432 = arith.mulf %431, %9 : vector<32x128xf32>
    %433 = vector.extract_strided_slice %432 {offsets = [0, 0], sizes = [32, 32], strides = [1, 1]} : vector<32x128xf32> to vector<32x32xf32>
    %434 = vector.extract_strided_slice %432 {offsets = [0, 32], sizes = [32, 32], strides = [1, 1]} : vector<32x128xf32> to vector<32x32xf32>
    %435 = vector.extract_strided_slice %432 {offsets = [0, 64], sizes = [32, 32], strides = [1, 1]} : vector<32x128xf32> to vector<32x32xf32>
    %436 = vector.extract_strided_slice %432 {offsets = [0, 96], sizes = [32, 1], strides = [1, 1]} : vector<32x128xf32> to vector<32x1xf32>
    %437 = vector.broadcast %10 : vector<1x4xf32> to vector<32x4xf32>
    %438 = arith.mulf %356, %437 : vector<32x4xf32>
    %439 = arith.mulf %356, %438 : vector<32x4xf32>
    %cst_223 = arith.constant dense<0.000000e+00> : vector<32xf32>
    %440 = vector.multi_reduction <add>, %439, %cst_223 [1] : vector<32x4xf32> to vector<32xf32>
    %441 = vector.shape_cast %440 : vector<32xf32> to vector<32x1xf32>
    %cst_224 = arith.constant dense<0.000000e+00> : vector<1x32xf32>
    %442 = tpu.matmul %11, %439, %cst_224 {dimension_numbers = #tpu.dot_dimension_numbers<[1], [1], [0], [0], [0, 0, 1, 0], [], []>} : vector<1x4xf32>, vector<32x4xf32>, vector<1x32xf32> -> vector<1x32xf32>
    %cst_225 = arith.constant dense<0.000000e+00> : vector<32x32xf32>
    %443 = tpu.matmul %356, %438, %cst_225 {dimension_numbers = #tpu.dot_dimension_numbers<[1], [1], [0], [0], [0, 0, 1, 0], [], []>} : vector<32x4xf32>, vector<32x4xf32>, vector<32x32xf32> -> vector<32x32xf32>
    %444 = vector.broadcast %441 : vector<32x1xf32> to vector<32x32xf32>
    %445 = vector.broadcast %442 : vector<1x32xf32> to vector<32x32xf32>
    %446 = arith.addf %444, %445 : vector<32x32xf32>
    %cst_226 = arith.constant 2.000000e+00 : f32
    %447 = vector.broadcast %cst_226 : f32 to vector<32x32xf32>
    %448 = arith.mulf %447, %443 : vector<32x32xf32>
    %449 = arith.subf %446, %448 : vector<32x32xf32>
    %cst_227 = arith.constant dense<0.000000e+00> : vector<32x32xf32>
    %450 = tpu.matmul %433, %434, %cst_227 {dimension_numbers = #tpu.dot_dimension_numbers<[1], [1], [0], [0], [0, 0, 1, 0], [], []>} : vector<32x32xf32>, vector<32x32xf32>, vector<32x32xf32> -> vector<32x32xf32>
    %c3_228 = arith.constant 3 : index
    %c0_229 = arith.constant 0 : index
    %c0_230 = arith.constant 0 : index
    %451 = vector.load %arg16[%c3_228, %c0_229, %c0_230] : memref<8x32x1xf32, #tpu.memory_space<vmem>>, vector<1x32x1xf32>
    %452 = vector.shape_cast %451 : vector<1x32x1xf32> to vector<32x1xf32>
    %453 = vector.broadcast %452 : vector<32x1xf32> to vector<32x32xf32>
    %454 = arith.mulf %453, %449 : vector<32x32xf32>
    %455 = arith.addf %450, %454 : vector<32x32xf32>
    %456 = arith.addf %455, %5 : vector<32x32xf32>
    %cst_231 = arith.constant dense<0xFF800000> : vector<32xf32>
    %457 = vector.multi_reduction <maximumf>, %456, %cst_231 [1] : vector<32x32xf32> to vector<32xf32>
    %458 = vector.shape_cast %457 : vector<32xf32> to vector<32x1xf32>
    %459 = vector.broadcast %458 : vector<32x1xf32> to vector<32x32xf32>
    %460 = arith.subf %456, %459 : vector<32x32xf32>
    %461 = math.exp %460 : vector<32x32xf32>
    %cst_232 = arith.constant dense<0.000000e+00> : vector<32xf32>
    %462 = vector.multi_reduction <add>, %461, %cst_232 [1] : vector<32x32xf32> to vector<32xf32>
    %463 = vector.shape_cast %462 : vector<32xf32> to vector<32x1xf32>
    %464 = tpu.reciprocal %463 {approx = true} : vector<32x1xf32> -> vector<32x1xf32>
    %465 = vector.broadcast %464 : vector<32x1xf32> to vector<32x32xf32>
    %466 = arith.mulf %461, %465 : vector<32x32xf32>
    %cst_233 = arith.constant dense<0.000000e+00> : vector<32x32xf32>
    %467 = tpu.matmul %466, %435, %cst_233 {dimension_numbers = #tpu.dot_dimension_numbers<[1], [0], [0], [1], [0, 0, 1, 1], [], []>} : vector<32x32xf32>, vector<32x32xf32>, vector<32x32xf32> -> vector<32x32xf32>
    %cst_234 = arith.constant dense<0.000000e+00> : vector<8x32xf32>
    %468 = tpu.matmul %7, %467, %cst_234 {dimension_numbers = #tpu.dot_dimension_numbers<[1], [0], [0], [1], [0, 0, 1, 1], [], []>} : vector<8x32xf32>, vector<32x32xf32>, vector<8x32xf32> -> vector<8x32xf32>
    %c3_235 = arith.constant 3 : index
    %c0_236 = arith.constant 0 : index
    %c0_237 = arith.constant 0 : index
    %469 = vector.load %arg17[%c3_235, %c0_236, %c0_237] : memref<8x32x32xf32, #tpu.memory_space<vmem>>, vector<1x32x32xf32>
    %470 = vector.shape_cast %469 : vector<1x32x32xf32> to vector<32x32xf32>
    %cst_238 = arith.constant dense<0.000000e+00> : vector<8x32xf32>
    %471 = tpu.matmul %468, %470, %cst_238 {dimension_numbers = #tpu.dot_dimension_numbers<[1], [0], [0], [1], [0, 0, 1, 1], [], []>} : vector<8x32xf32>, vector<32x32xf32>, vector<8x32xf32> -> vector<8x32xf32>
    %472 = vector.broadcast %1 : vector<8x1xf32> to vector<8x32xf32>
    %473 = arith.mulf %471, %472 : vector<8x32xf32>
    %474 = arith.addf %401, %473 : vector<8x32xf32>
    %cst_239 = arith.constant dense<0.000000e+00> : vector<32x4xf32>
    %475 = tpu.matmul %466, %356, %cst_239 {dimension_numbers = #tpu.dot_dimension_numbers<[1], [0], [0], [1], [0, 0, 1, 1], [], []>} : vector<32x32xf32>, vector<32x4xf32>, vector<32x4xf32> -> vector<32x4xf32>
    %cst_240 = arith.constant dense<0.000000e+00> : vector<32x4xf32>
    %476 = tpu.matmul %8, %475, %cst_240 {dimension_numbers = #tpu.dot_dimension_numbers<[1], [0], [0], [1], [0, 0, 1, 1], [], []>} : vector<32x32xf32>, vector<32x4xf32>, vector<32x4xf32> -> vector<32x4xf32>
    %477 = arith.subf %356, %476 : vector<32x4xf32>
    %478 = vector.broadcast %436 : vector<32x1xf32> to vector<32x4xf32>
    %479 = arith.mulf %477, %478 : vector<32x4xf32>
    %480 = vector.broadcast %3 : vector<32x1xf32> to vector<32x4xf32>
    %481 = arith.mulf %479, %480 : vector<32x4xf32>
    %482 = arith.addf %356, %481 : vector<32x4xf32>
    %c3_241 = arith.constant 3 : index
    %c0_242 = arith.constant 0 : index
    %c0_243 = arith.constant 0 : index
    %483 = vector.load %arg18[%c3_241, %c0_242, %c0_243] : memref<8x1x32xf32, #tpu.memory_space<vmem>>, vector<1x1x32xf32>
    %484 = vector.shape_cast %483 : vector<1x1x32xf32> to vector<1x32xf32>
    %c3_244 = arith.constant 3 : index
    %c0_245 = arith.constant 0 : index
    %c0_246 = arith.constant 0 : index
    %485 = vector.load %arg19[%c3_244, %c0_245, %c0_246] : memref<8x1x32xf32, #tpu.memory_space<vmem>>, vector<1x1x32xf32>
    %486 = vector.shape_cast %485 : vector<1x1x32xf32> to vector<1x32xf32>
    %cst_247 = arith.constant dense<0.000000e+00> : vector<8xf32>
    %487 = vector.multi_reduction <add>, %474, %cst_247 [1] : vector<8x32xf32> to vector<8xf32>
    %488 = vector.shape_cast %487 : vector<8xf32> to vector<8x1xf32>
    %cst_248 = arith.constant 3.200000e+01 : f32
    %489 = vector.broadcast %cst_248 : f32 to vector<8x1xf32>
    %490 = arith.divf %488, %489 : vector<8x1xf32>
    %491 = vector.broadcast %490 : vector<8x1xf32> to vector<8x32xf32>
    %492 = arith.subf %474, %491 : vector<8x32xf32>
    %493 = arith.mulf %492, %492 : vector<8x32xf32>
    %cst_249 = arith.constant dense<0.000000e+00> : vector<8xf32>
    %494 = vector.multi_reduction <add>, %493, %cst_249 [1] : vector<8x32xf32> to vector<8xf32>
    %495 = vector.shape_cast %494 : vector<8xf32> to vector<8x1xf32>
    %cst_250 = arith.constant 3.200000e+01 : f32
    %496 = vector.broadcast %cst_250 : f32 to vector<8x1xf32>
    %497 = arith.divf %495, %496 : vector<8x1xf32>
    %498 = vector.broadcast %490 : vector<8x1xf32> to vector<8x32xf32>
    %499 = arith.subf %474, %498 : vector<8x32xf32>
    %cst_251 = arith.constant 9.99999974E-6 : f32
    %500 = vector.broadcast %cst_251 : f32 to vector<8x1xf32>
    %501 = arith.addf %497, %500 : vector<8x1xf32>
    %502 = math.rsqrt %501 : vector<8x1xf32>
    %503 = vector.broadcast %502 : vector<8x1xf32> to vector<8x32xf32>
    %504 = arith.mulf %499, %503 : vector<8x32xf32>
    %505 = vector.broadcast %484 : vector<1x32xf32> to vector<8x32xf32>
    %506 = arith.mulf %504, %505 : vector<8x32xf32>
    %507 = vector.broadcast %486 : vector<1x32xf32> to vector<8x32xf32>
    %508 = arith.addf %506, %507 : vector<8x32xf32>
    %c3_252 = arith.constant 3 : index
    %c0_253 = arith.constant 0 : index
    %c0_254 = arith.constant 0 : index
    %509 = vector.load %arg20[%c3_252, %c0_253, %c0_254] : memref<8x32x64xf32, #tpu.memory_space<vmem>>, vector<1x32x64xf32>
    %510 = vector.shape_cast %509 : vector<1x32x64xf32> to vector<32x64xf32>
    %cst_255 = arith.constant dense<0.000000e+00> : vector<8x64xf32>
    %511 = tpu.matmul %508, %510, %cst_255 {dimension_numbers = #tpu.dot_dimension_numbers<[1], [0], [0], [1], [0, 0, 1, 1], [], []>} : vector<8x32xf32>, vector<32x64xf32>, vector<8x64xf32> -> vector<8x64xf32>
    %c3_256 = arith.constant 3 : index
    %c0_257 = arith.constant 0 : index
    %c0_258 = arith.constant 0 : index
    %512 = vector.load %arg21[%c3_256, %c0_257, %c0_258] : memref<8x1x64xf32, #tpu.memory_space<vmem>>, vector<1x1x64xf32>
    %513 = vector.shape_cast %512 : vector<1x1x64xf32> to vector<1x64xf32>
    %514 = vector.broadcast %513 : vector<1x64xf32> to vector<8x64xf32>
    %515 = arith.addf %511, %514 : vector<8x64xf32>
    %cst_259 = arith.constant 0.000000e+00 : f32
    %516 = vector.broadcast %cst_259 : f32 to vector<8x64xf32>
    %517 = arith.maximumf %515, %516 : vector<8x64xf32>
    %c3_260 = arith.constant 3 : index
    %c0_261 = arith.constant 0 : index
    %c0_262 = arith.constant 0 : index
    %518 = vector.load %arg22[%c3_260, %c0_261, %c0_262] : memref<8x64x32xf32, #tpu.memory_space<vmem>>, vector<1x64x32xf32>
    %519 = vector.shape_cast %518 : vector<1x64x32xf32> to vector<64x32xf32>
    %cst_263 = arith.constant dense<0.000000e+00> : vector<8x32xf32>
    %520 = tpu.matmul %517, %519, %cst_263 {dimension_numbers = #tpu.dot_dimension_numbers<[1], [0], [0], [1], [0, 0, 1, 1], [], []>} : vector<8x64xf32>, vector<64x32xf32>, vector<8x32xf32> -> vector<8x32xf32>
    %c3_264 = arith.constant 3 : index
    %c0_265 = arith.constant 0 : index
    %c0_266 = arith.constant 0 : index
    %521 = vector.load %arg23[%c3_264, %c0_265, %c0_266] : memref<8x1x32xf32, #tpu.memory_space<vmem>>, vector<1x1x32xf32>
    %522 = vector.shape_cast %521 : vector<1x1x32xf32> to vector<1x32xf32>
    %523 = vector.broadcast %522 : vector<1x32xf32> to vector<8x32xf32>
    %524 = arith.addf %520, %523 : vector<8x32xf32>
    %525 = vector.broadcast %1 : vector<8x1xf32> to vector<8x32xf32>
    %526 = arith.mulf %524, %525 : vector<8x32xf32>
    %527 = arith.addf %474, %526 : vector<8x32xf32>
    %c4 = arith.constant 4 : index
    %c0_267 = arith.constant 0 : index
    %c0_268 = arith.constant 0 : index
    %528 = vector.load %arg13[%c4, %c0_267, %c0_268] : memref<8x1x32xf32, #tpu.memory_space<vmem>>, vector<1x1x32xf32>
    %529 = vector.shape_cast %528 : vector<1x1x32xf32> to vector<1x32xf32>
    %c4_269 = arith.constant 4 : index
    %c0_270 = arith.constant 0 : index
    %c0_271 = arith.constant 0 : index
    %530 = vector.load %arg14[%c4_269, %c0_270, %c0_271] : memref<8x1x32xf32, #tpu.memory_space<vmem>>, vector<1x1x32xf32>
    %531 = vector.shape_cast %530 : vector<1x1x32xf32> to vector<1x32xf32>
    %cst_272 = arith.constant dense<0.000000e+00> : vector<8xf32>
    %532 = vector.multi_reduction <add>, %527, %cst_272 [1] : vector<8x32xf32> to vector<8xf32>
    %533 = vector.shape_cast %532 : vector<8xf32> to vector<8x1xf32>
    %cst_273 = arith.constant 3.200000e+01 : f32
    %534 = vector.broadcast %cst_273 : f32 to vector<8x1xf32>
    %535 = arith.divf %533, %534 : vector<8x1xf32>
    %536 = vector.broadcast %535 : vector<8x1xf32> to vector<8x32xf32>
    %537 = arith.subf %527, %536 : vector<8x32xf32>
    %538 = arith.mulf %537, %537 : vector<8x32xf32>
    %cst_274 = arith.constant dense<0.000000e+00> : vector<8xf32>
    %539 = vector.multi_reduction <add>, %538, %cst_274 [1] : vector<8x32xf32> to vector<8xf32>
    %540 = vector.shape_cast %539 : vector<8xf32> to vector<8x1xf32>
    %cst_275 = arith.constant 3.200000e+01 : f32
    %541 = vector.broadcast %cst_275 : f32 to vector<8x1xf32>
    %542 = arith.divf %540, %541 : vector<8x1xf32>
    %543 = vector.broadcast %535 : vector<8x1xf32> to vector<8x32xf32>
    %544 = arith.subf %527, %543 : vector<8x32xf32>
    %cst_276 = arith.constant 9.99999974E-6 : f32
    %545 = vector.broadcast %cst_276 : f32 to vector<8x1xf32>
    %546 = arith.addf %542, %545 : vector<8x1xf32>
    %547 = math.rsqrt %546 : vector<8x1xf32>
    %548 = vector.broadcast %547 : vector<8x1xf32> to vector<8x32xf32>
    %549 = arith.mulf %544, %548 : vector<8x32xf32>
    %550 = vector.broadcast %529 : vector<1x32xf32> to vector<8x32xf32>
    %551 = arith.mulf %549, %550 : vector<8x32xf32>
    %552 = vector.broadcast %531 : vector<1x32xf32> to vector<8x32xf32>
    %553 = arith.addf %551, %552 : vector<8x32xf32>
    %c4_277 = arith.constant 4 : index
    %c0_278 = arith.constant 0 : index
    %c0_279 = arith.constant 0 : index
    %554 = vector.load %arg15[%c4_277, %c0_278, %c0_279] : memref<8x32x128xf32, #tpu.memory_space<vmem>>, vector<1x32x128xf32>
    %555 = vector.shape_cast %554 : vector<1x32x128xf32> to vector<32x128xf32>
    %cst_280 = arith.constant dense<0.000000e+00> : vector<8x128xf32>
    %556 = tpu.matmul %553, %555, %cst_280 {dimension_numbers = #tpu.dot_dimension_numbers<[1], [0], [0], [1], [0, 0, 1, 1], [], []>} : vector<8x32xf32>, vector<32x128xf32>, vector<8x128xf32> -> vector<8x128xf32>
    %cst_281 = arith.constant dense<0.000000e+00> : vector<32x128xf32>
    %557 = tpu.matmul %6, %556, %cst_281 {dimension_numbers = #tpu.dot_dimension_numbers<[1], [0], [0], [1], [0, 0, 1, 1], [], []>} : vector<32x8xf32>, vector<8x128xf32>, vector<32x128xf32> -> vector<32x128xf32>
    %558 = arith.mulf %557, %9 : vector<32x128xf32>
    %559 = vector.extract_strided_slice %558 {offsets = [0, 0], sizes = [32, 32], strides = [1, 1]} : vector<32x128xf32> to vector<32x32xf32>
    %560 = vector.extract_strided_slice %558 {offsets = [0, 32], sizes = [32, 32], strides = [1, 1]} : vector<32x128xf32> to vector<32x32xf32>
    %561 = vector.extract_strided_slice %558 {offsets = [0, 64], sizes = [32, 32], strides = [1, 1]} : vector<32x128xf32> to vector<32x32xf32>
    %562 = vector.extract_strided_slice %558 {offsets = [0, 96], sizes = [32, 1], strides = [1, 1]} : vector<32x128xf32> to vector<32x1xf32>
    %563 = vector.broadcast %10 : vector<1x4xf32> to vector<32x4xf32>
    %564 = arith.mulf %482, %563 : vector<32x4xf32>
    %565 = arith.mulf %482, %564 : vector<32x4xf32>
    %cst_282 = arith.constant dense<0.000000e+00> : vector<32xf32>
    %566 = vector.multi_reduction <add>, %565, %cst_282 [1] : vector<32x4xf32> to vector<32xf32>
    %567 = vector.shape_cast %566 : vector<32xf32> to vector<32x1xf32>
    %cst_283 = arith.constant dense<0.000000e+00> : vector<1x32xf32>
    %568 = tpu.matmul %11, %565, %cst_283 {dimension_numbers = #tpu.dot_dimension_numbers<[1], [1], [0], [0], [0, 0, 1, 0], [], []>} : vector<1x4xf32>, vector<32x4xf32>, vector<1x32xf32> -> vector<1x32xf32>
    %cst_284 = arith.constant dense<0.000000e+00> : vector<32x32xf32>
    %569 = tpu.matmul %482, %564, %cst_284 {dimension_numbers = #tpu.dot_dimension_numbers<[1], [1], [0], [0], [0, 0, 1, 0], [], []>} : vector<32x4xf32>, vector<32x4xf32>, vector<32x32xf32> -> vector<32x32xf32>
    %570 = vector.broadcast %567 : vector<32x1xf32> to vector<32x32xf32>
    %571 = vector.broadcast %568 : vector<1x32xf32> to vector<32x32xf32>
    %572 = arith.addf %570, %571 : vector<32x32xf32>
    %cst_285 = arith.constant 2.000000e+00 : f32
    %573 = vector.broadcast %cst_285 : f32 to vector<32x32xf32>
    %574 = arith.mulf %573, %569 : vector<32x32xf32>
    %575 = arith.subf %572, %574 : vector<32x32xf32>
    %cst_286 = arith.constant dense<0.000000e+00> : vector<32x32xf32>
    %576 = tpu.matmul %559, %560, %cst_286 {dimension_numbers = #tpu.dot_dimension_numbers<[1], [1], [0], [0], [0, 0, 1, 0], [], []>} : vector<32x32xf32>, vector<32x32xf32>, vector<32x32xf32> -> vector<32x32xf32>
    %c4_287 = arith.constant 4 : index
    %c0_288 = arith.constant 0 : index
    %c0_289 = arith.constant 0 : index
    %577 = vector.load %arg16[%c4_287, %c0_288, %c0_289] : memref<8x32x1xf32, #tpu.memory_space<vmem>>, vector<1x32x1xf32>
    %578 = vector.shape_cast %577 : vector<1x32x1xf32> to vector<32x1xf32>
    %579 = vector.broadcast %578 : vector<32x1xf32> to vector<32x32xf32>
    %580 = arith.mulf %579, %575 : vector<32x32xf32>
    %581 = arith.addf %576, %580 : vector<32x32xf32>
    %582 = arith.addf %581, %5 : vector<32x32xf32>
    %cst_290 = arith.constant dense<0xFF800000> : vector<32xf32>
    %583 = vector.multi_reduction <maximumf>, %582, %cst_290 [1] : vector<32x32xf32> to vector<32xf32>
    %584 = vector.shape_cast %583 : vector<32xf32> to vector<32x1xf32>
    %585 = vector.broadcast %584 : vector<32x1xf32> to vector<32x32xf32>
    %586 = arith.subf %582, %585 : vector<32x32xf32>
    %587 = math.exp %586 : vector<32x32xf32>
    %cst_291 = arith.constant dense<0.000000e+00> : vector<32xf32>
    %588 = vector.multi_reduction <add>, %587, %cst_291 [1] : vector<32x32xf32> to vector<32xf32>
    %589 = vector.shape_cast %588 : vector<32xf32> to vector<32x1xf32>
    %590 = tpu.reciprocal %589 {approx = true} : vector<32x1xf32> -> vector<32x1xf32>
    %591 = vector.broadcast %590 : vector<32x1xf32> to vector<32x32xf32>
    %592 = arith.mulf %587, %591 : vector<32x32xf32>
    %cst_292 = arith.constant dense<0.000000e+00> : vector<32x32xf32>
    %593 = tpu.matmul %592, %561, %cst_292 {dimension_numbers = #tpu.dot_dimension_numbers<[1], [0], [0], [1], [0, 0, 1, 1], [], []>} : vector<32x32xf32>, vector<32x32xf32>, vector<32x32xf32> -> vector<32x32xf32>
    %cst_293 = arith.constant dense<0.000000e+00> : vector<8x32xf32>
    %594 = tpu.matmul %7, %593, %cst_293 {dimension_numbers = #tpu.dot_dimension_numbers<[1], [0], [0], [1], [0, 0, 1, 1], [], []>} : vector<8x32xf32>, vector<32x32xf32>, vector<8x32xf32> -> vector<8x32xf32>
    %c4_294 = arith.constant 4 : index
    %c0_295 = arith.constant 0 : index
    %c0_296 = arith.constant 0 : index
    %595 = vector.load %arg17[%c4_294, %c0_295, %c0_296] : memref<8x32x32xf32, #tpu.memory_space<vmem>>, vector<1x32x32xf32>
    %596 = vector.shape_cast %595 : vector<1x32x32xf32> to vector<32x32xf32>
    %cst_297 = arith.constant dense<0.000000e+00> : vector<8x32xf32>
    %597 = tpu.matmul %594, %596, %cst_297 {dimension_numbers = #tpu.dot_dimension_numbers<[1], [0], [0], [1], [0, 0, 1, 1], [], []>} : vector<8x32xf32>, vector<32x32xf32>, vector<8x32xf32> -> vector<8x32xf32>
    %598 = vector.broadcast %1 : vector<8x1xf32> to vector<8x32xf32>
    %599 = arith.mulf %597, %598 : vector<8x32xf32>
    %600 = arith.addf %527, %599 : vector<8x32xf32>
    %cst_298 = arith.constant dense<0.000000e+00> : vector<32x4xf32>
    %601 = tpu.matmul %592, %482, %cst_298 {dimension_numbers = #tpu.dot_dimension_numbers<[1], [0], [0], [1], [0, 0, 1, 1], [], []>} : vector<32x32xf32>, vector<32x4xf32>, vector<32x4xf32> -> vector<32x4xf32>
    %cst_299 = arith.constant dense<0.000000e+00> : vector<32x4xf32>
    %602 = tpu.matmul %8, %601, %cst_299 {dimension_numbers = #tpu.dot_dimension_numbers<[1], [0], [0], [1], [0, 0, 1, 1], [], []>} : vector<32x32xf32>, vector<32x4xf32>, vector<32x4xf32> -> vector<32x4xf32>
    %603 = arith.subf %482, %602 : vector<32x4xf32>
    %604 = vector.broadcast %562 : vector<32x1xf32> to vector<32x4xf32>
    %605 = arith.mulf %603, %604 : vector<32x4xf32>
    %606 = vector.broadcast %3 : vector<32x1xf32> to vector<32x4xf32>
    %607 = arith.mulf %605, %606 : vector<32x4xf32>
    %608 = arith.addf %482, %607 : vector<32x4xf32>
    %c4_300 = arith.constant 4 : index
    %c0_301 = arith.constant 0 : index
    %c0_302 = arith.constant 0 : index
    %609 = vector.load %arg18[%c4_300, %c0_301, %c0_302] : memref<8x1x32xf32, #tpu.memory_space<vmem>>, vector<1x1x32xf32>
    %610 = vector.shape_cast %609 : vector<1x1x32xf32> to vector<1x32xf32>
    %c4_303 = arith.constant 4 : index
    %c0_304 = arith.constant 0 : index
    %c0_305 = arith.constant 0 : index
    %611 = vector.load %arg19[%c4_303, %c0_304, %c0_305] : memref<8x1x32xf32, #tpu.memory_space<vmem>>, vector<1x1x32xf32>
    %612 = vector.shape_cast %611 : vector<1x1x32xf32> to vector<1x32xf32>
    %cst_306 = arith.constant dense<0.000000e+00> : vector<8xf32>
    %613 = vector.multi_reduction <add>, %600, %cst_306 [1] : vector<8x32xf32> to vector<8xf32>
    %614 = vector.shape_cast %613 : vector<8xf32> to vector<8x1xf32>
    %cst_307 = arith.constant 3.200000e+01 : f32
    %615 = vector.broadcast %cst_307 : f32 to vector<8x1xf32>
    %616 = arith.divf %614, %615 : vector<8x1xf32>
    %617 = vector.broadcast %616 : vector<8x1xf32> to vector<8x32xf32>
    %618 = arith.subf %600, %617 : vector<8x32xf32>
    %619 = arith.mulf %618, %618 : vector<8x32xf32>
    %cst_308 = arith.constant dense<0.000000e+00> : vector<8xf32>
    %620 = vector.multi_reduction <add>, %619, %cst_308 [1] : vector<8x32xf32> to vector<8xf32>
    %621 = vector.shape_cast %620 : vector<8xf32> to vector<8x1xf32>
    %cst_309 = arith.constant 3.200000e+01 : f32
    %622 = vector.broadcast %cst_309 : f32 to vector<8x1xf32>
    %623 = arith.divf %621, %622 : vector<8x1xf32>
    %624 = vector.broadcast %616 : vector<8x1xf32> to vector<8x32xf32>
    %625 = arith.subf %600, %624 : vector<8x32xf32>
    %cst_310 = arith.constant 9.99999974E-6 : f32
    %626 = vector.broadcast %cst_310 : f32 to vector<8x1xf32>
    %627 = arith.addf %623, %626 : vector<8x1xf32>
    %628 = math.rsqrt %627 : vector<8x1xf32>
    %629 = vector.broadcast %628 : vector<8x1xf32> to vector<8x32xf32>
    %630 = arith.mulf %625, %629 : vector<8x32xf32>
    %631 = vector.broadcast %610 : vector<1x32xf32> to vector<8x32xf32>
    %632 = arith.mulf %630, %631 : vector<8x32xf32>
    %633 = vector.broadcast %612 : vector<1x32xf32> to vector<8x32xf32>
    %634 = arith.addf %632, %633 : vector<8x32xf32>
    %c4_311 = arith.constant 4 : index
    %c0_312 = arith.constant 0 : index
    %c0_313 = arith.constant 0 : index
    %635 = vector.load %arg20[%c4_311, %c0_312, %c0_313] : memref<8x32x64xf32, #tpu.memory_space<vmem>>, vector<1x32x64xf32>
    %636 = vector.shape_cast %635 : vector<1x32x64xf32> to vector<32x64xf32>
    %cst_314 = arith.constant dense<0.000000e+00> : vector<8x64xf32>
    %637 = tpu.matmul %634, %636, %cst_314 {dimension_numbers = #tpu.dot_dimension_numbers<[1], [0], [0], [1], [0, 0, 1, 1], [], []>} : vector<8x32xf32>, vector<32x64xf32>, vector<8x64xf32> -> vector<8x64xf32>
    %c4_315 = arith.constant 4 : index
    %c0_316 = arith.constant 0 : index
    %c0_317 = arith.constant 0 : index
    %638 = vector.load %arg21[%c4_315, %c0_316, %c0_317] : memref<8x1x64xf32, #tpu.memory_space<vmem>>, vector<1x1x64xf32>
    %639 = vector.shape_cast %638 : vector<1x1x64xf32> to vector<1x64xf32>
    %640 = vector.broadcast %639 : vector<1x64xf32> to vector<8x64xf32>
    %641 = arith.addf %637, %640 : vector<8x64xf32>
    %cst_318 = arith.constant 0.000000e+00 : f32
    %642 = vector.broadcast %cst_318 : f32 to vector<8x64xf32>
    %643 = arith.maximumf %641, %642 : vector<8x64xf32>
    %c4_319 = arith.constant 4 : index
    %c0_320 = arith.constant 0 : index
    %c0_321 = arith.constant 0 : index
    %644 = vector.load %arg22[%c4_319, %c0_320, %c0_321] : memref<8x64x32xf32, #tpu.memory_space<vmem>>, vector<1x64x32xf32>
    %645 = vector.shape_cast %644 : vector<1x64x32xf32> to vector<64x32xf32>
    %cst_322 = arith.constant dense<0.000000e+00> : vector<8x32xf32>
    %646 = tpu.matmul %643, %645, %cst_322 {dimension_numbers = #tpu.dot_dimension_numbers<[1], [0], [0], [1], [0, 0, 1, 1], [], []>} : vector<8x64xf32>, vector<64x32xf32>, vector<8x32xf32> -> vector<8x32xf32>
    %c4_323 = arith.constant 4 : index
    %c0_324 = arith.constant 0 : index
    %c0_325 = arith.constant 0 : index
    %647 = vector.load %arg23[%c4_323, %c0_324, %c0_325] : memref<8x1x32xf32, #tpu.memory_space<vmem>>, vector<1x1x32xf32>
    %648 = vector.shape_cast %647 : vector<1x1x32xf32> to vector<1x32xf32>
    %649 = vector.broadcast %648 : vector<1x32xf32> to vector<8x32xf32>
    %650 = arith.addf %646, %649 : vector<8x32xf32>
    %651 = vector.broadcast %1 : vector<8x1xf32> to vector<8x32xf32>
    %652 = arith.mulf %650, %651 : vector<8x32xf32>
    %653 = arith.addf %600, %652 : vector<8x32xf32>
    %c5 = arith.constant 5 : index
    %c0_326 = arith.constant 0 : index
    %c0_327 = arith.constant 0 : index
    %654 = vector.load %arg13[%c5, %c0_326, %c0_327] : memref<8x1x32xf32, #tpu.memory_space<vmem>>, vector<1x1x32xf32>
    %655 = vector.shape_cast %654 : vector<1x1x32xf32> to vector<1x32xf32>
    %c5_328 = arith.constant 5 : index
    %c0_329 = arith.constant 0 : index
    %c0_330 = arith.constant 0 : index
    %656 = vector.load %arg14[%c5_328, %c0_329, %c0_330] : memref<8x1x32xf32, #tpu.memory_space<vmem>>, vector<1x1x32xf32>
    %657 = vector.shape_cast %656 : vector<1x1x32xf32> to vector<1x32xf32>
    %cst_331 = arith.constant dense<0.000000e+00> : vector<8xf32>
    %658 = vector.multi_reduction <add>, %653, %cst_331 [1] : vector<8x32xf32> to vector<8xf32>
    %659 = vector.shape_cast %658 : vector<8xf32> to vector<8x1xf32>
    %cst_332 = arith.constant 3.200000e+01 : f32
    %660 = vector.broadcast %cst_332 : f32 to vector<8x1xf32>
    %661 = arith.divf %659, %660 : vector<8x1xf32>
    %662 = vector.broadcast %661 : vector<8x1xf32> to vector<8x32xf32>
    %663 = arith.subf %653, %662 : vector<8x32xf32>
    %664 = arith.mulf %663, %663 : vector<8x32xf32>
    %cst_333 = arith.constant dense<0.000000e+00> : vector<8xf32>
    %665 = vector.multi_reduction <add>, %664, %cst_333 [1] : vector<8x32xf32> to vector<8xf32>
    %666 = vector.shape_cast %665 : vector<8xf32> to vector<8x1xf32>
    %cst_334 = arith.constant 3.200000e+01 : f32
    %667 = vector.broadcast %cst_334 : f32 to vector<8x1xf32>
    %668 = arith.divf %666, %667 : vector<8x1xf32>
    %669 = vector.broadcast %661 : vector<8x1xf32> to vector<8x32xf32>
    %670 = arith.subf %653, %669 : vector<8x32xf32>
    %cst_335 = arith.constant 9.99999974E-6 : f32
    %671 = vector.broadcast %cst_335 : f32 to vector<8x1xf32>
    %672 = arith.addf %668, %671 : vector<8x1xf32>
    %673 = math.rsqrt %672 : vector<8x1xf32>
    %674 = vector.broadcast %673 : vector<8x1xf32> to vector<8x32xf32>
    %675 = arith.mulf %670, %674 : vector<8x32xf32>
    %676 = vector.broadcast %655 : vector<1x32xf32> to vector<8x32xf32>
    %677 = arith.mulf %675, %676 : vector<8x32xf32>
    %678 = vector.broadcast %657 : vector<1x32xf32> to vector<8x32xf32>
    %679 = arith.addf %677, %678 : vector<8x32xf32>
    %c5_336 = arith.constant 5 : index
    %c0_337 = arith.constant 0 : index
    %c0_338 = arith.constant 0 : index
    %680 = vector.load %arg15[%c5_336, %c0_337, %c0_338] : memref<8x32x128xf32, #tpu.memory_space<vmem>>, vector<1x32x128xf32>
    %681 = vector.shape_cast %680 : vector<1x32x128xf32> to vector<32x128xf32>
    %cst_339 = arith.constant dense<0.000000e+00> : vector<8x128xf32>
    %682 = tpu.matmul %679, %681, %cst_339 {dimension_numbers = #tpu.dot_dimension_numbers<[1], [0], [0], [1], [0, 0, 1, 1], [], []>} : vector<8x32xf32>, vector<32x128xf32>, vector<8x128xf32> -> vector<8x128xf32>
    %cst_340 = arith.constant dense<0.000000e+00> : vector<32x128xf32>
    %683 = tpu.matmul %6, %682, %cst_340 {dimension_numbers = #tpu.dot_dimension_numbers<[1], [0], [0], [1], [0, 0, 1, 1], [], []>} : vector<32x8xf32>, vector<8x128xf32>, vector<32x128xf32> -> vector<32x128xf32>
    %684 = arith.mulf %683, %9 : vector<32x128xf32>
    %685 = vector.extract_strided_slice %684 {offsets = [0, 0], sizes = [32, 32], strides = [1, 1]} : vector<32x128xf32> to vector<32x32xf32>
    %686 = vector.extract_strided_slice %684 {offsets = [0, 32], sizes = [32, 32], strides = [1, 1]} : vector<32x128xf32> to vector<32x32xf32>
    %687 = vector.extract_strided_slice %684 {offsets = [0, 64], sizes = [32, 32], strides = [1, 1]} : vector<32x128xf32> to vector<32x32xf32>
    %688 = vector.extract_strided_slice %684 {offsets = [0, 96], sizes = [32, 1], strides = [1, 1]} : vector<32x128xf32> to vector<32x1xf32>
    %689 = vector.broadcast %10 : vector<1x4xf32> to vector<32x4xf32>
    %690 = arith.mulf %608, %689 : vector<32x4xf32>
    %691 = arith.mulf %608, %690 : vector<32x4xf32>
    %cst_341 = arith.constant dense<0.000000e+00> : vector<32xf32>
    %692 = vector.multi_reduction <add>, %691, %cst_341 [1] : vector<32x4xf32> to vector<32xf32>
    %693 = vector.shape_cast %692 : vector<32xf32> to vector<32x1xf32>
    %cst_342 = arith.constant dense<0.000000e+00> : vector<1x32xf32>
    %694 = tpu.matmul %11, %691, %cst_342 {dimension_numbers = #tpu.dot_dimension_numbers<[1], [1], [0], [0], [0, 0, 1, 0], [], []>} : vector<1x4xf32>, vector<32x4xf32>, vector<1x32xf32> -> vector<1x32xf32>
    %cst_343 = arith.constant dense<0.000000e+00> : vector<32x32xf32>
    %695 = tpu.matmul %608, %690, %cst_343 {dimension_numbers = #tpu.dot_dimension_numbers<[1], [1], [0], [0], [0, 0, 1, 0], [], []>} : vector<32x4xf32>, vector<32x4xf32>, vector<32x32xf32> -> vector<32x32xf32>
    %696 = vector.broadcast %693 : vector<32x1xf32> to vector<32x32xf32>
    %697 = vector.broadcast %694 : vector<1x32xf32> to vector<32x32xf32>
    %698 = arith.addf %696, %697 : vector<32x32xf32>
    %cst_344 = arith.constant 2.000000e+00 : f32
    %699 = vector.broadcast %cst_344 : f32 to vector<32x32xf32>
    %700 = arith.mulf %699, %695 : vector<32x32xf32>
    %701 = arith.subf %698, %700 : vector<32x32xf32>
    %cst_345 = arith.constant dense<0.000000e+00> : vector<32x32xf32>
    %702 = tpu.matmul %685, %686, %cst_345 {dimension_numbers = #tpu.dot_dimension_numbers<[1], [1], [0], [0], [0, 0, 1, 0], [], []>} : vector<32x32xf32>, vector<32x32xf32>, vector<32x32xf32> -> vector<32x32xf32>
    %c5_346 = arith.constant 5 : index
    %c0_347 = arith.constant 0 : index
    %c0_348 = arith.constant 0 : index
    %703 = vector.load %arg16[%c5_346, %c0_347, %c0_348] : memref<8x32x1xf32, #tpu.memory_space<vmem>>, vector<1x32x1xf32>
    %704 = vector.shape_cast %703 : vector<1x32x1xf32> to vector<32x1xf32>
    %705 = vector.broadcast %704 : vector<32x1xf32> to vector<32x32xf32>
    %706 = arith.mulf %705, %701 : vector<32x32xf32>
    %707 = arith.addf %702, %706 : vector<32x32xf32>
    %708 = arith.addf %707, %5 : vector<32x32xf32>
    %cst_349 = arith.constant dense<0xFF800000> : vector<32xf32>
    %709 = vector.multi_reduction <maximumf>, %708, %cst_349 [1] : vector<32x32xf32> to vector<32xf32>
    %710 = vector.shape_cast %709 : vector<32xf32> to vector<32x1xf32>
    %711 = vector.broadcast %710 : vector<32x1xf32> to vector<32x32xf32>
    %712 = arith.subf %708, %711 : vector<32x32xf32>
    %713 = math.exp %712 : vector<32x32xf32>
    %cst_350 = arith.constant dense<0.000000e+00> : vector<32xf32>
    %714 = vector.multi_reduction <add>, %713, %cst_350 [1] : vector<32x32xf32> to vector<32xf32>
    %715 = vector.shape_cast %714 : vector<32xf32> to vector<32x1xf32>
    %716 = tpu.reciprocal %715 {approx = true} : vector<32x1xf32> -> vector<32x1xf32>
    %717 = vector.broadcast %716 : vector<32x1xf32> to vector<32x32xf32>
    %718 = arith.mulf %713, %717 : vector<32x32xf32>
    %cst_351 = arith.constant dense<0.000000e+00> : vector<32x32xf32>
    %719 = tpu.matmul %718, %687, %cst_351 {dimension_numbers = #tpu.dot_dimension_numbers<[1], [0], [0], [1], [0, 0, 1, 1], [], []>} : vector<32x32xf32>, vector<32x32xf32>, vector<32x32xf32> -> vector<32x32xf32>
    %cst_352 = arith.constant dense<0.000000e+00> : vector<8x32xf32>
    %720 = tpu.matmul %7, %719, %cst_352 {dimension_numbers = #tpu.dot_dimension_numbers<[1], [0], [0], [1], [0, 0, 1, 1], [], []>} : vector<8x32xf32>, vector<32x32xf32>, vector<8x32xf32> -> vector<8x32xf32>
    %c5_353 = arith.constant 5 : index
    %c0_354 = arith.constant 0 : index
    %c0_355 = arith.constant 0 : index
    %721 = vector.load %arg17[%c5_353, %c0_354, %c0_355] : memref<8x32x32xf32, #tpu.memory_space<vmem>>, vector<1x32x32xf32>
    %722 = vector.shape_cast %721 : vector<1x32x32xf32> to vector<32x32xf32>
    %cst_356 = arith.constant dense<0.000000e+00> : vector<8x32xf32>
    %723 = tpu.matmul %720, %722, %cst_356 {dimension_numbers = #tpu.dot_dimension_numbers<[1], [0], [0], [1], [0, 0, 1, 1], [], []>} : vector<8x32xf32>, vector<32x32xf32>, vector<8x32xf32> -> vector<8x32xf32>
    %724 = vector.broadcast %1 : vector<8x1xf32> to vector<8x32xf32>
    %725 = arith.mulf %723, %724 : vector<8x32xf32>
    %726 = arith.addf %653, %725 : vector<8x32xf32>
    %cst_357 = arith.constant dense<0.000000e+00> : vector<32x4xf32>
    %727 = tpu.matmul %718, %608, %cst_357 {dimension_numbers = #tpu.dot_dimension_numbers<[1], [0], [0], [1], [0, 0, 1, 1], [], []>} : vector<32x32xf32>, vector<32x4xf32>, vector<32x4xf32> -> vector<32x4xf32>
    %cst_358 = arith.constant dense<0.000000e+00> : vector<32x4xf32>
    %728 = tpu.matmul %8, %727, %cst_358 {dimension_numbers = #tpu.dot_dimension_numbers<[1], [0], [0], [1], [0, 0, 1, 1], [], []>} : vector<32x32xf32>, vector<32x4xf32>, vector<32x4xf32> -> vector<32x4xf32>
    %729 = arith.subf %608, %728 : vector<32x4xf32>
    %730 = vector.broadcast %688 : vector<32x1xf32> to vector<32x4xf32>
    %731 = arith.mulf %729, %730 : vector<32x4xf32>
    %732 = vector.broadcast %3 : vector<32x1xf32> to vector<32x4xf32>
    %733 = arith.mulf %731, %732 : vector<32x4xf32>
    %734 = arith.addf %608, %733 : vector<32x4xf32>
    %c5_359 = arith.constant 5 : index
    %c0_360 = arith.constant 0 : index
    %c0_361 = arith.constant 0 : index
    %735 = vector.load %arg18[%c5_359, %c0_360, %c0_361] : memref<8x1x32xf32, #tpu.memory_space<vmem>>, vector<1x1x32xf32>
    %736 = vector.shape_cast %735 : vector<1x1x32xf32> to vector<1x32xf32>
    %c5_362 = arith.constant 5 : index
    %c0_363 = arith.constant 0 : index
    %c0_364 = arith.constant 0 : index
    %737 = vector.load %arg19[%c5_362, %c0_363, %c0_364] : memref<8x1x32xf32, #tpu.memory_space<vmem>>, vector<1x1x32xf32>
    %738 = vector.shape_cast %737 : vector<1x1x32xf32> to vector<1x32xf32>
    %cst_365 = arith.constant dense<0.000000e+00> : vector<8xf32>
    %739 = vector.multi_reduction <add>, %726, %cst_365 [1] : vector<8x32xf32> to vector<8xf32>
    %740 = vector.shape_cast %739 : vector<8xf32> to vector<8x1xf32>
    %cst_366 = arith.constant 3.200000e+01 : f32
    %741 = vector.broadcast %cst_366 : f32 to vector<8x1xf32>
    %742 = arith.divf %740, %741 : vector<8x1xf32>
    %743 = vector.broadcast %742 : vector<8x1xf32> to vector<8x32xf32>
    %744 = arith.subf %726, %743 : vector<8x32xf32>
    %745 = arith.mulf %744, %744 : vector<8x32xf32>
    %cst_367 = arith.constant dense<0.000000e+00> : vector<8xf32>
    %746 = vector.multi_reduction <add>, %745, %cst_367 [1] : vector<8x32xf32> to vector<8xf32>
    %747 = vector.shape_cast %746 : vector<8xf32> to vector<8x1xf32>
    %cst_368 = arith.constant 3.200000e+01 : f32
    %748 = vector.broadcast %cst_368 : f32 to vector<8x1xf32>
    %749 = arith.divf %747, %748 : vector<8x1xf32>
    %750 = vector.broadcast %742 : vector<8x1xf32> to vector<8x32xf32>
    %751 = arith.subf %726, %750 : vector<8x32xf32>
    %cst_369 = arith.constant 9.99999974E-6 : f32
    %752 = vector.broadcast %cst_369 : f32 to vector<8x1xf32>
    %753 = arith.addf %749, %752 : vector<8x1xf32>
    %754 = math.rsqrt %753 : vector<8x1xf32>
    %755 = vector.broadcast %754 : vector<8x1xf32> to vector<8x32xf32>
    %756 = arith.mulf %751, %755 : vector<8x32xf32>
    %757 = vector.broadcast %736 : vector<1x32xf32> to vector<8x32xf32>
    %758 = arith.mulf %756, %757 : vector<8x32xf32>
    %759 = vector.broadcast %738 : vector<1x32xf32> to vector<8x32xf32>
    %760 = arith.addf %758, %759 : vector<8x32xf32>
    %c5_370 = arith.constant 5 : index
    %c0_371 = arith.constant 0 : index
    %c0_372 = arith.constant 0 : index
    %761 = vector.load %arg20[%c5_370, %c0_371, %c0_372] : memref<8x32x64xf32, #tpu.memory_space<vmem>>, vector<1x32x64xf32>
    %762 = vector.shape_cast %761 : vector<1x32x64xf32> to vector<32x64xf32>
    %cst_373 = arith.constant dense<0.000000e+00> : vector<8x64xf32>
    %763 = tpu.matmul %760, %762, %cst_373 {dimension_numbers = #tpu.dot_dimension_numbers<[1], [0], [0], [1], [0, 0, 1, 1], [], []>} : vector<8x32xf32>, vector<32x64xf32>, vector<8x64xf32> -> vector<8x64xf32>
    %c5_374 = arith.constant 5 : index
    %c0_375 = arith.constant 0 : index
    %c0_376 = arith.constant 0 : index
    %764 = vector.load %arg21[%c5_374, %c0_375, %c0_376] : memref<8x1x64xf32, #tpu.memory_space<vmem>>, vector<1x1x64xf32>
    %765 = vector.shape_cast %764 : vector<1x1x64xf32> to vector<1x64xf32>
    %766 = vector.broadcast %765 : vector<1x64xf32> to vector<8x64xf32>
    %767 = arith.addf %763, %766 : vector<8x64xf32>
    %cst_377 = arith.constant 0.000000e+00 : f32
    %768 = vector.broadcast %cst_377 : f32 to vector<8x64xf32>
    %769 = arith.maximumf %767, %768 : vector<8x64xf32>
    %c5_378 = arith.constant 5 : index
    %c0_379 = arith.constant 0 : index
    %c0_380 = arith.constant 0 : index
    %770 = vector.load %arg22[%c5_378, %c0_379, %c0_380] : memref<8x64x32xf32, #tpu.memory_space<vmem>>, vector<1x64x32xf32>
    %771 = vector.shape_cast %770 : vector<1x64x32xf32> to vector<64x32xf32>
    %cst_381 = arith.constant dense<0.000000e+00> : vector<8x32xf32>
    %772 = tpu.matmul %769, %771, %cst_381 {dimension_numbers = #tpu.dot_dimension_numbers<[1], [0], [0], [1], [0, 0, 1, 1], [], []>} : vector<8x64xf32>, vector<64x32xf32>, vector<8x32xf32> -> vector<8x32xf32>
    %c5_382 = arith.constant 5 : index
    %c0_383 = arith.constant 0 : index
    %c0_384 = arith.constant 0 : index
    %773 = vector.load %arg23[%c5_382, %c0_383, %c0_384] : memref<8x1x32xf32, #tpu.memory_space<vmem>>, vector<1x1x32xf32>
    %774 = vector.shape_cast %773 : vector<1x1x32xf32> to vector<1x32xf32>
    %775 = vector.broadcast %774 : vector<1x32xf32> to vector<8x32xf32>
    %776 = arith.addf %772, %775 : vector<8x32xf32>
    %777 = vector.broadcast %1 : vector<8x1xf32> to vector<8x32xf32>
    %778 = arith.mulf %776, %777 : vector<8x32xf32>
    %779 = arith.addf %726, %778 : vector<8x32xf32>
    %c6 = arith.constant 6 : index
    %c0_385 = arith.constant 0 : index
    %c0_386 = arith.constant 0 : index
    %780 = vector.load %arg13[%c6, %c0_385, %c0_386] : memref<8x1x32xf32, #tpu.memory_space<vmem>>, vector<1x1x32xf32>
    %781 = vector.shape_cast %780 : vector<1x1x32xf32> to vector<1x32xf32>
    %c6_387 = arith.constant 6 : index
    %c0_388 = arith.constant 0 : index
    %c0_389 = arith.constant 0 : index
    %782 = vector.load %arg14[%c6_387, %c0_388, %c0_389] : memref<8x1x32xf32, #tpu.memory_space<vmem>>, vector<1x1x32xf32>
    %783 = vector.shape_cast %782 : vector<1x1x32xf32> to vector<1x32xf32>
    %cst_390 = arith.constant dense<0.000000e+00> : vector<8xf32>
    %784 = vector.multi_reduction <add>, %779, %cst_390 [1] : vector<8x32xf32> to vector<8xf32>
    %785 = vector.shape_cast %784 : vector<8xf32> to vector<8x1xf32>
    %cst_391 = arith.constant 3.200000e+01 : f32
    %786 = vector.broadcast %cst_391 : f32 to vector<8x1xf32>
    %787 = arith.divf %785, %786 : vector<8x1xf32>
    %788 = vector.broadcast %787 : vector<8x1xf32> to vector<8x32xf32>
    %789 = arith.subf %779, %788 : vector<8x32xf32>
    %790 = arith.mulf %789, %789 : vector<8x32xf32>
    %cst_392 = arith.constant dense<0.000000e+00> : vector<8xf32>
    %791 = vector.multi_reduction <add>, %790, %cst_392 [1] : vector<8x32xf32> to vector<8xf32>
    %792 = vector.shape_cast %791 : vector<8xf32> to vector<8x1xf32>
    %cst_393 = arith.constant 3.200000e+01 : f32
    %793 = vector.broadcast %cst_393 : f32 to vector<8x1xf32>
    %794 = arith.divf %792, %793 : vector<8x1xf32>
    %795 = vector.broadcast %787 : vector<8x1xf32> to vector<8x32xf32>
    %796 = arith.subf %779, %795 : vector<8x32xf32>
    %cst_394 = arith.constant 9.99999974E-6 : f32
    %797 = vector.broadcast %cst_394 : f32 to vector<8x1xf32>
    %798 = arith.addf %794, %797 : vector<8x1xf32>
    %799 = math.rsqrt %798 : vector<8x1xf32>
    %800 = vector.broadcast %799 : vector<8x1xf32> to vector<8x32xf32>
    %801 = arith.mulf %796, %800 : vector<8x32xf32>
    %802 = vector.broadcast %781 : vector<1x32xf32> to vector<8x32xf32>
    %803 = arith.mulf %801, %802 : vector<8x32xf32>
    %804 = vector.broadcast %783 : vector<1x32xf32> to vector<8x32xf32>
    %805 = arith.addf %803, %804 : vector<8x32xf32>
    %c6_395 = arith.constant 6 : index
    %c0_396 = arith.constant 0 : index
    %c0_397 = arith.constant 0 : index
    %806 = vector.load %arg15[%c6_395, %c0_396, %c0_397] : memref<8x32x128xf32, #tpu.memory_space<vmem>>, vector<1x32x128xf32>
    %807 = vector.shape_cast %806 : vector<1x32x128xf32> to vector<32x128xf32>
    %cst_398 = arith.constant dense<0.000000e+00> : vector<8x128xf32>
    %808 = tpu.matmul %805, %807, %cst_398 {dimension_numbers = #tpu.dot_dimension_numbers<[1], [0], [0], [1], [0, 0, 1, 1], [], []>} : vector<8x32xf32>, vector<32x128xf32>, vector<8x128xf32> -> vector<8x128xf32>
    %cst_399 = arith.constant dense<0.000000e+00> : vector<32x128xf32>
    %809 = tpu.matmul %6, %808, %cst_399 {dimension_numbers = #tpu.dot_dimension_numbers<[1], [0], [0], [1], [0, 0, 1, 1], [], []>} : vector<32x8xf32>, vector<8x128xf32>, vector<32x128xf32> -> vector<32x128xf32>
    %810 = arith.mulf %809, %9 : vector<32x128xf32>
    %811 = vector.extract_strided_slice %810 {offsets = [0, 0], sizes = [32, 32], strides = [1, 1]} : vector<32x128xf32> to vector<32x32xf32>
    %812 = vector.extract_strided_slice %810 {offsets = [0, 32], sizes = [32, 32], strides = [1, 1]} : vector<32x128xf32> to vector<32x32xf32>
    %813 = vector.extract_strided_slice %810 {offsets = [0, 64], sizes = [32, 32], strides = [1, 1]} : vector<32x128xf32> to vector<32x32xf32>
    %814 = vector.extract_strided_slice %810 {offsets = [0, 96], sizes = [32, 1], strides = [1, 1]} : vector<32x128xf32> to vector<32x1xf32>
    %815 = vector.broadcast %10 : vector<1x4xf32> to vector<32x4xf32>
    %816 = arith.mulf %734, %815 : vector<32x4xf32>
    %817 = arith.mulf %734, %816 : vector<32x4xf32>
    %cst_400 = arith.constant dense<0.000000e+00> : vector<32xf32>
    %818 = vector.multi_reduction <add>, %817, %cst_400 [1] : vector<32x4xf32> to vector<32xf32>
    %819 = vector.shape_cast %818 : vector<32xf32> to vector<32x1xf32>
    %cst_401 = arith.constant dense<0.000000e+00> : vector<1x32xf32>
    %820 = tpu.matmul %11, %817, %cst_401 {dimension_numbers = #tpu.dot_dimension_numbers<[1], [1], [0], [0], [0, 0, 1, 0], [], []>} : vector<1x4xf32>, vector<32x4xf32>, vector<1x32xf32> -> vector<1x32xf32>
    %cst_402 = arith.constant dense<0.000000e+00> : vector<32x32xf32>
    %821 = tpu.matmul %734, %816, %cst_402 {dimension_numbers = #tpu.dot_dimension_numbers<[1], [1], [0], [0], [0, 0, 1, 0], [], []>} : vector<32x4xf32>, vector<32x4xf32>, vector<32x32xf32> -> vector<32x32xf32>
    %822 = vector.broadcast %819 : vector<32x1xf32> to vector<32x32xf32>
    %823 = vector.broadcast %820 : vector<1x32xf32> to vector<32x32xf32>
    %824 = arith.addf %822, %823 : vector<32x32xf32>
    %cst_403 = arith.constant 2.000000e+00 : f32
    %825 = vector.broadcast %cst_403 : f32 to vector<32x32xf32>
    %826 = arith.mulf %825, %821 : vector<32x32xf32>
    %827 = arith.subf %824, %826 : vector<32x32xf32>
    %cst_404 = arith.constant dense<0.000000e+00> : vector<32x32xf32>
    %828 = tpu.matmul %811, %812, %cst_404 {dimension_numbers = #tpu.dot_dimension_numbers<[1], [1], [0], [0], [0, 0, 1, 0], [], []>} : vector<32x32xf32>, vector<32x32xf32>, vector<32x32xf32> -> vector<32x32xf32>
    %c6_405 = arith.constant 6 : index
    %c0_406 = arith.constant 0 : index
    %c0_407 = arith.constant 0 : index
    %829 = vector.load %arg16[%c6_405, %c0_406, %c0_407] : memref<8x32x1xf32, #tpu.memory_space<vmem>>, vector<1x32x1xf32>
    %830 = vector.shape_cast %829 : vector<1x32x1xf32> to vector<32x1xf32>
    %831 = vector.broadcast %830 : vector<32x1xf32> to vector<32x32xf32>
    %832 = arith.mulf %831, %827 : vector<32x32xf32>
    %833 = arith.addf %828, %832 : vector<32x32xf32>
    %834 = arith.addf %833, %5 : vector<32x32xf32>
    %cst_408 = arith.constant dense<0xFF800000> : vector<32xf32>
    %835 = vector.multi_reduction <maximumf>, %834, %cst_408 [1] : vector<32x32xf32> to vector<32xf32>
    %836 = vector.shape_cast %835 : vector<32xf32> to vector<32x1xf32>
    %837 = vector.broadcast %836 : vector<32x1xf32> to vector<32x32xf32>
    %838 = arith.subf %834, %837 : vector<32x32xf32>
    %839 = math.exp %838 : vector<32x32xf32>
    %cst_409 = arith.constant dense<0.000000e+00> : vector<32xf32>
    %840 = vector.multi_reduction <add>, %839, %cst_409 [1] : vector<32x32xf32> to vector<32xf32>
    %841 = vector.shape_cast %840 : vector<32xf32> to vector<32x1xf32>
    %842 = tpu.reciprocal %841 {approx = true} : vector<32x1xf32> -> vector<32x1xf32>
    %843 = vector.broadcast %842 : vector<32x1xf32> to vector<32x32xf32>
    %844 = arith.mulf %839, %843 : vector<32x32xf32>
    %cst_410 = arith.constant dense<0.000000e+00> : vector<32x32xf32>
    %845 = tpu.matmul %844, %813, %cst_410 {dimension_numbers = #tpu.dot_dimension_numbers<[1], [0], [0], [1], [0, 0, 1, 1], [], []>} : vector<32x32xf32>, vector<32x32xf32>, vector<32x32xf32> -> vector<32x32xf32>
    %cst_411 = arith.constant dense<0.000000e+00> : vector<8x32xf32>
    %846 = tpu.matmul %7, %845, %cst_411 {dimension_numbers = #tpu.dot_dimension_numbers<[1], [0], [0], [1], [0, 0, 1, 1], [], []>} : vector<8x32xf32>, vector<32x32xf32>, vector<8x32xf32> -> vector<8x32xf32>
    %c6_412 = arith.constant 6 : index
    %c0_413 = arith.constant 0 : index
    %c0_414 = arith.constant 0 : index
    %847 = vector.load %arg17[%c6_412, %c0_413, %c0_414] : memref<8x32x32xf32, #tpu.memory_space<vmem>>, vector<1x32x32xf32>
    %848 = vector.shape_cast %847 : vector<1x32x32xf32> to vector<32x32xf32>
    %cst_415 = arith.constant dense<0.000000e+00> : vector<8x32xf32>
    %849 = tpu.matmul %846, %848, %cst_415 {dimension_numbers = #tpu.dot_dimension_numbers<[1], [0], [0], [1], [0, 0, 1, 1], [], []>} : vector<8x32xf32>, vector<32x32xf32>, vector<8x32xf32> -> vector<8x32xf32>
    %850 = vector.broadcast %1 : vector<8x1xf32> to vector<8x32xf32>
    %851 = arith.mulf %849, %850 : vector<8x32xf32>
    %852 = arith.addf %779, %851 : vector<8x32xf32>
    %cst_416 = arith.constant dense<0.000000e+00> : vector<32x4xf32>
    %853 = tpu.matmul %844, %734, %cst_416 {dimension_numbers = #tpu.dot_dimension_numbers<[1], [0], [0], [1], [0, 0, 1, 1], [], []>} : vector<32x32xf32>, vector<32x4xf32>, vector<32x4xf32> -> vector<32x4xf32>
    %cst_417 = arith.constant dense<0.000000e+00> : vector<32x4xf32>
    %854 = tpu.matmul %8, %853, %cst_417 {dimension_numbers = #tpu.dot_dimension_numbers<[1], [0], [0], [1], [0, 0, 1, 1], [], []>} : vector<32x32xf32>, vector<32x4xf32>, vector<32x4xf32> -> vector<32x4xf32>
    %855 = arith.subf %734, %854 : vector<32x4xf32>
    %856 = vector.broadcast %814 : vector<32x1xf32> to vector<32x4xf32>
    %857 = arith.mulf %855, %856 : vector<32x4xf32>
    %858 = vector.broadcast %3 : vector<32x1xf32> to vector<32x4xf32>
    %859 = arith.mulf %857, %858 : vector<32x4xf32>
    %860 = arith.addf %734, %859 : vector<32x4xf32>
    %c6_418 = arith.constant 6 : index
    %c0_419 = arith.constant 0 : index
    %c0_420 = arith.constant 0 : index
    %861 = vector.load %arg18[%c6_418, %c0_419, %c0_420] : memref<8x1x32xf32, #tpu.memory_space<vmem>>, vector<1x1x32xf32>
    %862 = vector.shape_cast %861 : vector<1x1x32xf32> to vector<1x32xf32>
    %c6_421 = arith.constant 6 : index
    %c0_422 = arith.constant 0 : index
    %c0_423 = arith.constant 0 : index
    %863 = vector.load %arg19[%c6_421, %c0_422, %c0_423] : memref<8x1x32xf32, #tpu.memory_space<vmem>>, vector<1x1x32xf32>
    %864 = vector.shape_cast %863 : vector<1x1x32xf32> to vector<1x32xf32>
    %cst_424 = arith.constant dense<0.000000e+00> : vector<8xf32>
    %865 = vector.multi_reduction <add>, %852, %cst_424 [1] : vector<8x32xf32> to vector<8xf32>
    %866 = vector.shape_cast %865 : vector<8xf32> to vector<8x1xf32>
    %cst_425 = arith.constant 3.200000e+01 : f32
    %867 = vector.broadcast %cst_425 : f32 to vector<8x1xf32>
    %868 = arith.divf %866, %867 : vector<8x1xf32>
    %869 = vector.broadcast %868 : vector<8x1xf32> to vector<8x32xf32>
    %870 = arith.subf %852, %869 : vector<8x32xf32>
    %871 = arith.mulf %870, %870 : vector<8x32xf32>
    %cst_426 = arith.constant dense<0.000000e+00> : vector<8xf32>
    %872 = vector.multi_reduction <add>, %871, %cst_426 [1] : vector<8x32xf32> to vector<8xf32>
    %873 = vector.shape_cast %872 : vector<8xf32> to vector<8x1xf32>
    %cst_427 = arith.constant 3.200000e+01 : f32
    %874 = vector.broadcast %cst_427 : f32 to vector<8x1xf32>
    %875 = arith.divf %873, %874 : vector<8x1xf32>
    %876 = vector.broadcast %868 : vector<8x1xf32> to vector<8x32xf32>
    %877 = arith.subf %852, %876 : vector<8x32xf32>
    %cst_428 = arith.constant 9.99999974E-6 : f32
    %878 = vector.broadcast %cst_428 : f32 to vector<8x1xf32>
    %879 = arith.addf %875, %878 : vector<8x1xf32>
    %880 = math.rsqrt %879 : vector<8x1xf32>
    %881 = vector.broadcast %880 : vector<8x1xf32> to vector<8x32xf32>
    %882 = arith.mulf %877, %881 : vector<8x32xf32>
    %883 = vector.broadcast %862 : vector<1x32xf32> to vector<8x32xf32>
    %884 = arith.mulf %882, %883 : vector<8x32xf32>
    %885 = vector.broadcast %864 : vector<1x32xf32> to vector<8x32xf32>
    %886 = arith.addf %884, %885 : vector<8x32xf32>
    %c6_429 = arith.constant 6 : index
    %c0_430 = arith.constant 0 : index
    %c0_431 = arith.constant 0 : index
    %887 = vector.load %arg20[%c6_429, %c0_430, %c0_431] : memref<8x32x64xf32, #tpu.memory_space<vmem>>, vector<1x32x64xf32>
    %888 = vector.shape_cast %887 : vector<1x32x64xf32> to vector<32x64xf32>
    %cst_432 = arith.constant dense<0.000000e+00> : vector<8x64xf32>
    %889 = tpu.matmul %886, %888, %cst_432 {dimension_numbers = #tpu.dot_dimension_numbers<[1], [0], [0], [1], [0, 0, 1, 1], [], []>} : vector<8x32xf32>, vector<32x64xf32>, vector<8x64xf32> -> vector<8x64xf32>
    %c6_433 = arith.constant 6 : index
    %c0_434 = arith.constant 0 : index
    %c0_435 = arith.constant 0 : index
    %890 = vector.load %arg21[%c6_433, %c0_434, %c0_435] : memref<8x1x64xf32, #tpu.memory_space<vmem>>, vector<1x1x64xf32>
    %891 = vector.shape_cast %890 : vector<1x1x64xf32> to vector<1x64xf32>
    %892 = vector.broadcast %891 : vector<1x64xf32> to vector<8x64xf32>
    %893 = arith.addf %889, %892 : vector<8x64xf32>
    %cst_436 = arith.constant 0.000000e+00 : f32
    %894 = vector.broadcast %cst_436 : f32 to vector<8x64xf32>
    %895 = arith.maximumf %893, %894 : vector<8x64xf32>
    %c6_437 = arith.constant 6 : index
    %c0_438 = arith.constant 0 : index
    %c0_439 = arith.constant 0 : index
    %896 = vector.load %arg22[%c6_437, %c0_438, %c0_439] : memref<8x64x32xf32, #tpu.memory_space<vmem>>, vector<1x64x32xf32>
    %897 = vector.shape_cast %896 : vector<1x64x32xf32> to vector<64x32xf32>
    %cst_440 = arith.constant dense<0.000000e+00> : vector<8x32xf32>
    %898 = tpu.matmul %895, %897, %cst_440 {dimension_numbers = #tpu.dot_dimension_numbers<[1], [0], [0], [1], [0, 0, 1, 1], [], []>} : vector<8x64xf32>, vector<64x32xf32>, vector<8x32xf32> -> vector<8x32xf32>
    %c6_441 = arith.constant 6 : index
    %c0_442 = arith.constant 0 : index
    %c0_443 = arith.constant 0 : index
    %899 = vector.load %arg23[%c6_441, %c0_442, %c0_443] : memref<8x1x32xf32, #tpu.memory_space<vmem>>, vector<1x1x32xf32>
    %900 = vector.shape_cast %899 : vector<1x1x32xf32> to vector<1x32xf32>
    %901 = vector.broadcast %900 : vector<1x32xf32> to vector<8x32xf32>
    %902 = arith.addf %898, %901 : vector<8x32xf32>
    %903 = vector.broadcast %1 : vector<8x1xf32> to vector<8x32xf32>
    %904 = arith.mulf %902, %903 : vector<8x32xf32>
    %905 = arith.addf %852, %904 : vector<8x32xf32>
    %c7 = arith.constant 7 : index
    %c0_444 = arith.constant 0 : index
    %c0_445 = arith.constant 0 : index
    %906 = vector.load %arg13[%c7, %c0_444, %c0_445] : memref<8x1x32xf32, #tpu.memory_space<vmem>>, vector<1x1x32xf32>
    %907 = vector.shape_cast %906 : vector<1x1x32xf32> to vector<1x32xf32>
    %c7_446 = arith.constant 7 : index
    %c0_447 = arith.constant 0 : index
    %c0_448 = arith.constant 0 : index
    %908 = vector.load %arg14[%c7_446, %c0_447, %c0_448] : memref<8x1x32xf32, #tpu.memory_space<vmem>>, vector<1x1x32xf32>
    %909 = vector.shape_cast %908 : vector<1x1x32xf32> to vector<1x32xf32>
    %cst_449 = arith.constant dense<0.000000e+00> : vector<8xf32>
    %910 = vector.multi_reduction <add>, %905, %cst_449 [1] : vector<8x32xf32> to vector<8xf32>
    %911 = vector.shape_cast %910 : vector<8xf32> to vector<8x1xf32>
    %cst_450 = arith.constant 3.200000e+01 : f32
    %912 = vector.broadcast %cst_450 : f32 to vector<8x1xf32>
    %913 = arith.divf %911, %912 : vector<8x1xf32>
    %914 = vector.broadcast %913 : vector<8x1xf32> to vector<8x32xf32>
    %915 = arith.subf %905, %914 : vector<8x32xf32>
    %916 = arith.mulf %915, %915 : vector<8x32xf32>
    %cst_451 = arith.constant dense<0.000000e+00> : vector<8xf32>
    %917 = vector.multi_reduction <add>, %916, %cst_451 [1] : vector<8x32xf32> to vector<8xf32>
    %918 = vector.shape_cast %917 : vector<8xf32> to vector<8x1xf32>
    %cst_452 = arith.constant 3.200000e+01 : f32
    %919 = vector.broadcast %cst_452 : f32 to vector<8x1xf32>
    %920 = arith.divf %918, %919 : vector<8x1xf32>
    %921 = vector.broadcast %913 : vector<8x1xf32> to vector<8x32xf32>
    %922 = arith.subf %905, %921 : vector<8x32xf32>
    %cst_453 = arith.constant 9.99999974E-6 : f32
    %923 = vector.broadcast %cst_453 : f32 to vector<8x1xf32>
    %924 = arith.addf %920, %923 : vector<8x1xf32>
    %925 = math.rsqrt %924 : vector<8x1xf32>
    %926 = vector.broadcast %925 : vector<8x1xf32> to vector<8x32xf32>
    %927 = arith.mulf %922, %926 : vector<8x32xf32>
    %928 = vector.broadcast %907 : vector<1x32xf32> to vector<8x32xf32>
    %929 = arith.mulf %927, %928 : vector<8x32xf32>
    %930 = vector.broadcast %909 : vector<1x32xf32> to vector<8x32xf32>
    %931 = arith.addf %929, %930 : vector<8x32xf32>
    %c7_454 = arith.constant 7 : index
    %c0_455 = arith.constant 0 : index
    %c0_456 = arith.constant 0 : index
    %932 = vector.load %arg15[%c7_454, %c0_455, %c0_456] : memref<8x32x128xf32, #tpu.memory_space<vmem>>, vector<1x32x128xf32>
    %933 = vector.shape_cast %932 : vector<1x32x128xf32> to vector<32x128xf32>
    %cst_457 = arith.constant dense<0.000000e+00> : vector<8x128xf32>
    %934 = tpu.matmul %931, %933, %cst_457 {dimension_numbers = #tpu.dot_dimension_numbers<[1], [0], [0], [1], [0, 0, 1, 1], [], []>} : vector<8x32xf32>, vector<32x128xf32>, vector<8x128xf32> -> vector<8x128xf32>
    %cst_458 = arith.constant dense<0.000000e+00> : vector<32x128xf32>
    %935 = tpu.matmul %6, %934, %cst_458 {dimension_numbers = #tpu.dot_dimension_numbers<[1], [0], [0], [1], [0, 0, 1, 1], [], []>} : vector<32x8xf32>, vector<8x128xf32>, vector<32x128xf32> -> vector<32x128xf32>
    %936 = arith.mulf %935, %9 : vector<32x128xf32>
    %937 = vector.extract_strided_slice %936 {offsets = [0, 0], sizes = [32, 32], strides = [1, 1]} : vector<32x128xf32> to vector<32x32xf32>
    %938 = vector.extract_strided_slice %936 {offsets = [0, 32], sizes = [32, 32], strides = [1, 1]} : vector<32x128xf32> to vector<32x32xf32>
    %939 = vector.extract_strided_slice %936 {offsets = [0, 64], sizes = [32, 32], strides = [1, 1]} : vector<32x128xf32> to vector<32x32xf32>
    %940 = vector.broadcast %10 : vector<1x4xf32> to vector<32x4xf32>
    %941 = arith.mulf %860, %940 : vector<32x4xf32>
    %942 = arith.mulf %860, %941 : vector<32x4xf32>
    %cst_459 = arith.constant dense<0.000000e+00> : vector<32xf32>
    %943 = vector.multi_reduction <add>, %942, %cst_459 [1] : vector<32x4xf32> to vector<32xf32>
    %944 = vector.shape_cast %943 : vector<32xf32> to vector<32x1xf32>
    %cst_460 = arith.constant dense<0.000000e+00> : vector<1x32xf32>
    %945 = tpu.matmul %11, %942, %cst_460 {dimension_numbers = #tpu.dot_dimension_numbers<[1], [1], [0], [0], [0, 0, 1, 0], [], []>} : vector<1x4xf32>, vector<32x4xf32>, vector<1x32xf32> -> vector<1x32xf32>
    %cst_461 = arith.constant dense<0.000000e+00> : vector<32x32xf32>
    %946 = tpu.matmul %860, %941, %cst_461 {dimension_numbers = #tpu.dot_dimension_numbers<[1], [1], [0], [0], [0, 0, 1, 0], [], []>} : vector<32x4xf32>, vector<32x4xf32>, vector<32x32xf32> -> vector<32x32xf32>
    %947 = vector.broadcast %944 : vector<32x1xf32> to vector<32x32xf32>
    %948 = vector.broadcast %945 : vector<1x32xf32> to vector<32x32xf32>
    %949 = arith.addf %947, %948 : vector<32x32xf32>
    %cst_462 = arith.constant 2.000000e+00 : f32
    %950 = vector.broadcast %cst_462 : f32 to vector<32x32xf32>
    %951 = arith.mulf %950, %946 : vector<32x32xf32>
    %952 = arith.subf %949, %951 : vector<32x32xf32>
    %cst_463 = arith.constant dense<0.000000e+00> : vector<32x32xf32>
    %953 = tpu.matmul %937, %938, %cst_463 {dimension_numbers = #tpu.dot_dimension_numbers<[1], [1], [0], [0], [0, 0, 1, 0], [], []>} : vector<32x32xf32>, vector<32x32xf32>, vector<32x32xf32> -> vector<32x32xf32>
    %c7_464 = arith.constant 7 : index
    %c0_465 = arith.constant 0 : index
    %c0_466 = arith.constant 0 : index
    %954 = vector.load %arg16[%c7_464, %c0_465, %c0_466] : memref<8x32x1xf32, #tpu.memory_space<vmem>>, vector<1x32x1xf32>
    %955 = vector.shape_cast %954 : vector<1x32x1xf32> to vector<32x1xf32>
    %956 = vector.broadcast %955 : vector<32x1xf32> to vector<32x32xf32>
    %957 = arith.mulf %956, %952 : vector<32x32xf32>
    %958 = arith.addf %953, %957 : vector<32x32xf32>
    %959 = arith.addf %958, %5 : vector<32x32xf32>
    %cst_467 = arith.constant dense<0xFF800000> : vector<32xf32>
    %960 = vector.multi_reduction <maximumf>, %959, %cst_467 [1] : vector<32x32xf32> to vector<32xf32>
    %961 = vector.shape_cast %960 : vector<32xf32> to vector<32x1xf32>
    %962 = vector.broadcast %961 : vector<32x1xf32> to vector<32x32xf32>
    %963 = arith.subf %959, %962 : vector<32x32xf32>
    %964 = math.exp %963 : vector<32x32xf32>
    %cst_468 = arith.constant dense<0.000000e+00> : vector<32xf32>
    %965 = vector.multi_reduction <add>, %964, %cst_468 [1] : vector<32x32xf32> to vector<32xf32>
    %966 = vector.shape_cast %965 : vector<32xf32> to vector<32x1xf32>
    %967 = tpu.reciprocal %966 {approx = true} : vector<32x1xf32> -> vector<32x1xf32>
    %968 = vector.broadcast %967 : vector<32x1xf32> to vector<32x32xf32>
    %969 = arith.mulf %964, %968 : vector<32x32xf32>
    %cst_469 = arith.constant dense<0.000000e+00> : vector<32x32xf32>
    %970 = tpu.matmul %969, %939, %cst_469 {dimension_numbers = #tpu.dot_dimension_numbers<[1], [0], [0], [1], [0, 0, 1, 1], [], []>} : vector<32x32xf32>, vector<32x32xf32>, vector<32x32xf32> -> vector<32x32xf32>
    %cst_470 = arith.constant dense<0.000000e+00> : vector<8x32xf32>
    %971 = tpu.matmul %7, %970, %cst_470 {dimension_numbers = #tpu.dot_dimension_numbers<[1], [0], [0], [1], [0, 0, 1, 1], [], []>} : vector<8x32xf32>, vector<32x32xf32>, vector<8x32xf32> -> vector<8x32xf32>
    %c7_471 = arith.constant 7 : index
    %c0_472 = arith.constant 0 : index
    %c0_473 = arith.constant 0 : index
    %972 = vector.load %arg17[%c7_471, %c0_472, %c0_473] : memref<8x32x32xf32, #tpu.memory_space<vmem>>, vector<1x32x32xf32>
    %973 = vector.shape_cast %972 : vector<1x32x32xf32> to vector<32x32xf32>
    %cst_474 = arith.constant dense<0.000000e+00> : vector<8x32xf32>
    %974 = tpu.matmul %971, %973, %cst_474 {dimension_numbers = #tpu.dot_dimension_numbers<[1], [0], [0], [1], [0, 0, 1, 1], [], []>} : vector<8x32xf32>, vector<32x32xf32>, vector<8x32xf32> -> vector<8x32xf32>
    %975 = vector.broadcast %1 : vector<8x1xf32> to vector<8x32xf32>
    %976 = arith.mulf %974, %975 : vector<8x32xf32>
    %977 = arith.addf %905, %976 : vector<8x32xf32>
    %c7_475 = arith.constant 7 : index
    %c0_476 = arith.constant 0 : index
    %c0_477 = arith.constant 0 : index
    %978 = vector.load %arg18[%c7_475, %c0_476, %c0_477] : memref<8x1x32xf32, #tpu.memory_space<vmem>>, vector<1x1x32xf32>
    %979 = vector.shape_cast %978 : vector<1x1x32xf32> to vector<1x32xf32>
    %c7_478 = arith.constant 7 : index
    %c0_479 = arith.constant 0 : index
    %c0_480 = arith.constant 0 : index
    %980 = vector.load %arg19[%c7_478, %c0_479, %c0_480] : memref<8x1x32xf32, #tpu.memory_space<vmem>>, vector<1x1x32xf32>
    %981 = vector.shape_cast %980 : vector<1x1x32xf32> to vector<1x32xf32>
    %cst_481 = arith.constant dense<0.000000e+00> : vector<8xf32>
    %982 = vector.multi_reduction <add>, %977, %cst_481 [1] : vector<8x32xf32> to vector<8xf32>
    %983 = vector.shape_cast %982 : vector<8xf32> to vector<8x1xf32>
    %cst_482 = arith.constant 3.200000e+01 : f32
    %984 = vector.broadcast %cst_482 : f32 to vector<8x1xf32>
    %985 = arith.divf %983, %984 : vector<8x1xf32>
    %986 = vector.broadcast %985 : vector<8x1xf32> to vector<8x32xf32>
    %987 = arith.subf %977, %986 : vector<8x32xf32>
    %988 = arith.mulf %987, %987 : vector<8x32xf32>
    %cst_483 = arith.constant dense<0.000000e+00> : vector<8xf32>
    %989 = vector.multi_reduction <add>, %988, %cst_483 [1] : vector<8x32xf32> to vector<8xf32>
    %990 = vector.shape_cast %989 : vector<8xf32> to vector<8x1xf32>
    %cst_484 = arith.constant 3.200000e+01 : f32
    %991 = vector.broadcast %cst_484 : f32 to vector<8x1xf32>
    %992 = arith.divf %990, %991 : vector<8x1xf32>
    %993 = vector.broadcast %985 : vector<8x1xf32> to vector<8x32xf32>
    %994 = arith.subf %977, %993 : vector<8x32xf32>
    %cst_485 = arith.constant 9.99999974E-6 : f32
    %995 = vector.broadcast %cst_485 : f32 to vector<8x1xf32>
    %996 = arith.addf %992, %995 : vector<8x1xf32>
    %997 = math.rsqrt %996 : vector<8x1xf32>
    %998 = vector.broadcast %997 : vector<8x1xf32> to vector<8x32xf32>
    %999 = arith.mulf %994, %998 : vector<8x32xf32>
    %1000 = vector.broadcast %979 : vector<1x32xf32> to vector<8x32xf32>
    %1001 = arith.mulf %999, %1000 : vector<8x32xf32>
    %1002 = vector.broadcast %981 : vector<1x32xf32> to vector<8x32xf32>
    %1003 = arith.addf %1001, %1002 : vector<8x32xf32>
    %c7_486 = arith.constant 7 : index
    %c0_487 = arith.constant 0 : index
    %c0_488 = arith.constant 0 : index
    %1004 = vector.load %arg20[%c7_486, %c0_487, %c0_488] : memref<8x32x64xf32, #tpu.memory_space<vmem>>, vector<1x32x64xf32>
    %1005 = vector.shape_cast %1004 : vector<1x32x64xf32> to vector<32x64xf32>
    %cst_489 = arith.constant dense<0.000000e+00> : vector<8x64xf32>
    %1006 = tpu.matmul %1003, %1005, %cst_489 {dimension_numbers = #tpu.dot_dimension_numbers<[1], [0], [0], [1], [0, 0, 1, 1], [], []>} : vector<8x32xf32>, vector<32x64xf32>, vector<8x64xf32> -> vector<8x64xf32>
    %c7_490 = arith.constant 7 : index
    %c0_491 = arith.constant 0 : index
    %c0_492 = arith.constant 0 : index
    %1007 = vector.load %arg21[%c7_490, %c0_491, %c0_492] : memref<8x1x64xf32, #tpu.memory_space<vmem>>, vector<1x1x64xf32>
    %1008 = vector.shape_cast %1007 : vector<1x1x64xf32> to vector<1x64xf32>
    %1009 = vector.broadcast %1008 : vector<1x64xf32> to vector<8x64xf32>
    %1010 = arith.addf %1006, %1009 : vector<8x64xf32>
    %cst_493 = arith.constant 0.000000e+00 : f32
    %1011 = vector.broadcast %cst_493 : f32 to vector<8x64xf32>
    %1012 = arith.maximumf %1010, %1011 : vector<8x64xf32>
    %c7_494 = arith.constant 7 : index
    %c0_495 = arith.constant 0 : index
    %c0_496 = arith.constant 0 : index
    %1013 = vector.load %arg22[%c7_494, %c0_495, %c0_496] : memref<8x64x32xf32, #tpu.memory_space<vmem>>, vector<1x64x32xf32>
    %1014 = vector.shape_cast %1013 : vector<1x64x32xf32> to vector<64x32xf32>
    %cst_497 = arith.constant dense<0.000000e+00> : vector<8x32xf32>
    %1015 = tpu.matmul %1012, %1014, %cst_497 {dimension_numbers = #tpu.dot_dimension_numbers<[1], [0], [0], [1], [0, 0, 1, 1], [], []>} : vector<8x64xf32>, vector<64x32xf32>, vector<8x32xf32> -> vector<8x32xf32>
    %c7_498 = arith.constant 7 : index
    %c0_499 = arith.constant 0 : index
    %c0_500 = arith.constant 0 : index
    %1016 = vector.load %arg23[%c7_498, %c0_499, %c0_500] : memref<8x1x32xf32, #tpu.memory_space<vmem>>, vector<1x1x32xf32>
    %1017 = vector.shape_cast %1016 : vector<1x1x32xf32> to vector<1x32xf32>
    %1018 = vector.broadcast %1017 : vector<1x32xf32> to vector<8x32xf32>
    %1019 = arith.addf %1015, %1018 : vector<8x32xf32>
    %1020 = vector.broadcast %1 : vector<8x1xf32> to vector<8x32xf32>
    %1021 = arith.mulf %1019, %1020 : vector<8x32xf32>
    %1022 = arith.addf %977, %1021 : vector<8x32xf32>
    %cst_501 = arith.constant dense<0.000000e+00> : vector<32xf32>
    %1023 = vector.multi_reduction <add>, %1022, %cst_501 [0] : vector<8x32xf32> to vector<32xf32>
    %1024 = vector.shape_cast %1023 : vector<32xf32> to vector<1x32xf32>
    %c0_502 = arith.constant 0 : index
    %c0_503 = arith.constant 0 : index
    %1025 = vector.load %arg24[%c0_502, %c0_503] : memref<32x64xf32, #tpu.memory_space<vmem>>, vector<32x64xf32>
    %cst_504 = arith.constant dense<0.000000e+00> : vector<1x64xf32>
    %1026 = tpu.matmul %1024, %1025, %cst_504 {dimension_numbers = #tpu.dot_dimension_numbers<[1], [0], [0], [1], [0, 0, 1, 1], [], []>} : vector<1x32xf32>, vector<32x64xf32>, vector<1x64xf32> -> vector<1x64xf32>
    %c0_505 = arith.constant 0 : index
    %c0_506 = arith.constant 0 : index
    %1027 = vector.load %arg25[%c0_505, %c0_506] : memref<1x64xf32, #tpu.memory_space<vmem>>, vector<1x64xf32>
    %1028 = arith.addf %1026, %1027 : vector<1x64xf32>
    %cst_507 = arith.constant 0.000000e+00 : f32
    %1029 = vector.broadcast %cst_507 : f32 to vector<1x64xf32>
    %1030 = arith.maximumf %1028, %1029 : vector<1x64xf32>
    %c0_508 = arith.constant 0 : index
    %c0_509 = arith.constant 0 : index
    %1031 = vector.load %arg26[%c0_508, %c0_509] : memref<64x128xf32, #tpu.memory_space<vmem>>, vector<64x128xf32>
    %cst_510 = arith.constant dense<0.000000e+00> : vector<1x128xf32>
    %1032 = tpu.matmul %1030, %1031, %cst_510 {dimension_numbers = #tpu.dot_dimension_numbers<[1], [0], [0], [1], [0, 0, 1, 1], [], []>} : vector<1x64xf32>, vector<64x128xf32>, vector<1x128xf32> -> vector<1x128xf32>
    %c0_511 = arith.constant 0 : index
    %c0_512 = arith.constant 0 : index
    %1033 = vector.load %arg27[%c0_511, %c0_512] : memref<1x128xf32, #tpu.memory_space<vmem>>, vector<1x128xf32>
    %1034 = arith.addf %1032, %1033 : vector<1x128xf32>
    %c0_513 = arith.constant 0 : index
    %c0_514 = arith.constant 0 : index
    %c0_515 = arith.constant 0 : index
    %1035 = vector.load %arg28[%c0_513, %c0_514, %c0_515] : memref<1x1x128xf32, #tpu.memory_space<vmem>>, vector<1x1x128xf32>
    %1036 = vector.shape_cast %1035 : vector<1x1x128xf32> to vector<1x128xf32>
    %1037 = vector.shape_cast %1034 : vector<1x128xf32> to vector<1x1x128xf32>
    tpu.vector_store %arg28[%c0_513, %c0_514, %c0_515], %1037 {strides = array<i32>} : memref<1x1x128xf32, #tpu.memory_space<vmem>>, vector<1x1x128xf32>,
    return
  }
  func.func @transform_0(%arg0: i32) -> (i32, i32, i32) {
    %c0_i32 = arith.constant 0 : i32
    %c0_i32_0 = arith.constant 0 : i32
    %c0_i32_1 = arith.constant 0 : i32
    return %arg0, %c0_i32, %c0_i32_0 : i32, i32, i32
  }
  func.func @transform_1(%arg0: i32) -> (i32, i32, i32) {
    %c0_i32 = arith.constant 0 : i32
    %c0_i32_0 = arith.constant 0 : i32
    %c0_i32_1 = arith.constant 0 : i32
    return %arg0, %c0_i32, %c0_i32_0 : i32, i32, i32
  }
  func.func @transform_2(%arg0: i32) -> (i32, i32, i32) {
    %c0_i32 = arith.constant 0 : i32
    %c0_i32_0 = arith.constant 0 : i32
    %c0_i32_1 = arith.constant 0 : i32
    return %arg0, %c0_i32, %c0_i32_0 : i32, i32, i32
  }
  func.func @transform_3(%arg0: i32) -> (i32, i32, i32) {
    %c0_i32 = arith.constant 0 : i32
    %c0_i32_0 = arith.constant 0 : i32
    %c0_i32_1 = arith.constant 0 : i32
    return %arg0, %c0_i32, %c0_i32_0 : i32, i32, i32
  }
  func.func @transform_4(%arg0: i32) -> (i32, i32, i32) {
    %c0_i32 = arith.constant 0 : i32
    %c0_i32_0 = arith.constant 0 : i32
    %c0_i32_1 = arith.constant 0 : i32
    return %arg0, %c0_i32, %c0_i32_0 : i32, i32, i32
  }
  func.func @transform_5(%arg0: i32) -> (i32, i32) {
    %c0_i32 = arith.constant 0 : i32
    %c0_i32_0 = arith.constant 0 : i32
    %c0_i32_1 = arith.constant 0 : i32
    return %c0_i32, %c0_i32_0 : i32, i32
  }
  func.func @transform_6(%arg0: i32) -> (i32, i32) {
    %c0_i32 = arith.constant 0 : i32
    %c0_i32_0 = arith.constant 0 : i32
    %c0_i32_1 = arith.constant 0 : i32
    return %c0_i32, %c0_i32_0 : i32, i32
  }
  func.func @transform_7(%arg0: i32) -> (i32, i32) {
    %c0_i32 = arith.constant 0 : i32
    %c0_i32_0 = arith.constant 0 : i32
    %c0_i32_1 = arith.constant 0 : i32
    return %c0_i32, %c0_i32_0 : i32, i32
  }
  func.func @transform_8(%arg0: i32) -> (i32, i32) {
    %c0_i32 = arith.constant 0 : i32
    %c0_i32_0 = arith.constant 0 : i32
    %c0_i32_1 = arith.constant 0 : i32
    return %c0_i32, %c0_i32_0 : i32, i32
  }
  func.func @transform_9(%arg0: i32) -> (i32, i32) {
    %c0_i32 = arith.constant 0 : i32
    %c0_i32_0 = arith.constant 0 : i32
    %c0_i32_1 = arith.constant 0 : i32
    return %c0_i32, %c0_i32_0 : i32, i32
  }
  func.func @transform_10(%arg0: i32) -> (i32, i32) {
    %c0_i32 = arith.constant 0 : i32
    %c0_i32_0 = arith.constant 0 : i32
    %c0_i32_1 = arith.constant 0 : i32
    return %c0_i32, %c0_i32_0 : i32, i32
  }
  func.func @transform_11(%arg0: i32) -> (i32, i32) {
    %c0_i32 = arith.constant 0 : i32
    %c0_i32_0 = arith.constant 0 : i32
    %c0_i32_1 = arith.constant 0 : i32
    return %c0_i32, %c0_i32_0 : i32, i32
  }
  func.func @transform_12(%arg0: i32) -> (i32, i32, i32) {
    %c0_i32 = arith.constant 0 : i32
    %c0_i32_0 = arith.constant 0 : i32
    %c0_i32_1 = arith.constant 0 : i32
    %c0_i32_2 = arith.constant 0 : i32
    return %c0_i32, %c0_i32_0, %c0_i32_1 : i32, i32, i32
  }
  func.func @transform_13(%arg0: i32) -> (i32, i32, i32) {
    %c0_i32 = arith.constant 0 : i32
    %c0_i32_0 = arith.constant 0 : i32
    %c0_i32_1 = arith.constant 0 : i32
    %c0_i32_2 = arith.constant 0 : i32
    return %c0_i32, %c0_i32_0, %c0_i32_1 : i32, i32, i32
  }
  func.func @transform_14(%arg0: i32) -> (i32, i32, i32) {
    %c0_i32 = arith.constant 0 : i32
    %c0_i32_0 = arith.constant 0 : i32
    %c0_i32_1 = arith.constant 0 : i32
    %c0_i32_2 = arith.constant 0 : i32
    return %c0_i32, %c0_i32_0, %c0_i32_1 : i32, i32, i32
  }
  func.func @transform_15(%arg0: i32) -> (i32, i32, i32) {
    %c0_i32 = arith.constant 0 : i32
    %c0_i32_0 = arith.constant 0 : i32
    %c0_i32_1 = arith.constant 0 : i32
    %c0_i32_2 = arith.constant 0 : i32
    return %c0_i32, %c0_i32_0, %c0_i32_1 : i32, i32, i32
  }
  func.func @transform_16(%arg0: i32) -> (i32, i32, i32) {
    %c0_i32 = arith.constant 0 : i32
    %c0_i32_0 = arith.constant 0 : i32
    %c0_i32_1 = arith.constant 0 : i32
    %c0_i32_2 = arith.constant 0 : i32
    return %c0_i32, %c0_i32_0, %c0_i32_1 : i32, i32, i32
  }
  func.func @transform_17(%arg0: i32) -> (i32, i32, i32) {
    %c0_i32 = arith.constant 0 : i32
    %c0_i32_0 = arith.constant 0 : i32
    %c0_i32_1 = arith.constant 0 : i32
    %c0_i32_2 = arith.constant 0 : i32
    return %c0_i32, %c0_i32_0, %c0_i32_1 : i32, i32, i32
  }
  func.func @transform_18(%arg0: i32) -> (i32, i32, i32) {
    %c0_i32 = arith.constant 0 : i32
    %c0_i32_0 = arith.constant 0 : i32
    %c0_i32_1 = arith.constant 0 : i32
    %c0_i32_2 = arith.constant 0 : i32
    return %c0_i32, %c0_i32_0, %c0_i32_1 : i32, i32, i32
  }
  func.func @transform_19(%arg0: i32) -> (i32, i32, i32) {
    %c0_i32 = arith.constant 0 : i32
    %c0_i32_0 = arith.constant 0 : i32
    %c0_i32_1 = arith.constant 0 : i32
    %c0_i32_2 = arith.constant 0 : i32
    return %c0_i32, %c0_i32_0, %c0_i32_1 : i32, i32, i32
  }
  func.func @transform_20(%arg0: i32) -> (i32, i32, i32) {
    %c0_i32 = arith.constant 0 : i32
    %c0_i32_0 = arith.constant 0 : i32
    %c0_i32_1 = arith.constant 0 : i32
    %c0_i32_2 = arith.constant 0 : i32
    return %c0_i32, %c0_i32_0, %c0_i32_1 : i32, i32, i32
  }
  func.func @transform_21(%arg0: i32) -> (i32, i32, i32) {
    %c0_i32 = arith.constant 0 : i32
    %c0_i32_0 = arith.constant 0 : i32
    %c0_i32_1 = arith.constant 0 : i32
    %c0_i32_2 = arith.constant 0 : i32
    return %c0_i32, %c0_i32_0, %c0_i32_1 : i32, i32, i32
  }
  func.func @transform_22(%arg0: i32) -> (i32, i32, i32) {
    %c0_i32 = arith.constant 0 : i32
    %c0_i32_0 = arith.constant 0 : i32
    %c0_i32_1 = arith.constant 0 : i32
    %c0_i32_2 = arith.constant 0 : i32
    return %c0_i32, %c0_i32_0, %c0_i32_1 : i32, i32, i32
  }
  func.func @transform_23(%arg0: i32) -> (i32, i32) {
    %c0_i32 = arith.constant 0 : i32
    %c0_i32_0 = arith.constant 0 : i32
    %c0_i32_1 = arith.constant 0 : i32
    return %c0_i32, %c0_i32_0 : i32, i32
  }
  func.func @transform_24(%arg0: i32) -> (i32, i32) {
    %c0_i32 = arith.constant 0 : i32
    %c0_i32_0 = arith.constant 0 : i32
    %c0_i32_1 = arith.constant 0 : i32
    return %c0_i32, %c0_i32_0 : i32, i32
  }
  func.func @transform_25(%arg0: i32) -> (i32, i32) {
    %c0_i32 = arith.constant 0 : i32
    %c0_i32_0 = arith.constant 0 : i32
    %c0_i32_1 = arith.constant 0 : i32
    return %c0_i32, %c0_i32_0 : i32, i32
  }
  func.func @transform_26(%arg0: i32) -> (i32, i32) {
    %c0_i32 = arith.constant 0 : i32
    %c0_i32_0 = arith.constant 0 : i32
    %c0_i32_1 = arith.constant 0 : i32
    return %c0_i32, %c0_i32_0 : i32, i32
  }
  func.func @transform_27(%arg0: i32) -> (i32, i32, i32) {
    %c0_i32 = arith.constant 0 : i32
    %c0_i32_0 = arith.constant 0 : i32
    %c0_i32_1 = arith.constant 0 : i32
    return %arg0, %c0_i32, %c0_i32_0 : i32, i32, i32
  }
}

</mosaic_0001>

<bundles_post_ra>
// kernel: lorentz_classifier_forward.1
= control target key start
LH: loop header
LB: loop body
LE: loop exit
PB: predicated region body
PF: predicated region fallthrough
CT: control target
= control target key end

     0   :  { %s18311_s0 = inlined_call_operand.vmem [shape: f32[2,8,8], index: 0, kind: input, shape index: {}]   ;;  %s18312_s1 = inlined_call_operand.vmem [shape: f32[2,8,4], index: 1, kind: input, shape index: {}]   ;;  %s18313_s2 = inlined_call_operand.vmem [shape: f32[2,8,1], index: 2, kind: input, shape index: {}]   ;;  %s18314_s3 = inlined_call_operand.vmem [shape: f32[2,32,1], index: 3, kind: input, shape index: {}]   ;;  %s18315_s4 = inlined_call_operand.vmem [shape: f32[2,32,32], index: 4, kind: input, shape index: {}]   ;;  %s18316_s5 = inlined_call_operand.vmem [shape: f32[32,8], index: 5, kind: input, shape index: {}]   ;;  %s18317_s6 = inlined_call_operand.vmem [shape: f32[8,32], index: 6, kind: input, shape index: {}]   ;;  %s18318_s7 = inlined_call_operand.vmem [shape: f32[32,32], index: 7, kind: input, shape index: {}]   ;;  %s18319_s8 = inlined_call_operand.vmem [shape: f32[32,128], index: 8, kind: input, shape index: {}]   ;;  %s18320_s9 = inlined_call_operand.vmem [shape: f32[1,4], index: 9, kind: input, shape index: {}]   ;;  %s18321_s10 = inlined_call_operand.vmem [shape: f32[8,32], index: 10, kind: input, shape index: {}]   ;;  %s18322_s11 = inlined_call_operand.vmem [shape: f32[1,32], index: 11, kind: input, shape index: {}]   ;;  %s18323_s12 = inlined_call_operand.vmem [shape: f32[8,1,32], index: 12, kind: input, shape index: {}, may-alias: {12,17}]   ;;  %s18324_s13 = inlined_call_operand.vmem [shape: f32[8,1,32], index: 13, kind: input, shape index: {}, may-alias: {13,18}]   ;;  %s18325_s14 = inlined_call_operand.hbm [shape: f32[8,32,128], index: 14, kind: input, shape index: {}]   ;;  %s18326_s15 = inlined_call_operand.vmem [shape: f32[8,32,1], index: 15, kind: input, shape index: {}]   ;;  %s18327_s16 = inlined_call_operand.vmem [shape: f32[8,32,32], index: 16, kind: input, shape index: {}]   ;;  %s18328_s17 = inlined_call_operand.vmem [shape: f32[8,1,32], index: 17, kind: input, shape index: {}, may-alias: {12,17}]   ;;  %s18329_s18 = inlined_call_operand.vmem [shape: f32[8,1,32], index: 18, kind: input, shape index: {}, may-alias: {13,18}]   ;;  %s18330_s19 = inlined_call_operand.hbm [shape: f32[8,32,64], index: 19, kind: input, shape index: {}]   ;;  %s18331_s20 = inlined_call_operand.vmem [shape: f32[8,1,64], index: 20, kind: input, shape index: {}]   ;;  %s18332_s21 = inlined_call_operand.vmem [shape: f32[8,64,32], index: 21, kind: input, shape index: {}]   ;;  %s18333_s22 = inlined_call_operand.vmem [shape: f32[8,1,32], index: 22, kind: input, shape index: {}]   ;;  %s18334_s23 = inlined_call_operand.vmem [shape: f32[32,64], index: 23, kind: input, shape index: {}]   ;;  %s18335_s24 = inlined_call_operand.vmem [shape: f32[1,64], index: 24, kind: input, shape index: {}]   ;;  %s18336_s25 = inlined_call_operand.vmem [shape: f32[64,128], index: 25, kind: input, shape index: {}]   ;;  %s18337_s26 = inlined_call_operand.vmem [shape: f32[1,128], index: 26, kind: input, shape index: {}]   ;;  %s18338_s27 = inlined_call_operand.hbm [shape: f32[2,1,128], index: 27, kind: output, shape index: {}]  }
   0x1   :  { %18358 = sst [smem:[#allocation18_spill]] %s18311_s0 }
   0x2   :  { %18359 = sst [smem:[#allocation19_spill]] %s18312_s1 }
   0x3   :  { %18360 = sst [smem:[#allocation20_spill]] %s18313_s2 }
   0x4   :  { %18361 = sst [smem:[#allocation21_spill]] %s18314_s3 }
   0x5   :  { %18362 = sst [smem:[#allocation22_spill]] %s18315_s4 }
   0x6   :  { %18363 = sst [smem:[#allocation23_spill]] %s18316_s5 }
   0x7   :  { %18364 = sst [smem:[#allocation24_spill]] %s18317_s6 }
   0x8   :  { %18365 = sst [smem:[#allocation25_spill]] %s18318_s7 }
   0x9   :  { %18366 = sst [smem:[#allocation26_spill]] %s18319_s8 }
   0xa   :  { %18367 = sst [smem:[#allocation27_spill]] %s18320_s9 }
   0xb   :  { %18368 = sst [smem:[#allocation28_spill]] %s18321_s10 }
   0xc   :  { %18369 = sst [smem:[#allocation29_spill]] %s18322_s11 }
   0xd   :  { %18370 = sst [smem:[#allocation30_spill]] %s18325_s14 }
   0xe   :  { %18371 = sst [smem:[#allocation31_spill]] %s18330_s19 }
   0xf   :  { %18372 = sst [smem:[#allocation32_spill]] %s18335_s24 }
  0x10   :  { %18373 = sst [smem:[#allocation33_spill]] %s18337_s26 }
  0x11   :  { %18374 = sst [smem:[#allocation34_spill]] %s18338_s27 }
  0x12   :  { %32 = vsyncpa [#allocation3], 0 }
  0x13   :  { %33 = vsyncpa [#allocation6], 0 }
  0x14   :  { %34 = vsyncpa [#allocation4], 0 }
  0x15   :  { %36 = vsyncpa [#allocation4 + $0x1], 0  ;;  %s15479_s7 = smov 0   ;;  %s15481_s4 = smov 0  }
  0x16   :  { %s15483_s8 = smov 0   ;;  %s15485_s30 = smov 0  }
  0x17 LB: > { %18375 = sst [smem:[#allocation11_spill]] %s15312_s7  ;;  %s15500_s9 = sadd.s32 4294967295, %s15324_s30   ;;  %s15324_s30 = sphi %s15485_s30, %s18420_s30   ;;  %s15320_s8 = sphi %s15483_s8, %s18422_s8   ;;  %s15316_s4 = sphi %s15481_s4, %s18424_s4   ;;  %s15312_s7 = sphi %s15479_s7, %s18423_s7  }
  0x18   : > { %18376 = sst [smem:[#allocation12_spill]] %s15320_s8  ;;  %s11557_s5 = sadd.s32 4294967294, %s15324_s30  }
  0x19   : > { %18377 = sst [smem:[#allocation13_spill]] %s15324_s30  ;;  %s15504_s28 = sadd.s32 1, %s15324_s30  }
  0x1a   : > { %18378 = sst [smem:[#allocation14_spill]] %s15504_s28  ;;  %s641_s0 = sadd.s32 1, %s15320_s8 }
  0x1b   : > { %s638_s10 = ssub.s32 %s15324_s30, %s15504_s28  ;;  %p651_p0 = scmp.ne.s32.totalorder %s15320_s8, %s15316_s4 }
  0x1c   : > { %p639_p1 = scmp.eq.s32.totalorder %s638_s10, 0  ;;  %p652_p2 = scmp.eq.s32.totalorder %s15500_s9, 1 }
  0x1d   : > { %p657_p3 = scmp.ne.s32.totalorder %s15316_s4, %s15312_s7  ;;  %p658_p4 = scmp.eq.s32.totalorder %s11557_s5, 1 }
  0x1e   : > { %s15515_s29 = scalar_select %p639_p1, %s15320_s8, %s641_s0  }
  0x1f   : > { %p15517_p5 = por %p652_p2, %p651_p0  ;;  %p15521_p6 = por %p658_p4, %p657_p3 }
  0x20   : > { %18379 = sst [smem:[#allocation15_spill]] %s15515_s29  ;;  %p11558_p7 = scmp.ge.s32.totalorder %s15324_s30, 1 }
  0x21   : > { %s18380_s1 = scalar_select %p15517_p5, 1, 0 }
  0x22   : > { %s18382_s6 = scalar_select %p15521_p6, 1, 0 }
  0x23   : > { %18381 = sst [smem:[#allocation16_spill]] %s18380_s1  ;;  %p665_p8 = scmp.lt.s32.totalorder %s15324_s30, 3 }
  0x24   : > { %18383 = sst [smem:[#allocation17_spill]] %s18382_s6  ;;  %p18350_p9 = scmp.eq.s32.totalorder %s15500_s9, 0 }
  0x25   : > { %p15528_p10 = pnand %p11558_p7, %p665_p8  ;;  %s15326_s2 = smov [#allocation2]  }
  0x26   : > { %s704_s3 = sshll.u32 %s15326_s2, 4  ;;  %s15327_s0 = smov [#allocation5]   ;;  %s705_s3 = int_to_ptr.vmem [resolvable:$true] %s704_s3 }
  0x27   : > { %s18384_s11 = scalar_select %p15528_p10, 1, 0 }
  0x28   : > { %p14732_p11 = pneg %p15528_p10  ;;  %s729_s10 = sshll.u32 %s15327_s0, 4  ;;  %s15540_s10 = int_to_ptr.vmem [resolvable:$true] %s729_s10 }
  0x29   : > { %s18386_s14 = sld [smem:[#allocation30_spill]] }
  0x2a   : > { %p15536_p12 = pnand %p18350_p9, %p14732_p11 }
  0x2c   : > { %p15200_p0 = pneg %p15536_p12 }
  0x2f   : > { %s15198_s28 = scalar_lea.hbm %s18386_s14, 4096 }
  0x30   : > { %p15199_p13 = scmp.ne.s32.totalorder %s18386_s14, %s15198_s28  ;;  %p15205_p3 = scmp.lt.u32.totalorder %s15198_s28, %s18386_s14 }
  0x32   : > { %p15201_p1 = pnand %p15200_p0, %p15199_p13 }
  0x34   : > { %p15202_p2 = pneg %p15201_p1 }
  0x36   : > { %p15207_p4 = pnand %p15205_p3, %p15202_p2 }
  0x38   : > { %15210 = shalt.err (!%p15207_p4)
}
  0x39   : > { %s15211_s0 = scalar_lea.vmem %s705_s3, 4096  ;;  %p15219_p9 = scmp.lt.s32.totalorder %s705_s3, %s705_s3 }
  0x3a   : > { %p15212_p7 = scmp.ne.s32.totalorder %s705_s3, %s15211_s0  ;;  %p15220_p6 = scmp.lt.s32.totalorder %s15211_s0, %s15211_s0 }
  0x3c   : > { %p15214_p8 = pnand %p15212_p7, %p15200_p0  ;;  %p15221_p5 = por %p15220_p6, %p15219_p9 }
  0x3e   : > { %p15215_p11 = pneg %p15214_p8 }
  0x40   : > { %p15222_p10 = pnand %p15221_p5, %p15215_p11 }
  0x42   : > { %15225 = shalt.err (!%p15222_p10)
}
  0x43   : > { %s15328_s8 = smov 128   ;;  %s15329_s29 = smov 8  }
  0x44   : > { %14735 = dma.hbm_to_vmem [thread:$0]  (!%p15536_p12), %s18386_s14, 4096, %s705_s3, [#allocation3], %s15328_s8, %s15328_s8, %s15329_s29  }
  0x45   : > { %s18387_s19 = sld [smem:[#allocation31_spill]] }
  0x4b   : > { %s15226_s2 = scalar_lea.hbm %s18387_s19, 4096 }
  0x4c   : > { %p15227_p13 = scmp.ne.s32.totalorder %s18387_s19, %s15226_s2  ;;  %p15233_p9 = scmp.lt.u32.totalorder %s15226_s2, %s18387_s19 }
  0x4e   : > { %p15229_p5 = pnand %p15227_p13, %p15200_p0 }
  0x50   : > { %p15230_p6 = pneg %p15229_p5 }
  0x52   : > { %p15235_p10 = pnand %p15233_p9, %p15230_p6 }
  0x54   : > { %15238 = shalt.err (!%p15235_p10)
}
  0x55   : > { %s15239_s3 = scalar_lea.vmem %s15540_s10, 4096  ;;  %p15247_p4 = scmp.lt.s32.totalorder %s15540_s10, %s15540_s10 }
  0x56   : > { %p15240_p1 = scmp.ne.s32.totalorder %s15540_s10, %s15239_s3  ;;  %p15248_p7 = scmp.lt.s32.totalorder %s15239_s3, %s15239_s3 }
  0x58   : > { %p15242_p2 = pnand %p15240_p1, %p15200_p0  ;;  %p15249_p8 = por %p15248_p7, %p15247_p4 }
  0x5a   : > { %p15243_p3 = pneg %p15242_p2 }
  0x5c   : > { %p15250_p11 = pnand %p15249_p8, %p15243_p3 }
  0x5e   : > { %15253 = shalt.err (!%p15250_p11)
}
  0x5f   : > { %14738 = dma.hbm_to_vmem [thread:$0]  (!%p15536_p12), %s18387_s19, 4096, %s15540_s10, [#allocation6], %s15328_s8, %s15328_s8, %s15329_s29  }
  0x60   : > { %p18388_p13 = scmp.ne.s32.totalorder %s18384_s11, 0 }
  0x61   : > { %p18389_p5 = scmp.eq.s32.totalorder (!%p18388_p13), %s15500_s9, 0 }
  0x62   : > { %803 = sbr.rel (%p18388_p13) target bundleno = 23315 (0x5b13), region = 128 }
  0x69   : > { %15299 = dma.done.wait (%p18389_p5), [#allocation3], 4096   ;;  %p18390_p0 = pmov %p18389_p5 }
  0x6b   : > { %15301 = vsyncadd (%p18390_p0), [#allocation3], 4294963200  ;;  %p18391_p6 = pmov %p18390_p0 }
  0x6c   : > { %p18392_p9 = pmov %p18390_p0 }
  0x6d   : > { %15303 = dma.done.wait (%p18391_p6), [#allocation6], 4096  }
  0x6e   : > { %15305 = vsyncadd (%p18392_p9), [#allocation6], 4294963200  ;;  %p895_p10 = scmp.lt.s32.totalorder %s15500_s9, 1  ;;  %v15330_v0 = vmov 0.0   ;;  %vm15331_vm0 = vmmov 0   ;;  %v15332_v1 = vmov 0  }
  0x6f   : > { %12753 = vmatprep.subr.mxu0 %v15330_v0  ;;  %12755 = vmatprep.mubr.msk.f32.mxu0 %vm15331_vm0, %v15330_v0  ;;  %s18393_s8 = sld [smem:[#allocation18_spill]]  ;;  %vm949_vm1 = vcmask 64512   ;;  %s18394_s28 = sld [smem:[#allocation19_spill]]  ;;  %vm1129_vm2 = vcmask 261120   ;;  %vm1338_vm3 = vcmask 31744   ;;  %v1561_v35 = vld [vmem:[%s18326_s15] sm:$0xff] }
  0x70   : > { %s15604_s1 = scalar_select %p895_p10, %s15500_s9, 1  ;;  %14792 = vset.pattern.permute.xlu0 %v15332_v1  ;;  %14803 = vset.pattern.permute.xlu1 %v15332_v1  ;;  %v1563_v36 = vld [vmem:[%s18326_s15 + $0x10] sm:$0xff]  ;;  %v1564_v37 = vld [vmem:[%s18326_s15 + $0x18] sm:$0xff]  ;;  %v1158_v43 = vld [vmem:[#allocation2] sm:$0xff]  ;;  %v15333_v46 = vmov 0.0|0.0   ;;  %v15334_v53 = vmov 1.0  }
  0x71   : > { %s18395_s3 = sld [smem:[#allocation28_spill]]  ;;  %s18399_s2 = sld [smem:[#allocation29_spill]]  ;;  %v1159_v44 = vld [vmem:[#allocation2 + $0x8] sm:$0xff]  ;;  %v1160_v48 = vld [vmem:[#allocation2 + $0x10] sm:$0xff]  ;;  %v1161_v49 = vld [vmem:[#allocation2 + $0x18] sm:$0xff]  ;;  %vm2374_vm6 = vcmask 523264  }
  0x72   : > { %s11565_s11 = sshll.u32 %s15604_s1, 3  ;;  %s18396_s14 = sld [smem:[#allocation20_spill]]  ;;  %v13985_v45 = vpack.c.bf16 %v1159_v44, %v1158_v43  ;;  %v13988_v50 = vpack.c.bf16 %v1161_v49, %v1160_v48  ;;  %vm15715_vm4 = vmpackc.low %vm1338_vm3, %vm1338_vm3  ;;  %v11578_v58 = vld [vmem:[%s18323_s12] ss:$0 sm:$0xff] }
  0x73   : > { %s18400_s26 = sld [smem:[#allocation27_spill]]  ;;  %v11579_v60 = vld [vmem:[%s18324_s13] ss:$0 sm:$0xff]  ;;  %s15335_s7 = smov 96   ;;  %vm15825_vm5 = vmpackc.low %vm1129_vm2, %vm1129_vm2 }
  0x74   : > { %s18356_s0 = smov 64   ;;  %s18408_s10 = sld [smem:[#allocation25_spill]] }
  0x75   : > { %s898_s29 = scalar_lea.vmem %s18393_s8, %s11565_s11  ;;  %s902_s6 = scalar_lea.vmem %s18394_s28, %s11565_s11 }
  0x76   : > { %v940_v3 = vld [vmem:[%s898_s29] sm:$0xff]  ;;  %s18397_s8 = sld [smem:[#allocation23_spill]]  ;;  %s18411_s28 = sld [smem:[#allocation32_spill]] }
  0x77   : > { %v941_v2 = vld [vmem:[%s18395_s3] sm:$0xff]  ;;  %s18407_s3 = sld [smem:[#allocation24_spill]]  ;;  %s18413_s5 = sld [smem:[#allocation33_spill]] }
  0x78   : > { %s906_s19 = scalar_lea.vmem %s18396_s14, %s11565_s11  ;;  %12754 = vmatpush3.msra.mxu0 %v941_v2  ;;  %v1029_v4 = vld [vmem:[%s902_s6] sm:$0xff]  ;;  %s12114_s11 = sshll.u32 %s15604_s1, 5 }
  0x79   : > { %12756 = vmatmul.mubr.msk.f32.vlgmr.msra.gmra.mrb[0].mxu0 %vm949_vm1, %v940_v3  ;;  %12758 = vmatprep.subr.mxu1 %v1029_v4  ;;  %v917_v8 = vld [vmem:[%s906_s19] sm:$0xff]  ;;  %s18406_s19 = sld [smem:[#allocation22_spill]] }
  0x7a   : > { %12759 = vmatpush3.msra.mxu1 %v1029_v4  ;;  %1025 = vperm.xlu0 %14792, %v917_v8   ;;  %v11572_v10 = vld [vmem:[%s18399_s2] ss:$0 sm:$0xff]  ;;  %s18403_s2 = sld [smem:[#allocation26_spill]] }
  0x7b   : > { %12793 = vmatprep.mubr.msk.f32.mxu0 %vm15331_vm0, %v15330_v0  ;;  %v15662_v15 = vld [vmem:[%s18400_s26] ss:$0 sm:$0xff]  ;;  %13984 = vmatprep.subr.bf16.mxu1 %v15333_v46 }
  0x7c   : > { %s18398_s24 = smov %s18397_s8  ;;  %v15625_v5 = vld [vmem:[%s18397_s8] sm:$0xff]  ;;  %13990 = vmatprep.subr.bf16.mxu0 %v15333_v46  ;;  %s12111_s8 = sshll.u32 %s15500_s9, 4 }
  0x7d   : > { %v15630_v6 = vld [vmem:[%s18398_s24 + $0x8] sm:$0xff]  ;;  %12760 = vmatprep.mubr.msk.f32.mxu1 %vm949_vm1, %v15625_v5  ;;  %v15637_v7 = vld [vmem:[%s18398_s24 + $0x10] sm:$0xff]  ;;  %v15648_v9 = vld [vmem:[%s18398_s24 + $0x18] sm:$0xff]  ;;  %s15338_s9 = smov [#allocation7]  }
  0x7e   : > { %12761 = vmatmul.mubr.msk.f32.vlgmr.msra.gmra.mrb[0].mxu1 %vm949_vm1, %v15630_v6  ;;  %s15258_s1 = sshll.u32 %s15338_s9, 4  ;;  %s15259_s1 = int_to_ptr.vmem [resolvable:$false] %s15258_s1 }
  0x7f   : > { %12763 = vmatprep.mubr.msk.f32.mxu1 %vm949_vm1, %v15637_v7  ;;  %13986 = vmatpush3.bf16.msra.mxu1 %v13985_v45  ;;  %s15852_s6 = scalar_lea.vmem %s18406_s19, %s12114_s11  ;;  %s18409_s19 = sld [smem:[#allocation21_spill]] }
  0x80   : > { %13987 = vmatprep.subr.bf16.mxu1 %v15333_v46 }
  0x82   : > { %12764 = vmatmul.mubr.msk.f32.gmra.mrb[2].mxu1 %vm949_vm1, %v15648_v9 }
  0x83   : > { %12774 = vmatprep.mubr.msk.f32.mxu1 %vm15331_vm0, %v15330_v0  ;;  %13989 = vmatpush3.bf16.msra.mxu1 %v13988_v50 }
  0x85   : > { %s911_s27 = scalar_lea.vmem %s18409_s19, %s12114_s11  ;;  %s18410_s11 = smov 64  }
  0x86   : > { %s893_s19 = sand.u32 1, %s15316_s4  }
  0xf9   : > { %v15657_v12 = vpop.permute.xlu0 %1025 }
 0x14c   : > { %v1019_v11 = vpop.f32.mrb[0].mxu0 }
 0x14d   : > { %v1020_v13 = vadd.f32 %v11572_v10, %v1019_v11  ;;  %v12757_v14 = vpop.f32.mrb[1].mxu0  ;;  %v15772_v11 = vld [vmem:[%s18403_s2 + $0x8] sm:$0xff] }
 0x14f   : > { %v15667_v17 = vmul.f32 %v15657_v12, %v1020_v13  ;;  %v15777_v13 = vld [vmem:[%s18403_s2] sm:$0xff] }
 0x151   : > { %v15664_v16 = vpop.f32.mrb[0].mxu1  ;;  %v1130_v20 = vsel %vm1129_vm2, %v15667_v17, 0.0 }
 0x152   : > { %v15669_v18 = vpop.f32.mrb[1].mxu1  ;;  %v1331_v19 = vmul.f32 %v15664_v16, %v15662_v15  ;;  %1131 = vadd.xlane.f32.xlu0 %v1130_v20 }
 0x153   : > { %v1330_v21 = vmul.f32 %v15662_v15, %v15669_v18  ;;  %v15737_v63 = vpack.c.bf16 %v15664_v16, %v15669_v18 }
 0x154   : > { %v1335_v22 = vmul.f32 %v15664_v16, %v1331_v19 }
 0x155   : > { %v15678_v23 = vpop.f32.mrb[2].mxu1  ;;  %v15680_v24 = vpack.c.bf16 %v1331_v19, %v1330_v21  ;;  %v15709_v47 = vmul.f32 %v1330_v21, %v15669_v18 }
 0x156   : > { %v15682_v25 = vpop.f32.mrb[3].mxu1  ;;  %v1342_v26 = vsel %vm1338_vm3, %v1335_v22, 0.0  ;;  %v1333_v27 = vmul.f32 %v15678_v23, %v15662_v15 }
 0x157   : > { %v1332_v28 = vmul.f32 %v15662_v15, %v15682_v25  ;;  %1343 = vadd.xlane.f32.xlu0 %v1342_v26  ;;  %v13991_v51 = vpack.c.bf16 %v1335_v22, %v15709_v47  ;;  %v15741_v2 = vpack.c.bf16 %v15678_v23, %v15682_v25  ;;  %v15788_v22 = vld [vmem:[%s18403_s2 + $0x18] sm:$0xff] }
 0x158   : > { %v1337_v30 = vmul.f32 %v15678_v23, %v1333_v27 }
 0x159   : > { %v1336_v29 = vmul.f32 %v1332_v28, %v15682_v25  ;;  %v15691_v31 = vpack.c.bf16 %v1333_v27, %v1332_v28  ;;  %13993 = vmatpush3.bf16.xpose.msk.msra.mxu0 %vm15715_vm4, %v13991_v51 }
 0x15a   : > { %v1348_v34 = vsel %vm1338_vm3, %v1337_v30, 0.0  ;;  %13994 = vmatprep.subr.bf16.mxu0 %v15333_v46 }
 0x15b   : > { %v1345_v32 = vsel %vm1338_vm3, %v1336_v29, 0.0  ;;  %v13995_v33 = vpack.c.bf16 %v1337_v30, %v1336_v29  ;;  %v1545_v30 = vlaneseq }
 0x15c   : > { %1346 = vadd.xlane.f32.xlu0 %v1345_v32 }
 0x160   : > { %1349 = vadd.xlane.f32.xlu0 %v1348_v34 }
 0x161   : > { %13997 = vmatpush3.bf16.xpose.msk.msra.mxu0 %vm15715_vm4, %v13995_v33  ;;  %v1546_v33 = vshrl.u32 %v1545_v30, 7 }
 0x168   : > { %12794 = vmatmul.mubr.msk.f32.vlgmr.msra.gmra.mrb[2].mxu0 %vm1338_vm3, %v15334_v53 }
 0x176   : > { %1567 = vperm.xlu0 %14792, %v1561_v35   ;;  %v15815_v35 = vsub.s32 0, %v1546_v33 }
 0x17a   : > { %1577 = vperm.xlu0 %14792, %v1563_v36  }
 0x17e   : > { %1582 = vperm.xlu0 %14792, %v1564_v37  }
 0x1df   : > { %v1132_v38 = vpop.xlane.xlu0 %1131 }
 0x1e0   : > { %v1134_v39 = vmul.f32 0.03125, %v1132_v38 }
 0x1e2   : > { %v1135_v40 = vsub.f32 %v15667_v17, %v1134_v39 }
 0x1e4   : > { %v1136_v41 = vmul.f32 %v1135_v40, %v1135_v40  ;;  %v1344_v34 = vpop.xlane.xlu0 %1343 }
 0x1e6   : > { %v1137_v42 = vsel %vm1129_vm2, %v1136_v41, 0.0 }
 0x1e7   : > { %1138 = vadd.xlane.f32.xlu1 %v1137_v42 }
 0x1e9   : > { %v1347_v37 = vpop.xlane.xlu0 %1346 }
 0x1ed   : > { %v1350_v43 = vpop.xlane.xlu0 %1349 }
 0x23b   : > { %v1432_v3 = vpop.f32.mrb[2].mxu0 }
 0x23c   : > { %v12795_v4 = vpop.f32.mrb[3].mxu0  ;;  %v1548_v36 = vrot.slane %v1432_v3, %v15815_v35 }
 0x23e   : > { %v1550_v39 = vadd.f32 %v1548_v36, %v1344_v34  ;;  %v1552_v45 = vadd.f32 %v1548_v36, %v1350_v43  ;;  %v1551_v50 = vadd.f32 %v1548_v36, %v1347_v37  ;;  %v15855_v37 = vld [vmem:[%s15852_s6 + $0x8] sm:$0xff] }
 0x274   : > { %v1139_v54 = vpop.xlane.xlu1 %1138 }
 0x275   : > { %v1140_v55 = vmul.f32 0.03125, %v1139_v54 }
 0x277   : > { %v1141_v56 = vadd.f32 1e-05, %v1140_v55 }
 0x279   : > { %14984 = vrsqrt.f32 %v1141_v56  ;;  %v1339_v56 = vsel %vm1338_vm3, %v15709_v47, 0.0 }
 0x283   : > { %v14985_v57 = vpop.eup %14984 }
 0x284   : > { %v1143_v59 = vmul.f32 %v14985_v57, %v1135_v40  ;;  %v1562_v57 = vld [vmem:[%s18326_s15 + $0x8] sm:$0xff] }
 0x286   : > { %v1150_v61 = vmul.f32 %v11578_v58, %v1143_v59 }
 0x288   : > { %v1157_v62 = vadd.f32 %v11579_v60, %v1150_v61 }
 0x28a   : > { %12775 = vmatmul.mubr.msk.f32.vlgmr.msra.gmra.mrb[4].mxu1 %vm1129_vm2, %v1157_v62 }
 0x28b   : > { %12779 = vmatprep.mubr.msk.f32.mxu1 %vm949_vm1, %v15625_v5 }
 0x35d   : > { %v1231_v8 = vpop.f32.mrb[4].mxu1 }
 0x35e   : > { %v12776_v10 = vpop.f32.mrb[5].mxu1  ;;  %12777 = vmatprep.subr.mxu1 %v1231_v8 }
 0x35f   : > { %12778 = vmatpush3.msra.mxu1 %v1231_v8 }
 0x360   : > { %12780 = vmatmul.mubr.msk.f32.vlgmr.msra.gmra.mrb[6].mxu1 %vm949_vm1, %v15630_v6  ;;  %14000 = vmatprep.subr.msk.bf16.mxu1 %vm15715_vm4, %v15680_v24 }
 0x361   : > { %12782 = vmatprep.mubr.msk.f32.mxu1 %vm949_vm1, %v15637_v7 }
 0x364   : > { %12783 = vmatmul.mubr.msk.f32.gmra.mrb[8].mxu1 %vm949_vm1, %v15648_v9 }
 0x365   : > { %12804 = vmatprep.mubr.msk.f32.mxu1 %vm1338_vm3, %v15669_v18 }
 0x366   : > { %14003 = vmatpush3.bf16.xpose.msk.msra.mxu1 %vm15715_vm4, %v15680_v24  ;;  %v15793_v24 = vld [vmem:[%s18403_s2 + $0x10] sm:$0xff] }
 0x367   : > { %14006 = vmatprep.subr.msk.bf16.mxu1 %vm15715_vm4, %v15691_v31 }
 0x36e   : > { %14009 = vmatpush3.bf16.xpose.msk.msra.mxu1 %vm15715_vm4, %v15691_v31 }
 0x375   : > { %12805 = vmatmul.mubr.msk.f32.vlgmr.msra.gmra.mrb[10].mxu1 %vm1338_vm3, %v15664_v16 }
 0x376   : > { %12807 = vmatprep.mubr.msk.f32.mxu1 %vm1338_vm3, %v15682_v25 }
 0x379   : > { %12808 = vmatmul.mubr.msk.f32.gmra.mrb[12].mxu1 %vm1338_vm3, %v15678_v23 }
 0x433   : > { %v12781_v14 = vpop.f32.mrb[6].mxu1 }
 0x434   : > { %v15780_v19 = vmul.f32 %v12781_v14, %v15772_v11  ;;  %v1301_v20 = vpop.f32.mrb[7].mxu1 }
 0x435   : > { %v15783_v21 = vmul.f32 %v1301_v20, %v15777_v13 }
 0x437   : > { %v12784_v26 = vpop.f32.mrb[8].mxu1  ;;  %12818 = vmatprep.mubr.msk.f32.mxu0 %vm1129_vm2, %v15783_v21  ;;  %v15799_v27 = vpack.i.bf16 %v15780_v19, %v15783_v21 }
 0x438   : > { %v15802_v28 = vmul.f32 %v12784_v26, %v15788_v22  ;;  %v1311_v29 = vpop.f32.mrb[9].mxu1 }
 0x439   : > { %v15805_v31 = vmul.f32 %v1311_v29, %v15793_v24  ;;  %14794 = vrot.lane.b32.xlu1 %v15799_v27, %s15335_s7  ;;  %v1568_v29 = vpop.permute.xlu0 %1567 }
 0x43b   : > { %v15811_v32 = vpack.i.bf16 %v15802_v28, %v15805_v31 }
 0x43d   : > { %14799 = vrot.lane.b32.xlu1 %v15811_v32, %s15335_s7  ;;  %v1578_v30 = vpop.permute.xlu0 %1577 }
 0x441   : > { %v1583_v43 = vpop.permute.xlu0 %1582 }
 0x448   : > { %v12806_v38 = vpop.f32.mrb[10].mxu1 }
 0x449   : > { %v1554_v40 = vmul.f32 2.0, %v12806_v38  ;;  %v1526_v41 = vpop.f32.mrb[11].mxu1 }
 0x44a   : > { %v1553_v14 = vmul.f32 2.0, %v1526_v41 }
 0x44b   : > { %v1558_v42 = vsub.f32 %v1550_v39, %v1554_v40 }
 0x44c   : > { %v12809_v44 = vpop.f32.mrb[12].mxu1 }
 0x44d   : > { %v1556_v48 = vmul.f32 2.0, %v12809_v44  ;;  %v1536_v49 = vpop.f32.mrb[13].mxu1 }
 0x44e   : > { %v1555_v51 = vmul.f32 2.0, %v1536_v49 }
 0x44f   : > { %v1560_v54 = vsub.f32 %v1552_v45, %v1556_v48 }
 0x450   : > { %v1559_v55 = vsub.f32 %v1551_v50, %v1555_v51 }
 0x451   : > { %v1588_v45 = vmul.f32 %v1583_v43, %v1560_v54 }
 0x452   : > { %v1587_v50 = vmul.f32 %v1578_v30, %v1559_v55 }
 0x461   : > { %1340 = vadd.xlane.f32.xlu1 %v1339_v56  ;;  %v15863_v56 = vld [vmem:[%s15852_s6 + $0x10] sm:$0xff] }
 0x472   : > { %1572 = vperm.xlu1 %14803, %v1562_v57  }
 0x4ab   : > { %v14795_v58 = vpop.permute.xlu1 %14794 }
 0x4ac   : > { %v14797_v59 = vunpack.i.h.bf16 %v14795_v58  ;;  %v14796_v60 = vunpack.i.l.bf16 %v14795_v58 }
 0x4ae   : > { %v14010_v62 = vpack.c.bf16 %v14797_v59, %v14796_v60 }
 0x4af   : > { %v14800_v3 = vpop.permute.xlu1 %14799 }
 0x4b0   : > { %14012 = vmatprep.subr.msk.bf16.mxu0 %vm15825_vm5, %v14010_v62  ;;  %v14802_v47 = vunpack.i.h.bf16 %v14800_v3  ;;  %v14801_v4 = vunpack.i.l.bf16 %v14800_v3 }
 0x4b1   : > { %14015 = vmatpush3.bf16.xpose.msk.msra.mxu0 %vm15825_vm5, %v14010_v62  ;;  %v15868_v62 = vld [vmem:[%s15852_s6 + $0x18] sm:$0xff] }
 0x4b2   : > { %v14016_v8 = vpack.c.bf16 %v14802_v47, %v14801_v4 }
 0x4b4   : > { %14018 = vmatprep.subr.msk.bf16.mxu0 %vm15825_vm5, %v14016_v8 }
 0x4b9   : > { %14021 = vmatpush3.bf16.xpose.msk.msra.mxu0 %vm15825_vm5, %v14016_v8 }
 0x4ba   : > { %14036 = vmatprep.subr.bf16.mxu0 %v15333_v46 }
 0x4c0   : > { %12819 = vmatmul.mubr.msk.f32.vlgmr.msra.gmra.mrb[4].mxu0 %vm1129_vm2, %v15780_v19 }
 0x4c1   : > { %12821 = vmatprep.mubr.msk.f32.mxu0 %vm1129_vm2, %v15805_v31 }
 0x4c4   : > { %12822 = vmatmul.mubr.msk.f32.gmra.mrb[6].mxu0 %vm1129_vm2, %v15802_v28 }
 0x4c5   : > { %12857 = vmatprep.mubr.msk.f32.mxu0 %vm15331_vm0, %v15330_v0 }
 0x4ee   : > { %v1341_v10 = vpop.xlane.xlu1 %1340 }
 0x4ef   : > { %v1549_v20 = vadd.f32 %v1548_v36, %v1341_v10  ;;  %v15858_v36 = vld [vmem:[%s15852_s6] sm:$0xff] }
 0x4f1   : > { %v1557_v26 = vsub.f32 %v1549_v20, %v1553_v14 }
 0x4f2   : > { %v1573_v33 = vpop.permute.xlu1 %1572 }
 0x4f3   : > { %v1586_v34 = vmul.f32 %v1573_v33, %v1558_v42  ;;  %v1585_v39 = vmul.f32 %v1568_v29, %v1557_v26 }
 0x593   : > { %v12820_v38 = vpop.f32.mrb[4].mxu0 }
 0x594   : > { %v1689_v40 = vadd.f32 %v12820_v38, %v1586_v34  ;;  %v1683_v41 = vpop.f32.mrb[5].mxu0 }
 0x595   : > { %v1684_v44 = vadd.f32 %v1683_v41, %v1585_v39 }
 0x596   : > { %v1703_v48 = vadd.f32 %v1689_v40, %v15855_v37 }
 0x597   : > { %v12823_v49 = vpop.f32.mrb[6].mxu0  ;;  %v1702_v51 = vadd.f32 %v1684_v44, %v15858_v36 }
 0x598   : > { %v1699_v42 = vadd.f32 %v12823_v49, %v1588_v45  ;;  %v1693_v57 = vpop.f32.mrb[7].mxu0  ;;  %v1709_v58 = vsel %vm1129_vm2, %v1703_v48, -inf }
 0x599   : > { %v1694_v59 = vadd.f32 %v1693_v57, %v1587_v50  ;;  %1710 = vmax.xlane.f32.xlu1 %v1709_v58  ;;  %v1706_v60 = vsel %vm1129_vm2, %v1702_v51, -inf }
 0x59a   : > { %1707 = vmax.xlane.f32.xlu0 %v1706_v60  ;;  %v1705_v55 = vadd.f32 %v1699_v42, %v15868_v62 }
 0x59b   : > { %v1704_v54 = vadd.f32 %v1694_v59, %v15863_v56 }
 0x59c   : > { %v1715_v47 = vsel %vm1129_vm2, %v1705_v55, -inf }
 0x59d   : > { %v1712_v3 = vsel %vm1129_vm2, %v1704_v54, -inf }
 0x59e   : > { %1713 = vmax.xlane.f32.xlu0 %v1712_v3 }
 0x5a2   : > { %1716 = vmax.xlane.f32.xlu0 %v1715_v47 }
 0x626   : > { %v1711_v4 = vpop.xlane.xlu1 %1710 }
 0x627   : > { %v1719_v8 = vsub.f32 %v1703_v48, %v1711_v4  ;;  %v1708_v10 = vpop.xlane.xlu0 %1707 }
 0x628   : > { %v1718_v14 = vsub.f32 %v1702_v51, %v1708_v10 }
 0x629   : > { %v1724_v20 = vmul.f32 1.442695, %v1719_v8 }
 0x62a   : > { %v1722_v26 = vmul.f32 1.442695, %v1718_v14 }
 0x62b   : > { %14986 = vpow2.f32 %v1724_v20  ;;  %v1714_v29 = vpop.xlane.xlu0 %1713 }
 0x62c   : > { %14988 = vpow2.f32 %v1722_v26  ;;  %v1720_v30 = vsub.f32 %v1704_v54, %v1714_v29 }
 0x62e   : > { %v1726_v33 = vmul.f32 1.442695, %v1720_v30 }
 0x62f   : > { %v1717_v34 = vpop.xlane.xlu0 %1716 }
 0x630   : > { %14990 = vpow2.f32 %v1726_v33  ;;  %v1721_v38 = vsub.f32 %v1705_v55, %v1717_v34  ;;  %v1932_v33 = vld [vmem:[%s18327_s16] sm:$0xff]  ;;  %v1933_v34 = vld [vmem:[%s18327_s16 + $0x8] sm:$0xff] }
 0x632   : > { %v1728_v39 = vmul.f32 1.442695, %v1721_v38  ;;  %v1934_v38 = vld [vmem:[%s18327_s16 + $0x10] sm:$0xff] }
 0x634   : > { %14992 = vpow2.f32 %v1728_v39  ;;  %v14037_v39 = vpack.c.bf16 %v1933_v34, %v1932_v33 }
 0x635   : > { %v14987_v40 = vpop.eup %14986 }
 0x636   : > { %v14989_v41 = vpop.eup %14988  ;;  %v1733_v43 = vsel %vm1129_vm2, %v14987_v40, 0.0  ;;  %14038 = vmatpush3.bf16.msra.mxu0 %v14037_v39 }
 0x637   : > { %1734 = vadd.xlane.f32.xlu0 %v1733_v43  ;;  %v1730_v44 = vsel %vm1129_vm2, %v14989_v41, 0.0  ;;  %14039 = vmatprep.subr.bf16.mxu0 %v15333_v46 }
 0x638   : > { %1731 = vadd.xlane.f32.xlu1 %v1730_v44 }
 0x63a   : > { %v14991_v45 = vpop.eup %14990 }
 0x63b   : > { %v1736_v48 = vsel %vm1129_vm2, %v14991_v45, 0.0 }
 0x63c   : > { %1737 = vadd.xlane.f32.xlu1 %v1736_v48 }
 0x63e   : > { %v14993_v49 = vpop.eup %14992 }
 0x63f   : > { %v1739_v50 = vsel %vm1129_vm2, %v14993_v49, 0.0 }
 0x640   : > { %1740 = vadd.xlane.f32.xlu0 %v1739_v50 }
 0x64d   : > { %14805 = vrot.lane.b32.xlu1 %v15799_v27, %s18356_s0 }
 0x656   : > { %14810 = vrot.lane.b32.xlu0 %v15811_v32, %s18356_s0  ;;  %s18414_s0 = sld [smem:[#allocation34_spill]] }
 0x65c   : > { %s18269_s29 = scalar_lea.hbm %s18414_s0, %s12111_s8 }
 0x6c4   : > { %v1735_v42 = vpop.xlane.xlu0 %1734 }
 0x6c5   : > { %v1732_v51 = vpop.xlane.xlu1 %1731 }
 0x6c6   : > { %14994 = vrcp.f32 %v1732_v51  ;;  %v15906_v51 = vld [vmem:[%s18407_s3] sm:$0xff] }
 0x6c7   : > { %14996 = vrcp.f32 %v1735_v42 }
 0x6c9   : > { %v1738_v57 = vpop.xlane.xlu1 %1737 }
 0x6ca   : > { %14998 = vrcp.f32 %v1738_v57 }
 0x6cd   : > { %v14806_v58 = vpop.permute.xlu1 %14805  ;;  %v1741_v59 = vpop.xlane.xlu0 %1740 }
 0x6ce   : > { %v14808_v60 = vunpack.i.h.bf16 %v14806_v58  ;;  %v14807_v54 = vunpack.i.l.bf16 %v14806_v58  ;;  %15000 = vrcp.f32 %v1741_v59 }
 0x6d0   : > { %v14995_v3 = vpop.eup %14994  ;;  %v14022_v55 = vpack.c.bf16 %v14808_v60, %v14807_v54 }
 0x6d1   : > { %v14811_v47 = vpop.permute.xlu0 %14810  ;;  %v1746_v4 = vmul.f32 %v14995_v3, %v14989_v41  ;;  %v14997_v10 = vpop.eup %14996 }
 0x6d2   : > { %v14813_v8 = vunpack.i.h.bf16 %v14811_v47  ;;  %v14812_v27 = vunpack.i.l.bf16 %v14811_v47  ;;  %14023 = vmatprep.subr.bf16.mxu1 %v14022_v55  ;;  %v1747_v20 = vmul.f32 %v14997_v10, %v14987_v40  ;;  %v1935_v40 = vld [vmem:[%s18327_s16 + $0x18] sm:$0xff]  ;;  %v15937_v47 = vld [vmem:[%s18408_s10 + $0x10] sm:$0xff] }
 0x6d3   : > { %14025 = vmatpush3.bf16.msra.mxu1 %v14022_v55  ;;  %12832 = vmatprep.mubr.msk.f32.mxu1 %vm1129_vm2, %v1746_v4  ;;  %v14040_v41 = vpack.c.bf16 %v1935_v40, %v1934_v38  ;;  %v15932_v55 = vld [vmem:[%s18408_s10 + $0x8] sm:$0xff] }
 0x6d4   : > { %v14026_v32 = vpack.c.bf16 %v14813_v8, %v14812_v27  ;;  %v14999_v14 = vpop.eup %14998 }
 0x6d5   : > { %v1748_v29 = vmul.f32 %v14999_v14, %v14991_v45  ;;  %14041 = vmatpush3.bf16.msra.mxu0 %v14040_v41 }
 0x6d6   : > { %14027 = vmatprep.subr.bf16.mxu1 %v14026_v32 }
 0x6d7   : > { %14029 = vmatpush3.bf16.msra.mxu1 %v14026_v32 }
 0x6d8   : > { %14030 = vmatprep.subr.bf16.mxu1 %v15333_v46  ;;  %v15001_v26 = vpop.eup %15000 }
 0x6d9   : > { %v1749_v30 = vmul.f32 %v15001_v26, %v14993_v49 }
 0x6da   : > { %12833 = vmatmul.mubr.msk.f32.vlgmr.msra.gmra.mrb[14].mxu1 %vm1129_vm2, %v1747_v20 }
 0x6db   : > { %12835 = vmatprep.mubr.msk.f32.mxu1 %vm1129_vm2, %v1748_v29 }
 0x6de   : > { %12836 = vmatmul.mubr.msk.f32.gmra.mrb[16].mxu1 %vm1129_vm2, %v1749_v30 }
 0x6df   : > { %12846 = vmatprep.mubr.msk.f32.mxu1 %vm15331_vm0, %v15330_v0 }
 0x7ad   : > { %v12834_v43 = vpop.f32.mrb[14].mxu1 }
 0x7ae   : > { %v1840_v44 = vpop.f32.mrb[15].mxu1 }
 0x7af   : > { %v14031_v45 = vpack.c.bf16 %v12834_v43, %v1840_v44 }
 0x7b1   : > { %v12837_v48 = vpop.f32.mrb[16].mxu1  ;;  %14032 = vmatpush3.bf16.msra.mxu1 %v14031_v45  ;;  %v2274_v45 = vld [vmem:[#allocation5] sm:$0xff] }
 0x7b2   : > { %v1850_v49 = vpop.f32.mrb[17].mxu1  ;;  %14033 = vmatprep.subr.bf16.mxu1 %v15333_v46 }
 0x7b3   : > { %v14034_v50 = vpack.c.bf16 %v12837_v48, %v1850_v49  ;;  %v2275_v48 = vld [vmem:[#allocation5 + $0x8] sm:$0xff] }
 0x7b4   : > { %v14059_v49 = vpack.c.bf16 %v2275_v48, %v2274_v45  ;;  %v11622_v48 = vld [vmem:[%s18329_s18] ss:$0 sm:$0xff] }
 0x7b5   : > { %14035 = vmatpush3.bf16.msra.mxu1 %v14034_v50  ;;  %v2276_v50 = vld [vmem:[#allocation5 + $0x10] sm:$0xff] }
 0x7b6   : > { %14043 = vmatprep.subr.bf16.mxu1 %v15737_v63 }
 0x7b8   : > { %12847 = vmatmul.mubr.msk.f32.vlgmr.msra.gmra.mrb[18].mxu1 %vm1129_vm2, %v15906_v51 }
 0x7b9   : > { %14045 = vmatpush3.bf16.msra.mxu1 %v15737_v63  ;;  %12868 = vmatprep.mubr.msk.f32.mxu1 %vm1129_vm2, %v1746_v4  ;;  %v15924_v63 = vld [vmem:[%s18408_s10] sm:$0xff]  ;;  %v15947_v4 = vld [vmem:[%s18408_s10 + $0x18] sm:$0xff] }
 0x7ba   : > { %14047 = vmatprep.subr.bf16.mxu1 %v15741_v2 }
 0x7bd   : > { %14049 = vmatpush3.bf16.msra.mxu1 %v15741_v2 }
 0x7be   : > { %14058 = vmatprep.subr.bf16.mxu1 %v15333_v46 }
 0x7c0   : > { %12869 = vmatmul.mubr.msk.f32.vlgmr.msra.gmra.mrb[20].mxu1 %vm1129_vm2, %v1747_v20 }
 0x7c1   : > { %12871 = vmatprep.mubr.msk.f32.mxu1 %vm1129_vm2, %v1748_v29  ;;  %14060 = vmatpush3.bf16.msra.mxu1 %v14059_v49 }
 0x7c2   : > { %14061 = vmatprep.subr.bf16.mxu1 %v15333_v46 }
 0x7c4   : > { %12872 = vmatmul.mubr.msk.f32.gmra.mrb[22].mxu1 %vm1129_vm2, %v1749_v30 }
 0x7c5   : > { %12896 = vmatprep.mubr.msk.f32.mxu1 %vm15331_vm0, %v15330_v0 }
 0x88b   : > { %v1928_v42 = vpop.f32.mrb[18].mxu1 }
 0x88c   : > { %v12848_v57 = vpop.f32.mrb[19].mxu1  ;;  %12858 = vmatmul.mubr.msk.f32.vlgmr.msra.gmra.mrb[8].mxu0 %vm1129_vm2, %v1928_v42  ;;  %v2277_v42 = vld [vmem:[#allocation5 + $0x18] sm:$0xff] }
 0x88d   : > { %12882 = vmatprep.mubr.msk.f32.mxu0 %vm1129_vm2, %v15924_v63  ;;  %v14062_v57 = vpack.c.bf16 %v2277_v42, %v2276_v50  ;;  %v2365_v42 = vld [vmem:[%s18332_s21 + $0x30] sm:$0xff] }
 0x88f   : > { %14063 = vmatpush3.bf16.msra.mxu1 %v14062_v57  ;;  %v2366_v57 = vld [vmem:[%s18332_s21 + $0x38] sm:$0xff] }
 0x890   : > { %14076 = vmatprep.subr.bf16.mxu1 %v15333_v46 }
 0x893   : > { %v12870_v2 = vpop.f32.mrb[20].mxu1 }
 0x894   : > { %v2077_v58 = vpop.f32.mrb[21].mxu1 }
 0x895   : > { %v14050_v59 = vpack.c.bf16 %v12870_v2, %v2077_v58  ;;  %v2359_v2 = vld [vmem:[%s18332_s21] sm:$0xff]  ;;  %v2360_v58 = vld [vmem:[%s18332_s21 + $0x8] sm:$0xff] }
 0x897   : > { %v12873_v60 = vpop.f32.mrb[22].mxu1  ;;  %14051 = vmatprep.subr.bf16.mxu0 %v14050_v59 }
 0x898   : > { %v2087_v54 = vpop.f32.mrb[23].mxu1  ;;  %14053 = vmatpush3.bf16.msra.mxu0 %v14050_v59  ;;  %v2361_v59 = vld [vmem:[%s18332_s21 + $0x10] sm:$0xff] }
 0x899   : > { %v14054_v3 = vpack.c.bf16 %v12873_v60, %v2087_v54  ;;  %v14065_v60 = vpack.c.bf16 %v2360_v58, %v2359_v2  ;;  %v2362_v54 = vld [vmem:[%s18332_s21 + $0x18] sm:$0xff]  ;;  %v11623_v2 = vld [vmem:[%s18331_s20] ss:$0 sm:$0xff] }
 0x89b   : > { %14055 = vmatprep.subr.bf16.mxu0 %v14054_v3 }
 0x89c   : > { %14057 = vmatpush3.bf16.msra.mxu0 %v14054_v3  ;;  %v14068_v3 = vpack.c.bf16 %v2362_v54, %v2361_v59 }
 0x89d   : > { %14064 = vmatprep.subr.bf16.mxu0 %v15333_v46 }
 0x89f   : > { %12883 = vmatmul.mubr.msk.f32.vlgmr.msra.gmra.mrb[10].mxu0 %vm1129_vm2, %v15932_v55 }
 0x8a0   : > { %12885 = vmatprep.mubr.msk.f32.mxu0 %vm1129_vm2, %v15937_v47  ;;  %14066 = vmatpush3.bf16.msra.mxu0 %v14065_v60 }
 0x8a1   : > { %14067 = vmatprep.subr.bf16.mxu0 %v15333_v46 }
 0x8a3   : > { %12886 = vmatmul.mubr.msk.f32.gmra.mrb[12].mxu0 %vm1129_vm2, %v15947_v4 }
 0x8a4   : > { %12915 = vmatprep.mubr.msk.f32.mxu0 %vm15331_vm0, %v15330_v0  ;;  %14069 = vmatpush3.bf16.msra.mxu0 %v14068_v3  ;;  %v15337_v3 = vmov 96  }
 0x8a5   : > { %14070 = vmatprep.subr.bf16.mxu0 %v15333_v46  ;;  %14814 = vset.pattern.permute.xlu1 %v15337_v3 }
 0x8a6   : > { %14815 = vset.pattern.permute.xlu0 %v15337_v3 }
 0x95f   : > { %v2005_v8 = vpop.f32.mrb[8].mxu0 }
 0x960   : > { %v2009_v27 = vmul.f32 %v2005_v8, %v15657_v12  ;;  %v12859_v32 = vpop.f32.mrb[9].mxu0  ;;  %v2363_v8 = vld [vmem:[%s18332_s21 + $0x20] sm:$0xff] }
 0x962   : > { %v15955_v10 = vadd.f32 %v2009_v27, %v15667_v17  ;;  %v2364_v27 = vld [vmem:[%s18332_s21 + $0x28] sm:$0xff] }
 0x963   : > { %v14071_v32 = vpack.c.bf16 %v2364_v27, %v2363_v8  ;;  %v11625_v8 = vld [vmem:[%s18333_s22] ss:$0 sm:$0xff] }
 0x964   : > { %v2247_v14 = vsel %vm1129_vm2, %v15955_v10, 0.0 }
 0x965   : > { %2248 = vadd.xlane.f32.xlu1 %v2247_v14  ;;  %14072 = vmatpush3.bf16.msra.mxu0 %v14071_v32 }
 0x966   : > { %14073 = vmatprep.subr.bf16.mxu0 %v15333_v46 }
 0x972   : > { %v15959_v20 = vpop.f32.mrb[10].mxu0 }
 0x973   : > { %v2194_v26 = vsub.f32 %v15664_v16, %v15959_v20  ;;  %v15963_v29 = vpop.f32.mrb[11].mxu0  ;;  %v11630_v20 = vld [vmem:[%s18324_s13 + $0x1] ss:$0 sm:$0xff] }
 0x974   : > { %v2193_v30 = vsub.f32 %v15669_v18, %v15963_v29 }
 0x976   : > { %v15967_v33 = vpop.f32.mrb[12].mxu0 }
 0x977   : > { %v2196_v17 = vsub.f32 %v15678_v23, %v15967_v33  ;;  %v15971_v34 = vpop.f32.mrb[13].mxu0 }
 0x978   : > { %v2195_v38 = vsub.f32 %v15682_v25, %v15971_v34 }
 0x9f2   : > { %v2249_v39 = vpop.xlane.xlu1 %2248 }
 0x9f3   : > { %v2250_v40 = vmul.f32 0.03125, %v2249_v39 }
 0x9f5   : > { %v2251_v41 = vsub.f32 %v15955_v10, %v2250_v40 }
 0x9f7   : > { %v2252_v43 = vmul.f32 %v2251_v41, %v2251_v41 }
 0x9f9   : > { %v2253_v44 = vsel %vm1129_vm2, %v2252_v43, 0.0 }
 0x9fa   : > { %2254 = vadd.xlane.f32.xlu0 %v2253_v44  ;;  %v11621_v44 = vld [vmem:[%s18328_s17] ss:$0 sm:$0xff] }
 0xa87   : > { %v2255_v14 = vpop.xlane.xlu0 %2254 }
 0xa88   : > { %v2256_v39 = vmul.f32 0.03125, %v2255_v14 }
 0xa8a   : > { %v2257_v40 = vadd.f32 1e-05, %v2256_v39 }
 0xa8c   : > { %15002 = vrsqrt.f32 %v2257_v40 }
 0xa96   : > { %v15003_v43 = vpop.eup %15002 }
 0xa97   : > { %v2259_v45 = vmul.f32 %v15003_v43, %v2251_v41  ;;  %v14074_v41 = vpack.c.bf16 %v2366_v57, %v2365_v42 }
 0xa99   : > { %v2266_v49 = vmul.f32 %v11621_v44, %v2259_v45  ;;  %14075 = vmatpush3.bf16.msra.mxu0 %v14074_v41  ;;  %v918_v44 = vld [vmem:[%s911_s27] sm:$0xff]  ;;  %v919_v45 = vld [vmem:[%s911_s27 + $0x8] sm:$0xff] }
 0xa9b   : > { %v2273_v50 = vadd.f32 %v11622_v48, %v2266_v49  ;;  %v921_v48 = vld [vmem:[%s911_s27 + $0x18] sm:$0xff] }
 0xa9d   : > { %12897 = vmatmul.mubr.msk.f32.vlgmr.msra.gmra.mrb[24].mxu1 %vm1129_vm2, %v2273_v50 }
 0xa9e   : > { %12926 = vmatprep.mubr.msk.f32.mxu1 %vm15331_vm0, %v15330_v0 }
 0xb70   : > { %v2354_v58 = vpop.f32.mrb[24].mxu1 }
 0xb71   : > { %v2355_v59 = vadd.f32 %v11623_v2, %v2354_v58  ;;  %v12898_v60 = vpop.f32.mrb[25].mxu1 }
 0xb73   : > { %v2358_v54 = vmax.f32 %v2355_v59, 0.0 }
 0xb75   : > { %12916 = vmatmul.mubr.msk.f32.vlgmr.msra.gmra.mrb[14].mxu0 %vm2374_vm6, %v2358_v54 }
 0xc48   : > { %v2444_v27 = vpop.f32.mrb[14].mxu0 }
 0xc49   : > { %v2445_v32 = vadd.f32 %v11625_v8, %v2444_v27  ;;  %v12917_v14 = vpop.f32.mrb[15].mxu0 }
 0xc4b   : > { %v2448_v39 = vmul.f32 %v2445_v32, %v15657_v12 }
 0xc4d   : > { %v16026_v40 = vadd.f32 %v2448_v39, %v15955_v10  ;;  %v920_v10 = vld [vmem:[%s911_s27 + $0x10] sm:$0xff]  ;;  %v2482_v39 = vld [vmem:[#allocation2 + $0x20] sm:$0xff] }
 0xc4f   : > { %v2454_v43 = vsel %vm1129_vm2, %v16026_v40, 0.0 }
 0xc50   : > { %2455 = vadd.xlane.f32.xlu1 %v2454_v43  ;;  %v2483_v43 = vld [vmem:[#allocation2 + $0x28] sm:$0xff] }
 0xc61   : > { %2198 = vperm.xlu1 %14814, %v15783_v21  }
 0xc65   : > { %14816 = vset.pattern.permute.xlu1 %v15332_v1 }
 0xc66   : > { %2219 = vperm.xlu1 %14816, %v918_v44   ;;  %v14077_v44 = vpack.c.bf16 %v2483_v43, %v2482_v39  ;;  %v11629_v39 = vld [vmem:[%s18323_s12 + $0x1] ss:$0 sm:$0xff] }
 0xc68   : > { %14078 = vmatpush3.bf16.msra.mxu1 %v14077_v44 }
 0xc69   : > { %14079 = vmatprep.subr.bf16.mxu1 %v15333_v46 }
 0xc6a   : > { %2224 = vperm.xlu1 %14816, %v919_v45   ;;  %v2484_v45 = vld [vmem:[#allocation2 + $0x30] sm:$0xff] }
 0xc6e   : > { %14817 = vset.pattern.permute.xlu1 %v15337_v3 }
 0xc6f   : > { %2206 = vperm.xlu1 %14817, %v15805_v31  }
 0xc73   : > { %2210 = vperm.xlu1 %14817, %v15802_v28  }
 0xc77   : > { %14818 = vset.pattern.permute.xlu1 %v15332_v1 }
 0xc78   : > { %2229 = vperm.xlu1 %14818, %v920_v10   ;;  %v2485_v10 = vld [vmem:[#allocation2 + $0x38] sm:$0xff] }
 0xc7c   : > { %2234 = vperm.xlu1 %14818, %v921_v48  }
 0xcdd   : > { %v2456_v49 = vpop.xlane.xlu1 %2455 }
 0xcde   : > { %v2457_v21 = vmul.f32 0.03125, %v2456_v49 }
 0xce0   : > { %v2458_v50 = vsub.f32 %v16026_v40, %v2457_v21 }
 0xce1   : > { %v2199_v42 = vpop.permute.xlu1 %2198 }
 0xce2   : > { %v2459_v57 = vmul.f32 %v2458_v50, %v2458_v50  ;;  %v2213_v41 = vmul.f32 %v2199_v42, %v2193_v30 }
 0xce4   : > { %v2460_v31 = vsel %vm1129_vm2, %v2459_v57, 0.0 }
 0xce5   : > { %2461 = vadd.xlane.f32.xlu0 %v2460_v31  ;;  %v16046_v28 = vpop.permute.xlu1 %2219 }
 0xce6   : > { %v2237_v2 = vmul.f32 %v16046_v28, %v2213_v41 }
 0xce8   : > { %v16050_v58 = vadd.f32 %v2237_v2, %v15669_v18 }
 0xce9   : > { %v16052_v59 = vpop.permute.xlu1 %2224 }
 0xcea   : > { %12956 = vmatprep.mubr.msk.f32.mxu0 %vm1338_vm3, %v16050_v58  ;;  %v2648_v49 = vmul.f32 %v15662_v15, %v16050_v58 }
 0xcec   : > { %v2652_v21 = vmul.f32 %v2648_v49, %v16050_v58 }
 0xcee   : > { %v2207_v60 = vpop.permute.xlu1 %2206  ;;  %v2656_v42 = vsel %vm1338_vm3, %v2652_v21, 0.0 }
 0xcef   : > { %v2215_v29 = vmul.f32 %v2207_v60, %v2195_v38 }
 0xcf2   : > { %v2211_v54 = vpop.permute.xlu1 %2210 }
 0xcf3   : > { %v2216_v18 = vmul.f32 %v2211_v54, %v2196_v17 }
 0xcf7   : > { %v16059_v30 = vpop.permute.xlu1 %2229 }
 0xcf8   : > { %v2239_v8 = vmul.f32 %v16059_v30, %v2215_v29 }
 0xcfa   : > { %v16066_v27 = vadd.f32 %v2239_v8, %v15682_v25 }
 0xcfb   : > { %2202 = vperm.xlu0 %14815, %v15780_v19   ;;  %v16069_v32 = vpop.permute.xlu1 %2234 }
 0xcfc   : > { %v2240_v14 = vmul.f32 %v16069_v32, %v2216_v18  ;;  %v2650_v34 = vmul.f32 %v15662_v15, %v16066_v27 }
 0xcfe   : > { %v16075_v38 = vadd.f32 %v15678_v23, %v2240_v14  ;;  %v2654_v19 = vmul.f32 %v2650_v34, %v16066_v27  ;;  %v14080_v23 = vpack.c.bf16 %v2485_v10, %v2484_v45 }
 0xcff   : > { %14829 = vset.pattern.permute.xlu0 %v15332_v1 }
 0xd00   : > { %v2651_v25 = vmul.f32 %v15662_v15, %v16075_v38  ;;  %14081 = vmatpush3.bf16.msra.mxu1 %v14080_v23  ;;  %v2662_v57 = vsel %vm1338_vm3, %v2654_v19, 0.0 }
 0xd02   : > { %v2655_v33 = vmul.f32 %v2651_v25, %v16075_v38  ;;  %v14096_v17 = vpack.c.bf16 %v2651_v25, %v2650_v34 }
 0xd04   : > { %v14087_v48 = vpack.c.bf16 %v2655_v33, %v2654_v19  ;;  %v2665_v41 = vsel %vm1338_vm3, %v2655_v33, 0.0 }
 0xd1a   : > { %2657 = vadd.xlane.f32.xlu0 %v2656_v42 }
 0xd1e   : > { %2663 = vadd.xlane.f32.xlu0 %v2662_v57 }
 0xd22   : > { %2666 = vadd.xlane.f32.xlu0 %v2665_v41 }
 0xd72   : > { %v2462_v31 = vpop.xlane.xlu0 %2461 }
 0xd73   : > { %v2463_v2 = vmul.f32 0.03125, %v2462_v31 }
 0xd75   : > { %v2464_v60 = vadd.f32 1e-05, %v2463_v2 }
 0xd77   : > { %15004 = vrsqrt.f32 %v2464_v60 }
 0xd7a   : > { %v2203_v54 = vpop.permute.xlu0 %2202 }
 0xd7b   : > { %v2214_v29 = vmul.f32 %v2203_v54, %v2194_v26 }
 0xd7d   : > { %v2238_v8 = vmul.f32 %v16052_v59, %v2214_v29 }
 0xd7f   : > { %v16094_v18 = vadd.f32 %v15664_v16, %v2238_v8 }
 0xd81   : > { %v15005_v14 = vpop.eup %15004  ;;  %v2649_v34 = vmul.f32 %v15662_v15, %v16094_v18  ;;  %v11649_v15 = vld [vmem:[%s18326_s15 + $0x20] sm:$0xff] }
 0xd82   : > { %v2466_v43 = vmul.f32 %v15005_v14, %v2458_v50  ;;  %2882 = vperm.xlu0 %14829, %v11649_v15   ;;  %v11652_v15 = vld [vmem:[%s18326_s15 + $0x38] sm:$0xff] }
 0xd83   : > { %v14090_v44 = vpack.c.bf16 %v2649_v34, %v2648_v49  ;;  %v2653_v25 = vmul.f32 %v2649_v34, %v16094_v18 }
 0xd84   : > { %v2473_v26 = vmul.f32 %v11629_v39, %v2466_v43 }
 0xd85   : > { %14092 = vmatprep.subr.msk.bf16.mxu0 %vm15715_vm4, %v14090_v44  ;;  %v14083_v19 = vpack.c.bf16 %v2653_v25, %v2652_v21 }
 0xd86   : > { %14095 = vmatpush3.bf16.xpose.msk.msra.mxu0 %vm15715_vm4, %v14090_v44  ;;  %v2480_v16 = vadd.f32 %v11630_v20, %v2473_v26  ;;  %14840 = vset.pattern.permute.xlu0 %v15337_v3  ;;  %v2659_v20 = vsel %vm1338_vm3, %v2653_v25, 0.0  ;;  %v11650_v26 = vld [vmem:[%s18326_s15 + $0x28] sm:$0xff] }
 0xd87   : > { %14098 = vmatprep.subr.msk.bf16.mxu0 %vm15715_vm4, %v14096_v17 }
 0xd88   : > { %12927 = vmatmul.mubr.msk.f32.vlgmr.msra.gmra.mrb[26].mxu1 %vm1129_vm2, %v2480_v16  ;;  %v11651_v16 = vld [vmem:[%s18326_s15 + $0x30] sm:$0xff] }
 0xd89   : > { %12931 = vmatprep.mubr.msk.f32.mxu1 %vm949_vm1, %v15625_v5 }
 0xd8e   : > { %14101 = vmatpush3.bf16.xpose.msk.msra.mxu0 %vm15715_vm4, %v14096_v17 }
 0xd95   : > { %12957 = vmatmul.mubr.msk.f32.vlgmr.msra.gmra.mrb[16].mxu0 %vm1338_vm3, %v16094_v18 }
 0xd96   : > { %12959 = vmatprep.mubr.msk.f32.mxu0 %vm1338_vm3, %v16066_v27 }
 0xd99   : > { %12960 = vmatmul.mubr.msk.f32.gmra.mrb[18].mxu0 %vm1338_vm3, %v16075_v38 }
 0xe5b   : > { %v2555_v5 = vpop.f32.mrb[26].mxu1 }
 0xe5c   : > { %v12928_v50 = vpop.f32.mrb[27].mxu1  ;;  %12929 = vmatprep.subr.mxu1 %v2555_v5 }
 0xe5d   : > { %12930 = vmatpush3.msra.mxu1 %v2555_v5 }
 0xe5e   : > { %12932 = vmatmul.mubr.msk.f32.vlgmr.msra.gmra.mrb[28].mxu1 %vm949_vm1, %v15630_v6  ;;  %14082 = vmatprep.subr.bf16.mxu1 %v15333_v46 }
 0xe5f   : > { %12934 = vmatprep.mubr.msk.f32.mxu1 %vm949_vm1, %v15637_v7 }
 0xe62   : > { %12935 = vmatmul.mubr.msk.f32.gmra.mrb[30].mxu1 %vm949_vm1, %v15648_v9 }
 0xe63   : > { %12945 = vmatprep.mubr.msk.f32.mxu1 %vm15331_vm0, %v15330_v0 }
 0xe64   : > { %14085 = vmatpush3.bf16.xpose.msk.msra.mxu1 %vm15715_vm4, %v14083_v19 }
 0xe65   : > { %14086 = vmatprep.subr.bf16.mxu1 %v15333_v46 }
 0xe68   : > { %v12958_v33 = vpop.f32.mrb[16].mxu0 }
 0xe69   : > { %v2840_v17 = vpop.f32.mrb[17].mxu0 }
 0xe6a   : > { %v2867_v54 = vmul.f32 2.0, %v2840_v17 }
 0xe6c   : > { %14089 = vmatpush3.bf16.xpose.msk.msra.mxu1 %vm15715_vm4, %v14087_v48  ;;  %v12961_v6 = vpop.f32.mrb[18].mxu0 }
 0xe6d   : > { %v2850_v45 = vpop.f32.mrb[19].mxu0 }
 0xe6e   : > { %v2869_v29 = vmul.f32 2.0, %v2850_v45 }
 0xe73   : > { %12946 = vmatmul.mubr.msk.f32.vlgmr.msra.gmra.mrb[32].mxu1 %vm1338_vm3, %v15334_v53 }
 0xf31   : > { %v12933_v7 = vpop.f32.mrb[28].mxu1 }
 0xf32   : > { %v16143_v9 = vmul.f32 %v12933_v7, %v15772_v11  ;;  %v2625_v10 = vpop.f32.mrb[29].mxu1 }
 0xf33   : > { %v16146_v23 = vmul.f32 %v2625_v10, %v15777_v13  ;;  %v2658_v13 = vpop.xlane.xlu0 %2657 }
 0xf35   : > { %v12936_v49 = vpop.f32.mrb[30].mxu1  ;;  %12970 = vmatprep.mubr.msk.f32.mxu1 %vm1129_vm2, %v16146_v23  ;;  %v16152_v48 = vpack.i.bf16 %v16143_v9, %v16146_v23 }
 0xf36   : > { %v16155_v21 = vmul.f32 %v12936_v49, %v15788_v22  ;;  %v2635_v42 = vpop.f32.mrb[31].mxu1  ;;  %v2868_v49 = vmul.f32 2.0, %v12958_v33 }
 0xf37   : > { %v16158_v57 = vmul.f32 %v2635_v42, %v15793_v24  ;;  %14820 = vrot.lane.b32.xlu1 %v16152_v48, %s15335_s7  ;;  %v2664_v41 = vpop.xlane.xlu0 %2663  ;;  %v2870_v24 = vmul.f32 2.0, %v12961_v6 }
 0xf39   : > { %v16164_v11 = vpack.i.bf16 %v16155_v21, %v16158_v57 }
 0xf3b   : > { %14825 = vrot.lane.b32.xlu1 %v16164_v11, %s15335_s7  ;;  %v2667_v60 = vpop.xlane.xlu0 %2666 }
 0xf46   : > { %v2746_v31 = vpop.f32.mrb[32].mxu1 }
 0xf47   : > { %v2862_v22 = vrot.slane %v2746_v31, %v15815_v35  ;;  %v12947_v2 = vpop.f32.mrb[33].mxu1 }
 0xf48   : > { %v2883_v2 = vpop.permute.xlu0 %2882 }
 0xf49   : > { %v2863_v8 = vadd.f32 %v2862_v22, %v2658_v13  ;;  %v2865_v14 = vadd.f32 %v2862_v22, %v2664_v41  ;;  %v2866_v34 = vadd.f32 %v2862_v22, %v2667_v60 }
 0xf4b   : > { %v2871_v39 = vsub.f32 %v2863_v8, %v2867_v54  ;;  %v2873_v43 = vsub.f32 %v2865_v14, %v2869_v29  ;;  %v2874_v44 = vsub.f32 %v2866_v34, %v2870_v24 }
 0xf4d   : > { %v2900_v54 = vmul.f32 %v2883_v2, %v2871_v39 }
 0xf5f   : > { %2660 = vadd.xlane.f32.xlu1 %v2659_v20 }
 0xf70   : > { %2887 = vperm.xlu1 %14818, %v11650_v26  }
 0xf74   : > { %2892 = vperm.xlu1 %14818, %v11651_v16  }
 0xf78   : > { %2897 = vperm.xlu1 %14818, %v11652_v15  }
 0xf7c   : > { %14841 = vset.pattern.permute.xlu1 %v15337_v3 }
 0xfa9   : > { %v14821_v5 = vpop.permute.xlu1 %14820 }
 0xfaa   : > { %v14823_v50 = vunpack.i.h.bf16 %v14821_v5  ;;  %v14822_v25 = vunpack.i.l.bf16 %v14821_v5 }
 0xfac   : > { %v14102_v19 = vpack.c.bf16 %v14823_v50, %v14822_v25 }
 0xfad   : > { %v14826_v17 = vpop.permute.xlu1 %14825 }
 0xfae   : > { %14104 = vmatprep.subr.msk.bf16.mxu1 %vm15825_vm5, %v14102_v19  ;;  %v14828_v6 = vunpack.i.h.bf16 %v14826_v17  ;;  %v14827_v45 = vunpack.i.l.bf16 %v14826_v17 }
 0xfaf   : > { %14107 = vmatpush3.bf16.xpose.msk.msra.mxu1 %vm15825_vm5, %v14102_v19 }
 0xfb0   : > { %v14108_v7 = vpack.c.bf16 %v14828_v6, %v14827_v45 }
 0xfb2   : > { %14110 = vmatprep.subr.msk.bf16.mxu1 %vm15825_vm5, %v14108_v7 }
 0xfb7   : > { %14113 = vmatpush3.bf16.xpose.msk.msra.mxu1 %vm15825_vm5, %v14108_v7 }
 0xfb8   : > { %14128 = vmatprep.subr.bf16.mxu1 %v15333_v46 }
 0xfbe   : > { %12971 = vmatmul.mubr.msk.f32.vlgmr.msra.gmra.mrb[34].mxu1 %vm1129_vm2, %v16143_v9 }
 0xfbf   : > { %12973 = vmatprep.mubr.msk.f32.mxu1 %vm1129_vm2, %v16158_v57 }
 0xfc2   : > { %12974 = vmatmul.mubr.msk.f32.gmra.mrb[36].mxu1 %vm1129_vm2, %v16155_v21 }
 0xfc3   : > { %13009 = vmatprep.mubr.msk.f32.mxu1 %vm15331_vm0, %v15330_v0 }
 0xfec   : > { %v2661_v10 = vpop.xlane.xlu1 %2660 }
 0xfed   : > { %v2864_v42 = vadd.f32 %v2862_v22, %v2661_v10 }
 0xfef   : > { %v2872_v13 = vsub.f32 %v2864_v42, %v2868_v49 }
 0xff0   : > { %v2888_v41 = vpop.permute.xlu1 %2887 }
 0xff1   : > { %v2901_v60 = vmul.f32 %v2888_v41, %v2872_v13 }
 0xff4   : > { %v2893_v31 = vpop.permute.xlu1 %2892 }
 0xff5   : > { %v2902_v16 = vmul.f32 %v2893_v31, %v2873_v43 }
 0xff8   : > { %v2898_v24 = vpop.permute.xlu1 %2897 }
 0xff9   : > { %v2903_v20 = vmul.f32 %v2898_v24, %v2874_v44 }
0x1091   : > { %v12972_v29 = vpop.f32.mrb[34].mxu1 }
0x1092   : > { %v3004_v8 = vadd.f32 %v12972_v29, %v2901_v60  ;;  %v2998_v14 = vpop.f32.mrb[35].mxu1 }
0x1093   : > { %v2999_v34 = vadd.f32 %v2998_v14, %v2900_v54 }
0x1094   : > { %v3018_v26 = vadd.f32 %v3004_v8, %v15855_v37 }
0x1095   : > { %v12975_v15 = vpop.f32.mrb[36].mxu1  ;;  %v3017_v5 = vadd.f32 %v2999_v34, %v15858_v36 }
0x1096   : > { %v3014_v33 = vadd.f32 %v12975_v15, %v2903_v20  ;;  %v3008_v22 = vpop.f32.mrb[37].mxu1  ;;  %v3024_v50 = vsel %vm1129_vm2, %v3018_v26, -inf }
0x1097   : > { %v3009_v25 = vadd.f32 %v3008_v22, %v2902_v16  ;;  %3025 = vmax.xlane.f32.xlu0 %v3024_v50  ;;  %v3021_v39 = vsel %vm1129_vm2, %v3017_v5, -inf }
0x1098   : > { %3022 = vmax.xlane.f32.xlu1 %v3021_v39  ;;  %v3020_v44 = vadd.f32 %v3014_v33, %v15868_v62 }
0x1099   : > { %v3019_v19 = vadd.f32 %v3009_v25, %v15863_v56 }
0x109a   : > { %v3030_v37 = vsel %vm1129_vm2, %v3020_v44, -inf }
0x109b   : > { %v3027_v17 = vsel %vm1129_vm2, %v3019_v19, -inf }
0x109c   : > { %3028 = vmax.xlane.f32.xlu1 %v3027_v17 }
0x10a0   : > { %3031 = vmax.xlane.f32.xlu1 %v3030_v37 }
0x1124   : > { %v3026_v36 = vpop.xlane.xlu0 %3025 }
0x1125   : > { %v3034_v43 = vsub.f32 %v3018_v26, %v3026_v36  ;;  %v3023_v6 = vpop.xlane.xlu1 %3022 }
0x1126   : > { %v3033_v45 = vsub.f32 %v3017_v5, %v3023_v6 }
0x1127   : > { %v3039_v7 = vmul.f32 1.442695, %v3034_v43 }
0x1128   : > { %v3037_v10 = vmul.f32 1.442695, %v3033_v45  ;;  %v11666_v45 = vld [vmem:[%s18327_s16 + $0x20] sm:$0xff] }
0x1129   : > { %15006 = vpow2.f32 %v3039_v7  ;;  %v3029_v49 = vpop.xlane.xlu1 %3028  ;;  %v11667_v7 = vld [vmem:[%s18327_s16 + $0x28] sm:$0xff] }
0x112a   : > { %v3035_v42 = vsub.f32 %v3019_v19, %v3029_v49  ;;  %15008 = vpow2.f32 %v3037_v10  ;;  %v11668_v10 = vld [vmem:[%s18327_s16 + $0x30] sm:$0xff]  ;;  %v14129_v49 = vpack.c.bf16 %v11667_v7, %v11666_v45  ;;  %v11687_v45 = vld [vmem:[%s18332_s21 + $0x48] sm:$0xff] }
0x112b   : > { %v11688_v7 = vld [vmem:[%s18332_s21 + $0x50] sm:$0xff] }
0x112c   : > { %v3041_v13 = vmul.f32 1.442695, %v3035_v42  ;;  %v11669_v42 = vld [vmem:[%s18327_s16 + $0x38] sm:$0xff]  ;;  %14130 = vmatpush3.bf16.msra.mxu1 %v14129_v49 }
0x112d   : > { %v3032_v56 = vpop.xlane.xlu1 %3031  ;;  %14131 = vmatprep.subr.bf16.mxu1 %v15333_v46  ;;  %v11689_v49 = vld [vmem:[%s18332_s21 + $0x58] sm:$0xff] }
0x112e   : > { %15010 = vpow2.f32 %v3041_v13  ;;  %v3036_v41 = vsub.f32 %v3020_v44, %v3032_v56  ;;  %v14132_v13 = vpack.c.bf16 %v11669_v42, %v11668_v10  ;;  %v14160_v42 = vpack.c.bf16 %v11689_v49, %v11688_v7 }
0x1130   : > { %v3043_v31 = vmul.f32 1.442695, %v3036_v41  ;;  %14133 = vmatpush3.bf16.msra.mxu1 %v14132_v13  ;;  %v11690_v13 = vld [vmem:[%s18332_s21 + $0x60] sm:$0xff] }
0x1132   : > { %15012 = vpow2.f32 %v3043_v31 }
0x1133   : > { %v15007_v62 = vpop.eup %15006 }
0x1134   : > { %v3048_v2 = vsel %vm1129_vm2, %v15007_v62, 0.0  ;;  %v15009_v60 = vpop.eup %15008 }
0x1135   : > { %3049 = vadd.xlane.f32.xlu1 %v3048_v2  ;;  %v3045_v24 = vsel %vm1129_vm2, %v15009_v60, 0.0 }
0x1138   : > { %v15011_v54 = vpop.eup %15010 }
0x1139   : > { %3046 = vadd.xlane.f32.xlu1 %v3045_v24  ;;  %v3051_v29 = vsel %vm1129_vm2, %v15011_v54, 0.0  ;;  %v14138_v24 = vpack.c.bf16 %v16075_v38, %v16066_v27 }
0x113a   : > { %3052 = vadd.xlane.f32.xlu0 %v3051_v29 }
0x113c   : > { %v15013_v8 = vpop.eup %15012 }
0x113d   : > { %v3054_v14 = vsel %vm1129_vm2, %v15013_v8, 0.0 }
0x113e   : > { %3055 = vadd.xlane.f32.xlu1 %v3054_v14 }
0x114f   : > { %14836 = vrot.lane.b32.xlu1 %v16164_v11, %s18410_s11 }
0x1150   : > { %14831 = vrot.lane.b32.xlu0 %v16152_v48, %s18410_s11 }
0x11c2   : > { %v3050_v34 = vpop.xlane.xlu1 %3049 }
0x11c6   : > { %v3047_v20 = vpop.xlane.xlu1 %3046 }
0x11c7   : > { %15014 = vrcp.f32 %v3047_v20  ;;  %v3053_v26 = vpop.xlane.xlu0 %3052 }
0x11c8   : > { %15016 = vrcp.f32 %v3050_v34 }
0x11c9   : > { %15018 = vrcp.f32 %v3053_v26 }
0x11cb   : > { %v3056_v16 = vpop.xlane.xlu1 %3055  ;;  %v14832_v15 = vpop.permute.xlu0 %14831 }
0x11cc   : > { %v14834_v5 = vunpack.i.h.bf16 %v14832_v15  ;;  %v14833_v33 = vunpack.i.l.bf16 %v14832_v15  ;;  %15020 = vrcp.f32 %v3056_v16 }
0x11ce   : > { %v14114_v22 = vpack.c.bf16 %v14834_v5, %v14833_v33 }
0x11cf   : > { %v14837_v50 = vpop.permute.xlu1 %14836 }
0x11d0   : > { %v14839_v25 = vunpack.i.h.bf16 %v14837_v50  ;;  %v14838_v39 = vunpack.i.l.bf16 %v14837_v50  ;;  %14115 = vmatprep.subr.bf16.mxu0 %v14114_v22 }
0x11d1   : > { %v15015_v11 = vpop.eup %15014  ;;  %14117 = vmatpush3.bf16.msra.mxu0 %v14114_v22 }
0x11d2   : > { %v14118_v19 = vpack.c.bf16 %v14839_v25, %v14838_v39  ;;  %v3061_v48 = vmul.f32 %v15015_v11, %v15009_v60  ;;  %v15017_v17 = vpop.eup %15016 }
0x11d3   : > { %v15019_v44 = vpop.eup %15018  ;;  %v3062_v37 = vmul.f32 %v15017_v17, %v15007_v62  ;;  %v3559_v17 = vld [vmem:[#allocation5 + $0x28] sm:$0xff] }
0x11d4   : > { %14119 = vmatprep.subr.bf16.mxu0 %v14118_v19  ;;  %12984 = vmatprep.mubr.msk.f32.mxu0 %vm1129_vm2, %v3061_v48  ;;  %v3063_v43 = vmul.f32 %v15019_v44, %v15011_v54  ;;  %v14134_v54 = vpack.c.bf16 %v16094_v18, %v16050_v58 }
0x11d5   : > { %14121 = vmatpush3.bf16.msra.mxu0 %v14118_v19 }
0x11d6   : > { %14122 = vmatprep.subr.bf16.mxu0 %v15333_v46  ;;  %v15021_v36 = vpop.eup %15020 }
0x11d7   : > { %v3064_v6 = vmul.f32 %v15021_v36, %v15013_v8  ;;  %v3561_v36 = vld [vmem:[#allocation5 + $0x38] sm:$0xff] }
0x11d8   : > { %12985 = vmatmul.mubr.msk.f32.vlgmr.msra.gmra.mrb[20].mxu0 %vm1129_vm2, %v3062_v37 }
0x11d9   : > { %12987 = vmatprep.mubr.msk.f32.mxu0 %vm1129_vm2, %v3063_v43 }
0x11dc   : > { %12988 = vmatmul.mubr.msk.f32.gmra.mrb[22].mxu0 %vm1129_vm2, %v3064_v6 }
0x11dd   : > { %12998 = vmatprep.mubr.msk.f32.mxu0 %vm15331_vm0, %v15330_v0 }
0x12ab   : > { %v12986_v56 = vpop.f32.mrb[20].mxu0 }
0x12ac   : > { %v3155_v41 = vpop.f32.mrb[21].mxu0 }
0x12ad   : > { %v14123_v31 = vpack.c.bf16 %v12986_v56, %v3155_v41  ;;  %v11691_v56 = vld [vmem:[%s18332_s21 + $0x68] sm:$0xff] }
0x12ae   : > { %v14163_v41 = vpack.c.bf16 %v11691_v56, %v11690_v13  ;;  %v3771_v13 = vld [vmem:[#allocation2 + $0x58] sm:$0xff] }
0x12af   : > { %v12989_v62 = vpop.f32.mrb[22].mxu0  ;;  %14124 = vmatpush3.bf16.msra.mxu0 %v14123_v31 }
0x12b0   : > { %v3165_v2 = vpop.f32.mrb[23].mxu0  ;;  %14125 = vmatprep.subr.bf16.mxu0 %v15333_v46 }
0x12b1   : > { %v14126_v60 = vpack.c.bf16 %v12989_v62, %v3165_v2 }
0x12b3   : > { %14127 = vmatpush3.bf16.msra.mxu0 %v14126_v60 }
0x12b4   : > { %14135 = vmatprep.subr.bf16.mxu0 %v14134_v54 }
0x12b6   : > { %12999 = vmatmul.mubr.msk.f32.vlgmr.msra.gmra.mrb[24].mxu0 %vm1129_vm2, %v15906_v51 }
0x12b7   : > { %14137 = vmatpush3.bf16.msra.mxu0 %v14134_v54  ;;  %13020 = vmatprep.mubr.msk.f32.mxu0 %vm1129_vm2, %v3061_v48  ;;  %v3558_v48 = vld [vmem:[#allocation5 + $0x20] sm:$0xff] }
0x12b8   : > { %14139 = vmatprep.subr.bf16.mxu0 %v14138_v24  ;;  %v14151_v44 = vpack.c.bf16 %v3559_v17, %v3558_v48  ;;  %v11681_v54 = vld [vmem:[%s18328_s17 + $0x1] ss:$0 sm:$0xff] }
0x12bb   : > { %14141 = vmatpush3.bf16.msra.mxu0 %v14138_v24 }
0x12bc   : > { %14150 = vmatprep.subr.bf16.mxu0 %v15333_v46 }
0x12be   : > { %13021 = vmatmul.mubr.msk.f32.vlgmr.msra.gmra.mrb[26].mxu0 %vm1129_vm2, %v3062_v37  ;;  %v3560_v37 = vld [vmem:[#allocation5 + $0x30] sm:$0xff] }
0x12bf   : > { %13023 = vmatprep.mubr.msk.f32.mxu0 %vm1129_vm2, %v3063_v43  ;;  %14152 = vmatpush3.bf16.msra.mxu0 %v14151_v44  ;;  %v14154_v43 = vpack.c.bf16 %v3561_v36, %v3560_v37 }
0x12c0   : > { %14153 = vmatprep.subr.bf16.mxu0 %v15333_v46 }
0x12c2   : > { %13024 = vmatmul.mubr.msk.f32.gmra.mrb[28].mxu0 %vm1129_vm2, %v3064_v6  ;;  %v11686_v6 = vld [vmem:[%s18332_s21 + $0x40] sm:$0xff] }
0x12c3   : > { %13048 = vmatprep.mubr.msk.f32.mxu0 %vm15331_vm0, %v15330_v0  ;;  %14155 = vmatpush3.bf16.msra.mxu0 %v14154_v43  ;;  %v14157_v10 = vpack.c.bf16 %v11687_v45, %v11686_v6 }
0x12c4   : > { %14168 = vmatprep.subr.bf16.mxu0 %v15333_v46 }
0x1389   : > { %v3240_v51 = vpop.f32.mrb[24].mxu0 }
0x138a   : > { %v13000_v29 = vpop.f32.mrb[25].mxu0  ;;  %13010 = vmatmul.mubr.msk.f32.vlgmr.msra.gmra.mrb[38].mxu1 %vm1129_vm2, %v3240_v51  ;;  %v11682_v51 = vld [vmem:[%s18329_s18 + $0x1] ss:$0 sm:$0xff] }
0x138b   : > { %13034 = vmatprep.mubr.msk.f32.mxu1 %vm1129_vm2, %v15924_v63 }
0x1391   : > { %v13022_v8 = vpop.f32.mrb[26].mxu0 }
0x1392   : > { %v3390_v14 = vpop.f32.mrb[27].mxu0 }
0x1393   : > { %v14142_v34 = vpack.c.bf16 %v13022_v8, %v3390_v14  ;;  %v11692_v14 = vld [vmem:[%s18332_s21 + $0x70] sm:$0xff] }
0x1395   : > { %v13025_v20 = vpop.f32.mrb[28].mxu0  ;;  %14143 = vmatprep.subr.bf16.mxu1 %v14142_v34 }
0x1396   : > { %v3400_v26 = vpop.f32.mrb[29].mxu0  ;;  %14145 = vmatpush3.bf16.msra.mxu1 %v14142_v34  ;;  %v11693_v34 = vld [vmem:[%s18332_s21 + $0x78] sm:$0xff] }
0x1397   : > { %v14146_v16 = vpack.c.bf16 %v13025_v20, %v3400_v26  ;;  %v14166_v20 = vpack.c.bf16 %v11693_v34, %v11692_v14  ;;  %v11684_v26 = vld [vmem:[%s18331_s20 + $0x1] ss:$0 sm:$0xff] }
0x1399   : > { %14147 = vmatprep.subr.bf16.mxu1 %v14146_v16 }
0x139a   : > { %14149 = vmatpush3.bf16.msra.mxu1 %v14146_v16 }
0x139b   : > { %14156 = vmatprep.subr.bf16.mxu1 %v15333_v46 }
0x139d   : > { %13035 = vmatmul.mubr.msk.f32.vlgmr.msra.gmra.mrb[40].mxu1 %vm1129_vm2, %v15932_v55 }
0x139e   : > { %13037 = vmatprep.mubr.msk.f32.mxu1 %vm1129_vm2, %v15937_v47  ;;  %14158 = vmatpush3.bf16.msra.mxu1 %v14157_v10 }
0x139f   : > { %14159 = vmatprep.subr.bf16.mxu1 %v15333_v46 }
0x13a1   : > { %13038 = vmatmul.mubr.msk.f32.gmra.mrb[42].mxu1 %vm1129_vm2, %v15947_v4 }
0x13a2   : > { %13067 = vmatprep.mubr.msk.f32.mxu1 %vm15331_vm0, %v15330_v0  ;;  %14161 = vmatpush3.bf16.msra.mxu1 %v14160_v42  ;;  %v3770_v42 = vld [vmem:[#allocation2 + $0x50] sm:$0xff] }
0x13a3   : > { %14162 = vmatprep.subr.bf16.mxu1 %v15333_v46 }
0x13a6   : > { %14164 = vmatpush3.bf16.msra.mxu1 %v14163_v41 }
0x13a7   : > { %14165 = vmatprep.subr.bf16.mxu1 %v15333_v46 }
0x13aa   : > { %14167 = vmatpush3.bf16.msra.mxu1 %v14166_v20 }
0x145d   : > { %v3318_v63 = vpop.f32.mrb[38].mxu1 }
0x145e   : > { %v3322_v15 = vmul.f32 %v3318_v63, %v15657_v12  ;;  %v13011_v5 = vpop.f32.mrb[39].mxu1 }
0x1460   : > { %v16261_v33 = vadd.f32 %v3322_v15, %v16026_v40 }
0x1462   : > { %v3530_v22 = vsel %vm1129_vm2, %v16261_v33, 0.0 }
0x1463   : > { %3531 = vadd.xlane.f32.xlu1 %v3530_v22  ;;  %v11695_v22 = vld [vmem:[%s18333_s22 + $0x1] ss:$0 sm:$0xff] }
0x1470   : > { %v16265_v55 = vpop.f32.mrb[40].mxu1 }
0x1471   : > { %v16267_v47 = vpop.f32.mrb[41].mxu1 }
0x1472   : > { %v3494_v43 = vsub.f32 %v16050_v58, %v16267_v47  ;;  %v3769_v47 = vld [vmem:[#allocation2 + $0x48] sm:$0xff] }
0x1474   : > { %v16269_v50 = vpop.f32.mrb[42].mxu1 }
0x1475   : > { %v16271_v4 = vpop.f32.mrb[43].mxu1 }
0x14f0   : > { %v3532_v25 = vpop.xlane.xlu1 %3531 }
0x14f1   : > { %v3533_v39 = vmul.f32 0.03125, %v3532_v25 }
0x14f3   : > { %v3534_v11 = vsub.f32 %v16261_v33, %v3533_v39 }
0x14f5   : > { %v3535_v19 = vmul.f32 %v3534_v11, %v3534_v11 }
0x14f7   : > { %v3536_v40 = vsel %vm1129_vm2, %v3535_v19, 0.0 }
0x14f8   : > { %3537 = vadd.xlane.f32.xlu0 %v3536_v40 }
0x1585   : > { %v3538_v31 = vpop.xlane.xlu0 %3537 }
0x1586   : > { %v3539_v62 = vmul.f32 0.03125, %v3538_v31 }
0x1588   : > { %v3540_v2 = vadd.f32 1e-05, %v3539_v62  ;;  %v3496_v62 = vsub.f32 %v16066_v27, %v16271_v4 }
0x158a   : > { %15022 = vrsqrt.f32 %v3540_v2 }
0x1594   : > { %v15023_v60 = vpop.eup %15022 }
0x1595   : > { %v3542_v24 = vmul.f32 %v15023_v60, %v3534_v11 }
0x1597   : > { %v3549_v29 = vmul.f32 %v11681_v54, %v3542_v24 }
0x1599   : > { %v3556_v8 = vadd.f32 %v11682_v51, %v3549_v29  ;;  %v3497_v51 = vsub.f32 %v16075_v38, %v16269_v50 }
0x159b   : > { %13049 = vmatmul.mubr.msk.f32.vlgmr.msra.gmra.mrb[30].mxu0 %vm1129_vm2, %v3556_v8 }
0x159c   : > { %13078 = vmatprep.mubr.msk.f32.mxu0 %vm15331_vm0, %v15330_v0 }
0x166e   : > { %v3639_v16 = vpop.f32.mrb[30].mxu0 }
0x166f   : > { %v3640_v63 = vadd.f32 %v11684_v26, %v3639_v16  ;;  %v13050_v15 = vpop.f32.mrb[31].mxu0 }
0x1670   : > { %v11699_v15 = vld [vmem:[%s18323_s12 + $0x2] ss:$0 sm:$0xff] }
0x1671   : > { %v3643_v5 = vmax.f32 %v3640_v63, 0.0 }
0x1673   : > { %13068 = vmatmul.mubr.msk.f32.vlgmr.msra.gmra.mrb[44].mxu1 %vm2374_vm6, %v3643_v5 }
0x1746   : > { %v3730_v25 = vpop.f32.mrb[44].mxu1 }
0x1747   : > { %v3731_v39 = vadd.f32 %v11695_v22, %v3730_v25  ;;  %v13069_v11 = vpop.f32.mrb[45].mxu1  ;;  %v11700_v22 = vld [vmem:[%s18324_s13 + $0x2] ss:$0 sm:$0xff] }
0x1749   : > { %v3734_v19 = vmul.f32 %v3731_v39, %v15657_v12 }
0x174b   : > { %v16322_v40 = vadd.f32 %v3734_v19, %v16261_v33 }
0x174d   : > { %v3740_v48 = vsel %vm1129_vm2, %v16322_v40, 0.0 }
0x174e   : > { %3741 = vadd.xlane.f32.xlu0 %v3740_v48 }
0x1764   : > { %3499 = vperm.xlu0 %14840, %v16146_v23   ;;  %v3768_v23 = vld [vmem:[#allocation2 + $0x40] sm:$0xff] }
0x1765   : > { %v14169_v49 = vpack.c.bf16 %v3769_v47, %v3768_v23 }
0x1767   : > { %14170 = vmatpush3.bf16.msra.mxu0 %v14169_v49  ;;  %v16433_v49 = vld [vmem:[%s18398_s24 + $0x18] sm:$0xff] }
0x1768   : > { %14853 = vset.pattern.permute.xlu0 %v15332_v1  ;;  %14171 = vmatprep.subr.bf16.mxu0 %v15333_v46 }
0x17db   : > { %v3742_v17 = vpop.xlane.xlu0 %3741 }
0x17dc   : > { %v3743_v44 = vmul.f32 0.03125, %v3742_v17 }
0x17de   : > { %v3744_v37 = vsub.f32 %v16322_v40, %v3743_v44 }
0x17e0   : > { %v3745_v36 = vmul.f32 %v3744_v37, %v3744_v37 }
0x17e2   : > { %v3746_v6 = vsel %vm1129_vm2, %v3745_v36, 0.0  ;;  %v16398_v36 = vld [vmem:[%s18398_s24] sm:$0xff] }
0x17e3   : > { %3747 = vadd.xlane.f32.xlu1 %v3746_v6  ;;  %v3500_v33 = vpop.permute.xlu0 %3499 }
0x17e4   : > { %v3514_v45 = vmul.f32 %v3500_v33, %v3494_v43  ;;  %v11720_v43 = vld [vmem:[%s18326_s15 + $0x48] sm:$0xff] }
0x17e6   : > { %v3518_v7 = vmul.f32 %v3514_v45, %v16046_v28  ;;  %v16417_v45 = vld [vmem:[%s18398_s24 + $0x8] sm:$0xff] }
0x17e8   : > { %v16334_v10 = vadd.f32 %v3518_v7, %v16050_v58  ;;  %v14172_v58 = vpack.c.bf16 %v3771_v13, %v3770_v42  ;;  %v16425_v7 = vld [vmem:[%s18398_s24 + $0x10] sm:$0xff] }
0x17ea   : > { %13108 = vmatprep.mubr.msk.f32.mxu1 %vm1338_vm3, %v16334_v10  ;;  %14173 = vmatpush3.bf16.msra.mxu0 %v14172_v58 }
0x17f4   : > { %3503 = vperm.xlu1 %14841, %v16143_v9   ;;  %v3495_v9 = vsub.f32 %v16094_v18, %v16265_v55  ;;  %v16357_v55 = vld [vmem:[%s18400_s26] ss:$0 sm:$0xff] }
0x17f5   : > { %v3934_v4 = vmul.f32 %v16357_v55, %v16334_v10 }
0x17f7   : > { %v3938_v23 = vmul.f32 %v3934_v4, %v16334_v10 }
0x17f8   : > { %3507 = vperm.xlu1 %14841, %v16158_v57  }
0x17fc   : > { %3511 = vperm.xlu1 %14841, %v16155_v21  }
0x1800   : > { %14852 = vset.pattern.permute.xlu1 %v15332_v1 }
0x1870   : > { %v3748_v56 = vpop.xlane.xlu1 %3747 }
0x1871   : > { %v3749_v41 = vmul.f32 0.03125, %v3748_v56 }
0x1873   : > { %v3750_v57 = vadd.f32 1e-05, %v3749_v41 }
0x1874   : > { %v3504_v31 = vpop.permute.xlu1 %3503 }
0x1875   : > { %15024 = vrsqrt.f32 %v3750_v57  ;;  %v3515_v21 = vmul.f32 %v3504_v31, %v3495_v9  ;;  %v16451_v9 = vld [vmem:[%s18403_s2 + $0x8] sm:$0xff] }
0x1877   : > { %v3519_v2 = vmul.f32 %v3515_v21, %v16052_v59  ;;  %v16459_v21 = vld [vmem:[%s18403_s2] sm:$0xff] }
0x1878   : > { %v3508_v60 = vpop.permute.xlu1 %3507 }
0x1879   : > { %v16349_v54 = vadd.f32 %v3519_v2, %v16094_v18  ;;  %v3516_v24 = vmul.f32 %v3508_v60, %v3496_v62 }
0x187b   : > { %v3520_v29 = vmul.f32 %v3516_v24, %v16059_v30  ;;  %v3935_v8 = vmul.f32 %v16357_v55, %v16349_v54  ;;  %v16473_v24 = vld [vmem:[%s18403_s2 + $0x18] sm:$0xff] }
0x187c   : > { %v3512_v14 = vpop.permute.xlu1 %3511 }
0x187d   : > { %v16364_v18 = vadd.f32 %v3520_v29, %v16066_v27  ;;  %v3517_v34 = vmul.f32 %v3512_v14, %v3497_v51  ;;  %v14182_v20 = vpack.c.bf16 %v3935_v8, %v3934_v4  ;;  %v3939_v50 = vmul.f32 %v3935_v8, %v16349_v54  ;;  %v16481_v4 = vld [vmem:[%s18403_s2 + $0x10] sm:$0xff] }
0x187f   : > { %v15025_v26 = vpop.eup %15024  ;;  %v3521_v16 = vmul.f32 %v3517_v34, %v16069_v32  ;;  %14184 = vmatprep.subr.msk.bf16.mxu1 %vm15715_vm4, %v14182_v20  ;;  %v3945_v63 = vsel %vm1338_vm3, %v3939_v50, 0.0  ;;  %v3936_v25 = vmul.f32 %v16357_v55, %v16364_v18  ;;  %v14175_v47 = vpack.c.bf16 %v3939_v50, %v3938_v23 }
0x1880   : > { %v3752_v5 = vmul.f32 %v15025_v26, %v3744_v37  ;;  %3946 = vadd.xlane.f32.xlu0 %v3945_v63  ;;  %14187 = vmatpush3.bf16.xpose.msk.msra.mxu1 %vm15715_vm4, %v14182_v20 }
0x1881   : > { %v16377_v27 = vadd.f32 %v3521_v16, %v16075_v38  ;;  %v16388_v44 = vmul.f32 %v3936_v25, %v16364_v18 }
0x1882   : > { %v3759_v39 = vmul.f32 %v11699_v15, %v3752_v5 }
0x1883   : > { %v3937_v11 = vmul.f32 %v16357_v55, %v16377_v27 }
0x1884   : > { %v3766_v19 = vadd.f32 %v11700_v22, %v3759_v39 }
0x1885   : > { %v14188_v48 = vpack.c.bf16 %v3937_v11, %v3936_v25  ;;  %v3941_v17 = vmul.f32 %v3937_v11, %v16377_v27  ;;  %v3942_v11 = vsel %vm1338_vm3, %v3938_v23, 0.0 }
0x1886   : > { %13079 = vmatmul.mubr.msk.f32.vlgmr.msra.gmra.mrb[32].mxu0 %vm1129_vm2, %v3766_v19  ;;  %v3948_v19 = vsel %vm1338_vm3, %v16388_v44, 0.0 }
0x1887   : > { %14190 = vmatprep.subr.msk.bf16.mxu1 %vm15715_vm4, %v14188_v48  ;;  %v3951_v38 = vsel %vm1338_vm3, %v3941_v17, 0.0  ;;  %v14179_v37 = vpack.c.bf16 %v3941_v17, %v16388_v44  ;;  %13083 = vmatprep.mubr.msk.f32.mxu0 %vm949_vm1, %v16398_v36  ;;  %v11721_v17 = vld [vmem:[%s18326_s15 + $0x50] sm:$0xff] }
0x1888   : > { %3952 = vadd.xlane.f32.xlu0 %v3951_v38  ;;  %14193 = vmatpush3.bf16.xpose.msk.msra.mxu1 %vm15715_vm4, %v14188_v48  ;;  %v11719_v48 = vld [vmem:[%s18326_s15 + $0x40] sm:$0xff]  ;;  %v11722_v38 = vld [vmem:[%s18326_s15 + $0x58] sm:$0xff] }
0x188f   : > { %13109 = vmatmul.mubr.msk.f32.vlgmr.msra.gmra.mrb[46].mxu1 %vm1338_vm3, %v16349_v54 }
0x1890   : > { %13111 = vmatprep.mubr.msk.f32.mxu1 %vm1338_vm3, %v16364_v18 }
0x1893   : > { %13112 = vmatmul.mubr.msk.f32.gmra.mrb[48].mxu1 %vm1338_vm3, %v16377_v27 }
0x189e   : > { %4173 = vperm.xlu0 %14853, %v11720_v43  }
0x18a2   : > { %14865 = vset.pattern.permute.xlu0 %v15337_v3 }
0x190d   : > { %v3947_v34 = vpop.xlane.xlu0 %3946 }
0x1915   : > { %v3953_v16 = vpop.xlane.xlu0 %3952 }
0x1959   : > { %v3841_v6 = vpop.f32.mrb[32].mxu0 }
0x195a   : > { %v13080_v33 = vpop.f32.mrb[33].mxu0  ;;  %13081 = vmatprep.subr.mxu0 %v3841_v6 }
0x195b   : > { %13082 = vmatpush3.msra.mxu0 %v3841_v6 }
0x195c   : > { %13084 = vmatmul.mubr.msk.f32.vlgmr.msra.gmra.mrb[34].mxu0 %vm949_vm1, %v16417_v45  ;;  %14174 = vmatprep.subr.bf16.mxu0 %v15333_v46 }
0x195d   : > { %13086 = vmatprep.mubr.msk.f32.mxu0 %vm949_vm1, %v16425_v7 }
0x1960   : > { %13087 = vmatmul.mubr.msk.f32.gmra.mrb[36].mxu0 %vm949_vm1, %v16433_v49 }
0x1961   : > { %13097 = vmatprep.mubr.msk.f32.mxu0 %vm15331_vm0, %v15330_v0 }
0x1962   : > { %14177 = vmatpush3.bf16.xpose.msk.msra.mxu0 %vm15715_vm4, %v14175_v47  ;;  %v13110_v42 = vpop.f32.mrb[46].mxu1 }
0x1963   : > { %v4126_v13 = vpop.f32.mrb[47].mxu1  ;;  %14178 = vmatprep.subr.bf16.mxu0 %v15333_v46  ;;  %v4154_v63 = vmul.f32 2.0, %v13110_v42 }
0x1966   : > { %v13113_v58 = vpop.f32.mrb[48].mxu1 }
0x1967   : > { %v16442_v56 = vpop.f32.mrb[49].mxu1  ;;  %v4156_v15 = vmul.f32 2.0, %v13113_v58 }
0x196a   : > { %14181 = vmatpush3.bf16.xpose.msk.msra.mxu0 %vm15715_vm4, %v14179_v37 }
0x1971   : > { %13098 = vmatmul.mubr.msk.f32.vlgmr.msra.gmra.mrb[38].mxu0 %vm1338_vm3, %v15334_v53 }
0x1a2f   : > { %v13085_v41 = vpop.f32.mrb[34].mxu0 }
0x1a30   : > { %v16454_v57 = vmul.f32 %v16451_v9, %v13085_v41  ;;  %v3911_v31 = vpop.f32.mrb[35].mxu0  ;;  %v4153_v41 = vmul.f32 2.0, %v4126_v13 }
0x1a31   : > { %v16462_v62 = vmul.f32 %v16459_v21, %v3911_v31 }
0x1a33   : > { %v13088_v2 = vpop.f32.mrb[36].mxu0  ;;  %13122 = vmatprep.mubr.msk.f32.mxu0 %vm1129_vm2, %v16462_v62  ;;  %v16468_v60 = vpack.i.bf16 %v16454_v57, %v16462_v62 }
0x1a34   : > { %v16476_v51 = vmul.f32 %v16473_v24, %v13088_v2  ;;  %v3921_v29 = vpop.f32.mrb[37].mxu0 }
0x1a35   : > { %v16484_v8 = vmul.f32 %v16481_v4, %v3921_v29  ;;  %14843 = vrot.lane.b32.xlu1 %v16468_v60, %s15335_s7 }
0x1a37   : > { %v16490_v14 = vpack.i.bf16 %v16476_v51, %v16484_v8 }
0x1a39   : > { %14848 = vrot.lane.b32.xlu1 %v16490_v14, %s15335_s7 }
0x1a44   : > { %v4032_v20 = vpop.f32.mrb[38].mxu0 }
0x1a45   : > { %v4148_v50 = vrot.slane %v4032_v20, %v15815_v35  ;;  %v13099_v26 = vpop.f32.mrb[39].mxu0 }
0x1a47   : > { %v4150_v5 = vadd.f32 %v4148_v50, %v3947_v34  ;;  %v4152_v22 = vadd.f32 %v4148_v50, %v3953_v16  ;;  %v4155_v34 = vmul.f32 2.0, %v16442_v56 }
0x1a49   : > { %v4158_v25 = vsub.f32 %v4150_v5, %v4154_v63  ;;  %v4160_v39 = vsub.f32 %v4152_v22, %v4156_v15  ;;  %v4174_v15 = vpop.permute.xlu0 %4173 }
0x1a4b   : > { %v4187_v5 = vmul.f32 %v4174_v15, %v4158_v25 }
0x1a5d   : > { %3943 = vadd.xlane.f32.xlu1 %v3942_v11 }
0x1a61   : > { %3949 = vadd.xlane.f32.xlu1 %v3948_v19 }
0x1a72   : > { %4168 = vperm.xlu1 %14852, %v11719_v48  }
0x1a76   : > { %4178 = vperm.xlu1 %14852, %v11721_v17  }
0x1a7a   : > { %4183 = vperm.xlu1 %14852, %v11722_v38  }
0x1a7e   : > { %14864 = vset.pattern.permute.xlu1 %v15337_v3 }
0x1aa7   : > { %v14844_v37 = vpop.permute.xlu1 %14843 }
0x1aa8   : > { %v14846_v44 = vunpack.i.h.bf16 %v14844_v37  ;;  %v14845_v43 = vunpack.i.l.bf16 %v14844_v37  ;;  %v16527_v37 = vld [vmem:[%s15852_s6 + $0x8] sm:$0xff] }
0x1aaa   : > { %v14194_v6 = vpack.c.bf16 %v14846_v44, %v14845_v43  ;;  %v16531_v43 = vld [vmem:[%s15852_s6] sm:$0xff] }
0x1aab   : > { %v14849_v33 = vpop.permute.xlu1 %14848 }
0x1aac   : > { %14196 = vmatprep.subr.msk.bf16.mxu0 %vm15825_vm5, %v14194_v6  ;;  %v14851_v23 = vunpack.i.h.bf16 %v14849_v33  ;;  %v14850_v47 = vunpack.i.l.bf16 %v14849_v33 }
0x1aad   : > { %14199 = vmatpush3.bf16.xpose.msk.msra.mxu0 %vm15825_vm5, %v14194_v6 }
0x1aae   : > { %v14200_v42 = vpack.c.bf16 %v14851_v23, %v14850_v47 }
0x1ab0   : > { %14202 = vmatprep.subr.msk.bf16.mxu0 %vm15825_vm5, %v14200_v42 }
0x1ab5   : > { %14205 = vmatpush3.bf16.xpose.msk.msra.mxu0 %vm15825_vm5, %v14200_v42 }
0x1ab6   : > { %14220 = vmatprep.subr.bf16.mxu0 %v15333_v46 }
0x1abc   : > { %13123 = vmatmul.mubr.msk.f32.vlgmr.msra.gmra.mrb[40].mxu0 %vm1129_vm2, %v16454_v57 }
0x1abd   : > { %13125 = vmatprep.mubr.msk.f32.mxu0 %vm1129_vm2, %v16484_v8 }
0x1ac0   : > { %13126 = vmatmul.mubr.msk.f32.gmra.mrb[42].mxu0 %vm1129_vm2, %v16476_v51 }
0x1ac1   : > { %13161 = vmatprep.mubr.msk.f32.mxu0 %vm15331_vm0, %v15330_v0 }
0x1aea   : > { %v3944_v58 = vpop.xlane.xlu1 %3943 }
0x1aeb   : > { %v4149_v31 = vadd.f32 %v4148_v50, %v3944_v58 }
0x1aed   : > { %v4157_v2 = vsub.f32 %v4149_v31, %v4153_v41  ;;  %v16542_v31 = vld [vmem:[%s15852_s6 + $0x18] sm:$0xff] }
0x1aee   : > { %v3950_v29 = vpop.xlane.xlu1 %3949 }
0x1aef   : > { %v4151_v20 = vadd.f32 %v4148_v50, %v3950_v29 }
0x1af1   : > { %v4159_v26 = vsub.f32 %v4151_v20, %v4155_v34 }
0x1af2   : > { %v4169_v16 = vpop.permute.xlu1 %4168 }
0x1af3   : > { %v4186_v22 = vmul.f32 %v4169_v16, %v4157_v2 }
0x1af6   : > { %v4179_v63 = vpop.permute.xlu1 %4178 }
0x1af7   : > { %v4188_v50 = vmul.f32 %v4179_v63, %v4159_v26 }
0x1afa   : > { %v4184_v11 = vpop.permute.xlu1 %4183 }
0x1afb   : > { %v4189_v38 = vmul.f32 %v4184_v11, %v4160_v39  ;;  %v16537_v39 = vld [vmem:[%s15852_s6 + $0x10] sm:$0xff] }
0x1b8f   : > { %v13124_v19 = vpop.f32.mrb[40].mxu0 }
0x1b90   : > { %v4290_v48 = vadd.f32 %v13124_v19, %v4187_v5  ;;  %v4284_v17 = vpop.f32.mrb[41].mxu0 }
0x1b91   : > { %v4285_v13 = vadd.f32 %v4284_v17, %v4186_v22 }
0x1b92   : > { %v4304_v56 = vadd.f32 %v16527_v37, %v4290_v48 }
0x1b93   : > { %v13127_v44 = vpop.f32.mrb[42].mxu0  ;;  %v4303_v6 = vadd.f32 %v16531_v43, %v4285_v13 }
0x1b94   : > { %v4300_v25 = vadd.f32 %v13127_v44, %v4189_v38  ;;  %v4294_v33 = vpop.f32.mrb[43].mxu0  ;;  %v4310_v23 = vsel %vm1129_vm2, %v4304_v56, -inf }
0x1b95   : > { %v4295_v47 = vadd.f32 %v4294_v33, %v4188_v50  ;;  %4311 = vmax.xlane.f32.xlu0 %v4310_v23  ;;  %v4307_v42 = vsel %vm1129_vm2, %v4303_v6, -inf }
0x1b96   : > { %4308 = vmax.xlane.f32.xlu1 %v4307_v42  ;;  %v4306_v2 = vadd.f32 %v16542_v31, %v4300_v25 }
0x1b97   : > { %v4305_v58 = vadd.f32 %v16537_v39, %v4295_v47 }
0x1b98   : > { %v4316_v29 = vsel %vm1129_vm2, %v4306_v2, -inf }
0x1b99   : > { %v4313_v41 = vsel %vm1129_vm2, %v4305_v58, -inf }
0x1b9a   : > { %4314 = vmax.xlane.f32.xlu1 %v4313_v41 }
0x1b9e   : > { %4317 = vmax.xlane.f32.xlu1 %v4316_v29 }
0x1c22   : > { %v4312_v34 = vpop.xlane.xlu0 %4311 }
0x1c23   : > { %v4320_v20 = vsub.f32 %v4304_v56, %v4312_v34  ;;  %v4309_v26 = vpop.xlane.xlu1 %4308 }
0x1c24   : > { %v4319_v16 = vsub.f32 %v4303_v6, %v4309_v26 }
0x1c25   : > { %v4325_v63 = vmul.f32 1.442695, %v4320_v20 }
0x1c26   : > { %v4323_v15 = vmul.f32 1.442695, %v4319_v16 }
0x1c27   : > { %15026 = vpow2.f32 %v4325_v63  ;;  %v4315_v5 = vpop.xlane.xlu1 %4314 }
0x1c28   : > { %v4321_v22 = vsub.f32 %v4305_v58, %v4315_v5  ;;  %15028 = vpow2.f32 %v4323_v15 }
0x1c2a   : > { %v4327_v11 = vmul.f32 1.442695, %v4321_v22 }
0x1c2b   : > { %v4318_v19 = vpop.xlane.xlu1 %4317 }
0x1c2c   : > { %v4322_v48 = vsub.f32 %v4306_v2, %v4318_v19  ;;  %15030 = vpow2.f32 %v4327_v11 }
0x1c2e   : > { %v4329_v17 = vmul.f32 1.442695, %v4322_v48 }
0x1c30   : > { %15032 = vpow2.f32 %v4329_v17  ;;  %v11736_v17 = vld [vmem:[%s18327_s16 + $0x40] sm:$0xff] }
0x1c31   : > { %v15027_v13 = vpop.eup %15026 }
0x1c32   : > { %v4334_v38 = vsel %vm1129_vm2, %v15027_v13, 0.0  ;;  %v15029_v50 = vpop.eup %15028 }
0x1c33   : > { %4335 = vadd.xlane.f32.xlu1 %v4334_v38  ;;  %v4331_v56 = vsel %vm1129_vm2, %v15029_v50, 0.0  ;;  %v11738_v38 = vld [vmem:[%s18327_s16 + $0x50] sm:$0xff] }
0x1c36   : > { %v15031_v44 = vpop.eup %15030 }
0x1c37   : > { %4332 = vadd.xlane.f32.xlu1 %v4331_v56  ;;  %v4337_v25 = vsel %vm1129_vm2, %v15031_v44, 0.0  ;;  %v11739_v56 = vld [vmem:[%s18327_s16 + $0x58] sm:$0xff] }
0x1c3a   : > { %v15033_v6 = vpop.eup %15032 }
0x1c3b   : > { %4338 = vadd.xlane.f32.xlu1 %v4337_v25  ;;  %v4340_v33 = vsel %vm1129_vm2, %v15033_v6, 0.0 }
0x1c3c   : > { %4341 = vadd.xlane.f32.xlu0 %v4340_v33 }
0x1c4c   : > { %14855 = vrot.lane.b32.xlu1 %v16468_v60, %s18410_s11 }
0x1c52   : > { %14860 = vrot.lane.b32.xlu0 %v16490_v14, %s18410_s11 }
0x1cc0   : > { %v4336_v23 = vpop.xlane.xlu1 %4335 }
0x1cc4   : > { %v4333_v47 = vpop.xlane.xlu1 %4332 }
0x1cc5   : > { %15034 = vrcp.f32 %v4333_v47 }
0x1cc6   : > { %15036 = vrcp.f32 %v4336_v23 }
0x1cc8   : > { %v4339_v42 = vpop.xlane.xlu1 %4338 }
0x1cc9   : > { %v4342_v58 = vpop.xlane.xlu0 %4341  ;;  %15038 = vrcp.f32 %v4339_v42 }
0x1cca   : > { %15040 = vrcp.f32 %v4342_v58  ;;  %v14226_v58 = vpack.c.bf16 %v16349_v54, %v16334_v10 }
0x1ccc   : > { %v14856_v41 = vpop.permute.xlu1 %14855 }
0x1ccd   : > { %v14858_v2 = vunpack.i.h.bf16 %v14856_v41  ;;  %v14857_v29 = vunpack.i.l.bf16 %v14856_v41  ;;  %v14861_v34 = vpop.permute.xlu0 %14860  ;;  %v16580_v41 = vld [vmem:[%s18407_s3] sm:$0xff] }
0x1cce   : > { %v14863_v20 = vunpack.i.h.bf16 %v14861_v34  ;;  %v14862_v26 = vunpack.i.l.bf16 %v14861_v34 }
0x1ccf   : > { %v15035_v16 = vpop.eup %15034  ;;  %v14206_v63 = vpack.c.bf16 %v14858_v2, %v14857_v29  ;;  %v14230_v2 = vpack.c.bf16 %v16377_v27, %v16364_v18 }
0x1cd0   : > { %v14210_v60 = vpack.c.bf16 %v14863_v20, %v14862_v26  ;;  %v4347_v15 = vmul.f32 %v15035_v16, %v15029_v50  ;;  %v15037_v14 = vpop.eup %15036  ;;  %v16597_v20 = vld [vmem:[%s18408_s10] sm:$0xff] }
0x1cd1   : > { %14207 = vmatprep.subr.bf16.mxu1 %v14206_v63  ;;  %v4348_v22 = vmul.f32 %v15037_v14, %v15027_v13  ;;  %v11737_v13 = vld [vmem:[%s18327_s16 + $0x48] sm:$0xff] }
0x1cd2   : > { %14209 = vmatpush3.bf16.msra.mxu1 %v14206_v63  ;;  %13136 = vmatprep.mubr.msk.f32.mxu1 %vm1129_vm2, %v4347_v15  ;;  %v14221_v50 = vpack.c.bf16 %v11737_v13, %v11736_v17 }
0x1cd3   : > { %14211 = vmatprep.subr.bf16.mxu1 %v14210_v60  ;;  %v15039_v5 = vpop.eup %15038 }
0x1cd4   : > { %v15041_v11 = vpop.eup %15040  ;;  %v4349_v19 = vmul.f32 %v15039_v5, %v15031_v44  ;;  %14222 = vmatpush3.bf16.msra.mxu0 %v14221_v50  ;;  %v14224_v44 = vpack.c.bf16 %v11739_v56, %v11738_v38  ;;  %v16605_v5 = vld [vmem:[%s18408_s10 + $0x8] sm:$0xff] }
0x1cd5   : > { %v4350_v48 = vmul.f32 %v15041_v11, %v15033_v6  ;;  %14223 = vmatprep.subr.bf16.mxu0 %v15333_v46  ;;  %v16619_v11 = vld [vmem:[%s18408_s10 + $0x18] sm:$0xff] }
0x1cd6   : > { %14213 = vmatpush3.bf16.msra.mxu1 %v14210_v60 }
0x1cd7   : > { %14214 = vmatprep.subr.bf16.mxu1 %v15333_v46 }
0x1cd8   : > { %14225 = vmatpush3.bf16.msra.mxu0 %v14224_v44 }
0x1cd9   : > { %13137 = vmatmul.mubr.msk.f32.vlgmr.msra.gmra.mrb[50].mxu1 %vm1129_vm2, %v4348_v22 }
0x1cda   : > { %13139 = vmatprep.mubr.msk.f32.mxu1 %vm1129_vm2, %v4349_v19 }
0x1cdd   : > { %13140 = vmatmul.mubr.msk.f32.gmra.mrb[52].mxu1 %vm1129_vm2, %v4350_v48 }
0x1cde   : > { %13150 = vmatprep.mubr.msk.f32.mxu1 %vm15331_vm0, %v15330_v0 }
0x1dac   : > { %v13138_v6 = vpop.f32.mrb[50].mxu1 }
0x1dad   : > { %v4441_v25 = vpop.f32.mrb[51].mxu1 }
0x1dae   : > { %v14215_v33 = vpack.c.bf16 %v13138_v6, %v4441_v25 }
0x1db0   : > { %v13141_v23 = vpop.f32.mrb[52].mxu1  ;;  %14216 = vmatpush3.bf16.msra.mxu1 %v14215_v33 }
0x1db1   : > { %v4451_v47 = vpop.f32.mrb[53].mxu1  ;;  %14217 = vmatprep.subr.bf16.mxu1 %v15333_v46 }
0x1db2   : > { %v14218_v42 = vpack.c.bf16 %v13141_v23, %v4451_v47 }
0x1db4   : > { %14219 = vmatpush3.bf16.msra.mxu1 %v14218_v42  ;;  %v4844_v42 = vld [vmem:[#allocation5 + $0x40] sm:$0xff] }
0x1db5   : > { %14227 = vmatprep.subr.bf16.mxu1 %v14226_v58 }
0x1db7   : > { %13151 = vmatmul.mubr.msk.f32.vlgmr.msra.gmra.mrb[54].mxu1 %vm1129_vm2, %v16580_v41 }
0x1db8   : > { %14229 = vmatpush3.bf16.msra.mxu1 %v14226_v58  ;;  %13172 = vmatprep.mubr.msk.f32.mxu1 %vm1129_vm2, %v4347_v15  ;;  %v4845_v58 = vld [vmem:[#allocation5 + $0x48] sm:$0xff] }
0x1db9   : > { %14231 = vmatprep.subr.bf16.mxu1 %v14230_v2 }
0x1dbc   : > { %14233 = vmatpush3.bf16.msra.mxu1 %v14230_v2  ;;  %v14243_v2 = vpack.c.bf16 %v4845_v58, %v4844_v42  ;;  %v11751_v42 = vld [vmem:[%s18328_s17 + $0x2] ss:$0 sm:$0xff] }
0x1dbd   : > { %14242 = vmatprep.subr.bf16.mxu1 %v15333_v46 }
0x1dbf   : > { %13173 = vmatmul.mubr.msk.f32.vlgmr.msra.gmra.mrb[56].mxu1 %vm1129_vm2, %v4348_v22  ;;  %v16612_v22 = vld [vmem:[%s18408_s10 + $0x10] sm:$0xff] }
0x1dc0   : > { %13175 = vmatprep.mubr.msk.f32.mxu1 %vm1129_vm2, %v4349_v19  ;;  %14244 = vmatpush3.bf16.msra.mxu1 %v14243_v2  ;;  %v11752_v2 = vld [vmem:[%s18329_s18 + $0x2] ss:$0 sm:$0xff] }
0x1dc1   : > { %14245 = vmatprep.subr.bf16.mxu1 %v15333_v46 }
0x1dc3   : > { %13176 = vmatmul.mubr.msk.f32.gmra.mrb[58].mxu1 %vm1129_vm2, %v4350_v48 }
0x1dc4   : > { %13200 = vmatprep.mubr.msk.f32.mxu1 %vm15331_vm0, %v15330_v0 }
0x1e8a   : > { %v4526_v29 = vpop.f32.mrb[54].mxu1 }
0x1e8b   : > { %v13152_v34 = vpop.f32.mrb[55].mxu1  ;;  %13162 = vmatmul.mubr.msk.f32.vlgmr.msra.gmra.mrb[44].mxu0 %vm1129_vm2, %v4526_v29  ;;  %v4846_v29 = vld [vmem:[#allocation5 + $0x50] sm:$0xff] }
0x1e8c   : > { %13186 = vmatprep.mubr.msk.f32.mxu0 %vm1129_vm2, %v16597_v20  ;;  %v4847_v34 = vld [vmem:[#allocation5 + $0x58] sm:$0xff] }
0x1e92   : > { %v13174_v26 = vpop.f32.mrb[56].mxu1 }
0x1e93   : > { %v4676_v16 = vpop.f32.mrb[57].mxu1 }
0x1e94   : > { %v14234_v63 = vpack.c.bf16 %v13174_v26, %v4676_v16  ;;  %v14246_v26 = vpack.c.bf16 %v4847_v34, %v4846_v29  ;;  %v11756_v16 = vld [vmem:[%s18332_s21 + $0x80] sm:$0xff] }
0x1e96   : > { %v13177_v60 = vpop.f32.mrb[58].mxu1  ;;  %14235 = vmatprep.subr.bf16.mxu0 %v14234_v63  ;;  %14247 = vmatpush3.bf16.msra.mxu1 %v14246_v26  ;;  %v11762_v26 = vld [vmem:[%s18332_s21 + $0xb0] sm:$0xff] }
0x1e97   : > { %v4686_v15 = vpop.f32.mrb[59].mxu1  ;;  %14237 = vmatpush3.bf16.msra.mxu0 %v14234_v63  ;;  %14260 = vmatprep.subr.bf16.mxu1 %v15333_v46  ;;  %v11757_v63 = vld [vmem:[%s18332_s21 + $0x88] sm:$0xff] }
0x1e98   : > { %v14238_v14 = vpack.c.bf16 %v13177_v60, %v4686_v15  ;;  %v11758_v60 = vld [vmem:[%s18332_s21 + $0x90] sm:$0xff]  ;;  %v14249_v15 = vpack.c.bf16 %v11757_v63, %v11756_v16  ;;  %v11763_v16 = vld [vmem:[%s18332_s21 + $0xb8] sm:$0xff]  ;;  %v11754_v63 = vld [vmem:[%s18331_s20 + $0x2] ss:$0 sm:$0xff] }
0x1e9a   : > { %14239 = vmatprep.subr.bf16.mxu0 %v14238_v14 }
0x1e9b   : > { %14241 = vmatpush3.bf16.msra.mxu0 %v14238_v14  ;;  %v11759_v14 = vld [vmem:[%s18332_s21 + $0x98] sm:$0xff] }
0x1e9c   : > { %14248 = vmatprep.subr.bf16.mxu0 %v15333_v46 }
0x1e9e   : > { %13187 = vmatmul.mubr.msk.f32.vlgmr.msra.gmra.mrb[46].mxu0 %vm1129_vm2, %v16605_v5 }
0x1e9f   : > { %13189 = vmatprep.mubr.msk.f32.mxu0 %vm1129_vm2, %v16612_v22  ;;  %14250 = vmatpush3.bf16.msra.mxu0 %v14249_v15 }
0x1ea0   : > { %14251 = vmatprep.subr.bf16.mxu0 %v15333_v46 }
0x1ea2   : > { %13190 = vmatmul.mubr.msk.f32.gmra.mrb[48].mxu0 %vm1129_vm2, %v16619_v11 }
0x1ea3   : > { %13219 = vmatprep.mubr.msk.f32.mxu0 %vm15331_vm0, %v15330_v0 }
0x1f5e   : > { %v4604_v19 = vpop.f32.mrb[44].mxu0 }
0x1f5f   : > { %v4608_v48 = vmul.f32 %v4604_v19, %v15657_v12  ;;  %v13163_v17 = vpop.f32.mrb[45].mxu0  ;;  %v14252_v19 = vpack.c.bf16 %v11759_v14, %v11758_v60 }
0x1f60   : > { %v11761_v17 = vld [vmem:[%s18332_s21 + $0xa8] sm:$0xff] }
0x1f61   : > { %v16627_v13 = vadd.f32 %v4608_v48, %v16322_v40  ;;  %v11760_v48 = vld [vmem:[%s18332_s21 + $0xa0] sm:$0xff]  ;;  %14253 = vmatpush3.bf16.msra.mxu0 %v14252_v19 }
0x1f62   : > { %14254 = vmatprep.subr.bf16.mxu0 %v15333_v46 }
0x1f63   : > { %v4816_v38 = vsel %vm1129_vm2, %v16627_v13, 0.0 }
0x1f64   : > { %4817 = vadd.xlane.f32.xlu1 %v4816_v38  ;;  %v14255_v38 = vpack.c.bf16 %v11761_v17, %v11760_v48  ;;  %v11765_v48 = vld [vmem:[%s18333_s22 + $0x2] ss:$0 sm:$0xff] }
0x1f66   : > { %14256 = vmatpush3.bf16.msra.mxu0 %v14255_v38 }
0x1f67   : > { %14257 = vmatprep.subr.bf16.mxu0 %v15333_v46 }
0x1f71   : > { %v16631_v50 = vpop.f32.mrb[46].mxu0 }
0x1f72   : > { %v16633_v56 = vpop.f32.mrb[47].mxu0 }
0x1f75   : > { %v16635_v44 = vpop.f32.mrb[48].mxu0 }
0x1f76   : > { %v16637_v6 = vpop.f32.mrb[49].mxu0 }
0x1ff1   : > { %v4818_v25 = vpop.xlane.xlu1 %4817 }
0x1ff2   : > { %v4819_v33 = vmul.f32 0.03125, %v4818_v25 }
0x1ff4   : > { %v4820_v23 = vsub.f32 %v16627_v13, %v4819_v33 }
0x1ff6   : > { %v4821_v47 = vmul.f32 %v4820_v23, %v4820_v23 }
0x1ff8   : > { %v4822_v40 = vsel %vm1129_vm2, %v4821_v47, 0.0 }
0x1ff9   : > { %4823 = vadd.xlane.f32.xlu0 %v4822_v40 }
0x2086   : > { %v4824_v25 = vpop.xlane.xlu0 %4823 }
0x2087   : > { %v4825_v33 = vmul.f32 0.03125, %v4824_v25 }
0x2089   : > { %v4826_v47 = vadd.f32 1e-05, %v4825_v33 }
0x208b   : > { %15042 = vrsqrt.f32 %v4826_v47 }
0x2095   : > { %v15043_v40 = vpop.eup %15042 }
0x2096   : > { %v4828_v58 = vmul.f32 %v15043_v40, %v4820_v23  ;;  %v14258_v23 = vpack.c.bf16 %v11763_v16, %v11762_v26  ;;  %v4782_v16 = vsub.f32 %v16364_v18, %v16637_v6 }
0x2098   : > { %v4835_v29 = vmul.f32 %v11751_v42, %v4828_v58  ;;  %14259 = vmatpush3.bf16.msra.mxu0 %v14258_v23 }
0x209a   : > { %v4842_v34 = vadd.f32 %v11752_v2, %v4835_v29  ;;  %v4780_v2 = vsub.f32 %v16334_v10, %v16633_v56  ;;  %v4783_v56 = vsub.f32 %v16377_v27, %v16635_v44 }
0x209c   : > { %13201 = vmatmul.mubr.msk.f32.vlgmr.msra.gmra.mrb[60].mxu1 %vm1129_vm2, %v4842_v34 }
0x209d   : > { %13230 = vmatprep.mubr.msk.f32.mxu1 %vm15331_vm0, %v15330_v0 }
0x216f   : > { %v4925_v60 = vpop.f32.mrb[60].mxu1 }
0x2170   : > { %v4926_v15 = vadd.f32 %v11754_v63, %v4925_v60  ;;  %v13202_v14 = vpop.f32.mrb[61].mxu1 }
0x2172   : > { %v4929_v19 = vmax.f32 %v4926_v15, 0.0 }
0x2174   : > { %13220 = vmatmul.mubr.msk.f32.vlgmr.msra.gmra.mrb[50].mxu0 %vm2374_vm6, %v4929_v19 }
0x2247   : > { %v5016_v17 = vpop.f32.mrb[50].mxu0 }
0x2248   : > { %v5017_v38 = vadd.f32 %v11765_v48, %v5016_v17  ;;  %v13221_v25 = vpop.f32.mrb[51].mxu0 }
0x2249   : > { %v5054_v25 = vld [vmem:[#allocation2 + $0x60] sm:$0xff] }
0x224a   : > { %v5020_v33 = vmul.f32 %v5017_v38, %v15657_v12 }
0x224c   : > { %v16688_v47 = vadd.f32 %v5020_v33, %v16627_v13 }
0x224e   : > { %v5026_v40 = vsel %vm1129_vm2, %v16688_v47, 0.0 }
0x224f   : > { %5027 = vadd.xlane.f32.xlu1 %v5026_v40  ;;  %v5056_v40 = vld [vmem:[#allocation2 + $0x70] sm:$0xff] }
0x2260   : > { %4785 = vperm.xlu1 %14864, %v16462_v62  }
0x2264   : > { %4793 = vperm.xlu1 %14864, %v16484_v8  }
0x2268   : > { %4797 = vperm.xlu1 %14864, %v16476_v51  }
0x226c   : > { %14877 = vset.pattern.permute.xlu1 %v15332_v1 }
0x22dc   : > { %v5028_v42 = vpop.xlane.xlu1 %5027 }
0x22dd   : > { %v5029_v58 = vmul.f32 0.03125, %v5028_v42  ;;  %v5057_v42 = vld [vmem:[#allocation2 + $0x78] sm:$0xff] }
0x22df   : > { %v5030_v13 = vsub.f32 %v16688_v47, %v5029_v58  ;;  %v14264_v58 = vpack.c.bf16 %v5057_v42, %v5056_v40 }
0x22e0   : > { %v4786_v29 = vpop.permute.xlu1 %4785 }
0x22e1   : > { %v4800_v34 = vmul.f32 %v4786_v29, %v4780_v2  ;;  %v5031_v26 = vmul.f32 %v5030_v13, %v5030_v13 }
0x22e3   : > { %v4804_v62 = vmul.f32 %v4800_v34, %v16046_v28  ;;  %v5032_v8 = vsel %vm1129_vm2, %v5031_v26, 0.0  ;;  %v4781_v26 = vsub.f32 %v16349_v54, %v16631_v50 }
0x22e4   : > { %5033 = vadd.xlane.f32.xlu0 %v5032_v8  ;;  %v4794_v51 = vpop.permute.xlu1 %4793 }
0x22e5   : > { %v16704_v23 = vadd.f32 %v4804_v62, %v16334_v10  ;;  %v4802_v63 = vmul.f32 %v4794_v51, %v4782_v16 }
0x22e7   : > { %v4806_v60 = vmul.f32 %v4802_v63, %v16059_v30  ;;  %13260 = vmatprep.mubr.msk.f32.mxu0 %vm1338_vm3, %v16704_v23  ;;  %v5220_v63 = vmul.f32 %v16357_v55, %v16704_v23 }
0x22e8   : > { %v4798_v15 = vpop.permute.xlu1 %4797 }
0x22e9   : > { %v16712_v6 = vadd.f32 %v4806_v60, %v16364_v18  ;;  %v4803_v14 = vmul.f32 %v4798_v15, %v4783_v56  ;;  %v11769_v60 = vld [vmem:[%s18323_s12 + $0x3] ss:$0 sm:$0xff] }
0x22eb   : > { %v4807_v19 = vmul.f32 %v4803_v14, %v16069_v32  ;;  %v5222_v10 = vmul.f32 %v16357_v55, %v16712_v6 }
0x22ed   : > { %v16716_v48 = vadd.f32 %v4807_v19, %v16377_v27  ;;  %v16723_v17 = vmul.f32 %v5222_v10, %v16712_v6  ;;  %v5055_v27 = vld [vmem:[#allocation2 + $0x68] sm:$0xff] }
0x22ee   : > { %v14261_v33 = vpack.c.bf16 %v5055_v27, %v5054_v25 }
0x22ef   : > { %v5223_v44 = vmul.f32 %v16357_v55, %v16716_v48 }
0x22f0   : > { %14262 = vmatpush3.bf16.msra.mxu1 %v14261_v33 }
0x22f1   : > { %v16726_v38 = vmul.f32 %v5223_v44, %v16716_v48  ;;  %14263 = vmatprep.subr.bf16.mxu1 %v15333_v46  ;;  %v14280_v27 = vpack.c.bf16 %v5223_v44, %v5222_v10 }
0x22f3   : > { %v14271_v18 = vpack.c.bf16 %v16726_v38, %v16723_v17 }
0x22f4   : > { %14265 = vmatpush3.bf16.msra.mxu1 %v14264_v58 }
0x22fa   : > { %4789 = vperm.xlu0 %14865, %v16454_v57  }
0x22fe   : > { %14876 = vset.pattern.permute.xlu0 %v15332_v1 }
0x2371   : > { %v5034_v2 = vpop.xlane.xlu0 %5033 }
0x2372   : > { %v5035_v29 = vmul.f32 0.03125, %v5034_v2 }
0x2374   : > { %v5036_v34 = vadd.f32 1e-05, %v5035_v29 }
0x2376   : > { %15044 = vrsqrt.f32 %v5036_v34 }
0x2379   : > { %v4790_v57 = vpop.permute.xlu0 %4789 }
0x237a   : > { %v4801_v16 = vmul.f32 %v4790_v57, %v4781_v26 }
0x237c   : > { %v4805_v62 = vmul.f32 %v4801_v16, %v16052_v59 }
0x237e   : > { %v16737_v8 = vadd.f32 %v4805_v62, %v16349_v54  ;;  %v11770_v54 = vld [vmem:[%s18324_s13 + $0x3] ss:$0 sm:$0xff] }
0x2380   : > { %v15045_v51 = vpop.eup %15044  ;;  %v5221_v56 = vmul.f32 %v16357_v55, %v16737_v8 }
0x2381   : > { %v5038_v15 = vmul.f32 %v15045_v51, %v5030_v13 }
0x2382   : > { %v14274_v50 = vpack.c.bf16 %v5221_v56, %v5220_v63  ;;  %v5225_v14 = vmul.f32 %v5221_v56, %v16737_v8 }
0x2383   : > { %v5045_v19 = vmul.f32 %v11769_v60, %v5038_v15  ;;  %v5234_v15 = vsel %vm1338_vm3, %v16723_v17, 0.0 }
0x2384   : > { %14276 = vmatprep.subr.msk.bf16.mxu0 %vm15715_vm4, %v14274_v50  ;;  %v5231_v25 = vsel %vm1338_vm3, %v5225_v14, 0.0 }
0x2385   : > { %5232 = vadd.xlane.f32.xlu0 %v5231_v25  ;;  %14279 = vmatpush3.bf16.xpose.msk.msra.mxu0 %vm15715_vm4, %v14274_v50  ;;  %v5052_v55 = vadd.f32 %v11770_v54, %v5045_v19  ;;  %v5237_v50 = vsel %vm1338_vm3, %v16726_v38, 0.0  ;;  %v11791_v54 = vld [vmem:[%s18326_s15 + $0x70] sm:$0xff]  ;;  %v11792_v19 = vld [vmem:[%s18326_s15 + $0x78] sm:$0xff] }
0x2386   : > { %14282 = vmatprep.subr.msk.bf16.mxu0 %vm15715_vm4, %v14280_v27 }
0x2387   : > { %13231 = vmatmul.mubr.msk.f32.vlgmr.msra.gmra.mrb[62].mxu1 %vm1129_vm2, %v5052_v55 }
0x2388   : > { %13235 = vmatprep.mubr.msk.f32.mxu1 %vm949_vm1, %v16398_v36  ;;  %v5224_v36 = vmul.f32 %v5220_v63, %v16704_v23 }
0x238a   : > { %v14267_v44 = vpack.c.bf16 %v5225_v14, %v5224_v36  ;;  %v11790_v14 = vld [vmem:[%s18326_s15 + $0x68] sm:$0xff] }
0x238d   : > { %14285 = vmatpush3.bf16.xpose.msk.msra.mxu0 %vm15715_vm4, %v14280_v27 }
0x2394   : > { %13261 = vmatmul.mubr.msk.f32.vlgmr.msra.gmra.mrb[52].mxu0 %vm1338_vm3, %v16737_v8 }
0x2395   : > { %13263 = vmatprep.mubr.msk.f32.mxu0 %vm1338_vm3, %v16712_v6 }
0x2398   : > { %13264 = vmatmul.mubr.msk.f32.gmra.mrb[54].mxu0 %vm1338_vm3, %v16716_v48 }
0x245a   : > { %v5127_v13 = vpop.f32.mrb[62].mxu1 }
0x245b   : > { %v13232_v10 = vpop.f32.mrb[63].mxu1  ;;  %13233 = vmatprep.subr.mxu1 %v5127_v13 }
0x245c   : > { %13234 = vmatpush3.msra.mxu1 %v5127_v13 }
0x245d   : > { %13236 = vmatmul.mubr.msk.f32.vlgmr.msra.gmra.mrb[64].mxu1 %vm949_vm1, %v16417_v45  ;;  %14266 = vmatprep.subr.bf16.mxu1 %v15333_v46 }
0x245e   : > { %13238 = vmatprep.mubr.msk.f32.mxu1 %vm949_vm1, %v16425_v7 }
0x2461   : > { %13239 = vmatmul.mubr.msk.f32.gmra.mrb[66].mxu1 %vm949_vm1, %v16433_v49  ;;  %v11789_v49 = vld [vmem:[%s18326_s15 + $0x60] sm:$0xff] }
0x2462   : > { %13249 = vmatprep.mubr.msk.f32.mxu1 %vm15331_vm0, %v15330_v0  ;;  %5454 = vperm.xlu0 %14876, %v11789_v49  }
0x2463   : > { %14269 = vmatpush3.bf16.xpose.msk.msra.mxu1 %vm15715_vm4, %v14267_v44 }
0x2464   : > { %14270 = vmatprep.subr.bf16.mxu1 %v15333_v46 }
0x2466   : > { %14888 = vset.pattern.permute.xlu0 %v15337_v3 }
0x2467   : > { %v13262_v45 = vpop.f32.mrb[52].mxu0 }
0x2468   : > { %v5412_v33 = vpop.f32.mrb[53].mxu0  ;;  %v5440_v63 = vmul.f32 2.0, %v13262_v45 }
0x2469   : > { %v5439_v45 = vmul.f32 2.0, %v5412_v33 }
0x246b   : > { %14273 = vmatpush3.bf16.xpose.msk.msra.mxu1 %vm15715_vm4, %v14271_v18  ;;  %v16783_v7 = vpop.f32.mrb[54].mxu0 }
0x246c   : > { %v5422_v40 = vpop.f32.mrb[55].mxu0 }
0x2472   : > { %13250 = vmatmul.mubr.msk.f32.vlgmr.msra.gmra.mrb[68].mxu1 %vm1338_vm3, %v15334_v53 }
0x2530   : > { %v13237_v42 = vpop.f32.mrb[64].mxu1 }
0x2531   : > { %v16792_v58 = vmul.f32 %v16451_v9, %v13237_v42  ;;  %v5197_v2 = vpop.f32.mrb[65].mxu1 }
0x2532   : > { %v16795_v18 = vmul.f32 %v16459_v21, %v5197_v2 }
0x2534   : > { %v13240_v29 = vpop.f32.mrb[66].mxu1  ;;  %13274 = vmatprep.mubr.msk.f32.mxu1 %vm1129_vm2, %v16795_v18  ;;  %v16801_v34 = vpack.i.bf16 %v16792_v58, %v16795_v18 }
0x2535   : > { %v16804_v26 = vmul.f32 %v16473_v24, %v13240_v29  ;;  %v5207_v57 = vpop.f32.mrb[67].mxu1  ;;  %v5233_v24 = vpop.xlane.xlu0 %5232  ;;  %v5441_v29 = vmul.f32 2.0, %v5422_v40 }
0x2536   : > { %v16807_v16 = vmul.f32 %v16481_v4, %v5207_v57  ;;  %14867 = vrot.lane.b32.xlu1 %v16801_v34, %s15335_s7  ;;  %v5228_v4 = vsel %vm1338_vm3, %v5224_v36, 0.0 }
0x2538   : > { %v16813_v9 = vpack.i.bf16 %v16804_v26, %v16807_v16 }
0x253a   : > { %14872 = vrot.lane.b32.xlu1 %v16813_v9, %s15335_s7 }
0x2545   : > { %v5318_v21 = vpop.f32.mrb[68].mxu1 }
0x2546   : > { %v5434_v62 = vrot.slane %v5318_v21, %v15815_v35  ;;  %v13251_v51 = vpop.f32.mrb[69].mxu1 }
0x2548   : > { %v5436_v56 = vadd.f32 %v5434_v62, %v5233_v24  ;;  %v5442_v24 = vmul.f32 2.0, %v16783_v7 }
0x254a   : > { %v5444_v60 = vsub.f32 %v5436_v56, %v5440_v63 }
0x255e   : > { %5229 = vadd.xlane.f32.xlu1 %v5228_v4 }
0x2562   : > { %5235 = vadd.xlane.f32.xlu1 %v5234_v15 }
0x2566   : > { %5238 = vadd.xlane.f32.xlu1 %v5237_v50  ;;  %v5455_v50 = vpop.permute.xlu0 %5454 }
0x2577   : > { %5459 = vperm.xlu1 %14877, %v11790_v14  }
0x257b   : > { %5464 = vperm.xlu1 %14877, %v11791_v54  }
0x257f   : > { %5469 = vperm.xlu1 %14877, %v11792_v19  }
0x2583   : > { %14889 = vset.pattern.permute.xlu1 %v15337_v3 }
0x25a8   : > { %v14868_v17 = vpop.permute.xlu1 %14867 }
0x25a9   : > { %v14870_v38 = vunpack.i.h.bf16 %v14868_v17  ;;  %v14869_v25 = vunpack.i.l.bf16 %v14868_v17 }
0x25ab   : > { %v14286_v27 = vpack.c.bf16 %v14870_v38, %v14869_v25 }
0x25ac   : > { %v14873_v55 = vpop.permute.xlu1 %14872 }
0x25ad   : > { %14288 = vmatprep.subr.msk.bf16.mxu1 %vm15825_vm5, %v14286_v27  ;;  %v14875_v13 = vunpack.i.h.bf16 %v14873_v55  ;;  %v14874_v10 = vunpack.i.l.bf16 %v14873_v55 }
0x25ae   : > { %14291 = vmatpush3.bf16.xpose.msk.msra.mxu1 %vm15825_vm5, %v14286_v27 }
0x25af   : > { %v14292_v36 = vpack.c.bf16 %v14875_v13, %v14874_v10 }
0x25b1   : > { %14294 = vmatprep.subr.msk.bf16.mxu1 %vm15825_vm5, %v14292_v36 }
0x25b6   : > { %14297 = vmatpush3.bf16.xpose.msk.msra.mxu1 %vm15825_vm5, %v14292_v36 }
0x25b7   : > { %14312 = vmatprep.subr.bf16.mxu1 %v15333_v46 }
0x25bd   : > { %13275 = vmatmul.mubr.msk.f32.vlgmr.msra.gmra.mrb[70].mxu1 %vm1129_vm2, %v16792_v58 }
0x25be   : > { %13277 = vmatprep.mubr.msk.f32.mxu1 %vm1129_vm2, %v16807_v16 }
0x25c1   : > { %13278 = vmatmul.mubr.msk.f32.gmra.mrb[72].mxu1 %vm1129_vm2, %v16804_v26 }
0x25c2   : > { %13313 = vmatprep.mubr.msk.f32.mxu1 %vm15331_vm0, %v15330_v0 }
0x25eb   : > { %v5230_v44 = vpop.xlane.xlu1 %5229 }
0x25ec   : > { %v5435_v49 = vadd.f32 %v5434_v62, %v5230_v44 }
0x25ee   : > { %v5443_v42 = vsub.f32 %v5435_v49, %v5439_v45 }
0x25ef   : > { %v5236_v2 = vpop.xlane.xlu1 %5235 }
0x25f0   : > { %v5437_v57 = vadd.f32 %v5434_v62, %v5236_v2  ;;  %v5472_v54 = vmul.f32 %v5455_v50, %v5443_v42 }
0x25f2   : > { %v5445_v21 = vsub.f32 %v5437_v57, %v5441_v29 }
0x25f3   : > { %v5239_v51 = vpop.xlane.xlu1 %5238 }
0x25f4   : > { %v5438_v63 = vadd.f32 %v5434_v62, %v5239_v51 }
0x25f6   : > { %v5446_v56 = vsub.f32 %v5438_v63, %v5442_v24 }
0x25f7   : > { %v5460_v4 = vpop.permute.xlu1 %5459 }
0x25f8   : > { %v5473_v14 = vmul.f32 %v5460_v4, %v5444_v60 }
0x25fb   : > { %v5465_v15 = vpop.permute.xlu1 %5464 }
0x25fc   : > { %v5474_v55 = vmul.f32 %v5465_v15, %v5445_v21 }
0x25ff   : > { %v5470_v19 = vpop.permute.xlu1 %5469 }
0x2600   : > { %v5475_v27 = vmul.f32 %v5470_v19, %v5446_v56 }
0x2690   : > { %v13276_v17 = vpop.f32.mrb[70].mxu1 }
0x2691   : > { %v5576_v38 = vadd.f32 %v13276_v17, %v5473_v14  ;;  %v5570_v33 = vpop.f32.mrb[71].mxu1 }
0x2692   : > { %v5571_v25 = vadd.f32 %v5570_v33, %v5472_v54 }
0x2693   : > { %v5590_v40 = vadd.f32 %v16527_v37, %v5576_v38 }
0x2694   : > { %v5589_v13 = vadd.f32 %v16531_v43, %v5571_v25  ;;  %v13279_v10 = vpop.f32.mrb[72].mxu1 }
0x2695   : > { %v5586_v7 = vadd.f32 %v13279_v10, %v5475_v27  ;;  %v5580_v62 = vpop.f32.mrb[73].mxu1  ;;  %v5596_v36 = vsel %vm1129_vm2, %v5590_v40, -inf }
0x2696   : > { %v5581_v44 = vadd.f32 %v5580_v62, %v5474_v55  ;;  %5597 = vmax.xlane.f32.xlu0 %v5596_v36  ;;  %v5593_v60 = vsel %vm1129_vm2, %v5589_v13, -inf }
0x2697   : > { %5594 = vmax.xlane.f32.xlu1 %v5593_v60  ;;  %v5592_v49 = vadd.f32 %v16542_v31, %v5586_v7 }
0x2698   : > { %v5591_v45 = vadd.f32 %v16537_v39, %v5581_v44 }
0x2699   : > { %v5602_v37 = vsel %vm1129_vm2, %v5592_v49, -inf }
0x269a   : > { %v5599_v42 = vsel %vm1129_vm2, %v5591_v45, -inf }
0x269b   : > { %5600 = vmax.xlane.f32.xlu1 %v5599_v42 }
0x269f   : > { %5603 = vmax.xlane.f32.xlu1 %v5602_v37 }
0x2723   : > { %v5598_v43 = vpop.xlane.xlu0 %5597 }
0x2724   : > { %v5606_v2 = vsub.f32 %v5590_v40, %v5598_v43  ;;  %v5595_v29 = vpop.xlane.xlu1 %5594 }
0x2725   : > { %v5605_v57 = vsub.f32 %v5589_v13, %v5595_v29 }
0x2726   : > { %v5611_v21 = vmul.f32 1.442695, %v5606_v2 }
0x2727   : > { %v5609_v51 = vmul.f32 1.442695, %v5605_v57  ;;  %v11806_v57 = vld [vmem:[%s18327_s16 + $0x60] sm:$0xff] }
0x2728   : > { %15046 = vpow2.f32 %v5611_v21  ;;  %v5601_v24 = vpop.xlane.xlu1 %5600  ;;  %v11807_v21 = vld [vmem:[%s18327_s16 + $0x68] sm:$0xff] }
0x2729   : > { %v5607_v63 = vsub.f32 %v5591_v45, %v5601_v24  ;;  %15048 = vpow2.f32 %v5609_v51  ;;  %v11808_v51 = vld [vmem:[%s18327_s16 + $0x70] sm:$0xff]  ;;  %v14313_v24 = vpack.c.bf16 %v11807_v21, %v11806_v57  ;;  %v11827_v57 = vld [vmem:[%s18332_s21 + $0xc8] sm:$0xff] }
0x272a   : > { %v11828_v21 = vld [vmem:[%s18332_s21 + $0xd0] sm:$0xff] }
0x272b   : > { %v5613_v56 = vmul.f32 1.442695, %v5607_v63  ;;  %v11809_v63 = vld [vmem:[%s18327_s16 + $0x78] sm:$0xff]  ;;  %14314 = vmatpush3.bf16.msra.mxu1 %v14313_v24 }
0x272c   : > { %v5604_v39 = vpop.xlane.xlu1 %5603  ;;  %14315 = vmatprep.subr.bf16.mxu1 %v15333_v46  ;;  %v11829_v24 = vld [vmem:[%s18332_s21 + $0xd8] sm:$0xff] }
0x272d   : > { %15050 = vpow2.f32 %v5613_v56  ;;  %v5608_v31 = vsub.f32 %v5592_v49, %v5604_v39  ;;  %v14316_v56 = vpack.c.bf16 %v11809_v63, %v11808_v51  ;;  %v14344_v63 = vpack.c.bf16 %v11829_v24, %v11828_v21 }
0x272f   : > { %v5615_v4 = vmul.f32 1.442695, %v5608_v31  ;;  %14317 = vmatpush3.bf16.msra.mxu1 %v14316_v56  ;;  %v11830_v56 = vld [vmem:[%s18332_s21 + $0xe0] sm:$0xff] }
0x2731   : > { %15052 = vpow2.f32 %v5615_v4 }
0x2732   : > { %v15047_v15 = vpop.eup %15046 }
0x2733   : > { %v5620_v50 = vsel %vm1129_vm2, %v15047_v15, 0.0  ;;  %v15049_v14 = vpop.eup %15048 }
0x2734   : > { %5621 = vadd.xlane.f32.xlu1 %v5620_v50  ;;  %v5617_v19 = vsel %vm1129_vm2, %v15049_v14, 0.0 }
0x2737   : > { %v15051_v54 = vpop.eup %15050 }
0x2738   : > { %5618 = vadd.xlane.f32.xlu1 %v5617_v19  ;;  %v5623_v17 = vsel %vm1129_vm2, %v15051_v54, 0.0  ;;  %v14322_v19 = vpack.c.bf16 %v16716_v48, %v16712_v6 }
0x2739   : > { %5624 = vadd.xlane.f32.xlu0 %v5623_v17 }
0x273b   : > { %v15053_v38 = vpop.eup %15052 }
0x273c   : > { %v5626_v33 = vsel %vm1129_vm2, %v15053_v38, 0.0 }
0x273d   : > { %5627 = vadd.xlane.f32.xlu1 %v5626_v33 }
0x274e   : > { %14884 = vrot.lane.b32.xlu1 %v16813_v9, %s18410_s11 }
0x274f   : > { %14879 = vrot.lane.b32.xlu0 %v16801_v34, %s18410_s11 }
0x27c1   : > { %v5622_v25 = vpop.xlane.xlu1 %5621 }
0x27c5   : > { %v5619_v27 = vpop.xlane.xlu1 %5618 }
0x27c6   : > { %15054 = vrcp.f32 %v5619_v27  ;;  %v5625_v40 = vpop.xlane.xlu0 %5624 }
0x27c7   : > { %15056 = vrcp.f32 %v5622_v25 }
0x27c8   : > { %15058 = vrcp.f32 %v5625_v40 }
0x27ca   : > { %v14880_v55 = vpop.permute.xlu0 %14879  ;;  %v5628_v13 = vpop.xlane.xlu1 %5627 }
0x27cb   : > { %v14882_v10 = vunpack.i.h.bf16 %v14880_v55  ;;  %v14881_v7 = vunpack.i.l.bf16 %v14880_v55  ;;  %15060 = vrcp.f32 %v5628_v13 }
0x27cd   : > { %v14298_v62 = vpack.c.bf16 %v14882_v10, %v14881_v7 }
0x27ce   : > { %v14885_v36 = vpop.permute.xlu1 %14884 }
0x27cf   : > { %v14887_v44 = vunpack.i.h.bf16 %v14885_v36  ;;  %v14886_v60 = vunpack.i.l.bf16 %v14885_v36  ;;  %14299 = vmatprep.subr.bf16.mxu0 %v14298_v62 }
0x27d0   : > { %v15055_v9 = vpop.eup %15054  ;;  %14301 = vmatpush3.bf16.msra.mxu0 %v14298_v62 }
0x27d1   : > { %v14302_v45 = vpack.c.bf16 %v14887_v44, %v14886_v60  ;;  %v5633_v34 = vmul.f32 %v15055_v9, %v15049_v14  ;;  %v15057_v49 = vpop.eup %15056 }
0x27d2   : > { %v15059_v42 = vpop.eup %15058  ;;  %v5634_v37 = vmul.f32 %v15057_v49, %v15047_v15  ;;  %v6131_v49 = vld [vmem:[#allocation5 + $0x68] sm:$0xff] }
0x27d3   : > { %14303 = vmatprep.subr.bf16.mxu0 %v14302_v45  ;;  %13288 = vmatprep.mubr.msk.f32.mxu0 %vm1129_vm2, %v5633_v34  ;;  %v5635_v2 = vmul.f32 %v15059_v42, %v15051_v54  ;;  %v14318_v54 = vpack.c.bf16 %v16737_v8, %v16704_v23 }
0x27d4   : > { %14305 = vmatpush3.bf16.msra.mxu0 %v14302_v45 }
0x27d5   : > { %14306 = vmatprep.subr.bf16.mxu0 %v15333_v46  ;;  %v15061_v43 = vpop.eup %15060 }
0x27d6   : > { %v5636_v29 = vmul.f32 %v15061_v43, %v15053_v38  ;;  %v6133_v43 = vld [vmem:[#allocation5 + $0x78] sm:$0xff] }
0x27d7   : > { %13289 = vmatmul.mubr.msk.f32.vlgmr.msra.gmra.mrb[56].mxu0 %vm1129_vm2, %v5634_v37 }
0x27d8   : > { %13291 = vmatprep.mubr.msk.f32.mxu0 %vm1129_vm2, %v5635_v2 }
0x27db   : > { %13292 = vmatmul.mubr.msk.f32.gmra.mrb[58].mxu0 %vm1129_vm2, %v5636_v29 }
0x27dc   : > { %13302 = vmatprep.mubr.msk.f32.mxu0 %vm15331_vm0, %v15330_v0 }
0x28aa   : > { %v13290_v39 = vpop.f32.mrb[56].mxu0 }
0x28ab   : > { %v5727_v31 = vpop.f32.mrb[57].mxu0 }
0x28ac   : > { %v14307_v4 = vpack.c.bf16 %v13290_v39, %v5727_v31  ;;  %v11831_v39 = vld [vmem:[%s18332_s21 + $0xe8] sm:$0xff] }
0x28ad   : > { %v14347_v31 = vpack.c.bf16 %v11831_v39, %v11830_v56  ;;  %v6343_v56 = vld [vmem:[#allocation2 + $0x98] sm:$0xff] }
0x28ae   : > { %v13293_v15 = vpop.f32.mrb[58].mxu0  ;;  %14308 = vmatpush3.bf16.msra.mxu0 %v14307_v4 }
0x28af   : > { %v5737_v50 = vpop.f32.mrb[59].mxu0  ;;  %14309 = vmatprep.subr.bf16.mxu0 %v15333_v46 }
0x28b0   : > { %v14310_v14 = vpack.c.bf16 %v13293_v15, %v5737_v50 }
0x28b2   : > { %14311 = vmatpush3.bf16.msra.mxu0 %v14310_v14 }
0x28b3   : > { %14319 = vmatprep.subr.bf16.mxu0 %v14318_v54 }
0x28b5   : > { %13303 = vmatmul.mubr.msk.f32.vlgmr.msra.gmra.mrb[60].mxu0 %vm1129_vm2, %v16580_v41 }
0x28b6   : > { %14321 = vmatpush3.bf16.msra.mxu0 %v14318_v54  ;;  %13324 = vmatprep.mubr.msk.f32.mxu0 %vm1129_vm2, %v5633_v34  ;;  %v6130_v34 = vld [vmem:[#allocation5 + $0x60] sm:$0xff] }
0x28b7   : > { %14323 = vmatprep.subr.bf16.mxu0 %v14322_v19  ;;  %v14335_v42 = vpack.c.bf16 %v6131_v49, %v6130_v34  ;;  %v11821_v54 = vld [vmem:[%s18328_s17 + $0x3] ss:$0 sm:$0xff] }
0x28ba   : > { %14325 = vmatpush3.bf16.msra.mxu0 %v14322_v19 }
0x28bb   : > { %14334 = vmatprep.subr.bf16.mxu0 %v15333_v46 }
0x28bd   : > { %13325 = vmatmul.mubr.msk.f32.vlgmr.msra.gmra.mrb[62].mxu0 %vm1129_vm2, %v5634_v37  ;;  %v6132_v37 = vld [vmem:[#allocation5 + $0x70] sm:$0xff] }
0x28be   : > { %13327 = vmatprep.mubr.msk.f32.mxu0 %vm1129_vm2, %v5635_v2  ;;  %14336 = vmatpush3.bf16.msra.mxu0 %v14335_v42  ;;  %v14338_v2 = vpack.c.bf16 %v6133_v43, %v6132_v37 }
0x28bf   : > { %14337 = vmatprep.subr.bf16.mxu0 %v15333_v46 }
0x28c1   : > { %13328 = vmatmul.mubr.msk.f32.gmra.mrb[64].mxu0 %vm1129_vm2, %v5636_v29  ;;  %v11826_v29 = vld [vmem:[%s18332_s21 + $0xc0] sm:$0xff] }
0x28c2   : > { %13352 = vmatprep.mubr.msk.f32.mxu0 %vm15331_vm0, %v15330_v0  ;;  %14339 = vmatpush3.bf16.msra.mxu0 %v14338_v2  ;;  %v14341_v51 = vpack.c.bf16 %v11827_v57, %v11826_v29 }
0x28c3   : > { %14352 = vmatprep.subr.bf16.mxu0 %v15333_v46 }
0x2988   : > { %v5812_v41 = vpop.f32.mrb[60].mxu0 }
0x2989   : > { %v13304_v17 = vpop.f32.mrb[61].mxu0  ;;  %13314 = vmatmul.mubr.msk.f32.vlgmr.msra.gmra.mrb[74].mxu1 %vm1129_vm2, %v5812_v41  ;;  %v11822_v41 = vld [vmem:[%s18329_s18 + $0x3] ss:$0 sm:$0xff] }
0x298a   : > { %13338 = vmatprep.mubr.msk.f32.mxu1 %vm1129_vm2, %v16597_v20 }
0x2990   : > { %v13326_v38 = vpop.f32.mrb[62].mxu0 }
0x2991   : > { %v5962_v33 = vpop.f32.mrb[63].mxu0 }
0x2992   : > { %v14326_v25 = vpack.c.bf16 %v13326_v38, %v5962_v33  ;;  %v11832_v33 = vld [vmem:[%s18332_s21 + $0xf0] sm:$0xff] }
0x2994   : > { %v13329_v27 = vpop.f32.mrb[64].mxu0  ;;  %14327 = vmatprep.subr.bf16.mxu1 %v14326_v25 }
0x2995   : > { %v5972_v40 = vpop.f32.mrb[65].mxu0  ;;  %14329 = vmatpush3.bf16.msra.mxu1 %v14326_v25  ;;  %v11833_v25 = vld [vmem:[%s18332_s21 + $0xf8] sm:$0xff] }
0x2996   : > { %v14330_v55 = vpack.c.bf16 %v13329_v27, %v5972_v40  ;;  %v14350_v27 = vpack.c.bf16 %v11833_v25, %v11832_v33  ;;  %v11824_v40 = vld [vmem:[%s18331_s20 + $0x3] ss:$0 sm:$0xff] }
0x2998   : > { %14331 = vmatprep.subr.bf16.mxu1 %v14330_v55 }
0x2999   : > { %14333 = vmatpush3.bf16.msra.mxu1 %v14330_v55 }
0x299a   : > { %14340 = vmatprep.subr.bf16.mxu1 %v15333_v46 }
0x299c   : > { %13339 = vmatmul.mubr.msk.f32.vlgmr.msra.gmra.mrb[76].mxu1 %vm1129_vm2, %v16605_v5 }
0x299d   : > { %13341 = vmatprep.mubr.msk.f32.mxu1 %vm1129_vm2, %v16612_v22  ;;  %14342 = vmatpush3.bf16.msra.mxu1 %v14341_v51 }
0x299e   : > { %14343 = vmatprep.subr.bf16.mxu1 %v15333_v46 }
0x29a0   : > { %13342 = vmatmul.mubr.msk.f32.gmra.mrb[78].mxu1 %vm1129_vm2, %v16619_v11 }
0x29a1   : > { %13371 = vmatprep.mubr.msk.f32.mxu1 %vm15331_vm0, %v15330_v0  ;;  %14345 = vmatpush3.bf16.msra.mxu1 %v14344_v63  ;;  %v6342_v63 = vld [vmem:[#allocation2 + $0x90] sm:$0xff] }
0x29a2   : > { %14346 = vmatprep.subr.bf16.mxu1 %v15333_v46 }
0x29a5   : > { %14348 = vmatpush3.bf16.msra.mxu1 %v14347_v31 }
0x29a6   : > { %14349 = vmatprep.subr.bf16.mxu1 %v15333_v46 }
0x29a9   : > { %14351 = vmatpush3.bf16.msra.mxu1 %v14350_v27 }
0x2a5c   : > { %v5890_v20 = vpop.f32.mrb[74].mxu1 }
0x2a5d   : > { %v5894_v13 = vmul.f32 %v5890_v20, %v15657_v12  ;;  %v13315_v10 = vpop.f32.mrb[75].mxu1 }
0x2a5f   : > { %v16915_v7 = vadd.f32 %v5894_v13, %v16688_v47 }
0x2a61   : > { %v6102_v62 = vsel %vm1129_vm2, %v16915_v7, 0.0 }
0x2a62   : > { %6103 = vadd.xlane.f32.xlu1 %v6102_v62  ;;  %v11835_v62 = vld [vmem:[%s18333_s22 + $0x3] ss:$0 sm:$0xff] }
0x2a6f   : > { %v16919_v5 = vpop.f32.mrb[76].mxu1 }
0x2a70   : > { %v16921_v22 = vpop.f32.mrb[77].mxu1 }
0x2a71   : > { %v6066_v2 = vsub.f32 %v16704_v23, %v16921_v22  ;;  %v6341_v22 = vld [vmem:[#allocation2 + $0x88] sm:$0xff] }
0x2a73   : > { %v16923_v36 = vpop.f32.mrb[78].mxu1 }
0x2a74   : > { %v16925_v11 = vpop.f32.mrb[79].mxu1 }
0x2aef   : > { %v6104_v44 = vpop.xlane.xlu1 %6103 }
0x2af0   : > { %v6105_v60 = vmul.f32 0.03125, %v6104_v44 }
0x2af2   : > { %v6106_v9 = vsub.f32 %v16915_v7, %v6105_v60 }
0x2af4   : > { %v6107_v45 = vmul.f32 %v6106_v9, %v6106_v9 }
0x2af6   : > { %v6108_v47 = vsel %vm1129_vm2, %v6107_v45, 0.0 }
0x2af7   : > { %6109 = vadd.xlane.f32.xlu0 %v6108_v47 }
0x2b84   : > { %v6110_v4 = vpop.xlane.xlu0 %6109 }
0x2b85   : > { %v6111_v15 = vmul.f32 0.03125, %v6110_v4 }
0x2b87   : > { %v6112_v50 = vadd.f32 1e-05, %v6111_v15  ;;  %v6068_v15 = vsub.f32 %v16712_v6, %v16925_v11 }
0x2b89   : > { %15062 = vrsqrt.f32 %v6112_v50 }
0x2b93   : > { %v15063_v14 = vpop.eup %15062 }
0x2b94   : > { %v6114_v19 = vmul.f32 %v15063_v14, %v6106_v9 }
0x2b96   : > { %v6121_v17 = vmul.f32 %v11821_v54, %v6114_v19 }
0x2b98   : > { %v6128_v38 = vadd.f32 %v11822_v41, %v6121_v17  ;;  %v6069_v41 = vsub.f32 %v16716_v48, %v16923_v36 }
0x2b9a   : > { %13353 = vmatmul.mubr.msk.f32.vlgmr.msra.gmra.mrb[66].mxu0 %vm1129_vm2, %v6128_v38 }
0x2b9b   : > { %13382 = vmatprep.mubr.msk.f32.mxu0 %vm15331_vm0, %v15330_v0 }
0x2c6d   : > { %v6211_v55 = vpop.f32.mrb[66].mxu0 }
0x2c6e   : > { %v6212_v20 = vadd.f32 %v11824_v40, %v6211_v55  ;;  %v13354_v13 = vpop.f32.mrb[67].mxu0 }
0x2c6f   : > { %v11839_v13 = vld [vmem:[%s18323_s12 + $0x4] ss:$0 sm:$0xff] }
0x2c70   : > { %v6215_v10 = vmax.f32 %v6212_v20, 0.0 }
0x2c72   : > { %13372 = vmatmul.mubr.msk.f32.vlgmr.msra.gmra.mrb[80].mxu1 %vm2374_vm6, %v6215_v10 }
0x2d45   : > { %v6302_v44 = vpop.f32.mrb[80].mxu1 }
0x2d46   : > { %v6303_v60 = vadd.f32 %v11835_v62, %v6302_v44  ;;  %v13373_v9 = vpop.f32.mrb[81].mxu1  ;;  %v11840_v62 = vld [vmem:[%s18324_s13 + $0x4] ss:$0 sm:$0xff] }
0x2d48   : > { %v6306_v45 = vmul.f32 %v6303_v60, %v15657_v12 }
0x2d4a   : > { %v16976_v47 = vadd.f32 %v6306_v45, %v16915_v7 }
0x2d4c   : > { %v6312_v34 = vsel %vm1129_vm2, %v16976_v47, 0.0 }
0x2d4d   : > { %6313 = vadd.xlane.f32.xlu0 %v6312_v34 }
0x2d63   : > { %6071 = vperm.xlu0 %14888, %v16795_v18   ;;  %v6340_v18 = vld [vmem:[#allocation2 + $0x80] sm:$0xff] }
0x2d64   : > { %v14353_v24 = vpack.c.bf16 %v6341_v22, %v6340_v18 }
0x2d66   : > { %14354 = vmatpush3.bf16.msra.mxu0 %v14353_v24  ;;  %v17087_v24 = vld [vmem:[%s18398_s24 + $0x18] sm:$0xff] }
0x2d67   : > { %14901 = vset.pattern.permute.xlu0 %v15332_v1  ;;  %14355 = vmatprep.subr.bf16.mxu0 %v15333_v46 }
0x2dda   : > { %v6314_v49 = vpop.xlane.xlu0 %6313 }
0x2ddb   : > { %v6315_v42 = vmul.f32 0.03125, %v6314_v49 }
0x2ddd   : > { %v6316_v37 = vsub.f32 %v16976_v47, %v6315_v42 }
0x2ddf   : > { %v6317_v43 = vmul.f32 %v6316_v37, %v6316_v37 }
0x2de1   : > { %v6318_v29 = vsel %vm1129_vm2, %v6317_v43, 0.0  ;;  %v17052_v43 = vld [vmem:[%s18398_s24] sm:$0xff] }
0x2de2   : > { %6319 = vadd.xlane.f32.xlu1 %v6318_v29  ;;  %v6072_v7 = vpop.permute.xlu0 %6071 }
0x2de3   : > { %v6086_v57 = vmul.f32 %v6072_v7, %v6066_v2  ;;  %v11860_v2 = vld [vmem:[%s18326_s15 + $0x88] sm:$0xff] }
0x2de5   : > { %v6090_v21 = vmul.f32 %v6086_v57, %v16046_v28  ;;  %v17071_v57 = vld [vmem:[%s18398_s24 + $0x8] sm:$0xff] }
0x2de7   : > { %v16988_v51 = vadd.f32 %v6090_v21, %v16704_v23  ;;  %v14356_v23 = vpack.c.bf16 %v6343_v56, %v6342_v63  ;;  %v17079_v21 = vld [vmem:[%s18398_s24 + $0x10] sm:$0xff] }
0x2de9   : > { %13412 = vmatprep.mubr.msk.f32.mxu1 %vm1338_vm3, %v16988_v51  ;;  %14357 = vmatpush3.bf16.msra.mxu0 %v14356_v23 }
0x2df3   : > { %6075 = vperm.xlu1 %14889, %v16792_v58   ;;  %v6067_v58 = vsub.f32 %v16737_v8, %v16919_v5  ;;  %v17011_v5 = vld [vmem:[%s18400_s26] ss:$0 sm:$0xff] }
0x2df4   : > { %v6506_v11 = vmul.f32 %v17011_v5, %v16988_v51 }
0x2df6   : > { %v6510_v18 = vmul.f32 %v6506_v11, %v16988_v51 }
0x2df7   : > { %6079 = vperm.xlu1 %14889, %v16807_v16  }
0x2dfb   : > { %6083 = vperm.xlu1 %14889, %v16804_v26  }
0x2dff   : > { %14900 = vset.pattern.permute.xlu1 %v15332_v1 }
0x2e6f   : > { %v6320_v39 = vpop.xlane.xlu1 %6319 }
0x2e70   : > { %v6321_v31 = vmul.f32 0.03125, %v6320_v39 }
0x2e72   : > { %v6322_v16 = vadd.f32 1e-05, %v6321_v31 }
0x2e73   : > { %v6076_v4 = vpop.permute.xlu1 %6075 }
0x2e74   : > { %15064 = vrsqrt.f32 %v6322_v16  ;;  %v6087_v26 = vmul.f32 %v6076_v4, %v6067_v58  ;;  %v17105_v58 = vld [vmem:[%s18403_s2 + $0x8] sm:$0xff] }
0x2e76   : > { %v6091_v50 = vmul.f32 %v6087_v26, %v16052_v59  ;;  %v17113_v26 = vld [vmem:[%s18403_s2] sm:$0xff] }
0x2e77   : > { %v6080_v14 = vpop.permute.xlu1 %6079 }
0x2e78   : > { %v17003_v54 = vadd.f32 %v6091_v50, %v16737_v8  ;;  %v6088_v19 = vmul.f32 %v6080_v14, %v6068_v15 }
0x2e7a   : > { %v6092_v17 = vmul.f32 %v6088_v19, %v16059_v30  ;;  %v6507_v38 = vmul.f32 %v17011_v5, %v17003_v54  ;;  %v17127_v19 = vld [vmem:[%s18403_s2 + $0x18] sm:$0xff] }
0x2e7b   : > { %v6084_v33 = vpop.permute.xlu1 %6083 }
0x2e7c   : > { %v17018_v8 = vadd.f32 %v6092_v17, %v16712_v6  ;;  %v6089_v25 = vmul.f32 %v6084_v33, %v6069_v41  ;;  %v14366_v27 = vpack.c.bf16 %v6507_v38, %v6506_v11  ;;  %v6511_v36 = vmul.f32 %v6507_v38, %v17003_v54  ;;  %v17135_v11 = vld [vmem:[%s18403_s2 + $0x10] sm:$0xff] }
0x2e7e   : > { %v15065_v40 = vpop.eup %15064  ;;  %v6093_v55 = vmul.f32 %v6089_v25, %v16069_v32  ;;  %14368 = vmatprep.subr.msk.bf16.mxu1 %vm15715_vm4, %v14366_v27  ;;  %v6517_v20 = vsel %vm1338_vm3, %v6511_v36, 0.0  ;;  %v6508_v44 = vmul.f32 %v17011_v5, %v17018_v8  ;;  %v14359_v22 = vpack.c.bf16 %v6511_v36, %v6510_v18 }
0x2e7f   : > { %v6324_v10 = vmul.f32 %v15065_v40, %v6316_v37  ;;  %6518 = vadd.xlane.f32.xlu0 %v6517_v20  ;;  %14371 = vmatpush3.bf16.xpose.msk.msra.mxu1 %vm15715_vm4, %v14366_v27 }
0x2e80   : > { %v17031_v6 = vadd.f32 %v6093_v55, %v16716_v48  ;;  %v17042_v42 = vmul.f32 %v6508_v44, %v17018_v8 }
0x2e81   : > { %v6331_v60 = vmul.f32 %v11839_v13, %v6324_v10 }
0x2e82   : > { %v6509_v9 = vmul.f32 %v17011_v5, %v17031_v6 }
0x2e83   : > { %v6338_v45 = vadd.f32 %v11840_v62, %v6331_v60 }
0x2e84   : > { %v14372_v34 = vpack.c.bf16 %v6509_v9, %v6508_v44  ;;  %v6513_v49 = vmul.f32 %v6509_v9, %v17031_v6  ;;  %v6514_v9 = vsel %vm1338_vm3, %v6510_v18, 0.0 }
0x2e85   : > { %13383 = vmatmul.mubr.msk.f32.vlgmr.msra.gmra.mrb[68].mxu0 %vm1129_vm2, %v6338_v45  ;;  %v6520_v45 = vsel %vm1338_vm3, %v17042_v42, 0.0 }
0x2e86   : > { %14374 = vmatprep.subr.msk.bf16.mxu1 %vm15715_vm4, %v14372_v34  ;;  %v6523_v48 = vsel %vm1338_vm3, %v6513_v49, 0.0  ;;  %v14363_v37 = vpack.c.bf16 %v6513_v49, %v17042_v42  ;;  %13387 = vmatprep.mubr.msk.f32.mxu0 %vm949_vm1, %v17052_v43  ;;  %v11861_v49 = vld [vmem:[%s18326_s15 + $0x90] sm:$0xff] }
0x2e87   : > { %6524 = vadd.xlane.f32.xlu0 %v6523_v48  ;;  %14377 = vmatpush3.bf16.xpose.msk.msra.mxu1 %vm15715_vm4, %v14372_v34  ;;  %v11859_v34 = vld [vmem:[%s18326_s15 + $0x80] sm:$0xff]  ;;  %v11862_v48 = vld [vmem:[%s18326_s15 + $0x98] sm:$0xff] }
0x2e8e   : > { %13413 = vmatmul.mubr.msk.f32.vlgmr.msra.gmra.mrb[82].mxu1 %vm1338_vm3, %v17003_v54 }
0x2e8f   : > { %13415 = vmatprep.mubr.msk.f32.mxu1 %vm1338_vm3, %v17018_v8 }
0x2e92   : > { %13416 = vmatmul.mubr.msk.f32.gmra.mrb[84].mxu1 %vm1338_vm3, %v17031_v6 }
0x2e9d   : > { %6745 = vperm.xlu0 %14901, %v11860_v2  }
0x2ea1   : > { %14913 = vset.pattern.permute.xlu0 %v15337_v3 }
0x2f0c   : > { %v6519_v25 = vpop.xlane.xlu0 %6518 }
0x2f14   : > { %v6525_v55 = vpop.xlane.xlu0 %6524 }
0x2f58   : > { %v6413_v29 = vpop.f32.mrb[68].mxu0 }
0x2f59   : > { %v13384_v7 = vpop.f32.mrb[69].mxu0  ;;  %13385 = vmatprep.subr.mxu0 %v6413_v29 }
0x2f5a   : > { %13386 = vmatpush3.msra.mxu0 %v6413_v29 }
0x2f5b   : > { %13388 = vmatmul.mubr.msk.f32.vlgmr.msra.gmra.mrb[70].mxu0 %vm949_vm1, %v17071_v57  ;;  %14358 = vmatprep.subr.bf16.mxu0 %v15333_v46 }
0x2f5c   : > { %13390 = vmatprep.mubr.msk.f32.mxu0 %vm949_vm1, %v17079_v21 }
0x2f5f   : > { %13391 = vmatmul.mubr.msk.f32.gmra.mrb[72].mxu0 %vm949_vm1, %v17087_v24 }
0x2f60   : > { %13401 = vmatprep.mubr.msk.f32.mxu0 %vm15331_vm0, %v15330_v0 }
0x2f61   : > { %14361 = vmatpush3.bf16.xpose.msk.msra.mxu0 %vm15715_vm4, %v14359_v22  ;;  %v13414_v63 = vpop.f32.mrb[82].mxu1 }
0x2f62   : > { %v6698_v56 = vpop.f32.mrb[83].mxu1  ;;  %14362 = vmatprep.subr.bf16.mxu0 %v15333_v46  ;;  %v6726_v20 = vmul.f32 2.0, %v13414_v63 }
0x2f65   : > { %v13417_v23 = vpop.f32.mrb[84].mxu1 }
0x2f66   : > { %v17096_v39 = vpop.f32.mrb[85].mxu1  ;;  %v6728_v13 = vmul.f32 2.0, %v13417_v23 }
0x2f69   : > { %14365 = vmatpush3.bf16.xpose.msk.msra.mxu0 %vm15715_vm4, %v14363_v37 }
0x2f70   : > { %13402 = vmatmul.mubr.msk.f32.vlgmr.msra.gmra.mrb[74].mxu0 %vm1338_vm3, %v15334_v53 }
0x302e   : > { %v13389_v31 = vpop.f32.mrb[70].mxu0 }
0x302f   : > { %v17108_v16 = vmul.f32 %v17105_v58, %v13389_v31  ;;  %v6483_v4 = vpop.f32.mrb[71].mxu0  ;;  %v6725_v31 = vmul.f32 2.0, %v6698_v56 }
0x3030   : > { %v17116_v15 = vmul.f32 %v17113_v26, %v6483_v4 }
0x3032   : > { %v13392_v50 = vpop.f32.mrb[72].mxu0  ;;  %13426 = vmatprep.mubr.msk.f32.mxu0 %vm1129_vm2, %v17116_v15  ;;  %v17122_v14 = vpack.i.bf16 %v17108_v16, %v17116_v15 }
0x3033   : > { %v17130_v41 = vmul.f32 %v17127_v19, %v13392_v50  ;;  %v6493_v17 = vpop.f32.mrb[73].mxu0 }
0x3034   : > { %v17138_v38 = vmul.f32 %v17135_v11, %v6493_v17  ;;  %14891 = vrot.lane.b32.xlu1 %v17122_v14, %s15335_s7 }
0x3036   : > { %v17144_v33 = vpack.i.bf16 %v17130_v41, %v17138_v38 }
0x3038   : > { %14896 = vrot.lane.b32.xlu1 %v17144_v33, %s15335_s7 }
0x3043   : > { %v6604_v27 = vpop.f32.mrb[74].mxu0 }
0x3044   : > { %v6720_v36 = vrot.slane %v6604_v27, %v15815_v35  ;;  %v13403_v40 = vpop.f32.mrb[75].mxu0 }
0x3046   : > { %v6722_v10 = vadd.f32 %v6720_v36, %v6519_v25  ;;  %v6724_v62 = vadd.f32 %v6720_v36, %v6525_v55  ;;  %v6727_v25 = vmul.f32 2.0, %v17096_v39 }
0x3048   : > { %v6730_v44 = vsub.f32 %v6722_v10, %v6726_v20  ;;  %v6732_v60 = vsub.f32 %v6724_v62, %v6728_v13  ;;  %v6746_v13 = vpop.permute.xlu0 %6745 }
0x304a   : > { %v6759_v10 = vmul.f32 %v6746_v13, %v6730_v44 }
0x305c   : > { %6515 = vadd.xlane.f32.xlu1 %v6514_v9 }
0x3060   : > { %6521 = vadd.xlane.f32.xlu1 %v6520_v45 }
0x3071   : > { %6740 = vperm.xlu1 %14900, %v11859_v34  }
0x3075   : > { %6750 = vperm.xlu1 %14900, %v11861_v49  }
0x3079   : > { %6755 = vperm.xlu1 %14900, %v11862_v48  }
0x307d   : > { %14912 = vset.pattern.permute.xlu1 %v15337_v3 }
0x30a6   : > { %v14892_v37 = vpop.permute.xlu1 %14891 }
0x30a7   : > { %v14894_v42 = vunpack.i.h.bf16 %v14892_v37  ;;  %v14893_v2 = vunpack.i.l.bf16 %v14892_v37  ;;  %v17181_v37 = vld [vmem:[%s15852_s6 + $0x8] sm:$0xff] }
0x30a9   : > { %v14378_v29 = vpack.c.bf16 %v14894_v42, %v14893_v2  ;;  %v17185_v42 = vld [vmem:[%s15852_s6] sm:$0xff] }
0x30aa   : > { %v14897_v7 = vpop.permute.xlu1 %14896 }
0x30ab   : > { %14380 = vmatprep.subr.msk.bf16.mxu0 %vm15825_vm5, %v14378_v29  ;;  %v14899_v18 = vunpack.i.h.bf16 %v14897_v7  ;;  %v14898_v22 = vunpack.i.l.bf16 %v14897_v7 }
0x30ac   : > { %14383 = vmatpush3.bf16.xpose.msk.msra.mxu0 %vm15825_vm5, %v14378_v29 }
0x30ad   : > { %v14384_v63 = vpack.c.bf16 %v14899_v18, %v14898_v22 }
0x30af   : > { %14386 = vmatprep.subr.msk.bf16.mxu0 %vm15825_vm5, %v14384_v63 }
0x30b4   : > { %14389 = vmatpush3.bf16.xpose.msk.msra.mxu0 %vm15825_vm5, %v14384_v63 }
0x30b5   : > { %14404 = vmatprep.subr.bf16.mxu0 %v15333_v46 }
0x30bb   : > { %13427 = vmatmul.mubr.msk.f32.vlgmr.msra.gmra.mrb[76].mxu0 %vm1129_vm2, %v17108_v16 }
0x30bc   : > { %13429 = vmatprep.mubr.msk.f32.mxu0 %vm1129_vm2, %v17138_v38 }
0x30bf   : > { %13430 = vmatmul.mubr.msk.f32.gmra.mrb[78].mxu0 %vm1129_vm2, %v17130_v41 }
0x30c0   : > { %13465 = vmatprep.mubr.msk.f32.mxu0 %vm15331_vm0, %v15330_v0 }
0x30e9   : > { %v6516_v23 = vpop.xlane.xlu1 %6515 }
0x30ea   : > { %v6721_v4 = vadd.f32 %v6720_v36, %v6516_v23 }
0x30ec   : > { %v6729_v50 = vsub.f32 %v6721_v4, %v6725_v31  ;;  %v17195_v31 = vld [vmem:[%s15852_s6 + $0x18] sm:$0xff] }
0x30ed   : > { %v6522_v17 = vpop.xlane.xlu1 %6521 }
0x30ee   : > { %v6723_v27 = vadd.f32 %v6720_v36, %v6522_v17 }
0x30f0   : > { %v6731_v40 = vsub.f32 %v6723_v27, %v6727_v25 }
0x30f1   : > { %v6741_v55 = vpop.permute.xlu1 %6740 }
0x30f2   : > { %v6758_v62 = vmul.f32 %v6741_v55, %v6729_v50 }
0x30f5   : > { %v6751_v20 = vpop.permute.xlu1 %6750 }
0x30f6   : > { %v6760_v36 = vmul.f32 %v6751_v20, %v6731_v40 }
0x30f9   : > { %v6756_v9 = vpop.permute.xlu1 %6755 }
0x30fa   : > { %v6761_v48 = vmul.f32 %v6756_v9, %v6732_v60  ;;  %v17191_v60 = vld [vmem:[%s15852_s6 + $0x10] sm:$0xff] }
0x318e   : > { %v13428_v45 = vpop.f32.mrb[76].mxu0 }
0x318f   : > { %v6862_v34 = vadd.f32 %v13428_v45, %v6759_v10  ;;  %v6856_v49 = vpop.f32.mrb[77].mxu0 }
0x3190   : > { %v6857_v56 = vadd.f32 %v6856_v49, %v6758_v62 }
0x3191   : > { %v6876_v39 = vadd.f32 %v17181_v37, %v6862_v34 }
0x3192   : > { %v6875_v2 = vadd.f32 %v17185_v42, %v6857_v56  ;;  %v13431_v29 = vpop.f32.mrb[78].mxu0 }
0x3193   : > { %v6872_v44 = vadd.f32 %v13431_v29, %v6761_v48  ;;  %v6866_v7 = vpop.f32.mrb[79].mxu0  ;;  %v6882_v18 = vsel %vm1129_vm2, %v6876_v39, -inf }
0x3194   : > { %v6867_v22 = vadd.f32 %v6866_v7, %v6760_v36  ;;  %6883 = vmax.xlane.f32.xlu0 %v6882_v18  ;;  %v6879_v63 = vsel %vm1129_vm2, %v6875_v2, -inf }
0x3195   : > { %6880 = vmax.xlane.f32.xlu1 %v6879_v63  ;;  %v6878_v4 = vadd.f32 %v17195_v31, %v6872_v44 }
0x3196   : > { %v6877_v23 = vadd.f32 %v17191_v60, %v6867_v22 }
0x3197   : > { %v6888_v17 = vsel %vm1129_vm2, %v6878_v4, -inf }
0x3198   : > { %v6885_v50 = vsel %vm1129_vm2, %v6877_v23, -inf }
0x3199   : > { %6886 = vmax.xlane.f32.xlu1 %v6885_v50 }
0x319d   : > { %6889 = vmax.xlane.f32.xlu1 %v6888_v17 }
0x3221   : > { %v6884_v25 = vpop.xlane.xlu0 %6883 }
0x3222   : > { %v6892_v27 = vsub.f32 %v6876_v39, %v6884_v25  ;;  %v6881_v40 = vpop.xlane.xlu1 %6880 }
0x3223   : > { %v6891_v55 = vsub.f32 %v6875_v2, %v6881_v40 }
0x3224   : > { %v6897_v20 = vmul.f32 1.442695, %v6892_v27 }
0x3225   : > { %v6895_v13 = vmul.f32 1.442695, %v6891_v55 }
0x3226   : > { %15066 = vpow2.f32 %v6897_v20  ;;  %v6887_v10 = vpop.xlane.xlu1 %6886 }
0x3227   : > { %v6893_v62 = vsub.f32 %v6877_v23, %v6887_v10  ;;  %15068 = vpow2.f32 %v6895_v13 }
0x3229   : > { %v6899_v9 = vmul.f32 1.442695, %v6893_v62 }
0x322a   : > { %v6890_v45 = vpop.xlane.xlu1 %6889 }
0x322b   : > { %v6894_v34 = vsub.f32 %v6878_v4, %v6890_v45  ;;  %15070 = vpow2.f32 %v6899_v9 }
0x322d   : > { %v6901_v49 = vmul.f32 1.442695, %v6894_v34 }
0x322f   : > { %15072 = vpow2.f32 %v6901_v49  ;;  %v11876_v49 = vld [vmem:[%s18327_s16 + $0x80] sm:$0xff] }
0x3230   : > { %v15067_v56 = vpop.eup %15066 }
0x3231   : > { %v6906_v48 = vsel %vm1129_vm2, %v15067_v56, 0.0  ;;  %v15069_v36 = vpop.eup %15068 }
0x3232   : > { %6907 = vadd.xlane.f32.xlu1 %v6906_v48  ;;  %v6903_v39 = vsel %vm1129_vm2, %v15069_v36, 0.0  ;;  %v11878_v48 = vld [vmem:[%s18327_s16 + $0x90] sm:$0xff] }
0x3235   : > { %v15071_v2 = vpop.eup %15070 }
0x3236   : > { %6904 = vadd.xlane.f32.xlu1 %v6903_v39  ;;  %v6909_v44 = vsel %vm1129_vm2, %v15071_v2, 0.0  ;;  %v11879_v39 = vld [vmem:[%s18327_s16 + $0x98] sm:$0xff] }
0x3239   : > { %v15073_v29 = vpop.eup %15072 }
0x323a   : > { %6910 = vadd.xlane.f32.xlu1 %v6909_v44  ;;  %v6912_v7 = vsel %vm1129_vm2, %v15073_v29, 0.0 }
0x323b   : > { %6913 = vadd.xlane.f32.xlu0 %v6912_v7 }
0x324b   : > { %14903 = vrot.lane.b32.xlu1 %v17122_v14, %s18410_s11 }
0x3251   : > { %14908 = vrot.lane.b32.xlu0 %v17144_v33, %s18410_s11 }
0x32bf   : > { %v6908_v18 = vpop.xlane.xlu1 %6907 }
0x32c3   : > { %v6905_v22 = vpop.xlane.xlu1 %6904 }
0x32c4   : > { %15074 = vrcp.f32 %v6905_v22 }
0x32c5   : > { %15076 = vrcp.f32 %v6908_v18 }
0x32c7   : > { %v6911_v63 = vpop.xlane.xlu1 %6910 }
0x32c8   : > { %v6914_v23 = vpop.xlane.xlu0 %6913  ;;  %15078 = vrcp.f32 %v6911_v63 }
0x32c9   : > { %15080 = vrcp.f32 %v6914_v23  ;;  %v14410_v23 = vpack.c.bf16 %v17003_v54, %v16988_v51 }
0x32cb   : > { %v14904_v4 = vpop.permute.xlu1 %14903 }
0x32cc   : > { %v14906_v50 = vunpack.i.h.bf16 %v14904_v4  ;;  %v14905_v17 = vunpack.i.l.bf16 %v14904_v4  ;;  %v14909_v25 = vpop.permute.xlu0 %14908  ;;  %v17234_v4 = vld [vmem:[%s18407_s3] sm:$0xff] }
0x32cd   : > { %v14911_v27 = vunpack.i.h.bf16 %v14909_v25  ;;  %v14910_v40 = vunpack.i.l.bf16 %v14909_v25 }
0x32ce   : > { %v15075_v55 = vpop.eup %15074  ;;  %v14390_v20 = vpack.c.bf16 %v14906_v50, %v14905_v17  ;;  %v14414_v50 = vpack.c.bf16 %v17031_v6, %v17018_v8 }
0x32cf   : > { %v14394_v14 = vpack.c.bf16 %v14911_v27, %v14910_v40  ;;  %v6919_v13 = vmul.f32 %v15075_v55, %v15069_v36  ;;  %v15077_v33 = vpop.eup %15076  ;;  %v17251_v27 = vld [vmem:[%s18408_s10] sm:$0xff] }
0x32d0   : > { %14391 = vmatprep.subr.bf16.mxu1 %v14390_v20  ;;  %v6920_v62 = vmul.f32 %v15077_v33, %v15067_v56  ;;  %v11877_v56 = vld [vmem:[%s18327_s16 + $0x88] sm:$0xff] }
0x32d1   : > { %14393 = vmatpush3.bf16.msra.mxu1 %v14390_v20  ;;  %13440 = vmatprep.mubr.msk.f32.mxu1 %vm1129_vm2, %v6919_v13  ;;  %v14405_v36 = vpack.c.bf16 %v11877_v56, %v11876_v49 }
0x32d2   : > { %14395 = vmatprep.subr.bf16.mxu1 %v14394_v14  ;;  %v15079_v10 = vpop.eup %15078 }
0x32d3   : > { %v15081_v9 = vpop.eup %15080  ;;  %v6921_v45 = vmul.f32 %v15079_v10, %v15071_v2  ;;  %14406 = vmatpush3.bf16.msra.mxu0 %v14405_v36  ;;  %v14408_v2 = vpack.c.bf16 %v11879_v39, %v11878_v48  ;;  %v17259_v10 = vld [vmem:[%s18408_s10 + $0x8] sm:$0xff] }
0x32d4   : > { %v6922_v34 = vmul.f32 %v15081_v9, %v15073_v29  ;;  %14407 = vmatprep.subr.bf16.mxu0 %v15333_v46  ;;  %v17273_v9 = vld [vmem:[%s18408_s10 + $0x18] sm:$0xff] }
0x32d5   : > { %14397 = vmatpush3.bf16.msra.mxu1 %v14394_v14 }
0x32d6   : > { %14398 = vmatprep.subr.bf16.mxu1 %v15333_v46 }
0x32d7   : > { %14409 = vmatpush3.bf16.msra.mxu0 %v14408_v2 }
0x32d8   : > { %13441 = vmatmul.mubr.msk.f32.vlgmr.msra.gmra.mrb[86].mxu1 %vm1129_vm2, %v6920_v62 }
0x32d9   : > { %13443 = vmatprep.mubr.msk.f32.mxu1 %vm1129_vm2, %v6921_v45 }
0x32dc   : > { %13444 = vmatmul.mubr.msk.f32.gmra.mrb[88].mxu1 %vm1129_vm2, %v6922_v34 }
0x32dd   : > { %13454 = vmatprep.mubr.msk.f32.mxu1 %vm15331_vm0, %v15330_v0 }
0x33ab   : > { %v13442_v29 = vpop.f32.mrb[86].mxu1 }
0x33ac   : > { %v7013_v44 = vpop.f32.mrb[87].mxu1 }
0x33ad   : > { %v14399_v7 = vpack.c.bf16 %v13442_v29, %v7013_v44 }
0x33af   : > { %v13445_v18 = vpop.f32.mrb[88].mxu1  ;;  %14400 = vmatpush3.bf16.msra.mxu1 %v14399_v7 }
0x33b0   : > { %v7023_v22 = vpop.f32.mrb[89].mxu1  ;;  %14401 = vmatprep.subr.bf16.mxu1 %v15333_v46 }
0x33b1   : > { %v14402_v63 = vpack.c.bf16 %v13445_v18, %v7023_v22 }
0x33b3   : > { %14403 = vmatpush3.bf16.msra.mxu1 %v14402_v63  ;;  %v7416_v63 = vld [vmem:[#allocation5 + $0x80] sm:$0xff] }
0x33b4   : > { %14411 = vmatprep.subr.bf16.mxu1 %v14410_v23 }
0x33b6   : > { %13455 = vmatmul.mubr.msk.f32.vlgmr.msra.gmra.mrb[90].mxu1 %vm1129_vm2, %v17234_v4 }
0x33b7   : > { %14413 = vmatpush3.bf16.msra.mxu1 %v14410_v23  ;;  %13476 = vmatprep.mubr.msk.f32.mxu1 %vm1129_vm2, %v6919_v13  ;;  %v7417_v23 = vld [vmem:[#allocation5 + $0x88] sm:$0xff] }
0x33b8   : > { %14415 = vmatprep.subr.bf16.mxu1 %v14414_v50 }
0x33bb   : > { %14417 = vmatpush3.bf16.msra.mxu1 %v14414_v50  ;;  %v14427_v50 = vpack.c.bf16 %v7417_v23, %v7416_v63  ;;  %v11891_v63 = vld [vmem:[%s18328_s17 + $0x4] ss:$0 sm:$0xff] }
0x33bc   : > { %14426 = vmatprep.subr.bf16.mxu1 %v15333_v46 }
0x33be   : > { %13477 = vmatmul.mubr.msk.f32.vlgmr.msra.gmra.mrb[92].mxu1 %vm1129_vm2, %v6920_v62  ;;  %v17266_v62 = vld [vmem:[%s18408_s10 + $0x10] sm:$0xff] }
0x33bf   : > { %13479 = vmatprep.mubr.msk.f32.mxu1 %vm1129_vm2, %v6921_v45  ;;  %14428 = vmatpush3.bf16.msra.mxu1 %v14427_v50  ;;  %v11892_v50 = vld [vmem:[%s18329_s18 + $0x4] ss:$0 sm:$0xff] }
0x33c0   : > { %14429 = vmatprep.subr.bf16.mxu1 %v15333_v46 }
0x33c2   : > { %13480 = vmatmul.mubr.msk.f32.gmra.mrb[94].mxu1 %vm1129_vm2, %v6922_v34 }
0x33c3   : > { %13504 = vmatprep.mubr.msk.f32.mxu1 %vm15331_vm0, %v15330_v0 }
0x3489   : > { %v7098_v17 = vpop.f32.mrb[90].mxu1 }
0x348a   : > { %v13456_v25 = vpop.f32.mrb[91].mxu1  ;;  %13466 = vmatmul.mubr.msk.f32.vlgmr.msra.gmra.mrb[80].mxu0 %vm1129_vm2, %v7098_v17  ;;  %v7418_v17 = vld [vmem:[#allocation5 + $0x90] sm:$0xff] }
0x348b   : > { %13490 = vmatprep.mubr.msk.f32.mxu0 %vm1129_vm2, %v17251_v27  ;;  %v7419_v25 = vld [vmem:[#allocation5 + $0x98] sm:$0xff] }
0x3491   : > { %v13478_v40 = vpop.f32.mrb[92].mxu1 }
0x3492   : > { %v7248_v55 = vpop.f32.mrb[93].mxu1 }
0x3493   : > { %v14418_v20 = vpack.c.bf16 %v13478_v40, %v7248_v55  ;;  %v14430_v40 = vpack.c.bf16 %v7419_v25, %v7418_v17  ;;  %v11896_v55 = vld [vmem:[%s18332_s21 + $0x100] sm:$0xff] }
0x3495   : > { %v13481_v14 = vpop.f32.mrb[94].mxu1  ;;  %14419 = vmatprep.subr.bf16.mxu0 %v14418_v20  ;;  %14431 = vmatpush3.bf16.msra.mxu1 %v14430_v40  ;;  %v11902_v40 = vld [vmem:[%s18332_s21 + $0x130] sm:$0xff] }
0x3496   : > { %v7258_v13 = vpop.f32.mrb[95].mxu1  ;;  %14421 = vmatpush3.bf16.msra.mxu0 %v14418_v20  ;;  %14444 = vmatprep.subr.bf16.mxu1 %v15333_v46  ;;  %v11897_v20 = vld [vmem:[%s18332_s21 + $0x108] sm:$0xff] }
0x3497   : > { %v14422_v33 = vpack.c.bf16 %v13481_v14, %v7258_v13  ;;  %v11898_v14 = vld [vmem:[%s18332_s21 + $0x110] sm:$0xff]  ;;  %v14433_v13 = vpack.c.bf16 %v11897_v20, %v11896_v55  ;;  %v11903_v55 = vld [vmem:[%s18332_s21 + $0x138] sm:$0xff]  ;;  %v11894_v20 = vld [vmem:[%s18331_s20 + $0x4] ss:$0 sm:$0xff] }
0x3499   : > { %14423 = vmatprep.subr.bf16.mxu0 %v14422_v33 }
0x349a   : > { %14425 = vmatpush3.bf16.msra.mxu0 %v14422_v33  ;;  %v11899_v33 = vld [vmem:[%s18332_s21 + $0x118] sm:$0xff] }
0x349b   : > { %14432 = vmatprep.subr.bf16.mxu0 %v15333_v46 }
0x349d   : > { %13491 = vmatmul.mubr.msk.f32.vlgmr.msra.gmra.mrb[82].mxu0 %vm1129_vm2, %v17259_v10 }
0x349e   : > { %13493 = vmatprep.mubr.msk.f32.mxu0 %vm1129_vm2, %v17266_v62  ;;  %14434 = vmatpush3.bf16.msra.mxu0 %v14433_v13 }
0x349f   : > { %14435 = vmatprep.subr.bf16.mxu0 %v15333_v46 }
0x34a1   : > { %13494 = vmatmul.mubr.msk.f32.gmra.mrb[84].mxu0 %vm1129_vm2, %v17273_v9 }
0x34a2   : > { %13523 = vmatprep.mubr.msk.f32.mxu0 %vm15331_vm0, %v15330_v0 }
0x355d   : > { %v7176_v45 = vpop.f32.mrb[80].mxu0 }
0x355e   : > { %v7180_v34 = vmul.f32 %v7176_v45, %v15657_v12  ;;  %v13467_v49 = vpop.f32.mrb[81].mxu0  ;;  %v14436_v45 = vpack.c.bf16 %v11899_v33, %v11898_v14 }
0x355f   : > { %v11901_v49 = vld [vmem:[%s18332_s21 + $0x128] sm:$0xff] }
0x3560   : > { %v17281_v56 = vadd.f32 %v7180_v34, %v16976_v47  ;;  %v11900_v34 = vld [vmem:[%s18332_s21 + $0x120] sm:$0xff]  ;;  %14437 = vmatpush3.bf16.msra.mxu0 %v14436_v45 }
0x3561   : > { %14438 = vmatprep.subr.bf16.mxu0 %v15333_v46 }
0x3562   : > { %v7388_v48 = vsel %vm1129_vm2, %v17281_v56, 0.0 }
0x3563   : > { %7389 = vadd.xlane.f32.xlu1 %v7388_v48  ;;  %v14439_v48 = vpack.c.bf16 %v11901_v49, %v11900_v34  ;;  %v11905_v34 = vld [vmem:[%s18333_s22 + $0x4] ss:$0 sm:$0xff] }
0x3565   : > { %14440 = vmatpush3.bf16.msra.mxu0 %v14439_v48 }
0x3566   : > { %14441 = vmatprep.subr.bf16.mxu0 %v15333_v46 }
0x3570   : > { %v17285_v36 = vpop.f32.mrb[82].mxu0 }
0x3571   : > { %v17287_v39 = vpop.f32.mrb[83].mxu0 }
0x3574   : > { %v17289_v2 = vpop.f32.mrb[84].mxu0 }
0x3575   : > { %v17291_v29 = vpop.f32.mrb[85].mxu0 }
0x35f0   : > { %v7390_v44 = vpop.xlane.xlu1 %7389 }
0x35f1   : > { %v7391_v7 = vmul.f32 0.03125, %v7390_v44 }
0x35f3   : > { %v7392_v18 = vsub.f32 %v17281_v56, %v7391_v7 }
0x35f5   : > { %v7393_v22 = vmul.f32 %v7392_v18, %v7392_v18 }
0x35f7   : > { %v7394_v47 = vsel %vm1129_vm2, %v7393_v22, 0.0 }
0x35f8   : > { %7395 = vadd.xlane.f32.xlu0 %v7394_v47 }
0x3685   : > { %v7396_v44 = vpop.xlane.xlu0 %7395 }
0x3686   : > { %v7397_v7 = vmul.f32 0.03125, %v7396_v44 }
0x3688   : > { %v7398_v22 = vadd.f32 1e-05, %v7397_v7 }
0x368a   : > { %15082 = vrsqrt.f32 %v7398_v22 }
0x3694   : > { %v15083_v47 = vpop.eup %15082 }
0x3695   : > { %v7400_v23 = vmul.f32 %v15083_v47, %v7392_v18  ;;  %v14442_v18 = vpack.c.bf16 %v11903_v55, %v11902_v40  ;;  %v7354_v55 = vsub.f32 %v17018_v8, %v17291_v29 }
0x3697   : > { %v7407_v17 = vmul.f32 %v11891_v63, %v7400_v23  ;;  %14443 = vmatpush3.bf16.msra.mxu0 %v14442_v18 }
0x3699   : > { %v7414_v25 = vadd.f32 %v11892_v50, %v7407_v17  ;;  %v7352_v50 = vsub.f32 %v16988_v51, %v17287_v39  ;;  %v7355_v39 = vsub.f32 %v17031_v6, %v17289_v2 }
0x369b   : > { %13505 = vmatmul.mubr.msk.f32.vlgmr.msra.gmra.mrb[96].mxu1 %vm1129_vm2, %v7414_v25 }
0x369c   : > { %13534 = vmatprep.mubr.msk.f32.mxu1 %vm15331_vm0, %v15330_v0 }
0x376e   : > { %v7497_v14 = vpop.f32.mrb[96].mxu1 }
0x376f   : > { %v7498_v13 = vadd.f32 %v11894_v20, %v7497_v14  ;;  %v13506_v33 = vpop.f32.mrb[97].mxu1 }
0x3771   : > { %v7501_v45 = vmax.f32 %v7498_v13, 0.0 }
0x3773   : > { %13524 = vmatmul.mubr.msk.f32.vlgmr.msra.gmra.mrb[86].mxu0 %vm2374_vm6, %v7501_v45 }
0x3846   : > { %v7588_v49 = vpop.f32.mrb[86].mxu0 }
0x3847   : > { %v7589_v48 = vadd.f32 %v11905_v34, %v7588_v49  ;;  %v13525_v44 = vpop.f32.mrb[87].mxu0 }
0x3848   : > { %v7626_v44 = vld [vmem:[#allocation2 + $0xa0] sm:$0xff] }
0x3849   : > { %v7592_v7 = vmul.f32 %v7589_v48, %v15657_v12 }
0x384b   : > { %v17342_v22 = vadd.f32 %v7592_v7, %v17281_v56 }
0x384d   : > { %v7598_v47 = vsel %vm1129_vm2, %v17342_v22, 0.0 }
0x384e   : > { %7599 = vadd.xlane.f32.xlu1 %v7598_v47  ;;  %v7628_v47 = vld [vmem:[#allocation2 + $0xb0] sm:$0xff] }
0x385f   : > { %7357 = vperm.xlu1 %14912, %v17116_v15  }
0x3863   : > { %7365 = vperm.xlu1 %14912, %v17138_v38  }
0x3867   : > { %7369 = vperm.xlu1 %14912, %v17130_v41  }
0x386b   : > { %14925 = vset.pattern.permute.xlu1 %v15332_v1 }
0x38db   : > { %v7600_v63 = vpop.xlane.xlu1 %7599 }
0x38dc   : > { %v7601_v23 = vmul.f32 0.03125, %v7600_v63  ;;  %v7629_v63 = vld [vmem:[#allocation2 + $0xb8] sm:$0xff] }
0x38de   : > { %v7602_v56 = vsub.f32 %v17342_v22, %v7601_v23  ;;  %v14448_v23 = vpack.c.bf16 %v7629_v63, %v7628_v47 }
0x38df   : > { %v7358_v17 = vpop.permute.xlu1 %7357 }
0x38e0   : > { %v7372_v25 = vmul.f32 %v7358_v17, %v7352_v50  ;;  %v7603_v40 = vmul.f32 %v7602_v56, %v7602_v56 }
0x38e2   : > { %v7376_v15 = vmul.f32 %v7372_v25, %v16046_v28  ;;  %v7604_v38 = vsel %vm1129_vm2, %v7603_v40, 0.0  ;;  %v7353_v40 = vsub.f32 %v17003_v54, %v17285_v36 }
0x38e3   : > { %7605 = vadd.xlane.f32.xlu0 %v7604_v38  ;;  %v7366_v41 = vpop.permute.xlu1 %7365 }
0x38e4   : > { %v17358_v18 = vadd.f32 %v7376_v15, %v16988_v51  ;;  %v7374_v20 = vmul.f32 %v7366_v41, %v7354_v55 }
0x38e6   : > { %v7378_v14 = vmul.f32 %v7374_v20, %v16059_v30  ;;  %13564 = vmatprep.mubr.msk.f32.mxu0 %vm1338_vm3, %v17358_v18  ;;  %v7792_v20 = vmul.f32 %v17011_v5, %v17358_v18 }
0x38e7   : > { %v7370_v13 = vpop.permute.xlu1 %7369 }
0x38e8   : > { %v17366_v29 = vadd.f32 %v7378_v14, %v17018_v8  ;;  %v7375_v33 = vmul.f32 %v7370_v13, %v7355_v39  ;;  %v11909_v14 = vld [vmem:[%s18323_s12 + $0x5] ss:$0 sm:$0xff] }
0x38ea   : > { %v7379_v45 = vmul.f32 %v7375_v33, %v16069_v32  ;;  %v7794_v51 = vmul.f32 %v17011_v5, %v17366_v29 }
0x38ec   : > { %v17370_v34 = vadd.f32 %v7379_v45, %v17031_v6  ;;  %v17377_v49 = vmul.f32 %v7794_v51, %v17366_v29  ;;  %v7627_v6 = vld [vmem:[#allocation2 + $0xa8] sm:$0xff] }
0x38ed   : > { %v14445_v7 = vpack.c.bf16 %v7627_v6, %v7626_v44 }
0x38ee   : > { %v7795_v2 = vmul.f32 %v17011_v5, %v17370_v34 }
0x38ef   : > { %14446 = vmatpush3.bf16.msra.mxu1 %v14445_v7 }
0x38f0   : > { %v17380_v48 = vmul.f32 %v7795_v2, %v17370_v34  ;;  %14447 = vmatprep.subr.bf16.mxu1 %v15333_v46  ;;  %v14464_v6 = vpack.c.bf16 %v7795_v2, %v7794_v51 }
0x38f2   : > { %v14455_v8 = vpack.c.bf16 %v17380_v48, %v17377_v49 }
0x38f3   : > { %14449 = vmatpush3.bf16.msra.mxu1 %v14448_v23 }
0x38f9   : > { %7361 = vperm.xlu0 %14913, %v17108_v16  }
0x38fd   : > { %14924 = vset.pattern.permute.xlu0 %v15332_v1 }
0x3970   : > { %v7606_v50 = vpop.xlane.xlu0 %7605 }
0x3971   : > { %v7607_v17 = vmul.f32 0.03125, %v7606_v50 }
0x3973   : > { %v7608_v25 = vadd.f32 1e-05, %v7607_v17 }
0x3975   : > { %15084 = vrsqrt.f32 %v7608_v25 }
0x3978   : > { %v7362_v16 = vpop.permute.xlu0 %7361 }
0x3979   : > { %v7373_v55 = vmul.f32 %v7362_v16, %v7353_v40 }
0x397b   : > { %v7377_v15 = vmul.f32 %v7373_v55, %v16052_v59 }
0x397d   : > { %v17391_v38 = vadd.f32 %v7377_v15, %v17003_v54  ;;  %v11910_v54 = vld [vmem:[%s18324_s13 + $0x5] ss:$0 sm:$0xff] }
0x397f   : > { %v15085_v41 = vpop.eup %15084  ;;  %v7793_v39 = vmul.f32 %v17011_v5, %v17391_v38 }
0x3980   : > { %v7610_v13 = vmul.f32 %v15085_v41, %v7602_v56 }
0x3981   : > { %v14458_v36 = vpack.c.bf16 %v7793_v39, %v7792_v20  ;;  %v7797_v33 = vmul.f32 %v7793_v39, %v17391_v38 }
0x3982   : > { %v7617_v45 = vmul.f32 %v11909_v14, %v7610_v13  ;;  %v7806_v13 = vsel %vm1338_vm3, %v17377_v49, 0.0 }
0x3983   : > { %14460 = vmatprep.subr.msk.bf16.mxu0 %vm15715_vm4, %v14458_v36  ;;  %v7803_v44 = vsel %vm1338_vm3, %v7797_v33, 0.0 }
0x3984   : > { %7804 = vadd.xlane.f32.xlu0 %v7803_v44  ;;  %14463 = vmatpush3.bf16.xpose.msk.msra.mxu0 %vm15715_vm4, %v14458_v36  ;;  %v7624_v5 = vadd.f32 %v11910_v54, %v7617_v45  ;;  %v7809_v36 = vsel %vm1338_vm3, %v17380_v48, 0.0  ;;  %v11931_v54 = vld [vmem:[%s18326_s15 + $0xb0] sm:$0xff]  ;;  %v11932_v45 = vld [vmem:[%s18326_s15 + $0xb8] sm:$0xff] }
0x3985   : > { %14466 = vmatprep.subr.msk.bf16.mxu0 %vm15715_vm4, %v14464_v6 }
0x3986   : > { %13535 = vmatmul.mubr.msk.f32.vlgmr.msra.gmra.mrb[98].mxu1 %vm1129_vm2, %v7624_v5 }
0x3987   : > { %13539 = vmatprep.mubr.msk.f32.mxu1 %vm949_vm1, %v17052_v43  ;;  %v7796_v43 = vmul.f32 %v7792_v20, %v17358_v18 }
0x3989   : > { %v14451_v2 = vpack.c.bf16 %v7797_v33, %v7796_v43  ;;  %v11930_v33 = vld [vmem:[%s18326_s15 + $0xa8] sm:$0xff] }
0x398c   : > { %14469 = vmatpush3.bf16.xpose.msk.msra.mxu0 %vm15715_vm4, %v14464_v6 }
0x3993   : > { %13565 = vmatmul.mubr.msk.f32.vlgmr.msra.gmra.mrb[88].mxu0 %vm1338_vm3, %v17391_v38 }
0x3994   : > { %13567 = vmatprep.mubr.msk.f32.mxu0 %vm1338_vm3, %v17366_v29 }
0x3997   : > { %13568 = vmatmul.mubr.msk.f32.gmra.mrb[90].mxu0 %vm1338_vm3, %v17370_v34 }
0x3a59   : > { %v7699_v56 = vpop.f32.mrb[98].mxu1 }
0x3a5a   : > { %v13536_v51 = vpop.f32.mrb[99].mxu1  ;;  %13537 = vmatprep.subr.mxu1 %v7699_v56 }
0x3a5b   : > { %13538 = vmatpush3.msra.mxu1 %v7699_v56 }
0x3a5c   : > { %13540 = vmatmul.mubr.msk.f32.vlgmr.msra.gmra.mrb[100].mxu1 %vm949_vm1, %v17071_v57  ;;  %14450 = vmatprep.subr.bf16.mxu1 %v15333_v46 }
0x3a5d   : > { %13542 = vmatprep.mubr.msk.f32.mxu1 %vm949_vm1, %v17079_v21 }
0x3a60   : > { %13543 = vmatmul.mubr.msk.f32.gmra.mrb[102].mxu1 %vm949_vm1, %v17087_v24  ;;  %v11929_v24 = vld [vmem:[%s18326_s15 + $0xa0] sm:$0xff] }
0x3a61   : > { %13553 = vmatprep.mubr.msk.f32.mxu1 %vm15331_vm0, %v15330_v0  ;;  %8026 = vperm.xlu0 %14924, %v11929_v24  }
0x3a62   : > { %14453 = vmatpush3.bf16.xpose.msk.msra.mxu1 %vm15715_vm4, %v14451_v2 }
0x3a63   : > { %14454 = vmatprep.subr.bf16.mxu1 %v15333_v46 }
0x3a65   : > { %14936 = vset.pattern.permute.xlu0 %v15337_v3 }
0x3a66   : > { %v13566_v57 = vpop.f32.mrb[88].mxu0 }
0x3a67   : > { %v7984_v7 = vpop.f32.mrb[89].mxu0  ;;  %v8012_v20 = vmul.f32 2.0, %v13566_v57 }
0x3a68   : > { %v8011_v57 = vmul.f32 2.0, %v7984_v7 }
0x3a6a   : > { %14457 = vmatpush3.bf16.xpose.msk.msra.mxu1 %vm15715_vm4, %v14455_v8  ;;  %v17437_v21 = vpop.f32.mrb[90].mxu0 }
0x3a6b   : > { %v7994_v47 = vpop.f32.mrb[91].mxu0 }
0x3a71   : > { %13554 = vmatmul.mubr.msk.f32.vlgmr.msra.gmra.mrb[104].mxu1 %vm1338_vm3, %v15334_v53 }
0x3b2f   : > { %v13541_v63 = vpop.f32.mrb[100].mxu1 }
0x3b30   : > { %v17446_v23 = vmul.f32 %v17105_v58, %v13541_v63  ;;  %v7769_v50 = vpop.f32.mrb[101].mxu1 }
0x3b31   : > { %v17449_v8 = vmul.f32 %v17113_v26, %v7769_v50 }
0x3b33   : > { %v13544_v17 = vpop.f32.mrb[102].mxu1  ;;  %13578 = vmatprep.mubr.msk.f32.mxu1 %vm1129_vm2, %v17449_v8  ;;  %v17455_v25 = vpack.i.bf16 %v17446_v23, %v17449_v8 }
0x3b34   : > { %v17458_v40 = vmul.f32 %v17127_v19, %v13544_v17  ;;  %v7779_v16 = vpop.f32.mrb[103].mxu1  ;;  %v7805_v19 = vpop.xlane.xlu0 %7804  ;;  %v8013_v17 = vmul.f32 2.0, %v7994_v47 }
0x3b35   : > { %v17461_v55 = vmul.f32 %v17135_v11, %v7779_v16  ;;  %14915 = vrot.lane.b32.xlu1 %v17455_v25, %s15335_s7  ;;  %v7800_v11 = vsel %vm1338_vm3, %v7796_v43, 0.0 }
0x3b37   : > { %v17467_v58 = vpack.i.bf16 %v17458_v40, %v17461_v55 }
0x3b39   : > { %14920 = vrot.lane.b32.xlu1 %v17467_v58, %s15335_s7 }
0x3b44   : > { %v7890_v26 = vpop.f32.mrb[104].mxu1 }
0x3b45   : > { %v8006_v15 = vrot.slane %v7890_v26, %v15815_v35  ;;  %v13555_v41 = vpop.f32.mrb[105].mxu1 }
0x3b47   : > { %v8008_v39 = vadd.f32 %v8006_v15, %v7805_v19  ;;  %v8014_v19 = vmul.f32 2.0, %v17437_v21 }
0x3b49   : > { %v8016_v14 = vsub.f32 %v8008_v39, %v8012_v20 }
0x3b5d   : > { %7801 = vadd.xlane.f32.xlu1 %v7800_v11 }
0x3b61   : > { %7807 = vadd.xlane.f32.xlu1 %v7806_v13 }
0x3b65   : > { %7810 = vadd.xlane.f32.xlu1 %v7809_v36  ;;  %v8027_v36 = vpop.permute.xlu0 %8026 }
0x3b76   : > { %8031 = vperm.xlu1 %14925, %v11930_v33  }
0x3b7a   : > { %8036 = vperm.xlu1 %14925, %v11931_v54  }
0x3b7e   : > { %8041 = vperm.xlu1 %14925, %v11932_v45  }
0x3b82   : > { %14937 = vset.pattern.permute.xlu1 %v15337_v3 }
0x3ba7   : > { %v14916_v49 = vpop.permute.xlu1 %14915 }
0x3ba8   : > { %v14918_v48 = vunpack.i.h.bf16 %v14916_v49  ;;  %v14917_v44 = vunpack.i.l.bf16 %v14916_v49 }
0x3baa   : > { %v14470_v6 = vpack.c.bf16 %v14918_v48, %v14917_v44 }
0x3bab   : > { %v14921_v5 = vpop.permute.xlu1 %14920 }
0x3bac   : > { %14472 = vmatprep.subr.msk.bf16.mxu1 %vm15825_vm5, %v14470_v6  ;;  %v14923_v56 = vunpack.i.h.bf16 %v14921_v5  ;;  %v14922_v51 = vunpack.i.l.bf16 %v14921_v5 }
0x3bad   : > { %14475 = vmatpush3.bf16.xpose.msk.msra.mxu1 %vm15825_vm5, %v14470_v6 }
0x3bae   : > { %v14476_v43 = vpack.c.bf16 %v14923_v56, %v14922_v51 }
0x3bb0   : > { %14478 = vmatprep.subr.msk.bf16.mxu1 %vm15825_vm5, %v14476_v43 }
0x3bb5   : > { %14481 = vmatpush3.bf16.xpose.msk.msra.mxu1 %vm15825_vm5, %v14476_v43 }
0x3bb6   : > { %14496 = vmatprep.subr.bf16.mxu1 %v15333_v46 }
0x3bbc   : > { %13579 = vmatmul.mubr.msk.f32.vlgmr.msra.gmra.mrb[106].mxu1 %vm1129_vm2, %v17446_v23 }
0x3bbd   : > { %13581 = vmatprep.mubr.msk.f32.mxu1 %vm1129_vm2, %v17461_v55 }
0x3bc0   : > { %13582 = vmatmul.mubr.msk.f32.gmra.mrb[108].mxu1 %vm1129_vm2, %v17458_v40 }
0x3bc1   : > { %13617 = vmatprep.mubr.msk.f32.mxu1 %vm15331_vm0, %v15330_v0 }
0x3bea   : > { %v7802_v2 = vpop.xlane.xlu1 %7801 }
0x3beb   : > { %v8007_v24 = vadd.f32 %v8006_v15, %v7802_v2 }
0x3bed   : > { %v8015_v63 = vsub.f32 %v8007_v24, %v8011_v57 }
0x3bee   : > { %v7808_v50 = vpop.xlane.xlu1 %7807 }
0x3bef   : > { %v8009_v16 = vadd.f32 %v8006_v15, %v7808_v50  ;;  %v8044_v54 = vmul.f32 %v8027_v36, %v8015_v63 }
0x3bf1   : > { %v8017_v26 = vsub.f32 %v8009_v16, %v8013_v17 }
0x3bf2   : > { %v7811_v41 = vpop.xlane.xlu1 %7810 }
0x3bf3   : > { %v8010_v20 = vadd.f32 %v8006_v15, %v7811_v41 }
0x3bf5   : > { %v8018_v39 = vsub.f32 %v8010_v20, %v8014_v19 }
0x3bf6   : > { %v8032_v11 = vpop.permute.xlu1 %8031 }
0x3bf7   : > { %v8045_v33 = vmul.f32 %v8032_v11, %v8016_v14 }
0x3bfa   : > { %v8037_v13 = vpop.permute.xlu1 %8036 }
0x3bfb   : > { %v8046_v5 = vmul.f32 %v8037_v13, %v8017_v26 }
0x3bfe   : > { %v8042_v45 = vpop.permute.xlu1 %8041 }
0x3bff   : > { %v8047_v6 = vmul.f32 %v8042_v45, %v8018_v39 }
0x3c8f   : > { %v13580_v49 = vpop.f32.mrb[106].mxu1 }
0x3c90   : > { %v8148_v48 = vadd.f32 %v13580_v49, %v8045_v33  ;;  %v8142_v7 = vpop.f32.mrb[107].mxu1 }
0x3c91   : > { %v8143_v44 = vadd.f32 %v8142_v7, %v8044_v54 }
0x3c92   : > { %v8162_v47 = vadd.f32 %v17181_v37, %v8148_v48 }
0x3c93   : > { %v8161_v56 = vadd.f32 %v17185_v42, %v8143_v44  ;;  %v13583_v51 = vpop.f32.mrb[108].mxu1 }
0x3c94   : > { %v8158_v21 = vadd.f32 %v13583_v51, %v8047_v6  ;;  %v8152_v15 = vpop.f32.mrb[109].mxu1  ;;  %v8168_v43 = vsel %vm1129_vm2, %v8162_v47, -inf }
0x3c95   : > { %v8153_v2 = vadd.f32 %v8152_v15, %v8046_v5  ;;  %8169 = vmax.xlane.f32.xlu0 %v8168_v43  ;;  %v8165_v14 = vsel %vm1129_vm2, %v8161_v56, -inf }
0x3c96   : > { %8166 = vmax.xlane.f32.xlu1 %v8165_v14  ;;  %v8164_v24 = vadd.f32 %v17195_v31, %v8158_v21 }
0x3c97   : > { %v8163_v57 = vadd.f32 %v17191_v60, %v8153_v2 }
0x3c98   : > { %v8174_v37 = vsel %vm1129_vm2, %v8164_v24, -inf }
0x3c99   : > { %v8171_v63 = vsel %vm1129_vm2, %v8163_v57, -inf }
0x3c9a   : > { %8172 = vmax.xlane.f32.xlu1 %v8171_v63 }
0x3c9e   : > { %8175 = vmax.xlane.f32.xlu1 %v8174_v37 }
0x3d22   : > { %v8170_v42 = vpop.xlane.xlu0 %8169 }
0x3d23   : > { %v8178_v50 = vsub.f32 %v8162_v47, %v8170_v42  ;;  %v8167_v17 = vpop.xlane.xlu1 %8166 }
0x3d24   : > { %v8177_v16 = vsub.f32 %v8161_v56, %v8167_v17 }
0x3d25   : > { %v8183_v26 = vmul.f32 1.442695, %v8178_v50 }
0x3d26   : > { %v8181_v41 = vmul.f32 1.442695, %v8177_v16  ;;  %v11946_v16 = vld [vmem:[%s18327_s16 + $0xa0] sm:$0xff] }
0x3d27   : > { %15086 = vpow2.f32 %v8183_v26  ;;  %v8173_v19 = vpop.xlane.xlu1 %8172  ;;  %v11947_v26 = vld [vmem:[%s18327_s16 + $0xa8] sm:$0xff] }
0x3d28   : > { %v8179_v20 = vsub.f32 %v8163_v57, %v8173_v19  ;;  %15088 = vpow2.f32 %v8181_v41  ;;  %v11948_v41 = vld [vmem:[%s18327_s16 + $0xb0] sm:$0xff]  ;;  %v14497_v19 = vpack.c.bf16 %v11947_v26, %v11946_v16  ;;  %v11967_v16 = vld [vmem:[%s18332_s21 + $0x148] sm:$0xff] }
0x3d29   : > { %v11968_v26 = vld [vmem:[%s18332_s21 + $0x150] sm:$0xff] }
0x3d2a   : > { %v8185_v39 = vmul.f32 1.442695, %v8179_v20  ;;  %v11949_v20 = vld [vmem:[%s18327_s16 + $0xb8] sm:$0xff]  ;;  %14498 = vmatpush3.bf16.msra.mxu1 %v14497_v19 }
0x3d2b   : > { %v8176_v60 = vpop.xlane.xlu1 %8175  ;;  %14499 = vmatprep.subr.bf16.mxu1 %v15333_v46  ;;  %v11969_v19 = vld [vmem:[%s18332_s21 + $0x158] sm:$0xff] }
0x3d2c   : > { %15090 = vpow2.f32 %v8185_v39  ;;  %v8180_v31 = vsub.f32 %v8164_v24, %v8176_v60  ;;  %v14500_v39 = vpack.c.bf16 %v11949_v20, %v11948_v41  ;;  %v14528_v20 = vpack.c.bf16 %v11969_v19, %v11968_v26 }
0x3d2e   : > { %v8187_v11 = vmul.f32 1.442695, %v8180_v31  ;;  %14501 = vmatpush3.bf16.msra.mxu1 %v14500_v39  ;;  %v11970_v39 = vld [vmem:[%s18332_s21 + $0x160] sm:$0xff] }
0x3d30   : > { %15092 = vpow2.f32 %v8187_v11 }
0x3d31   : > { %v15087_v13 = vpop.eup %15086 }
0x3d32   : > { %v8192_v36 = vsel %vm1129_vm2, %v15087_v13, 0.0  ;;  %v15089_v33 = vpop.eup %15088 }
0x3d33   : > { %8193 = vadd.xlane.f32.xlu1 %v8192_v36  ;;  %v8189_v45 = vsel %vm1129_vm2, %v15089_v33, 0.0 }
0x3d36   : > { %v15091_v54 = vpop.eup %15090 }
0x3d37   : > { %8190 = vadd.xlane.f32.xlu1 %v8189_v45  ;;  %v8195_v49 = vsel %vm1129_vm2, %v15091_v54, 0.0  ;;  %v14506_v45 = vpack.c.bf16 %v17370_v34, %v17366_v29 }
0x3d38   : > { %8196 = vadd.xlane.f32.xlu0 %v8195_v49 }
0x3d3a   : > { %v15093_v48 = vpop.eup %15092 }
0x3d3b   : > { %v8198_v7 = vsel %vm1129_vm2, %v15093_v48, 0.0 }
0x3d3c   : > { %8199 = vadd.xlane.f32.xlu1 %v8198_v7 }
0x3d4d   : > { %14932 = vrot.lane.b32.xlu1 %v17467_v58, %s18410_s11 }
0x3d4e   : > { %14927 = vrot.lane.b32.xlu0 %v17455_v25, %s18410_s11 }
0x3dc0   : > { %v8194_v44 = vpop.xlane.xlu1 %8193 }
0x3dc4   : > { %v8191_v6 = vpop.xlane.xlu1 %8190 }
0x3dc5   : > { %15094 = vrcp.f32 %v8191_v6  ;;  %v8197_v47 = vpop.xlane.xlu0 %8196 }
0x3dc6   : > { %15096 = vrcp.f32 %v8194_v44 }
0x3dc7   : > { %15098 = vrcp.f32 %v8197_v47 }
0x3dc9   : > { %v14928_v5 = vpop.permute.xlu0 %14927  ;;  %v8200_v56 = vpop.xlane.xlu1 %8199 }
0x3dca   : > { %v14930_v51 = vunpack.i.h.bf16 %v14928_v5  ;;  %v14929_v21 = vunpack.i.l.bf16 %v14928_v5  ;;  %15100 = vrcp.f32 %v8200_v56 }
0x3dcc   : > { %v14482_v15 = vpack.c.bf16 %v14930_v51, %v14929_v21 }
0x3dcd   : > { %v14933_v43 = vpop.permute.xlu1 %14932 }
0x3dce   : > { %v14935_v2 = vunpack.i.h.bf16 %v14933_v43  ;;  %v14934_v14 = vunpack.i.l.bf16 %v14933_v43  ;;  %14483 = vmatprep.subr.bf16.mxu0 %v14482_v15 }
0x3dcf   : > { %v15095_v58 = vpop.eup %15094  ;;  %14485 = vmatpush3.bf16.msra.mxu0 %v14482_v15 }
0x3dd0   : > { %v14486_v57 = vpack.c.bf16 %v14935_v2, %v14934_v14  ;;  %v8205_v25 = vmul.f32 %v15095_v58, %v15089_v33  ;;  %v15097_v24 = vpop.eup %15096 }
0x3dd1   : > { %v15099_v63 = vpop.eup %15098  ;;  %v8206_v37 = vmul.f32 %v15097_v24, %v15087_v13  ;;  %v8703_v24 = vld [vmem:[#allocation5 + $0xa8] sm:$0xff] }
0x3dd2   : > { %14487 = vmatprep.subr.bf16.mxu0 %v14486_v57  ;;  %13592 = vmatprep.mubr.msk.f32.mxu0 %vm1129_vm2, %v8205_v25  ;;  %v8207_v50 = vmul.f32 %v15099_v63, %v15091_v54  ;;  %v14502_v54 = vpack.c.bf16 %v17391_v38, %v17358_v18 }
0x3dd3   : > { %14489 = vmatpush3.bf16.msra.mxu0 %v14486_v57 }
0x3dd4   : > { %14490 = vmatprep.subr.bf16.mxu0 %v15333_v46  ;;  %v15101_v42 = vpop.eup %15100 }
0x3dd5   : > { %v8208_v17 = vmul.f32 %v15101_v42, %v15093_v48  ;;  %v8705_v42 = vld [vmem:[#allocation5 + $0xb8] sm:$0xff] }
0x3dd6   : > { %13593 = vmatmul.mubr.msk.f32.vlgmr.msra.gmra.mrb[92].mxu0 %vm1129_vm2, %v8206_v37 }
0x3dd7   : > { %13595 = vmatprep.mubr.msk.f32.mxu0 %vm1129_vm2, %v8207_v50 }
0x3dda   : > { %13596 = vmatmul.mubr.msk.f32.gmra.mrb[94].mxu0 %vm1129_vm2, %v8208_v17 }
0x3ddb   : > { %13606 = vmatprep.mubr.msk.f32.mxu0 %vm15331_vm0, %v15330_v0 }
0x3ea9   : > { %v13594_v60 = vpop.f32.mrb[92].mxu0 }
0x3eaa   : > { %v8299_v31 = vpop.f32.mrb[93].mxu0 }
0x3eab   : > { %v14491_v11 = vpack.c.bf16 %v13594_v60, %v8299_v31  ;;  %v11971_v60 = vld [vmem:[%s18332_s21 + $0x168] sm:$0xff] }
0x3eac   : > { %v14531_v31 = vpack.c.bf16 %v11971_v60, %v11970_v39  ;;  %v8915_v39 = vld [vmem:[#allocation2 + $0xd8] sm:$0xff] }
0x3ead   : > { %v13597_v13 = vpop.f32.mrb[94].mxu0  ;;  %14492 = vmatpush3.bf16.msra.mxu0 %v14491_v11 }
0x3eae   : > { %v8309_v36 = vpop.f32.mrb[95].mxu0  ;;  %14493 = vmatprep.subr.bf16.mxu0 %v15333_v46 }
0x3eaf   : > { %v14494_v33 = vpack.c.bf16 %v13597_v13, %v8309_v36 }
0x3eb1   : > { %14495 = vmatpush3.bf16.msra.mxu0 %v14494_v33 }
0x3eb2   : > { %14503 = vmatprep.subr.bf16.mxu0 %v14502_v54 }
0x3eb4   : > { %13607 = vmatmul.mubr.msk.f32.vlgmr.msra.gmra.mrb[96].mxu0 %vm1129_vm2, %v17234_v4 }
0x3eb5   : > { %14505 = vmatpush3.bf16.msra.mxu0 %v14502_v54  ;;  %13628 = vmatprep.mubr.msk.f32.mxu0 %vm1129_vm2, %v8205_v25  ;;  %v8702_v25 = vld [vmem:[#allocation5 + $0xa0] sm:$0xff] }
0x3eb6   : > { %14507 = vmatprep.subr.bf16.mxu0 %v14506_v45  ;;  %v14519_v63 = vpack.c.bf16 %v8703_v24, %v8702_v25  ;;  %v11961_v54 = vld [vmem:[%s18328_s17 + $0x5] ss:$0 sm:$0xff] }
0x3eb9   : > { %14509 = vmatpush3.bf16.msra.mxu0 %v14506_v45 }
0x3eba   : > { %14518 = vmatprep.subr.bf16.mxu0 %v15333_v46 }
0x3ebc   : > { %13629 = vmatmul.mubr.msk.f32.vlgmr.msra.gmra.mrb[98].mxu0 %vm1129_vm2, %v8206_v37  ;;  %v8704_v37 = vld [vmem:[#allocation5 + $0xb0] sm:$0xff] }
0x3ebd   : > { %13631 = vmatprep.mubr.msk.f32.mxu0 %vm1129_vm2, %v8207_v50  ;;  %14520 = vmatpush3.bf16.msra.mxu0 %v14519_v63  ;;  %v14522_v50 = vpack.c.bf16 %v8705_v42, %v8704_v37 }
0x3ebe   : > { %14521 = vmatprep.subr.bf16.mxu0 %v15333_v46 }
0x3ec0   : > { %13632 = vmatmul.mubr.msk.f32.gmra.mrb[100].mxu0 %vm1129_vm2, %v8208_v17  ;;  %v11966_v17 = vld [vmem:[%s18332_s21 + $0x140] sm:$0xff] }
0x3ec1   : > { %13656 = vmatprep.mubr.msk.f32.mxu0 %vm15331_vm0, %v15330_v0  ;;  %14523 = vmatpush3.bf16.msra.mxu0 %v14522_v50  ;;  %v14525_v41 = vpack.c.bf16 %v11967_v16, %v11966_v17 }
0x3ec2   : > { %14536 = vmatprep.subr.bf16.mxu0 %v15333_v46 }
0x3f87   : > { %v8384_v4 = vpop.f32.mrb[96].mxu0 }
0x3f88   : > { %v13608_v49 = vpop.f32.mrb[97].mxu0  ;;  %13618 = vmatmul.mubr.msk.f32.vlgmr.msra.gmra.mrb[110].mxu1 %vm1129_vm2, %v8384_v4  ;;  %v11962_v4 = vld [vmem:[%s18329_s18 + $0x5] ss:$0 sm:$0xff] }
0x3f89   : > { %13642 = vmatprep.mubr.msk.f32.mxu1 %vm1129_vm2, %v17251_v27 }
0x3f8f   : > { %v13630_v48 = vpop.f32.mrb[98].mxu0 }
0x3f90   : > { %v8534_v7 = vpop.f32.mrb[99].mxu0 }
0x3f91   : > { %v14510_v44 = vpack.c.bf16 %v13630_v48, %v8534_v7  ;;  %v11972_v7 = vld [vmem:[%s18332_s21 + $0x170] sm:$0xff] }
0x3f93   : > { %v13633_v6 = vpop.f32.mrb[100].mxu0  ;;  %14511 = vmatprep.subr.bf16.mxu1 %v14510_v44 }
0x3f94   : > { %v8544_v47 = vpop.f32.mrb[101].mxu0  ;;  %14513 = vmatpush3.bf16.msra.mxu1 %v14510_v44  ;;  %v11973_v44 = vld [vmem:[%s18332_s21 + $0x178] sm:$0xff] }
0x3f95   : > { %v14514_v5 = vpack.c.bf16 %v13633_v6, %v8544_v47  ;;  %v14534_v6 = vpack.c.bf16 %v11973_v44, %v11972_v7  ;;  %v11964_v47 = vld [vmem:[%s18331_s20 + $0x5] ss:$0 sm:$0xff] }
0x3f97   : > { %14515 = vmatprep.subr.bf16.mxu1 %v14514_v5 }
0x3f98   : > { %14517 = vmatpush3.bf16.msra.mxu1 %v14514_v5 }
0x3f99   : > { %14524 = vmatprep.subr.bf16.mxu1 %v15333_v46 }
0x3f9b   : > { %13643 = vmatmul.mubr.msk.f32.vlgmr.msra.gmra.mrb[112].mxu1 %vm1129_vm2, %v17259_v10 }
0x3f9c   : > { %13645 = vmatprep.mubr.msk.f32.mxu1 %vm1129_vm2, %v17266_v62  ;;  %14526 = vmatpush3.bf16.msra.mxu1 %v14525_v41 }
0x3f9d   : > { %14527 = vmatprep.subr.bf16.mxu1 %v15333_v46 }
0x3f9f   : > { %13646 = vmatmul.mubr.msk.f32.gmra.mrb[114].mxu1 %vm1129_vm2, %v17273_v9 }
0x3fa0   : > { %13675 = vmatprep.mubr.msk.f32.mxu1 %vm15331_vm0, %v15330_v0  ;;  %14529 = vmatpush3.bf16.msra.mxu1 %v14528_v20  ;;  %v8914_v20 = vld [vmem:[#allocation2 + $0xd0] sm:$0xff] }
0x3fa1   : > { %14530 = vmatprep.subr.bf16.mxu1 %v15333_v46 }
0x3fa4   : > { %14532 = vmatpush3.bf16.msra.mxu1 %v14531_v31 }
0x3fa5   : > { %14533 = vmatprep.subr.bf16.mxu1 %v15333_v46 }
0x3fa8   : > { %14535 = vmatpush3.bf16.msra.mxu1 %v14534_v6 }
0x405b   : > { %v8462_v27 = vpop.f32.mrb[110].mxu1 }
0x405c   : > { %v8466_v56 = vmul.f32 %v8462_v27, %v15657_v12  ;;  %v13619_v51 = vpop.f32.mrb[111].mxu1 }
0x405e   : > { %v17569_v21 = vadd.f32 %v8466_v56, %v17342_v22 }
0x4060   : > { %v8674_v15 = vsel %vm1129_vm2, %v17569_v21, 0.0 }
0x4061   : > { %8675 = vadd.xlane.f32.xlu1 %v8674_v15  ;;  %v11975_v15 = vld [vmem:[%s18333_s22 + $0x5] ss:$0 sm:$0xff] }
0x406e   : > { %v17573_v10 = vpop.f32.mrb[112].mxu1 }
0x406f   : > { %v17575_v62 = vpop.f32.mrb[113].mxu1 }
0x4070   : > { %v8638_v50 = vsub.f32 %v17358_v18, %v17575_v62  ;;  %v8913_v62 = vld [vmem:[#allocation2 + $0xc8] sm:$0xff] }
0x4072   : > { %v17577_v43 = vpop.f32.mrb[114].mxu1 }
0x4073   : > { %v17579_v9 = vpop.f32.mrb[115].mxu1 }
0x40ee   : > { %v8676_v2 = vpop.xlane.xlu1 %8675 }
0x40ef   : > { %v8677_v14 = vmul.f32 0.03125, %v8676_v2 }
0x40f1   : > { %v8678_v58 = vsub.f32 %v17569_v21, %v8677_v14 }
0x40f3   : > { %v8679_v57 = vmul.f32 %v8678_v58, %v8678_v58 }
0x40f5   : > { %v8680_v22 = vsel %vm1129_vm2, %v8679_v57, 0.0 }
0x40f6   : > { %8681 = vadd.xlane.f32.xlu0 %v8680_v22 }
0x4183   : > { %v8682_v11 = vpop.xlane.xlu0 %8681 }
0x4184   : > { %v8683_v13 = vmul.f32 0.03125, %v8682_v11 }
0x4186   : > { %v8684_v36 = vadd.f32 1e-05, %v8683_v13  ;;  %v8640_v13 = vsub.f32 %v17366_v29, %v17579_v9 }
0x4188   : > { %15102 = vrsqrt.f32 %v8684_v36 }
0x4192   : > { %v15103_v33 = vpop.eup %15102 }
0x4193   : > { %v8686_v45 = vmul.f32 %v15103_v33, %v8678_v58 }
0x4195   : > { %v8693_v49 = vmul.f32 %v11961_v54, %v8686_v45 }
0x4197   : > { %v8700_v48 = vadd.f32 %v11962_v4, %v8693_v49  ;;  %v8641_v4 = vsub.f32 %v17370_v34, %v17577_v43 }
0x4199   : > { %13657 = vmatmul.mubr.msk.f32.vlgmr.msra.gmra.mrb[102].mxu0 %vm1129_vm2, %v8700_v48 }
0x419a   : > { %13686 = vmatprep.mubr.msk.f32.mxu0 %vm15331_vm0, %v15330_v0 }
0x426c   : > { %v8783_v5 = vpop.f32.mrb[102].mxu0 }
0x426d   : > { %v8784_v27 = vadd.f32 %v11964_v47, %v8783_v5  ;;  %v13658_v56 = vpop.f32.mrb[103].mxu0 }
0x426e   : > { %v11979_v56 = vld [vmem:[%s18323_s12 + $0x6] ss:$0 sm:$0xff] }
0x426f   : > { %v8787_v51 = vmax.f32 %v8784_v27, 0.0 }
0x4271   : > { %13676 = vmatmul.mubr.msk.f32.vlgmr.msra.gmra.mrb[116].mxu1 %vm2374_vm6, %v8787_v51 }
0x4344   : > { %v8874_v2 = vpop.f32.mrb[116].mxu1 }
0x4345   : > { %v8875_v14 = vadd.f32 %v11975_v15, %v8874_v2  ;;  %v13677_v58 = vpop.f32.mrb[117].mxu1  ;;  %v11980_v15 = vld [vmem:[%s18324_s13 + $0x6] ss:$0 sm:$0xff] }
0x4347   : > { %v8878_v57 = vmul.f32 %v8875_v14, %v15657_v12 }
0x4349   : > { %v17630_v22 = vadd.f32 %v8878_v57, %v17569_v21 }
0x434b   : > { %v8884_v25 = vsel %vm1129_vm2, %v17630_v22, 0.0 }
0x434c   : > { %8885 = vadd.xlane.f32.xlu0 %v8884_v25 }
0x4362   : > { %8643 = vperm.xlu0 %14936, %v17449_v8   ;;  %v8912_v8 = vld [vmem:[#allocation2 + $0xc0] sm:$0xff] }
0x4363   : > { %v14537_v19 = vpack.c.bf16 %v8913_v62, %v8912_v8 }
0x4365   : > { %14538 = vmatpush3.bf16.msra.mxu0 %v14537_v19  ;;  %v17741_v19 = vld [vmem:[%s18398_s24 + $0x18] sm:$0xff] }
0x4366   : > { %14949 = vset.pattern.permute.xlu0 %v15332_v1  ;;  %14539 = vmatprep.subr.bf16.mxu0 %v15333_v46 }
0x43d9   : > { %v8886_v24 = vpop.xlane.xlu0 %8885 }
0x43da   : > { %v8887_v63 = vmul.f32 0.03125, %v8886_v24 }
0x43dc   : > { %v8888_v37 = vsub.f32 %v17630_v22, %v8887_v63 }
0x43de   : > { %v8889_v42 = vmul.f32 %v8888_v37, %v8888_v37 }
0x43e0   : > { %v8890_v17 = vsel %vm1129_vm2, %v8889_v42, 0.0  ;;  %v17706_v42 = vld [vmem:[%s18398_s24] sm:$0xff] }
0x43e1   : > { %8891 = vadd.xlane.f32.xlu1 %v8890_v17  ;;  %v8644_v21 = vpop.permute.xlu0 %8643 }
0x43e2   : > { %v8658_v16 = vmul.f32 %v8644_v21, %v8638_v50  ;;  %v12000_v50 = vld [vmem:[%s18326_s15 + $0xc8] sm:$0xff] }
0x43e4   : > { %v8662_v26 = vmul.f32 %v8658_v16, %v16046_v28  ;;  %v17725_v16 = vld [vmem:[%s18398_s24 + $0x8] sm:$0xff] }
0x43e6   : > { %v17642_v41 = vadd.f32 %v8662_v26, %v17358_v18  ;;  %v14540_v18 = vpack.c.bf16 %v8915_v39, %v8914_v20  ;;  %v17733_v26 = vld [vmem:[%s18398_s24 + $0x10] sm:$0xff] }
0x43e8   : > { %13716 = vmatprep.mubr.msk.f32.mxu1 %vm1338_vm3, %v17642_v41  ;;  %14541 = vmatpush3.bf16.msra.mxu0 %v14540_v18 }
0x43f2   : > { %8647 = vperm.xlu1 %14937, %v17446_v23   ;;  %v8639_v23 = vsub.f32 %v17391_v38, %v17573_v10  ;;  %v17665_v10 = vld [vmem:[%s18400_s26] ss:$0 sm:$0xff] }
0x43f3   : > { %v9078_v9 = vmul.f32 %v17665_v10, %v17642_v41 }
0x43f5   : > { %v9082_v8 = vmul.f32 %v9078_v9, %v17642_v41 }
0x43f6   : > { %8651 = vperm.xlu1 %14937, %v17461_v55  }
0x43fa   : > { %8655 = vperm.xlu1 %14937, %v17458_v40  }
0x43fe   : > { %14948 = vset.pattern.permute.xlu1 %v15332_v1 }
0x446e   : > { %v8892_v60 = vpop.xlane.xlu1 %8891 }
0x446f   : > { %v8893_v31 = vmul.f32 0.03125, %v8892_v60 }
0x4471   : > { %v8894_v55 = vadd.f32 1e-05, %v8893_v31 }
0x4472   : > { %v8648_v11 = vpop.permute.xlu1 %8647 }
0x4473   : > { %15104 = vrsqrt.f32 %v8894_v55  ;;  %v8659_v40 = vmul.f32 %v8648_v11, %v8639_v23  ;;  %v17759_v23 = vld [vmem:[%s18403_s2 + $0x8] sm:$0xff] }
0x4475   : > { %v8663_v36 = vmul.f32 %v8659_v40, %v16052_v59  ;;  %v17767_v40 = vld [vmem:[%s18403_s2] sm:$0xff] }
0x4476   : > { %v8652_v33 = vpop.permute.xlu1 %8651 }
0x4477   : > { %v17657_v54 = vadd.f32 %v8663_v36, %v17391_v38  ;;  %v8660_v45 = vmul.f32 %v8652_v33, %v8640_v13 }
0x4479   : > { %v8664_v49 = vmul.f32 %v8660_v45, %v16059_v30  ;;  %v9079_v48 = vmul.f32 %v17665_v10, %v17657_v54  ;;  %v17781_v45 = vld [vmem:[%s18403_s2 + $0x18] sm:$0xff] }
0x447a   : > { %v8656_v7 = vpop.permute.xlu1 %8655 }
0x447b   : > { %v17672_v38 = vadd.f32 %v8664_v49, %v17366_v29  ;;  %v8661_v44 = vmul.f32 %v8656_v7, %v8641_v4  ;;  %v14550_v6 = vpack.c.bf16 %v9079_v48, %v9078_v9  ;;  %v9083_v43 = vmul.f32 %v9079_v48, %v17657_v54  ;;  %v17789_v9 = vld [vmem:[%s18403_s2 + $0x10] sm:$0xff] }
0x447d   : > { %v15105_v47 = vpop.eup %15104  ;;  %v8665_v5 = vmul.f32 %v8661_v44, %v16069_v32  ;;  %14552 = vmatprep.subr.msk.bf16.mxu1 %vm15715_vm4, %v14550_v6  ;;  %v9089_v27 = vsel %vm1338_vm3, %v9083_v43, 0.0  ;;  %v9080_v2 = vmul.f32 %v17665_v10, %v17672_v38  ;;  %v14543_v62 = vpack.c.bf16 %v9083_v43, %v9082_v8 }
0x447e   : > { %v8896_v51 = vmul.f32 %v15105_v47, %v8888_v37  ;;  %9090 = vadd.xlane.f32.xlu0 %v9089_v27  ;;  %14555 = vmatpush3.bf16.xpose.msk.msra.mxu1 %vm15715_vm4, %v14550_v6 }
0x447f   : > { %v17685_v29 = vadd.f32 %v8665_v5, %v17370_v34  ;;  %v17696_v63 = vmul.f32 %v9080_v2, %v17672_v38 }
0x4480   : > { %v8903_v14 = vmul.f32 %v11979_v56, %v8896_v51 }
0x4481   : > { %v9081_v58 = vmul.f32 %v17665_v10, %v17685_v29 }
0x4482   : > { %v8910_v57 = vadd.f32 %v11980_v15, %v8903_v14 }
0x4483   : > { %v14556_v25 = vpack.c.bf16 %v9081_v58, %v9080_v2  ;;  %v9085_v24 = vmul.f32 %v9081_v58, %v17685_v29  ;;  %v9086_v58 = vsel %vm1338_vm3, %v9082_v8, 0.0 }
0x4484   : > { %13687 = vmatmul.mubr.msk.f32.vlgmr.msra.gmra.mrb[104].mxu0 %vm1129_vm2, %v8910_v57  ;;  %v9092_v57 = vsel %vm1338_vm3, %v17696_v63, 0.0 }
0x4485   : > { %14558 = vmatprep.subr.msk.bf16.mxu1 %vm15715_vm4, %v14556_v25  ;;  %v9095_v34 = vsel %vm1338_vm3, %v9085_v24, 0.0  ;;  %v14547_v37 = vpack.c.bf16 %v9085_v24, %v17696_v63  ;;  %13691 = vmatprep.mubr.msk.f32.mxu0 %vm949_vm1, %v17706_v42  ;;  %v12001_v24 = vld [vmem:[%s18326_s15 + $0xd0] sm:$0xff] }
0x4486   : > { %9096 = vadd.xlane.f32.xlu0 %v9095_v34  ;;  %14561 = vmatpush3.bf16.xpose.msk.msra.mxu1 %vm15715_vm4, %v14556_v25  ;;  %v11999_v25 = vld [vmem:[%s18326_s15 + $0xc0] sm:$0xff]  ;;  %v12002_v34 = vld [vmem:[%s18326_s15 + $0xd8] sm:$0xff] }
0x448d   : > { %13717 = vmatmul.mubr.msk.f32.vlgmr.msra.gmra.mrb[118].mxu1 %vm1338_vm3, %v17657_v54 }
0x448e   : > { %13719 = vmatprep.mubr.msk.f32.mxu1 %vm1338_vm3, %v17672_v38 }
0x4491   : > { %13720 = vmatmul.mubr.msk.f32.gmra.mrb[120].mxu1 %vm1338_vm3, %v17685_v29 }
0x449c   : > { %9317 = vperm.xlu0 %14949, %v12000_v50  }
0x44a0   : > { %14961 = vset.pattern.permute.xlu0 %v15337_v3 }
0x450b   : > { %v9091_v44 = vpop.xlane.xlu0 %9090 }
0x4513   : > { %v9097_v5 = vpop.xlane.xlu0 %9096 }
0x4557   : > { %v8985_v17 = vpop.f32.mrb[104].mxu0 }
0x4558   : > { %v13688_v21 = vpop.f32.mrb[105].mxu0  ;;  %13689 = vmatprep.subr.mxu0 %v8985_v17 }
0x4559   : > { %13690 = vmatpush3.msra.mxu0 %v8985_v17 }
0x455a   : > { %13692 = vmatmul.mubr.msk.f32.vlgmr.msra.gmra.mrb[106].mxu0 %vm949_vm1, %v17725_v16  ;;  %14542 = vmatprep.subr.bf16.mxu0 %v15333_v46 }
0x455b   : > { %13694 = vmatprep.mubr.msk.f32.mxu0 %vm949_vm1, %v17733_v26 }
0x455e   : > { %13695 = vmatmul.mubr.msk.f32.gmra.mrb[108].mxu0 %vm949_vm1, %v17741_v19 }
0x455f   : > { %13705 = vmatprep.mubr.msk.f32.mxu0 %vm15331_vm0, %v15330_v0 }
0x4560   : > { %14545 = vmatpush3.bf16.xpose.msk.msra.mxu0 %vm15715_vm4, %v14543_v62  ;;  %v13718_v20 = vpop.f32.mrb[118].mxu1 }
0x4561   : > { %v9270_v39 = vpop.f32.mrb[119].mxu1  ;;  %14546 = vmatprep.subr.bf16.mxu0 %v15333_v46  ;;  %v9298_v27 = vmul.f32 2.0, %v13718_v20 }
0x4564   : > { %v13721_v18 = vpop.f32.mrb[120].mxu1 }
0x4565   : > { %v17750_v60 = vpop.f32.mrb[121].mxu1  ;;  %v9300_v56 = vmul.f32 2.0, %v13721_v18  ;;  %v9297_v18 = vmul.f32 2.0, %v9270_v39 }
0x4568   : > { %14549 = vmatpush3.bf16.xpose.msk.msra.mxu0 %vm15715_vm4, %v14547_v37 }
0x456f   : > { %13706 = vmatmul.mubr.msk.f32.vlgmr.msra.gmra.mrb[110].mxu0 %vm1338_vm3, %v15334_v53 }
0x462d   : > { %v13693_v31 = vpop.f32.mrb[106].mxu0 }
0x462e   : > { %v17762_v55 = vmul.f32 %v17759_v23, %v13693_v31  ;;  %v9055_v11 = vpop.f32.mrb[107].mxu0 }
0x462f   : > { %v17770_v13 = vmul.f32 %v17767_v40, %v9055_v11 }
0x4631   : > { %v13696_v36 = vpop.f32.mrb[108].mxu0  ;;  %13730 = vmatprep.mubr.msk.f32.mxu0 %vm1129_vm2, %v17770_v13  ;;  %v17776_v33 = vpack.i.bf16 %v17762_v55, %v17770_v13 }
0x4632   : > { %v17784_v4 = vmul.f32 %v17781_v45, %v13696_v36  ;;  %v9065_v49 = vpop.f32.mrb[109].mxu0 }
0x4633   : > { %v17792_v48 = vmul.f32 %v17789_v9, %v9065_v49  ;;  %14939 = vrot.lane.b32.xlu1 %v17776_v33, %s15335_s7  ;;  %v9299_v49 = vmul.f32 2.0, %v17750_v60 }
0x4635   : > { %v17798_v7 = vpack.i.bf16 %v17784_v4, %v17792_v48 }
0x4637   : > { %14944 = vrot.lane.b32.xlu1 %v17798_v7, %s15335_s7 }
0x4642   : > { %v9176_v6 = vpop.f32.mrb[110].mxu0 }
0x4643   : > { %v9292_v43 = vrot.slane %v9176_v6, %v15815_v35  ;;  %v13707_v47 = vpop.f32.mrb[111].mxu0 }
0x4645   : > { %v9294_v51 = vadd.f32 %v9292_v43, %v9091_v44  ;;  %v9296_v15 = vadd.f32 %v9292_v43, %v9097_v5 }
0x4647   : > { %v9302_v2 = vsub.f32 %v9294_v51, %v9298_v27  ;;  %v9304_v14 = vsub.f32 %v9296_v15, %v9300_v56  ;;  %v9318_v27 = vpop.permute.xlu0 %9317 }
0x4649   : > { %v9331_v56 = vmul.f32 %v9318_v27, %v9302_v2 }
0x465b   : > { %9087 = vadd.xlane.f32.xlu1 %v9086_v58 }
0x465f   : > { %9093 = vadd.xlane.f32.xlu1 %v9092_v57 }
0x4670   : > { %9312 = vperm.xlu1 %14948, %v11999_v25  }
0x4674   : > { %9322 = vperm.xlu1 %14948, %v12001_v24  }
0x4678   : > { %9327 = vperm.xlu1 %14948, %v12002_v34   ;;  %v17835_v34 = vld [vmem:[%s15852_s6 + $0x8] sm:$0xff] }
0x467c   : > { %14960 = vset.pattern.permute.xlu1 %v15337_v3 }
0x46a5   : > { %v14940_v37 = vpop.permute.xlu1 %14939 }
0x46a6   : > { %v14942_v63 = vunpack.i.h.bf16 %v14940_v37  ;;  %v14941_v50 = vunpack.i.l.bf16 %v14940_v37  ;;  %v17839_v37 = vld [vmem:[%s15852_s6] sm:$0xff] }
0x46a8   : > { %v14562_v17 = vpack.c.bf16 %v14942_v63, %v14941_v50 }
0x46a9   : > { %v14945_v21 = vpop.permute.xlu1 %14944 }
0x46aa   : > { %14564 = vmatprep.subr.msk.bf16.mxu0 %vm15825_vm5, %v14562_v17  ;;  %v14947_v8 = vunpack.i.h.bf16 %v14945_v21  ;;  %v14946_v62 = vunpack.i.l.bf16 %v14945_v21 }
0x46ab   : > { %14567 = vmatpush3.bf16.xpose.msk.msra.mxu0 %vm15825_vm5, %v14562_v17 }
0x46ac   : > { %v14568_v20 = vpack.c.bf16 %v14947_v8, %v14946_v62 }
0x46ae   : > { %14570 = vmatprep.subr.msk.bf16.mxu0 %vm15825_vm5, %v14568_v20 }
0x46b3   : > { %14573 = vmatpush3.bf16.xpose.msk.msra.mxu0 %vm15825_vm5, %v14568_v20 }
0x46b4   : > { %14588 = vmatprep.subr.bf16.mxu0 %v15333_v46 }
0x46ba   : > { %13731 = vmatmul.mubr.msk.f32.vlgmr.msra.gmra.mrb[112].mxu0 %vm1129_vm2, %v17762_v55 }
0x46bb   : > { %13733 = vmatprep.mubr.msk.f32.mxu0 %vm1129_vm2, %v17792_v48 }
0x46be   : > { %13734 = vmatmul.mubr.msk.f32.gmra.mrb[114].mxu0 %vm1129_vm2, %v17784_v4 }
0x46bf   : > { %13769 = vmatprep.mubr.msk.f32.mxu0 %vm15331_vm0, %v15330_v0 }
0x46e8   : > { %v9088_v3 = vpop.xlane.xlu1 %9087 }
0x46e9   : > { %v9293_v31 = vadd.f32 %v9292_v43, %v9088_v3  ;;  %v17849_v3 = vld [vmem:[%s15852_s6 + $0x18] sm:$0xff] }
0x46eb   : > { %v9301_v11 = vsub.f32 %v9293_v31, %v9297_v18 }
0x46ec   : > { %v9094_v36 = vpop.xlane.xlu1 %9093 }
0x46ed   : > { %v9295_v44 = vadd.f32 %v9292_v43, %v9094_v36 }
0x46ef   : > { %v9303_v6 = vsub.f32 %v9295_v44, %v9299_v49 }
0x46f0   : > { %v9313_v47 = vpop.permute.xlu1 %9312 }
0x46f1   : > { %v9330_v51 = vmul.f32 %v9313_v47, %v9301_v11 }
0x46f4   : > { %v9323_v5 = vpop.permute.xlu1 %9322 }
0x46f5   : > { %v9332_v43 = vmul.f32 %v9323_v5, %v9303_v6 }
0x46f8   : > { %v9328_v15 = vpop.permute.xlu1 %9327 }
0x46f9   : > { %v9333_v24 = vmul.f32 %v9328_v15, %v9304_v14  ;;  %v17845_v14 = vld [vmem:[%s15852_s6 + $0x10] sm:$0xff] }
0x478d   : > { %v13732_v58 = vpop.f32.mrb[112].mxu0 }
0x478e   : > { %v9434_v57 = vadd.f32 %v13732_v58, %v9331_v56  ;;  %v9428_v25 = vpop.f32.mrb[113].mxu0 }
0x478f   : > { %v9429_v39 = vadd.f32 %v9428_v25, %v9330_v51 }
0x4790   : > { %v9448_v60 = vadd.f32 %v17835_v34, %v9434_v57 }
0x4791   : > { %v9447_v63 = vadd.f32 %v17839_v37, %v9429_v39  ;;  %v13735_v50 = vpop.f32.mrb[114].mxu0 }
0x4792   : > { %v9444_v2 = vadd.f32 %v13735_v50, %v9333_v24  ;;  %v9438_v17 = vpop.f32.mrb[115].mxu0  ;;  %v9454_v21 = vsel %vm1129_vm2, %v9448_v60, -inf }
0x4793   : > { %v9439_v8 = vadd.f32 %v9438_v17, %v9332_v43  ;;  %9455 = vmax.xlane.f32.xlu0 %v9454_v21  ;;  %v9451_v62 = vsel %vm1129_vm2, %v9447_v63, -inf }
0x4794   : > { %9452 = vmax.xlane.f32.xlu1 %v9451_v62  ;;  %v9450_v18 = vadd.f32 %v17849_v3, %v9444_v2 }
0x4795   : > { %v9449_v20 = vadd.f32 %v17845_v14, %v9439_v8 }
0x4796   : > { %v9460_v11 = vsel %vm1129_vm2, %v9450_v18, -inf }
0x4797   : > { %v9457_v31 = vsel %vm1129_vm2, %v9449_v20, -inf }
0x4798   : > { %9458 = vmax.xlane.f32.xlu1 %v9457_v31 }
0x479c   : > { %9461 = vmax.xlane.f32.xlu1 %v9460_v11 }
0x4820   : > { %v9456_v36 = vpop.xlane.xlu0 %9455 }
0x4821   : > { %v9464_v49 = vsub.f32 %v9448_v60, %v9456_v36  ;;  %v9453_v44 = vpop.xlane.xlu1 %9452 }
0x4822   : > { %v9463_v6 = vsub.f32 %v9447_v63, %v9453_v44 }
0x4823   : > { %v9469_v47 = vmul.f32 1.442695, %v9464_v49 }
0x4824   : > { %v9467_v5 = vmul.f32 1.442695, %v9463_v6 }
0x4825   : > { %15106 = vpow2.f32 %v9469_v47  ;;  %v9459_v27 = vpop.xlane.xlu1 %9458 }
0x4826   : > { %v9465_v56 = vsub.f32 %v9449_v20, %v9459_v27  ;;  %15108 = vpow2.f32 %v9467_v5 }
0x4828   : > { %v9471_v51 = vmul.f32 1.442695, %v9465_v56 }
0x4829   : > { %v9462_v15 = vpop.xlane.xlu1 %9461 }
0x482a   : > { %v9466_v58 = vsub.f32 %v9450_v18, %v9462_v15  ;;  %15110 = vpow2.f32 %v9471_v51 }
0x482c   : > { %v9473_v57 = vmul.f32 1.442695, %v9466_v58  ;;  %v12016_v58 = vld [vmem:[%s18327_s16 + $0xc0] sm:$0xff] }
0x482e   : > { %15112 = vpow2.f32 %v9473_v57  ;;  %v12017_v57 = vld [vmem:[%s18327_s16 + $0xc8] sm:$0xff] }
0x482f   : > { %v15107_v25 = vpop.eup %15106 }
0x4830   : > { %v9478_v39 = vsel %vm1129_vm2, %v15107_v25, 0.0  ;;  %v15109_v24 = vpop.eup %15108 }
0x4831   : > { %9479 = vadd.xlane.f32.xlu1 %v9478_v39  ;;  %v9475_v60 = vsel %vm1129_vm2, %v15109_v24, 0.0  ;;  %v14589_v39 = vpack.c.bf16 %v12017_v57, %v12016_v58 }
0x4833   : > { %14590 = vmatpush3.bf16.msra.mxu0 %v14589_v39 }
0x4834   : > { %v15111_v43 = vpop.eup %15110  ;;  %14591 = vmatprep.subr.bf16.mxu0 %v15333_v46 }
0x4835   : > { %9476 = vadd.xlane.f32.xlu1 %v9475_v60  ;;  %v9481_v50 = vsel %vm1129_vm2, %v15111_v43, 0.0 }
0x4838   : > { %v15113_v63 = vpop.eup %15112 }
0x4839   : > { %9482 = vadd.xlane.f32.xlu1 %v9481_v50  ;;  %v9484_v2 = vsel %vm1129_vm2, %v15113_v63, 0.0 }
0x483a   : > { %9485 = vadd.xlane.f32.xlu0 %v9484_v2 }
0x484a   : > { %14951 = vrot.lane.b32.xlu1 %v17776_v33, %s18410_s11 }
0x4850   : > { %14956 = vrot.lane.b32.xlu0 %v17798_v7, %s18410_s11 }
0x48be   : > { %v9480_v17 = vpop.xlane.xlu1 %9479 }
0x48c2   : > { %v9477_v21 = vpop.xlane.xlu1 %9476 }
0x48c3   : > { %15114 = vrcp.f32 %v9477_v21 }
0x48c4   : > { %15116 = vrcp.f32 %v9480_v17 }
0x48c6   : > { %v9483_v8 = vpop.xlane.xlu1 %9482 }
0x48c7   : > { %v9486_v62 = vpop.xlane.xlu0 %9485  ;;  %15118 = vrcp.f32 %v9483_v8  ;;  %v14594_v8 = vpack.c.bf16 %v17657_v54, %v17642_v41 }
0x48c8   : > { %15120 = vrcp.f32 %v9486_v62  ;;  %v17888_v62 = vld [vmem:[%s18407_s3] sm:$0xff] }
0x48ca   : > { %v14952_v20 = vpop.permute.xlu1 %14951 }
0x48cb   : > { %v14954_v18 = vunpack.i.h.bf16 %v14952_v20  ;;  %v14953_v31 = vunpack.i.l.bf16 %v14952_v20  ;;  %v14957_v11 = vpop.permute.xlu0 %14956  ;;  %v14598_v20 = vpack.c.bf16 %v17685_v29, %v17672_v38 }
0x48cc   : > { %v14959_v36 = vunpack.i.h.bf16 %v14957_v11  ;;  %v14958_v49 = vunpack.i.l.bf16 %v14957_v11  ;;  %v15194_v11 = vld [vmem:[%s18408_s10] sm:$0xff] }
0x48cd   : > { %v15115_v44 = vpop.eup %15114  ;;  %v14574_v6 = vpack.c.bf16 %v14954_v18, %v14953_v31 }
0x48ce   : > { %v14578_v33 = vpack.c.bf16 %v14959_v36, %v14958_v49  ;;  %v9491_v47 = vmul.f32 %v15115_v44, %v15109_v24  ;;  %v15117_v7 = vpop.eup %15116  ;;  %v12019_v24 = vld [vmem:[%s18327_s16 + $0xd8] sm:$0xff] }
0x48cf   : > { %14575 = vmatprep.subr.bf16.mxu1 %v14574_v6  ;;  %v9492_v27 = vmul.f32 %v15117_v7, %v15107_v25  ;;  %v12018_v25 = vld [vmem:[%s18327_s16 + $0xd0] sm:$0xff]  ;;  %v15195_v7 = vld [vmem:[%s18408_s10 + $0x8] sm:$0xff] }
0x48d0   : > { %14577 = vmatpush3.bf16.msra.mxu1 %v14574_v6  ;;  %13744 = vmatprep.mubr.msk.f32.mxu1 %vm1129_vm2, %v9491_v47  ;;  %v14592_v60 = vpack.c.bf16 %v12019_v24, %v12018_v25 }
0x48d1   : > { %14579 = vmatprep.subr.bf16.mxu1 %v14578_v33  ;;  %v15119_v5 = vpop.eup %15118 }
0x48d2   : > { %v15121_v56 = vpop.eup %15120  ;;  %v9493_v51 = vmul.f32 %v15119_v5, %v15111_v43  ;;  %14593 = vmatpush3.bf16.msra.mxu0 %v14592_v60  ;;  %v15196_v5 = vld [vmem:[%s18408_s10 + $0x10] sm:$0xff] }
0x48d3   : > { %v9494_v15 = vmul.f32 %v15121_v56, %v15113_v63 }
0x48d4   : > { %14581 = vmatpush3.bf16.msra.mxu1 %v14578_v33 }
0x48d5   : > { %14582 = vmatprep.subr.bf16.mxu1 %v15333_v46 }
0x48d7   : > { %13745 = vmatmul.mubr.msk.f32.vlgmr.msra.gmra.mrb[122].mxu1 %vm1129_vm2, %v9492_v27 }
0x48d8   : > { %13747 = vmatprep.mubr.msk.f32.mxu1 %vm1129_vm2, %v9493_v51 }
0x48db   : > { %13748 = vmatmul.mubr.msk.f32.gmra.mrb[124].mxu1 %vm1129_vm2, %v9494_v15 }
0x48dc   : > { %13758 = vmatprep.mubr.msk.f32.mxu1 %vm15331_vm0, %v15330_v0 }
0x49aa   : > { %v13746_v43 = vpop.f32.mrb[122].mxu1 }
0x49ab   : > { %v9585_v63 = vpop.f32.mrb[123].mxu1 }
0x49ac   : > { %v14583_v50 = vpack.c.bf16 %v13746_v43, %v9585_v63 }
0x49ae   : > { %v13749_v2 = vpop.f32.mrb[124].mxu1  ;;  %14584 = vmatpush3.bf16.msra.mxu1 %v14583_v50 }
0x49af   : > { %v9595_v17 = vpop.f32.mrb[125].mxu1  ;;  %14585 = vmatprep.subr.bf16.mxu1 %v15333_v46 }
0x49b0   : > { %v14586_v21 = vpack.c.bf16 %v13749_v2, %v9595_v17  ;;  %v9988_v17 = vld [vmem:[#allocation5 + $0xc0] sm:$0xff] }
0x49b2   : > { %14587 = vmatpush3.bf16.msra.mxu1 %v14586_v21  ;;  %v9989_v21 = vld [vmem:[#allocation5 + $0xc8] sm:$0xff] }
0x49b3   : > { %14595 = vmatprep.subr.bf16.mxu1 %v14594_v8 }
0x49b5   : > { %13759 = vmatmul.mubr.msk.f32.vlgmr.msra.gmra.mrb[126].mxu1 %vm1129_vm2, %v17888_v62 }
0x49b6   : > { %14597 = vmatpush3.bf16.msra.mxu1 %v14594_v8  ;;  %13780 = vmatprep.mubr.msk.f32.mxu1 %vm1129_vm2, %v9491_v47  ;;  %v14611_v8 = vpack.c.bf16 %v9989_v21, %v9988_v17  ;;  %v12042_v17 = vld [vmem:[%s18332_s21 + $0x1b0] sm:$0xff]  ;;  %v12043_v21 = vld [vmem:[%s18332_s21 + $0x1b8] sm:$0xff] }
0x49b7   : > { %14599 = vmatprep.subr.bf16.mxu1 %v14598_v20 }
0x49ba   : > { %14601 = vmatpush3.bf16.msra.mxu1 %v14598_v20  ;;  %v9990_v20 = vld [vmem:[#allocation5 + $0xd0] sm:$0xff] }
0x49bb   : > { %14610 = vmatprep.subr.bf16.mxu1 %v15333_v46 }
0x49bd   : > { %13781 = vmatmul.mubr.msk.f32.vlgmr.msra.gmra.mrb[128].mxu1 %vm1129_vm2, %v9492_v27  ;;  %v15197_v27 = vld [vmem:[%s18408_s10 + $0x18] sm:$0xff] }
0x49be   : > { %13783 = vmatprep.mubr.msk.f32.mxu1 %vm1129_vm2, %v9493_v51  ;;  %14612 = vmatpush3.bf16.msra.mxu1 %v14611_v8  ;;  %v12034_v8 = vld [vmem:[%s18331_s20 + $0x6] ss:$0 sm:$0xff] }
0x49bf   : > { %14613 = vmatprep.subr.bf16.mxu1 %v15333_v46 }
0x49c1   : > { %13784 = vmatmul.mubr.msk.f32.gmra.mrb[130].mxu1 %vm1129_vm2, %v9494_v15 }
0x49c2   : > { %13808 = vmatprep.mubr.msk.f32.mxu1 %vm15331_vm0, %v15330_v0 }
0x4a88   : > { %v9670_v18 = vpop.f32.mrb[126].mxu1 }
0x4a89   : > { %v13760_v31 = vpop.f32.mrb[127].mxu1  ;;  %13770 = vmatmul.mubr.msk.f32.vlgmr.msra.gmra.mrb[116].mxu0 %vm1129_vm2, %v9670_v18  ;;  %v9991_v18 = vld [vmem:[#allocation5 + $0xd8] sm:$0xff] }
0x4a8a   : > { %13794 = vmatprep.mubr.msk.f32.mxu0 %vm1129_vm2, %v15194_v11  ;;  %v14614_v31 = vpack.c.bf16 %v9991_v18, %v9990_v20  ;;  %v12036_v11 = vld [vmem:[%s18332_s21 + $0x180] sm:$0xff] }
0x4a8c   : > { %14615 = vmatpush3.bf16.msra.mxu1 %v14614_v31 }
0x4a8d   : > { %14628 = vmatprep.subr.bf16.mxu1 %v15333_v46 }
0x4a90   : > { %v13782_v36 = vpop.f32.mrb[128].mxu1 }
0x4a91   : > { %v9820_v49 = vpop.f32.mrb[129].mxu1 }
0x4a92   : > { %v14602_v44 = vpack.c.bf16 %v13782_v36, %v9820_v49  ;;  %v12037_v36 = vld [vmem:[%s18332_s21 + $0x188] sm:$0xff]  ;;  %v12038_v49 = vld [vmem:[%s18332_s21 + $0x190] sm:$0xff] }
0x4a94   : > { %v13785_v6 = vpop.f32.mrb[130].mxu1  ;;  %14603 = vmatprep.subr.bf16.mxu0 %v14602_v44 }
0x4a95   : > { %v9830_v33 = vpop.f32.mrb[131].mxu1  ;;  %14605 = vmatpush3.bf16.msra.mxu0 %v14602_v44  ;;  %v14617_v44 = vpack.c.bf16 %v12037_v36, %v12036_v11  ;;  %v12045_v36 = vld [vmem:[%s18333_s22 + $0x6] ss:$0 sm:$0xff] }
0x4a96   : > { %v14606_v47 = vpack.c.bf16 %v13785_v6, %v9830_v33  ;;  %v12039_v6 = vld [vmem:[%s18332_s21 + $0x198] sm:$0xff] }
0x4a97   : > { %v14620_v33 = vpack.c.bf16 %v12039_v6, %v12038_v49 }
0x4a98   : > { %14607 = vmatprep.subr.bf16.mxu0 %v14606_v47 }
0x4a99   : > { %14609 = vmatpush3.bf16.msra.mxu0 %v14606_v47  ;;  %v12040_v47 = vld [vmem:[%s18332_s21 + $0x1a0] sm:$0xff] }
0x4a9a   : > { %14616 = vmatprep.subr.bf16.mxu0 %v15333_v46 }
0x4a9c   : > { %13795 = vmatmul.mubr.msk.f32.vlgmr.msra.gmra.mrb[118].mxu0 %vm1129_vm2, %v15195_v7  ;;  %v12041_v7 = vld [vmem:[%s18332_s21 + $0x1a8] sm:$0xff] }
0x4a9d   : > { %13797 = vmatprep.mubr.msk.f32.mxu0 %vm1129_vm2, %v15196_v5  ;;  %14618 = vmatpush3.bf16.msra.mxu0 %v14617_v44  ;;  %v14623_v5 = vpack.c.bf16 %v12041_v7, %v12040_v47 }
0x4a9e   : > { %14619 = vmatprep.subr.bf16.mxu0 %v15333_v46 }
0x4aa0   : > { %13798 = vmatmul.mubr.msk.f32.gmra.mrb[120].mxu0 %vm1129_vm2, %v15197_v27 }
0x4aa1   : > { %13827 = vmatprep.mubr.msk.f32.mxu0 %vm15331_vm0, %v15330_v0  ;;  %14621 = vmatpush3.bf16.msra.mxu0 %v14620_v33 }
0x4aa2   : > { %14622 = vmatprep.subr.bf16.mxu0 %v15333_v46 }
0x4aa5   : > { %14624 = vmatpush3.bf16.msra.mxu0 %v14623_v5 }
0x4aa6   : > { %14625 = vmatprep.subr.bf16.mxu0 %v15333_v46 }
0x4b5c   : > { %v9748_v56 = vpop.f32.mrb[116].mxu0 }
0x4b5d   : > { %v9752_v51 = vmul.f32 %v9748_v56, %v15657_v12  ;;  %v13771_v15 = vpop.f32.mrb[117].mxu0 }
0x4b5f   : > { %v17923_v58 = vadd.f32 %v9752_v51, %v17630_v22 }
0x4b61   : > { %v9960_v57 = vsel %vm1129_vm2, %v17923_v58, 0.0 }
0x4b62   : > { %9961 = vadd.xlane.f32.xlu1 %v9960_v57  ;;  %v12031_v57 = vld [vmem:[%s18328_s17 + $0x6] ss:$0 sm:$0xff] }
0x4b6f   : > { %v17927_v25 = vpop.f32.mrb[118].mxu0 }
0x4b70   : > { %v17929_v39 = vpop.f32.mrb[119].mxu0 }
0x4b73   : > { %v17931_v24 = vpop.f32.mrb[120].mxu0 }
0x4b74   : > { %v17933_v60 = vpop.f32.mrb[121].mxu0 }
0x4bef   : > { %v9962_v43 = vpop.xlane.xlu1 %9961 }
0x4bf0   : > { %v9963_v63 = vmul.f32 0.03125, %v9962_v43 }
0x4bf2   : > { %v9964_v50 = vsub.f32 %v17923_v58, %v9963_v63  ;;  %v12032_v63 = vld [vmem:[%s18329_s18 + $0x6] ss:$0 sm:$0xff] }
0x4bf4   : > { %v9965_v2 = vmul.f32 %v9964_v50, %v9964_v50 }
0x4bf6   : > { %v9966_v22 = vsel %vm1129_vm2, %v9965_v2, 0.0 }
0x4bf7   : > { %9967 = vadd.xlane.f32.xlu0 %v9966_v22 }
0x4c84   : > { %v9968_v27 = vpop.xlane.xlu0 %9967 }
0x4c85   : > { %v9969_v56 = vmul.f32 0.03125, %v9968_v27 }
0x4c87   : > { %v9970_v51 = vadd.f32 1e-05, %v9969_v56  ;;  %v9924_v56 = vsub.f32 %v17642_v41, %v17929_v39  ;;  %v9927_v39 = vsub.f32 %v17685_v29, %v17931_v24 }
0x4c89   : > { %15122 = vrsqrt.f32 %v9970_v51 }
0x4c93   : > { %v15123_v15 = vpop.eup %15122 }
0x4c94   : > { %v9972_v43 = vmul.f32 %v15123_v15, %v9964_v50  ;;  %v14626_v50 = vpack.c.bf16 %v12043_v21, %v12042_v17 }
0x4c96   : > { %v9979_v2 = vmul.f32 %v12031_v57, %v9972_v43  ;;  %14627 = vmatpush3.bf16.msra.mxu0 %v14626_v50  ;;  %v9926_v43 = vsub.f32 %v17672_v38, %v17933_v60 }
0x4c98   : > { %v9986_v22 = vadd.f32 %v12032_v63, %v9979_v2 }
0x4c9a   : > { %13809 = vmatmul.mubr.msk.f32.vlgmr.msra.gmra.mrb[132].mxu1 %vm1129_vm2, %v9986_v22 }
0x4c9b   : > { %13838 = vmatprep.mubr.msk.f32.mxu1 %vm15331_vm0, %v15330_v0 }
0x4d6d   : > { %v10069_v20 = vpop.f32.mrb[132].mxu1 }
0x4d6e   : > { %v10070_v18 = vadd.f32 %v12034_v8, %v10069_v20  ;;  %v13810_v31 = vpop.f32.mrb[133].mxu1 }
0x4d70   : > { %v10073_v11 = vmax.f32 %v10070_v18, 0.0  ;;  %v10198_v18 = vld [vmem:[#allocation2 + $0xe0] sm:$0xff] }
0x4d72   : > { %13828 = vmatmul.mubr.msk.f32.vlgmr.msra.gmra.mrb[122].mxu0 %vm2374_vm6, %v10073_v11 }
0x4e45   : > { %v10160_v49 = vpop.f32.mrb[122].mxu0 }
0x4e46   : > { %v10161_v44 = vadd.f32 %v12045_v36, %v10160_v49  ;;  %v13829_v6 = vpop.f32.mrb[123].mxu0 }
0x4e47   : > { %v9925_v6 = vsub.f32 %v17657_v54, %v17927_v25  ;;  %v12050_v25 = vld [vmem:[%s18324_s13 + $0x7] ss:$0 sm:$0xff] }
0x4e48   : > { %v10164_v33 = vmul.f32 %v10161_v44, %v15657_v12 }
0x4e4a   : > { %v17984_v47 = vadd.f32 %v10164_v33, %v17923_v58 }
0x4e4c   : > { %v10170_v7 = vsel %vm1129_vm2, %v17984_v47, 0.0 }
0x4e4d   : > { %10171 = vadd.xlane.f32.xlu1 %v10170_v7 }
0x4e5e   : > { %9929 = vperm.xlu1 %14960, %v17770_v13  }
0x4e62   : > { %9937 = vperm.xlu1 %14960, %v17792_v48  }
0x4e66   : > { %9941 = vperm.xlu1 %14960, %v17784_v4  }
0x4e6a   : > { %14973 = vset.pattern.permute.xlu1 %v15332_v1 }
0x4eda   : > { %v10172_v5 = vpop.xlane.xlu1 %10171 }
0x4edb   : > { %v10173_v27 = vmul.f32 0.03125, %v10172_v5 }
0x4edd   : > { %v10174_v58 = vsub.f32 %v17984_v47, %v10173_v27 }
0x4ede   : > { %v9930_v51 = vpop.permute.xlu1 %9929 }
0x4edf   : > { %v9944_v15 = vmul.f32 %v9930_v51, %v9924_v56  ;;  %v10175_v57 = vmul.f32 %v10174_v58, %v10174_v58  ;;  %v12049_v51 = vld [vmem:[%s18323_s12 + $0x7] ss:$0 sm:$0xff] }
0x4ee1   : > { %v9948_v13 = vmul.f32 %v9944_v15, %v16046_v28  ;;  %v10176_v48 = vsel %vm1129_vm2, %v10175_v57, 0.0 }
0x4ee2   : > { %10177 = vadd.xlane.f32.xlu0 %v10176_v48  ;;  %v9938_v4 = vpop.permute.xlu1 %9937 }
0x4ee3   : > { %v18000_v63 = vadd.f32 %v9948_v13, %v17642_v41  ;;  %v9946_v2 = vmul.f32 %v9938_v4, %v9926_v43 }
0x4ee5   : > { %v9950_v22 = vmul.f32 %v9946_v2, %v16059_v30  ;;  %13868 = vmatprep.mubr.msk.f32.mxu0 %vm1338_vm3, %v18000_v63  ;;  %v10364_v27 = vmul.f32 %v17665_v10, %v18000_v63 }
0x4ee6   : > { %v9942_v17 = vpop.permute.xlu1 %9941 }
0x4ee7   : > { %v9954_v60 = vadd.f32 %v9950_v22, %v17672_v38  ;;  %v9947_v28 = vmul.f32 %v9942_v17, %v9927_v39  ;;  %v10199_v38 = vld [vmem:[#allocation2 + $0xe8] sm:$0xff] }
0x4ee8   : > { %v14629_v31 = vpack.c.bf16 %v10199_v38, %v10198_v18 }
0x4ee9   : > { %v9951_v21 = vmul.f32 %v9947_v28, %v16069_v32  ;;  %v10366_v50 = vmul.f32 %v17665_v10, %v9954_v60  ;;  %v10200_v32 = vld [vmem:[#allocation2 + $0xf0] sm:$0xff] }
0x4eea   : > { %14630 = vmatpush3.bf16.msra.mxu1 %v14629_v31 }
0x4eeb   : > { %v9955_v41 = vadd.f32 %v9951_v21, %v17685_v29  ;;  %v18012_v20 = vmul.f32 %v10366_v50, %v9954_v60  ;;  %14631 = vmatprep.subr.bf16.mxu1 %v15333_v46  ;;  %v10201_v29 = vld [vmem:[#allocation2 + $0xf8] sm:$0xff] }
0x4eec   : > { %v14632_v11 = vpack.c.bf16 %v10201_v29, %v10200_v32  ;;  %v12071_v29 = vld [vmem:[%s18326_s15 + $0xf0] sm:$0xff] }
0x4eed   : > { %v10367_v8 = vmul.f32 %v17665_v10, %v9955_v41 }
0x4eee   : > { %14633 = vmatpush3.bf16.msra.mxu1 %v14632_v11  ;;  %v12072_v11 = vld [vmem:[%s18326_s15 + $0xf8] sm:$0xff] }
0x4eef   : > { %v18014_v24 = vmul.f32 %v10367_v8, %v9955_v41  ;;  %v14648_v13 = vpack.c.bf16 %v10367_v8, %v10366_v50 }
0x4ef1   : > { %v14639_v30 = vpack.c.bf16 %v18014_v24, %v18012_v20  ;;  %v10381_v32 = vsel %vm1338_vm3, %v18014_v24, 0.0 }
0x4ef8   : > { %9933 = vperm.xlu0 %14961, %v17762_v55  }
0x4efc   : > { %14972 = vset.pattern.permute.xlu0 %v15332_v1 }
0x4f6f   : > { %v10178_v36 = vpop.xlane.xlu0 %10177 }
0x4f70   : > { %v10179_v49 = vmul.f32 0.03125, %v10178_v36 }
0x4f72   : > { %v10180_v44 = vadd.f32 1e-05, %v10179_v49 }
0x4f74   : > { %15124 = vrsqrt.f32 %v10180_v44 }
0x4f77   : > { %v9934_v55 = vpop.permute.xlu0 %9933 }
0x4f78   : > { %v9945_v33 = vmul.f32 %v9934_v55, %v9925_v6 }
0x4f7a   : > { %v9949_v7 = vmul.f32 %v9945_v33, %v16052_v59 }
0x4f7c   : > { %v9953_v1 = vadd.f32 %v9949_v7, %v17657_v54 }
0x4f7e   : > { %v15125_v5 = vpop.eup %15124  ;;  %v10365_v56 = vmul.f32 %v17665_v10, %v9953_v1 }
0x4f7f   : > { %v10182_v15 = vmul.f32 %v15125_v5, %v10174_v58 }
0x4f80   : > { %v14642_v57 = vpack.c.bf16 %v10365_v56, %v10364_v27  ;;  %v10369_v43 = vmul.f32 %v10365_v56, %v9953_v1 }
0x4f81   : > { %v10189_v59 = vmul.f32 %v12049_v51, %v10182_v15 }
0x4f82   : > { %14644 = vmatprep.subr.msk.bf16.mxu0 %vm15715_vm4, %v14642_v57  ;;  %v10375_v54 = vsel %vm1338_vm3, %v10369_v43, 0.0 }
0x4f83   : > { %10376 = vadd.xlane.f32.xlu0 %v10375_v54  ;;  %14647 = vmatpush3.bf16.xpose.msk.msra.mxu0 %vm15715_vm4, %v14642_v57  ;;  %v10196_v10 = vadd.f32 %v12050_v25, %v10189_v59 }
0x4f84   : > { %14650 = vmatprep.subr.msk.bf16.mxu0 %vm15715_vm4, %v14648_v13 }
0x4f85   : > { %13839 = vmatmul.mubr.msk.f32.vlgmr.msra.gmra.mrb[134].mxu1 %vm1129_vm2, %v10196_v10 }
0x4f86   : > { %13843 = vmatprep.mubr.msk.f32.mxu1 %vm949_vm1, %v17706_v42  ;;  %v10368_v42 = vmul.f32 %v10364_v27, %v18000_v63 }
0x4f88   : > { %v14635_v4 = vpack.c.bf16 %v10369_v43, %v10368_v42 }
0x4f8b   : > { %14653 = vmatpush3.bf16.xpose.msk.msra.mxu0 %vm15715_vm4, %v14648_v13 }
0x4f92   : > { %13869 = vmatmul.mubr.msk.f32.vlgmr.msra.gmra.mrb[124].mxu0 %vm1338_vm3, %v9953_v1 }
0x4f93   : > { %13871 = vmatprep.mubr.msk.f32.mxu0 %vm1338_vm3, %v9954_v60 }
0x4f96   : > { %13872 = vmatmul.mubr.msk.f32.gmra.mrb[126].mxu0 %vm1338_vm3, %v9955_v41 }
0x5058   : > { %v10271_v58 = vpop.f32.mrb[134].mxu1 }
0x5059   : > { %v13840_v48 = vpop.f32.mrb[135].mxu1  ;;  %13841 = vmatprep.subr.mxu1 %v10271_v58 }
0x505a   : > { %13842 = vmatpush3.msra.mxu1 %v10271_v58 }
0x505b   : > { %13844 = vmatmul.mubr.msk.f32.vlgmr.msra.gmra.mrb[136].mxu1 %vm949_vm1, %v17725_v16  ;;  %14634 = vmatprep.subr.bf16.mxu1 %v15333_v46 }
0x505c   : > { %13846 = vmatprep.mubr.msk.f32.mxu1 %vm949_vm1, %v17733_v26 }
0x505f   : > { %13847 = vmatmul.mubr.msk.f32.gmra.mrb[138].mxu1 %vm949_vm1, %v17741_v19  ;;  %v12069_v19 = vld [vmem:[%s18326_s15 + $0xe0] sm:$0xff] }
0x5060   : > { %13857 = vmatprep.mubr.msk.f32.mxu1 %vm15331_vm0, %v15330_v0  ;;  %10598 = vperm.xlu0 %14972, %v12069_v19  }
0x5061   : > { %14637 = vmatpush3.bf16.xpose.msk.msra.mxu1 %vm15715_vm4, %v14635_v4 }
0x5062   : > { %14638 = vmatprep.subr.bf16.mxu1 %v15333_v46 }
0x5065   : > { %v13870_v16 = vpop.f32.mrb[124].mxu0 }
0x5066   : > { %v10556_v2 = vpop.f32.mrb[125].mxu0  ;;  %v10584_v18 = vmul.f32 2.0, %v13870_v16 }
0x5067   : > { %v10583_v1 = vmul.f32 2.0, %v10556_v2 }
0x5069   : > { %14641 = vmatpush3.bf16.xpose.msk.msra.mxu1 %vm15715_vm4, %v14639_v30  ;;  %v13873_v26 = vpop.f32.mrb[126].mxu0  ;;  %v10377_v30 = vpop.xlane.xlu0 %10376 }
0x506a   : > { %v10566_v39 = vpop.f32.mrb[127].mxu0  ;;  %v10586_v43 = vmul.f32 2.0, %v13873_v26 }
0x506b   : > { %v10585_v51 = vmul.f32 2.0, %v10566_v39 }
0x5070   : > { %13858 = vmatmul.mubr.msk.f32.vlgmr.msra.gmra.mrb[140].mxu1 %vm1338_vm3, %v15334_v53 }
0x50df   : > { %v10599_v10 = vpop.permute.xlu0 %10598 }
0x512e   : > { %v13845_v63 = vpop.f32.mrb[136].mxu1 }
0x512f   : > { %v10361_v22 = vmul.f32 %v17759_v23, %v13845_v63  ;;  %v10341_v17 = vpop.f32.mrb[137].mxu1 }
0x5130   : > { %v10360_v60 = vmul.f32 %v17767_v40, %v10341_v17 }
0x5132   : > { %v18071_v28 = vpack.i.bf16 %v10361_v22, %v10360_v60  ;;  %v13848_v52 = vpop.f32.mrb[138].mxu1  ;;  %13882 = vmatprep.mubr.msk.f32.mxu1 %vm1129_vm2, %v10360_v60 }
0x5133   : > { %v10363_v21 = vmul.f32 %v17781_v45, %v13848_v52  ;;  %v10351_v50 = vpop.f32.mrb[139].mxu1  ;;  %v10372_v45 = vsel %vm1338_vm3, %v10368_v42, 0.0 }
0x5134   : > { %v10362_v53 = vmul.f32 %v17789_v9, %v10351_v50  ;;  %14963 = vrot.lane.b32.xlu1 %v18071_v28, %s15335_s7  ;;  %v10378_v9 = vsel %vm1338_vm3, %v18012_v20, 0.0 }
0x5136   : > { %v18078_v41 = vpack.i.bf16 %v10363_v21, %v10362_v53 }
0x5138   : > { %14968 = vrot.lane.b32.xlu1 %v18078_v41, %s15335_s7  ;;  %s18412_s7 = sld [smem:[#allocation16_spill]] }
0x513e   : > { %p18415_p1 = scmp.ne.s32.totalorder %s18412_s7, 0 }
0x5143   : > { %v10462_v23 = vpop.f32.mrb[140].mxu1 }
0x5144   : > { %v10578_v40 = vrot.slane %v10462_v23, %v15815_v35  ;;  %v13859_v8 = vpop.f32.mrb[141].mxu1  ;;  %v12070_v35 = vld [vmem:[%s18326_s15 + $0xe8] sm:$0xff] }
0x5146   : > { %v10580_v38 = vadd.f32 %v10578_v40, %v10377_v30 }
0x5148   : > { %v10588_v31 = vsub.f32 %v10580_v38, %v10584_v18 }
0x515c   : > { %10373 = vadd.xlane.f32.xlu1 %v10372_v45 }
0x5160   : > { %10379 = vadd.xlane.f32.xlu1 %v10378_v9 }
0x5164   : > { %10382 = vadd.xlane.f32.xlu1 %v10381_v32 }
0x5175   : > { %10603 = vperm.xlu1 %14973, %v12070_v35  }
0x5179   : > { %10608 = vperm.xlu1 %14973, %v12071_v29  }
0x517d   : > { %10613 = vperm.xlu1 %14973, %v12072_v11  }
0x51a6   : > { %v14964_v20 = vpop.permute.xlu1 %14963 }
0x51a7   : > { %v14966_v36 = vunpack.i.h.bf16 %v14964_v20  ;;  %v14965_v49 = vunpack.i.l.bf16 %v14964_v20 }
0x51a9   : > { %v14654_v24 = vpack.c.bf16 %v14966_v36, %v14965_v49 }
0x51aa   : > { %v14969_v44 = vpop.permute.xlu1 %14968 }
0x51ab   : > { %14656 = vmatprep.subr.msk.bf16.mxu1 %vm15825_vm5, %v14654_v24  ;;  %v14971_v6 = vunpack.i.h.bf16 %v14969_v44  ;;  %v14970_v55 = vunpack.i.l.bf16 %v14969_v44 }
0x51ac   : > { %14659 = vmatpush3.bf16.xpose.msk.msra.mxu1 %vm15825_vm5, %v14654_v24 }
0x51ad   : > { %v14660_v33 = vpack.c.bf16 %v14971_v6, %v14970_v55 }
0x51af   : > { %14662 = vmatprep.subr.msk.bf16.mxu1 %vm15825_vm5, %v14660_v33 }
0x51b4   : > { %14665 = vmatpush3.bf16.xpose.msk.msra.mxu1 %vm15825_vm5, %v14660_v33 }
0x51b5   : > { %14680 = vmatprep.subr.bf16.mxu1 %v15333_v46 }
0x51bb   : > { %13883 = vmatmul.mubr.msk.f32.vlgmr.msra.gmra.mrb[142].mxu1 %vm1129_vm2, %v10361_v22 }
0x51bc   : > { %13885 = vmatprep.mubr.msk.f32.mxu1 %vm1129_vm2, %v10362_v53 }
0x51bf   : > { %13886 = vmatmul.mubr.msk.f32.gmra.mrb[144].mxu1 %vm1129_vm2, %v10363_v21 }
0x51c0   : > { %13921 = vmatprep.mubr.msk.f32.mxu1 %vm15331_vm0, %v15330_v0 }
0x51e9   : > { %v10374_v7 = vpop.xlane.xlu1 %10373 }
0x51ea   : > { %v10579_v5 = vadd.f32 %v10578_v40, %v10374_v7 }
0x51ec   : > { %v10587_v27 = vsub.f32 %v10579_v5, %v10583_v1 }
0x51ed   : > { %v10380_v56 = vpop.xlane.xlu1 %10379 }
0x51ee   : > { %v10581_v15 = vadd.f32 %v10578_v40, %v10380_v56  ;;  %v10616_v48 = vmul.f32 %v10599_v10, %v10587_v27 }
0x51f0   : > { %v10589_v61 = vsub.f32 %v10581_v15, %v10585_v51 }
0x51f1   : > { %v10383_v57 = vpop.xlane.xlu1 %10382 }
0x51f2   : > { %v10582_v25 = vadd.f32 %v10578_v40, %v10383_v57 }
0x51f4   : > { %v10590_v59 = vsub.f32 %v10582_v25, %v10586_v43 }
0x51f5   : > { %v10604_v54 = vpop.permute.xlu1 %10603 }
0x51f6   : > { %v10617_v58 = vmul.f32 %v10604_v54, %v10588_v31 }
0x51f9   : > { %v10609_v13 = vpop.permute.xlu1 %10608 }
0x51fa   : > { %v10618_v39 = vmul.f32 %v10609_v13, %v10589_v61 }
0x51fd   : > { %v10614_v42 = vpop.permute.xlu1 %10613 }
0x51fe   : > { %v10619_v63 = vmul.f32 %v10614_v42, %v10590_v59  ;;  %v12086_v42 = vld [vmem:[%s18327_s16 + $0xe0] sm:$0xff] }
0x528e   : > { %v13884_v4 = vpop.f32.mrb[142].mxu1 }
0x528f   : > { %v10720_v16 = vadd.f32 %v13884_v4, %v10617_v58  ;;  %v10714_v19 = vpop.f32.mrb[143].mxu1  ;;  %v12087_v4 = vld [vmem:[%s18327_s16 + $0xe8] sm:$0xff] }
0x5290   : > { %v10715_v2 = vadd.f32 %v10714_v19, %v10616_v48  ;;  %v14681_v19 = vpack.c.bf16 %v12087_v4, %v12086_v42  ;;  %v12107_v4 = vld [vmem:[%s18333_s22 + $0x7] ss:$0 sm:$0xff] }
0x5291   : > { %v10734_v22 = vadd.f32 %v17835_v34, %v10720_v16  ;;  %v12088_v16 = vld [vmem:[%s18327_s16 + $0xf0] sm:$0xff] }
0x5292   : > { %v10733_v17 = vadd.f32 %v17839_v37, %v10715_v2  ;;  %v13887_v60 = vpop.f32.mrb[144].mxu1  ;;  %v12089_v2 = vld [vmem:[%s18327_s16 + $0xf8] sm:$0xff]  ;;  %14682 = vmatpush3.bf16.msra.mxu1 %v14681_v19 }
0x5293   : > { %v10730_v26 = vadd.f32 %v13887_v60, %v10619_v63  ;;  %v10724_v52 = vpop.f32.mrb[145].mxu1  ;;  %v10740_v21 = vsel %vm1129_vm2, %v10734_v22, -inf  ;;  %v14684_v63 = vpack.c.bf16 %v12089_v2, %v12088_v16  ;;  %14683 = vmatprep.subr.bf16.mxu1 %v15333_v46 }
0x5294   : > { %v10725_v50 = vadd.f32 %v10724_v52, %v10618_v39  ;;  %10741 = vmax.xlane.f32.xlu0 %v10740_v21  ;;  %v10737_v53 = vsel %vm1129_vm2, %v10733_v17, -inf }
0x5295   : > { %10738 = vmax.xlane.f32.xlu1 %v10737_v53  ;;  %v10736_v40 = vadd.f32 %v17849_v3, %v10730_v26 }
0x5296   : > { %v10735_v23 = vadd.f32 %v17845_v14, %v10725_v50  ;;  %14685 = vmatpush3.bf16.msra.mxu1 %v14684_v63 }
0x5297   : > { %v10746_v34 = vsel %vm1129_vm2, %v10736_v40, -inf  ;;  %14692 = vmatprep.subr.bf16.mxu1 %v15333_v46 }
0x5298   : > { %v10743_v8 = vsel %vm1129_vm2, %v10735_v23, -inf }
0x5299   : > { %10744 = vmax.xlane.f32.xlu1 %v10743_v8 }
0x529d   : > { %10747 = vmax.xlane.f32.xlu1 %v10746_v34 }
0x5321   : > { %v10742_v37 = vpop.xlane.xlu0 %10741 }
0x5322   : > { %v10750_v30 = vsub.f32 %v10734_v22, %v10742_v37  ;;  %v10739_v18 = vpop.xlane.xlu1 %10738 }
0x5323   : > { %v10749_v38 = vsub.f32 %v10733_v17, %v10739_v18 }
0x5324   : > { %v10755_v31 = vmul.f32 1.442695, %v10750_v30 }
0x5325   : > { %v10753_v45 = vmul.f32 1.442695, %v10749_v38 }
0x5326   : > { %15126 = vpow2.f32 %v10755_v31  ;;  %v10745_v9 = vpop.xlane.xlu1 %10744  ;;  %v11072_v31 = vld [vmem:[#allocation5 + $0xe0] sm:$0xff] }
0x5327   : > { %v10751_v32 = vsub.f32 %v10735_v23, %v10745_v9  ;;  %15128 = vpow2.f32 %v10753_v45  ;;  %v11073_v45 = vld [vmem:[#allocation5 + $0xe8] sm:$0xff] }
0x5328   : > { %v14687_v9 = vpack.c.bf16 %v11073_v45, %v11072_v31  ;;  %v11261_v31 = vld [vmem:[%s18411_s28] sm:$0x1]  ;;  %s11420_s28 = scalar_lea.sflag [#allocation4], %s893_s19 }
0x5329   : > { %v10757_v35 = vmul.f32 1.442695, %v10751_v32  ;;  %v11075_v32 = vld [vmem:[#allocation5 + $0xf8] sm:$0xff] }
0x532a   : > { %v10748_v14 = vpop.xlane.xlu1 %10747 }
0x532b   : > { %15130 = vpow2.f32 %v10757_v35  ;;  %v10752_v3 = vsub.f32 %v10736_v40, %v10748_v14  ;;  %v12098_v14 = vld [vmem:[%s18332_s21 + $0x1c0] sm:$0xff] }
0x532d   : > { %v10759_v29 = vmul.f32 1.442695, %v10752_v3  ;;  %v12099_v3 = vld [vmem:[%s18332_s21 + $0x1c8] sm:$0xff] }
0x532f   : > { %15132 = vpow2.f32 %v10759_v29  ;;  %v12100_v29 = vld [vmem:[%s18332_s21 + $0x1d0] sm:$0xff] }
0x5330   : > { %v15127_v11 = vpop.eup %15126 }
0x5331   : > { %v10764_v20 = vsel %vm1129_vm2, %v15127_v11, 0.0  ;;  %v15129_v36 = vpop.eup %15128 }
0x5332   : > { %10765 = vadd.xlane.f32.xlu1 %v10764_v20  ;;  %v10761_v24 = vsel %vm1129_vm2, %v15129_v36, 0.0  ;;  %v12101_v20 = vld [vmem:[%s18332_s21 + $0x1d8] sm:$0xff] }
0x5335   : > { %v15131_v49 = vpop.eup %15130 }
0x5336   : > { %10762 = vadd.xlane.f32.xlu1 %v10761_v24  ;;  %v10767_v44 = vsel %vm1129_vm2, %v15131_v49, 0.0  ;;  %v12103_v24 = vld [vmem:[%s18332_s21 + $0x1e8] sm:$0xff] }
0x5337   : > { %10768 = vadd.xlane.f32.xlu0 %v10767_v44 }
0x5339   : > { %v15133_v6 = vpop.eup %15132 }
0x533a   : > { %v10770_v55 = vsel %vm1129_vm2, %v15133_v6, 0.0 }
0x533b   : > { %10771 = vadd.xlane.f32.xlu1 %v10770_v55 }
0x534c   : > { %14980 = vrot.lane.b32.xlu1 %v18078_v41, %s18410_s11 }
0x534d   : > { %14975 = vrot.lane.b32.xlu0 %v18071_v28, %s18410_s11  ;;  %s894_s11 = scalar_lea.vmem [#allocation7], %s893_s19 }
0x534e   : > { %s11432_s30 = sshll.u32 %s894_s11, 4  ;;  %s18271_s30 = int_to_ptr.vmem [resolvable:$true] %s11432_s30 }
0x534f   : > { %s15254_s27 = scalar_lea.vmem %s18271_s30, 16  ;;  %p15261_p4 = scmp.lt.s32.totalorder %s18271_s30, %s15259_s1 }
0x5350   : > { %p15255_p12 = scmp.ne.s32.totalorder %s18271_s30, %s15254_s27 }
0x5352   : > { %p15256_p2 = pnand %p15255_p12, %p18415_p1 }
0x5354   : > { %p15257_p3 = pneg %p15256_p2 }
0x53bf   : > { %v10766_v33 = vpop.xlane.xlu1 %10765 }
0x53c3   : > { %v10763_v7 = vpop.xlane.xlu1 %10762 }
0x53c4   : > { %15134 = vrcp.f32 %v10763_v7  ;;  %v10769_v1 = vpop.xlane.xlu0 %10768 }
0x53c5   : > { %15136 = vrcp.f32 %v10766_v33 }
0x53c6   : > { %15138 = vrcp.f32 %v10769_v1  ;;  %v12093_v1 = vld [vmem:[%s18328_s17 + $0x7] ss:$0 sm:$0xff] }
0x53c8   : > { %v14976_v5 = vpop.permute.xlu0 %14975  ;;  %v10772_v27 = vpop.xlane.xlu1 %10771 }
0x53c9   : > { %v14978_v56 = vunpack.i.h.bf16 %v14976_v5  ;;  %v14977_v51 = vunpack.i.l.bf16 %v14976_v5  ;;  %15140 = vrcp.f32 %v10772_v27  ;;  %v12094_v27 = vld [vmem:[%s18329_s18 + $0x7] ss:$0 sm:$0xff] }
0x53cb   : > { %v14666_v15 = vpack.c.bf16 %v14978_v56, %v14977_v51 }
0x53cc   : > { %v14981_v61 = vpop.permute.xlu1 %14980 }
0x53cd   : > { %v14983_v57 = vunpack.i.h.bf16 %v14981_v61  ;;  %v14982_v43 = vunpack.i.l.bf16 %v14981_v61  ;;  %14667 = vmatprep.subr.bf16.mxu0 %v14666_v15  ;;  %v12105_v61 = vld [vmem:[%s18332_s21 + $0x1f8] sm:$0xff] }
0x53ce   : > { %v15135_v41 = vpop.eup %15134  ;;  %14669 = vmatpush3.bf16.msra.mxu0 %v14666_v15  ;;  %v12104_v15 = vld [vmem:[%s18332_s21 + $0x1f0] sm:$0xff] }
0x53cf   : > { %v14670_v25 = vpack.c.bf16 %v14983_v57, %v14982_v43  ;;  %v10777_v28 = vmul.f32 %v15135_v41, %v15129_v36  ;;  %v15137_v59 = vpop.eup %15136  ;;  %v14696_v36 = vpack.c.bf16 %v12101_v20, %v12100_v29  ;;  %v14702_v57 = vpack.c.bf16 %v12105_v61, %v12104_v15  ;;  %v12096_v43 = vld [vmem:[%s18331_s20 + $0x7] ss:$0 sm:$0xff] }
0x53d0   : > { %v15139_v54 = vpop.eup %15138  ;;  %v10778_v13 = vmul.f32 %v15137_v59, %v15127_v11  ;;  %v14693_v11 = vpack.c.bf16 %v12099_v3, %v12098_v14 }
0x53d1   : > { %14671 = vmatprep.subr.bf16.mxu0 %v14670_v25  ;;  %13896 = vmatprep.mubr.msk.f32.mxu0 %vm1129_vm2, %v10777_v28  ;;  %v10779_v58 = vmul.f32 %v15139_v54, %v15131_v49  ;;  %v12102_v49 = vld [vmem:[%s18332_s21 + $0x1e0] sm:$0xff] }
0x53d2   : > { %14673 = vmatpush3.bf16.msra.mxu0 %v14670_v25  ;;  %v14699_v44 = vpack.c.bf16 %v12103_v24, %v12102_v49  ;;  %v11257_v54 = vld [vmem:[%s18334_s23] sm:$0xff] }
0x53d3   : > { %14674 = vmatprep.subr.bf16.mxu0 %v15333_v46  ;;  %v15141_v10 = vpop.eup %15140 }
0x53d4   : > { %v10780_v48 = vmul.f32 %v15141_v10, %v15133_v6 }
0x53d5   : > { %13897 = vmatmul.mubr.msk.f32.vlgmr.msra.gmra.mrb[128].mxu0 %vm1129_vm2, %v10778_v13  ;;  %v11258_v13 = vld [vmem:[%s18334_s23 + $0x8] sm:$0xff] }
0x53d6   : > { %13899 = vmatprep.mubr.msk.f32.mxu0 %vm1129_vm2, %v10779_v58  ;;  %v14705_v10 = vpack.c.bf16 %v11258_v13, %v11257_v54  ;;  %v11259_v58 = vld [vmem:[%s18334_s23 + $0x10] sm:$0xff] }
0x53d9   : > { %13900 = vmatmul.mubr.msk.f32.gmra.mrb[130].mxu0 %vm1129_vm2, %v10780_v48  ;;  %v11260_v48 = vld [vmem:[%s18334_s23 + $0x18] sm:$0xff] }
0x53da   : > { %13910 = vmatprep.mubr.msk.f32.mxu0 %vm15331_vm0, %v15330_v0  ;;  %v14708_v42 = vpack.c.bf16 %v11260_v48, %v11259_v58 }
0x54a8   : > { %v13898_v22 = vpop.f32.mrb[128].mxu0 }
0x54a9   : > { %v10871_v39 = vpop.f32.mrb[129].mxu0 }
0x54aa   : > { %v14675_v17 = vpack.c.bf16 %v13898_v22, %v10871_v39 }
0x54ac   : > { %v13901_v60 = vpop.f32.mrb[130].mxu0  ;;  %14676 = vmatpush3.bf16.msra.mxu0 %v14675_v17 }
0x54ad   : > { %v10881_v26 = vpop.f32.mrb[131].mxu0  ;;  %14677 = vmatprep.subr.bf16.mxu0 %v15333_v46 }
0x54ae   : > { %v14678_v52 = vpack.c.bf16 %v13901_v60, %v10881_v26 }
0x54b0   : > { %14679 = vmatpush3.bf16.msra.mxu0 %v14678_v52 }
0x54b1   : > { %14686 = vmatprep.subr.bf16.mxu0 %v15333_v46 }
0x54b3   : > { %13911 = vmatmul.mubr.msk.f32.vlgmr.msra.gmra.mrb[132].mxu0 %vm1129_vm2, %v17888_v62 }
0x54b4   : > { %13932 = vmatprep.mubr.msk.f32.mxu0 %vm15331_vm0, %v15330_v0  ;;  %14688 = vmatpush3.bf16.msra.mxu0 %v14687_v9 }
0x54b5   : > { %14689 = vmatprep.subr.bf16.mxu0 %v15333_v46 }
0x5586   : > { %v10956_v21 = vpop.f32.mrb[132].mxu0 }
0x5587   : > { %13922 = vmatmul.mubr.msk.f32.vlgmr.msra.gmra.mrb[146].mxu1 %vm1129_vm2, %v10956_v21  ;;  %v13912_v50 = vpop.f32.mrb[133].mxu0  ;;  %v11336_v21 = vld [vmem:[%s18336_s25] sm:$0xff] }
0x5588   : > { %13951 = vmatprep.mubr.msk.f32.mxu1 %vm15331_vm0, %v15330_v0  ;;  %14694 = vmatpush3.bf16.msra.mxu1 %v14693_v11  ;;  %v11337_v50 = vld [vmem:[%s18336_s25 + $0x8] sm:$0xff] }
0x5589   : > { %14695 = vmatprep.subr.bf16.mxu1 %v15333_v46 }
0x558c   : > { %14697 = vmatpush3.bf16.msra.mxu1 %v14696_v36 }
0x558d   : > { %14698 = vmatprep.subr.bf16.mxu1 %v15333_v46 }
0x5590   : > { %14700 = vmatpush3.bf16.msra.mxu1 %v14699_v44 }
0x5591   : > { %14701 = vmatprep.subr.bf16.mxu1 %v15333_v46 }
0x5594   : > { %14703 = vmatpush3.bf16.msra.mxu1 %v14702_v57 }
0x565a   : > { %v11034_v53 = vpop.f32.mrb[146].mxu1 }
0x565b   : > { %v11038_v23 = vmul.f32 %v11034_v53, %v15657_v12  ;;  %v13923_v40 = vpop.f32.mrb[147].mxu1 }
0x565d   : > { %v18159_v8 = vadd.f32 %v11038_v23, %v17984_v47  ;;  %v11074_v47 = vld [vmem:[#allocation5 + $0xf0] sm:$0xff]  ;;  %v14711_v23 = vpack.c.bf16 %v11337_v50, %v11336_v21 }
0x565e   : > { %v14690_v35 = vpack.c.bf16 %v11075_v32, %v11074_v47 }
0x565f   : > { %v11044_v62 = vsel %vm1129_vm2, %v18159_v8, 0.0 }
0x5660   : > { %11045 = vadd.xlane.f32.xlu1 %v11044_v62  ;;  %14691 = vmatpush3.bf16.msra.mxu0 %v14690_v35 }
0x5661   : > { %14704 = vmatprep.subr.bf16.mxu0 %v15333_v46 }
0x56ed   : > { %v11046_v34 = vpop.xlane.xlu1 %11045 }
0x56ee   : > { %v11047_v37 = vmul.f32 0.03125, %v11046_v34  ;;  %v11340_v34 = vld [vmem:[%s18336_s25 + $0x20] sm:$0xff] }
0x56f0   : > { %v11048_v30 = vsub.f32 %v18159_v8, %v11047_v37  ;;  %v11341_v37 = vld [vmem:[%s18336_s25 + $0x28] sm:$0xff] }
0x56f2   : > { %v11049_v18 = vmul.f32 %v11048_v30, %v11048_v30 }
0x56f4   : > { %v11050_v38 = vsel %vm1129_vm2, %v11049_v18, 0.0  ;;  %v11343_v18 = vld [vmem:[%s18336_s25 + $0x38] sm:$0xff] }
0x56f5   : > { %11051 = vadd.xlane.f32.xlu0 %v11050_v38 }
0x5782   : > { %v11052_v6 = vpop.xlane.xlu0 %11051 }
0x5783   : > { %v11053_v55 = vmul.f32 0.03125, %v11052_v6 }
0x5785   : > { %v11054_v33 = vadd.f32 1e-05, %v11053_v55 }
0x5787   : > { %15142 = vrsqrt.f32 %v11054_v33 }
0x5791   : > { %v15143_v7 = vpop.eup %15142 }
0x5792   : > { %v11056_v5 = vmul.f32 %v15143_v7, %v11048_v30  ;;  %v14717_v30 = vpack.c.bf16 %v11341_v37, %v11340_v34 }
0x5794   : > { %v11063_v56 = vmul.f32 %v12093_v1, %v11056_v5 }
0x5796   : > { %v11070_v51 = vadd.f32 %v12094_v27, %v11063_v56 }
0x5798   : > { %13933 = vmatmul.mubr.msk.f32.vlgmr.msra.gmra.mrb[134].mxu0 %vm1129_vm2, %v11070_v51 }
0x5799   : > { %13962 = vmatprep.mubr.msk.f32.mxu0 %vm15331_vm0, %v15330_v0  ;;  %14706 = vmatpush3.bf16.msra.mxu0 %v14705_v10 }
0x579a   : > { %14707 = vmatprep.subr.bf16.mxu0 %v15333_v46 }
0x579d   : > { %14709 = vmatpush3.bf16.msra.mxu0 %v14708_v42 }
0x579e   : > { %14710 = vmatprep.subr.bf16.mxu0 %v15333_v46 }
0x586b   : > { %v11153_v41 = vpop.f32.mrb[134].mxu0 }
0x586c   : > { %v11154_v25 = vadd.f32 %v12096_v43, %v11153_v41  ;;  %v13934_v28 = vpop.f32.mrb[135].mxu0 }
0x586e   : > { %v11157_v59 = vmax.f32 %v11154_v25, 0.0 }
0x5870   : > { %13952 = vmatmul.mubr.msk.f32.vlgmr.msra.gmra.mrb[148].mxu1 %vm2374_vm6, %v11157_v59 }
0x5943   : > { %v11244_v16 = vpop.f32.mrb[148].mxu1 }
0x5944   : > { %v11245_v19 = vadd.f32 %v12107_v4, %v11244_v16  ;;  %v13953_v2 = vpop.f32.mrb[149].mxu1 }
0x5946   : > { %v11248_v63 = vmul.f32 %v11245_v19, %v15657_v12  ;;  %v11338_v12 = vld [vmem:[%s18336_s25 + $0x10] sm:$0xff] }
0x5948   : > { %v11249_v22 = vadd.f32 %v11248_v63, %v18159_v8  ;;  %v11339_v8 = vld [vmem:[%s18336_s25 + $0x18] sm:$0xff] }
0x5949   : > { %v14714_v62 = vpack.c.bf16 %v11339_v8, %v11338_v12 }
0x594a   : > { %v11250_v39 = vsel %vm1129_vm2, %v11249_v22, 0.0 }
0x594b   : > { %v11251_v17 = vrot.slane %v11250_v39, 4 }
0x594d   : > { %v11252_v60 = vadd.f32 %v11251_v17, %v11250_v39 }
0x594f   : > { %v11253_v26 = vrot.slane %v11252_v60, 2 }
0x5951   : > { %v11254_v52 = vadd.f32 %v11253_v26, %v11252_v60 }
0x5953   : > { %v11255_v53 = vrot.slane %v11254_v52, 1 }
0x5955   : > { %v11256_v40 = vadd.f32 %v11255_v53, %v11254_v52 }
0x5957   : > { %13963 = vmatmul.mubr.msk.f32.vlgmr.msra.gmra.mrb[136].mxu0 %vm1129_vm2, %v11256_v40 }
0x5958   : > { %14712 = vmatpush3.bf16.msra.mxu0 %v14711_v23  ;;  %13981 = vmatprep.mubr.msk.f32.mxu0 %vm15331_vm0, %v15330_v0  ;;  %v11342_v0 = vld [vmem:[%s18336_s25 + $0x30] sm:$0xff] }
0x5959   : > { %14713 = vmatprep.subr.bf16.mxu0 %v15333_v46  ;;  %v14720_v38 = vpack.c.bf16 %v11343_v18, %v11342_v0 }
0x595c   : > { %14715 = vmatpush3.bf16.msra.mxu0 %v14714_v62 }
0x595d   : > { %14716 = vmatprep.subr.bf16.mxu0 %v15333_v46 }
0x5960   : > { %14718 = vmatpush3.bf16.msra.mxu0 %v14717_v30 }
0x5961   : > { %14719 = vmatprep.subr.bf16.mxu0 %v15333_v46  ;;  %v11344_v46 = vld [vmem:[%s18413_s5] sm:$0x1]  ;;  %s15260_s5 = scalar_lea.vmem %s15259_s1, 32 }
0x5962   : > { %p15262_p7 = scmp.lt.s32.totalorder %s15260_s5, %s15254_s27 }
0x5964   : > { %14721 = vmatpush3.bf16.msra.mxu0 %v14720_v38  ;;  %p15263_p8 = por %p15262_p7, %p15261_p4 }
0x5966   : > { %p15264_p11 = pnand %p15263_p8, %p15257_p3 }
0x5a2a   : > { %v11331_v45 = vpop.f32.mrb[136].mxu0 }
0x5a2b   : > { %v11332_v9 = vadd.f32 %v11331_v45, %v11261_v31  ;;  %v13964_v47 = vpop.f32.mrb[137].mxu0 }
0x5a2d   : > { %v11335_v32 = vmax.f32 %v11332_v9, 0.0 }
0x5a2f   : > { %13982 = vmatmul.mubr.msk.f32.vlgmr.msra.gmra.mrb[138].mxu0 %vm2374_vm6, %v11335_v32 }
0x5b02   : > { %v11414_v35 = vpop.f32.mrb[138].mxu0 }
0x5b03   : > { %v11415_v14 = vadd.f32 %v11414_v35, %v11344_v46  ;;  %v13983_v3 = vpop.f32.mrb[139].mxu0 }
0x5b05   : > { %11418 = vst [vmem:[%s894_s11] sm:$0x1] %v11415_v14 }
0x5b06   : > { %15267 = shalt.err (!%p15264_p11)
}
0x5b07   : > { %s15268_s19 = scalar_lea.hbm %s18269_s29, 16  ;;  %s15272_s14 = scalar_lea.hbm %s18414_s0, 32 }
0x5b08   : > { %p15269_p13 = scmp.ne.s32.totalorder %s18269_s29, %s15268_s19  ;;  %p15273_p6 = scmp.lt.u32.totalorder %s18269_s29, %s18414_s0 }
0x5b09   : > { %p15274_p9 = scmp.lt.u32.totalorder %s15272_s14, %s15268_s19  ;;  %p15276_p12 = scmp.lt.u32.totalorder %s15268_s19, %s18269_s29 }
0x5b0a   : > { %p15270_p5 = pnand %p15269_p13, %p18415_p1 }
0x5b0b   : > { %p15275_p10 = por %p15274_p9, %p15273_p6 }
0x5b0c   : > { %p15271_p0 = pneg %p15270_p5 }
0x5b0d   : > { %p15277_p2 = por %p15276_p12, %p15275_p10 }
0x5b0f   : > { %p15278_p3 = pnand %p15277_p2, %p15271_p0 }
0x5b11   : > { %15281 = shalt.err (!%p15278_p3)
}
0x5b12   : > { %14730 = dma.vmem_to_hbm [thread:$0]  (%p18415_p1), %s18271_s30, 16, %s18269_s29, %s11420_s28  }
0x5b13 PF: > { %s18416_s27 = sld [smem:[#allocation13_spill]]  ;;  %s18417_s1 = sld [smem:[#allocation11_spill]] }
0x5b14   : > { %s18418_s5 = sld [smem:[#allocation17_spill]] }
0x5b19   : > { %p14747_p4 = scmp.ge.s32.totalorder %s18416_s27, 2  ;;  %s11444_s8 = sand.u32 1, %s18417_s1  }
0x5b1a   : > { %p18419_p7 = scmp.ne.s32.totalorder %s18418_s5, 0  ;;  %s11445_s11 = scalar_lea.sflag [#allocation4], %s11444_s8 }
0x5b1c   : > { %p14740_p8 = pnand %p14747_p4, %p18419_p7 }
0x5b1e   : > { %15307 = dma.done.wait (!%p14740_p8), %s11445_s11, 16  }
0x5b1f   : > { %15309 = vsyncadd (!%p14740_p8), %s11445_s11, 4294967280  ;;  %s18420_s30 = sld [smem:[#allocation14_spill]]  ;;  %s18421_s19 = sld [smem:[#allocation12_spill]] }
0x5b20   : > { %s18422_s8 = sld [smem:[#allocation15_spill]]  ;;  %s18423_s7 = smov %s15316_s4 }
0x5b25   : > { %p39_p11 = scmp.ge.s32.totalorder %s18420_s30, 4   ;;  %s18424_s4 = smov %s18421_s19 }
0x5b27   :  { %41 = sbr.rel (!%p39_p11) target bundleno = 23 (0x17), region = 261 }
0x5b2e   :  { %11449 = vsyncpa [#allocation3], 1 }
0x5b2f   :  { %11451 = vsyncpa [#allocation3 + $0x1], 1 }
0x5b30   :  { %11452 = vsyncpa [#allocation6], 1 }
0x5b31   :  { %11453 = vsyncpa [#allocation4], 1 }
0x5b32   :  { %11455 = vsyncpa [#allocation4 + $0x1], 1 }

</bundles_post_ra>
